<compile_context>
chip_gen: v7x
topology: tpu7x:2x2x1
jax: 0.10.0
libtpu: 0.0.40
codegen_flags: <defaults>
</compile_context>

<pallas_src>
import jax
import jax.numpy as jnp
from jax import lax
from jax.experimental import pallas as pl
from jax.experimental.pallas import tpu as pltpu

IN = 28 * 28
H1 = 1200
H2 = 1200
OUT = 10
EPS = 1e-5
DROP_P = 0.8
KEEP_P = 1.0 - DROP_P
INV_KEEP = 1.0 / KEEP_P


def _bn_relu(h, gamma, beta):
    """Training-mode BatchNorm1d (biased variance) fused with ReLU, in f32."""
    mean = jnp.mean(h, axis=0, keepdims=True)
    centered = h - mean
    var = jnp.mean(centered * centered, axis=0, keepdims=True)
    scale = gamma * lax.rsqrt(var + EPS)
    return jnp.maximum(centered * scale + beta, 0.0)


def teacher_kernel(x_ref,
                   w1_ref, g1_ref, be1_ref, m1_ref,
                   w2_ref, g2_ref, be2_ref, m2_ref,
                   w3_ref, b3_ref,
                   out_ref):
    x = x_ref[...]                                                   # (N, 784) bf16

    # fc1 (bias omitted: cancelled by BN mean-subtraction) -> BN -> ReLU -> dropout
    h = jnp.dot(x, w1_ref[...], preferred_element_type=jnp.float32)  # (N, H1) f32
    h = _bn_relu(h, g1_ref[...], be1_ref[...])
    h = h.astype(jnp.bfloat16) * m1_ref[...]                         # mask holds 0 or 1/keep

    # fc2 -> BN -> ReLU -> dropout
    h = jnp.dot(h, w2_ref[...], preferred_element_type=jnp.float32)  # (N, H2) f32
    h = _bn_relu(h, g2_ref[...], be2_ref[...])
    h = h.astype(jnp.bfloat16) * m2_ref[...]

    # fc3 (logits, f32)
    out_ref[...] = (jnp.dot(h, w3_ref[...], preferred_element_type=jnp.float32)
                    + b3_ref[...])


def teacher_forward(x, params, key):
    """x: (N, 1, 28, 28) float32 (NCHW, as in the PyTorch module)."""
    n = x.shape[0]
    x2d = x.reshape(n, IN).astype(jnp.bfloat16)

    w1, g1, be1, w2, g2, be2, w3, b3 = params

    # Dropout masks, pre-scaled by 1/keep_prob (exact in bf16: 0.0 or 5.0).
    k1, k2 = jax.random.split(key)
    m1 = (jax.random.bernoulli(k1, KEEP_P, (n, H1)).astype(jnp.float32)
          * INV_KEEP).astype(jnp.bfloat16)
    m2 = (jax.random.bernoulli(k2, KEEP_P, (n, H2)).astype(jnp.float32)
          * INV_KEEP).astype(jnp.bfloat16)

    num_inputs = 11
    return pl.pallas_call(
        teacher_kernel,
        out_shape=jax.ShapeDtypeStruct((n, OUT), jnp.float32),
        in_specs=[pl.BlockSpec(memory_space=pltpu.MemorySpace.VMEM)] * num_inputs,
        out_specs=pl.BlockSpec(memory_space=pltpu.MemorySpace.VMEM),
        compiler_params=pltpu.CompilerParams(vmem_limit_bytes=32 * 1024 * 1024),
    )(x2d, w1, g1, be1, m1, w2, g2, be2, m2, w3, b3)


def init_params(key):
    """Synthetic parameters matching the PyTorch module's shapes.

    Linear weights are stored transposed (in_features, out_features) and cast
    to bf16 for the MXU.  fc1/fc2 biases are omitted: BatchNorm in training
    mode cancels them exactly."""
    ks = jax.random.split(key, 4)

    w1 = (jax.random.normal(ks[0], (IN, H1), jnp.float32) * 0.02).astype(jnp.bfloat16)
    g1 = jnp.ones((1, H1), jnp.float32)
    be1 = jnp.zeros((1, H1), jnp.float32)

    w2 = (jax.random.normal(ks[1], (H1, H2), jnp.float32) * 0.02).astype(jnp.bfloat16)
    g2 = jnp.ones((1, H2), jnp.float32)
    be2 = jnp.zeros((1, H2), jnp.float32)

    w3 = (jax.random.normal(ks[2], (H2, OUT), jnp.float32) * 0.02).astype(jnp.bfloat16)
    b3 = jax.random.normal(ks[3], (1, OUT), jnp.float32) * 0.01

    return (w1, g1, be1, w2, g2, be2, w3, b3)


if __name__ == "__main__":
    key = jax.random.PRNGKey(0)
    k_params, k_x, k_drop = jax.random.split(key, 3)

    params = init_params(k_params)
    x = jax.random.normal(k_x, (16, 1, 28, 28), jnp.float32)  # same shape as torch example

    logits = teacher_forward(x, params, k_drop)
    jax.block_until_ready(logits)

    assert logits.shape == (16, 10), logits.shape
    assert bool(jnp.all(jnp.isfinite(logits)))
    print("KERNEL_OK")
</pallas_src>

<mosaic_0001>
module attributes {stable_mosaic.version = 11 : i64} {
  func.func @teacher_kernel(%arg0: memref<16x784xbf16, #tpu.memory_space<vmem>>, %arg1: memref<784x1200xbf16, #tpu.memory_space<vmem>>, %arg2: memref<1x1200xf32, #tpu.memory_space<vmem>>, %arg3: memref<1x1200xf32, #tpu.memory_space<vmem>>, %arg4: memref<16x1200xbf16, #tpu.memory_space<vmem>>, %arg5: memref<1200x1200xbf16, #tpu.memory_space<vmem>>, %arg6: memref<1x1200xf32, #tpu.memory_space<vmem>>, %arg7: memref<1x1200xf32, #tpu.memory_space<vmem>>, %arg8: memref<16x1200xbf16, #tpu.memory_space<vmem>>, %arg9: memref<1200x10xbf16, #tpu.memory_space<vmem>>, %arg10: memref<1x10xf32, #tpu.memory_space<vmem>>, %arg11: memref<16x10xf32, #tpu.memory_space<vmem>>) attributes {dimension_semantics = [], scalar_prefetch = 0 : i64, scratch_operands = 0 : i64, tpu.core_type = #tpu.core_type<tc>} {
    %c0 = arith.constant 0 : index
    %c0_0 = arith.constant 0 : index
    %0 = vector.load %arg0[%c0, %c0_0] : memref<16x784xbf16, #tpu.memory_space<vmem>>, vector<16x784xbf16>
    %c0_1 = arith.constant 0 : index
    %c0_2 = arith.constant 0 : index
    %1 = vector.load %arg1[%c0_1, %c0_2] : memref<784x1200xbf16, #tpu.memory_space<vmem>>, vector<784x1200xbf16>
    %cst = arith.constant dense<0.000000e+00> : vector<16x1200xf32>
    %2 = tpu.matmul %0, %1, %cst {dimension_numbers = #tpu.dot_dimension_numbers<[1], [0], [0], [1], [0, 0, 1, 1], [], []>} : vector<16x784xbf16>, vector<784x1200xbf16>, vector<16x1200xf32> -> vector<16x1200xf32>
    %c0_3 = arith.constant 0 : index
    %c0_4 = arith.constant 0 : index
    %3 = vector.load %arg2[%c0_3, %c0_4] : memref<1x1200xf32, #tpu.memory_space<vmem>>, vector<1x1200xf32>
    %c0_5 = arith.constant 0 : index
    %c0_6 = arith.constant 0 : index
    %4 = vector.load %arg3[%c0_5, %c0_6] : memref<1x1200xf32, #tpu.memory_space<vmem>>, vector<1x1200xf32>
    %cst_7 = arith.constant dense<0.000000e+00> : vector<1200xf32>
    %5 = vector.multi_reduction <add>, %2, %cst_7 [0] : vector<16x1200xf32> to vector<1200xf32>
    %6 = vector.shape_cast %5 : vector<1200xf32> to vector<1x1200xf32>
    %cst_8 = arith.constant 1.600000e+01 : f32
    %7 = vector.broadcast %cst_8 : f32 to vector<1x1200xf32>
    %8 = arith.divf %6, %7 : vector<1x1200xf32>
    %9 = vector.broadcast %8 : vector<1x1200xf32> to vector<16x1200xf32>
    %10 = arith.subf %2, %9 : vector<16x1200xf32>
    %11 = arith.mulf %10, %10 : vector<16x1200xf32>
    %cst_9 = arith.constant dense<0.000000e+00> : vector<1200xf32>
    %12 = vector.multi_reduction <add>, %11, %cst_9 [0] : vector<16x1200xf32> to vector<1200xf32>
    %13 = vector.shape_cast %12 : vector<1200xf32> to vector<1x1200xf32>
    %cst_10 = arith.constant 1.600000e+01 : f32
    %14 = vector.broadcast %cst_10 : f32 to vector<1x1200xf32>
    %15 = arith.divf %13, %14 : vector<1x1200xf32>
    %cst_11 = arith.constant 9.99999974E-6 : f32
    %16 = vector.broadcast %cst_11 : f32 to vector<1x1200xf32>
    %17 = arith.addf %15, %16 : vector<1x1200xf32>
    %18 = math.rsqrt %17 : vector<1x1200xf32>
    %19 = arith.mulf %3, %18 : vector<1x1200xf32>
    %20 = vector.broadcast %19 : vector<1x1200xf32> to vector<16x1200xf32>
    %21 = arith.mulf %10, %20 : vector<16x1200xf32>
    %22 = vector.broadcast %4 : vector<1x1200xf32> to vector<16x1200xf32>
    %23 = arith.addf %21, %22 : vector<16x1200xf32>
    %cst_12 = arith.constant 0.000000e+00 : f32
    %24 = vector.broadcast %cst_12 : f32 to vector<16x1200xf32>
    %25 = arith.maximumf %23, %24 : vector<16x1200xf32>
    %26 = arith.truncf %25 : vector<16x1200xf32> to vector<16x1200xbf16>
    %c0_13 = arith.constant 0 : index
    %c0_14 = arith.constant 0 : index
    %27 = vector.load %arg4[%c0_13, %c0_14] : memref<16x1200xbf16, #tpu.memory_space<vmem>>, vector<16x1200xbf16>
    %28 = arith.mulf %26, %27 : vector<16x1200xbf16>
    %c0_15 = arith.constant 0 : index
    %c0_16 = arith.constant 0 : index
    %29 = vector.load %arg5[%c0_15, %c0_16] : memref<1200x1200xbf16, #tpu.memory_space<vmem>>, vector<1200x1200xbf16>
    %cst_17 = arith.constant dense<0.000000e+00> : vector<16x1200xf32>
    %30 = tpu.matmul %28, %29, %cst_17 {dimension_numbers = #tpu.dot_dimension_numbers<[1], [0], [0], [1], [0, 0, 1, 1], [], []>} : vector<16x1200xbf16>, vector<1200x1200xbf16>, vector<16x1200xf32> -> vector<16x1200xf32>
    %c0_18 = arith.constant 0 : index
    %c0_19 = arith.constant 0 : index
    %31 = vector.load %arg6[%c0_18, %c0_19] : memref<1x1200xf32, #tpu.memory_space<vmem>>, vector<1x1200xf32>
    %c0_20 = arith.constant 0 : index
    %c0_21 = arith.constant 0 : index
    %32 = vector.load %arg7[%c0_20, %c0_21] : memref<1x1200xf32, #tpu.memory_space<vmem>>, vector<1x1200xf32>
    %cst_22 = arith.constant dense<0.000000e+00> : vector<1200xf32>
    %33 = vector.multi_reduction <add>, %30, %cst_22 [0] : vector<16x1200xf32> to vector<1200xf32>
    %34 = vector.shape_cast %33 : vector<1200xf32> to vector<1x1200xf32>
    %cst_23 = arith.constant 1.600000e+01 : f32
    %35 = vector.broadcast %cst_23 : f32 to vector<1x1200xf32>
    %36 = arith.divf %34, %35 : vector<1x1200xf32>
    %37 = vector.broadcast %36 : vector<1x1200xf32> to vector<16x1200xf32>
    %38 = arith.subf %30, %37 : vector<16x1200xf32>
    %39 = arith.mulf %38, %38 : vector<16x1200xf32>
    %cst_24 = arith.constant dense<0.000000e+00> : vector<1200xf32>
    %40 = vector.multi_reduction <add>, %39, %cst_24 [0] : vector<16x1200xf32> to vector<1200xf32>
    %41 = vector.shape_cast %40 : vector<1200xf32> to vector<1x1200xf32>
    %cst_25 = arith.constant 1.600000e+01 : f32
    %42 = vector.broadcast %cst_25 : f32 to vector<1x1200xf32>
    %43 = arith.divf %41, %42 : vector<1x1200xf32>
    %cst_26 = arith.constant 9.99999974E-6 : f32
    %44 = vector.broadcast %cst_26 : f32 to vector<1x1200xf32>
    %45 = arith.addf %43, %44 : vector<1x1200xf32>
    %46 = math.rsqrt %45 : vector<1x1200xf32>
    %47 = arith.mulf %31, %46 : vector<1x1200xf32>
    %48 = vector.broadcast %47 : vector<1x1200xf32> to vector<16x1200xf32>
    %49 = arith.mulf %38, %48 : vector<16x1200xf32>
    %50 = vector.broadcast %32 : vector<1x1200xf32> to vector<16x1200xf32>
    %51 = arith.addf %49, %50 : vector<16x1200xf32>
    %cst_27 = arith.constant 0.000000e+00 : f32
    %52 = vector.broadcast %cst_27 : f32 to vector<16x1200xf32>
    %53 = arith.maximumf %51, %52 : vector<16x1200xf32>
    %54 = arith.truncf %53 : vector<16x1200xf32> to vector<16x1200xbf16>
    %c0_28 = arith.constant 0 : index
    %c0_29 = arith.constant 0 : index
    %55 = vector.load %arg8[%c0_28, %c0_29] : memref<16x1200xbf16, #tpu.memory_space<vmem>>, vector<16x1200xbf16>
    %56 = arith.mulf %54, %55 : vector<16x1200xbf16>
    %c0_30 = arith.constant 0 : index
    %c0_31 = arith.constant 0 : index
    %57 = vector.load %arg9[%c0_30, %c0_31] : memref<1200x10xbf16, #tpu.memory_space<vmem>>, vector<1200x10xbf16>
    %cst_32 = arith.constant dense<0.000000e+00> : vector<16x10xf32>
    %58 = tpu.matmul %56, %57, %cst_32 {dimension_numbers = #tpu.dot_dimension_numbers<[1], [0], [0], [1], [0, 0, 1, 1], [], []>} : vector<16x1200xbf16>, vector<1200x10xbf16>, vector<16x10xf32> -> vector<16x10xf32>
    %c0_33 = arith.constant 0 : index
    %c0_34 = arith.constant 0 : index
    %59 = vector.load %arg10[%c0_33, %c0_34] : memref<1x10xf32, #tpu.memory_space<vmem>>, vector<1x10xf32>
    %60 = vector.broadcast %59 : vector<1x10xf32> to vector<16x10xf32>
    %61 = arith.addf %58, %60 : vector<16x10xf32>
    %c0_35 = arith.constant 0 : index
    %c0_36 = arith.constant 0 : index
    %62 = vector.load %arg11[%c0_35, %c0_36] : memref<16x10xf32, #tpu.memory_space<vmem>>, vector<16x10xf32>
    tpu.vector_store %arg11[%c0_35, %c0_36], %61 {strides = array<i32>} : memref<16x10xf32, #tpu.memory_space<vmem>>, vector<16x10xf32>,
    return
  }
}

</mosaic_0001>

<bundles_post_ra>
// kernel: tpu_custom_call.1
= control target key start
LH: loop header
LB: loop body
LE: loop exit
PB: predicated region body
PF: predicated region fallthrough
CT: control target
= control target key end

     0   :  { %16 = vsyncpa [#allocation3], 0  ;;  %s16388_s0 = inlined_call_operand.hbm [shape: bf16[16,784], index: 0, kind: input, shape index: {}]   ;;  %s16389_s1 = inlined_call_operand.hbm [shape: bf16[784,1200], index: 1, kind: input, shape index: {}]   ;;  %s16390_s2 = inlined_call_operand.hbm [shape: f32[1,1200], index: 2, kind: input, shape index: {}]   ;;  %s16391_s3 = inlined_call_operand.hbm [shape: f32[1,1200], index: 3, kind: input, shape index: {}]   ;;  %s16392_s4 = inlined_call_operand.hbm [shape: bf16[16,1200], index: 4, kind: input, shape index: {}]   ;;  %s16393_s5 = inlined_call_operand.hbm [shape: bf16[1200,1200], index: 5, kind: input, shape index: {}]   ;;  %s16394_s6 = inlined_call_operand.hbm [shape: f32[1,1200], index: 6, kind: input, shape index: {}]   ;;  %s16395_s7 = inlined_call_operand.hbm [shape: f32[1,1200], index: 7, kind: input, shape index: {}]   ;;  %s16396_s8 = inlined_call_operand.hbm [shape: bf16[16,1200], index: 8, kind: input, shape index: {}]   ;;  %s16397_s9 = inlined_call_operand.vmem [shape: bf16[1200,10], index: 9, kind: input, shape index: {}]   ;;  %s16398_s10 = inlined_call_operand.hbm [shape: f32[1,10], index: 10, kind: input, shape index: {}]   ;;  %s16399_s11 = inlined_call_operand.hbm [shape: f32[16,10], index: 11, kind: output, shape index: {}]  }
   0x1   :  { %17 = vsyncpa [#allocation6], 0 }
   0x2   :  { %18 = vsyncpa [#allocation9], 0 }
   0x3   :  { %19 = vsyncpa [#allocation12], 0 }
   0x4   :  { %20 = vsyncpa [#allocation15], 0 }
   0x5   :  { %21 = vsyncpa [#allocation18], 0 }
   0x6   :  { %22 = vsyncpa [#allocation4], 0  ;;  %s15419_s17 = smov [#allocation5]   ;;  %s15163_s21 = scalar_lea.hbm %s16389_s1, 62720 }
   0x7   :  { %s40_s18 = sshll.u32 %s15419_s17, 4  ;;  %p15164_p0 = scmp.ne.s32.totalorder %s16389_s1, %s15163_s21  ;;  %s41_s18 = int_to_ptr.vmem [resolvable:$true] %s40_s18 }
   0x8   :  { %p15167_p1 = scmp.lt.u32.totalorder %s15163_s21, %s16389_s1 }
   0xa   :  { %p15169_p2 = pnand %p15167_p1, %p15164_p0 }
   0xc   :  { %15172 = shalt.err (!%p15169_p2)
}
   0xd   :  { %s15173_s26 = scalar_lea.vmem %s41_s18, 62720  ;;  %p15178_p4 = scmp.lt.s32.totalorder %s41_s18, %s41_s18 }
   0xe   :  { %p15174_p3 = scmp.ne.s32.totalorder %s41_s18, %s15173_s26  ;;  %p15179_p5 = scmp.lt.s32.totalorder %s15173_s26, %s15173_s26 }
  0x10   :  { %p15180_p6 = por %p15179_p5, %p15178_p4 }
  0x12   :  { %p15181_p7 = pnand %p15180_p6, %p15174_p3 }
  0x14   :  { %15184 = shalt.err (!%p15181_p7)
}
  0x15   :  { %s15420_s27 = smov 640   ;;  %s15421_s28 = smov 40  }
  0x16   :  { %46 = dma.hbm_to_vmem [thread:$0]  %s16389_s1, 62720, %s41_s18, [#allocation6], %s15420_s27, %s15420_s27, %s15421_s28  }
  0x17   :  { %s15422_s12 = smov [#allocation8]   ;;  %s15423_s14 = smov [#allocation11]  }
  0x18   :  { %s63_s13 = sshll.u32 %s15422_s12, 4  ;;  %s84_s15 = sshll.u32 %s15423_s14, 4  ;;  %s64_s13 = int_to_ptr.vmem [resolvable:$true] %s63_s13  ;;  %s85_s15 = int_to_ptr.vmem [resolvable:$true] %s84_s15 }
  0x19   :  { %s15185_s19 = scalar_lea.hbm %s16391_s3, 160 }
  0x1a   :  { %p15186_p8 = scmp.ne.s32.totalorder %s16391_s3, %s15185_s19  ;;  %p15189_p9 = scmp.lt.u32.totalorder %s15185_s19, %s16391_s3 }
  0x1c   :  { %p15191_p10 = pnand %p15189_p9, %p15186_p8 }
  0x1e   :  { %15194 = shalt.err (!%p15191_p10)
}
  0x1f   :  { %s15195_s1 = scalar_lea.vmem %s64_s13, 160  ;;  %p15200_p12 = scmp.lt.s32.totalorder %s64_s13, %s64_s13 }
  0x20   :  { %p15196_p11 = scmp.ne.s32.totalorder %s64_s13, %s15195_s1  ;;  %p15201_p13 = scmp.lt.s32.totalorder %s15195_s1, %s15195_s1 }
  0x22   :  { %p15202_p0 = por %p15201_p13, %p15200_p12 }
  0x24   :  { %p15203_p1 = pnand %p15202_p0, %p15196_p11 }
  0x26   :  { %15206 = shalt.err (!%p15203_p1)
}
  0x27   :  { %66 = dma.hbm_to_vmem [thread:$0]  %s16391_s3, 160, %s64_s13, [#allocation9]  }
  0x28   :  { %s15207_s29 = scalar_lea.hbm %s16393_s5, 96000 }
  0x29   :  { %p15208_p2 = scmp.ne.s32.totalorder %s16393_s5, %s15207_s29  ;;  %p15211_p3 = scmp.lt.u32.totalorder %s15207_s29, %s16393_s5 }
  0x2b   :  { %p15213_p4 = pnand %p15211_p3, %p15208_p2 }
  0x2d   :  { %15216 = shalt.err (!%p15213_p4)
}
  0x2e   :  { %s15217_s17 = scalar_lea.vmem %s85_s15, 96000  ;;  %p15222_p6 = scmp.lt.s32.totalorder %s85_s15, %s85_s15 }
  0x2f   :  { %p15218_p5 = scmp.ne.s32.totalorder %s85_s15, %s15217_s17  ;;  %p15223_p7 = scmp.lt.s32.totalorder %s15217_s17, %s15217_s17 }
  0x31   :  { %p15224_p8 = por %p15223_p7, %p15222_p6 }
  0x33   :  { %p15225_p9 = pnand %p15224_p8, %p15218_p5 }
  0x35   :  { %15228 = shalt.err (!%p15225_p9)
}
  0x36   :  { %90 = dma.hbm_to_vmem [thread:$0]  %s16393_s5, 96000, %s85_s15, [#allocation12], %s15420_s27, %s15420_s27, %s15421_s28  }
  0x37   :  { %s15424_s19 = smov [#allocation14]   ;;  %s15425_s21 = smov [#allocation2]  }
  0x38   :  { %s107_s20 = sshll.u32 %s15424_s19, 4  ;;  %s28_s22 = sshll.u32 %s15425_s21, 4  ;;  %s108_s20 = int_to_ptr.vmem [resolvable:$true] %s107_s20  ;;  %s29_s22 = int_to_ptr.vmem [resolvable:$true] %s28_s22 }
  0x39   :  { %s15229_s18 = scalar_lea.hbm %s16395_s7, 160 }
  0x3a   :  { %p15230_p10 = scmp.ne.s32.totalorder %s16395_s7, %s15229_s18  ;;  %p15233_p11 = scmp.lt.u32.totalorder %s15229_s18, %s16395_s7 }
  0x3c   :  { %p15235_p12 = pnand %p15233_p11, %p15230_p10 }
  0x3e   :  { %15238 = shalt.err (!%p15235_p12)
}
  0x3f   :  { %s15239_s5 = scalar_lea.vmem %s108_s20, 160  ;;  %p15244_p0 = scmp.lt.s32.totalorder %s108_s20, %s108_s20 }
  0x40   :  { %p15240_p13 = scmp.ne.s32.totalorder %s108_s20, %s15239_s5  ;;  %p15245_p1 = scmp.lt.s32.totalorder %s15239_s5, %s15239_s5 }
  0x42   :  { %p15246_p2 = por %p15245_p1, %p15244_p0 }
  0x44   :  { %p15247_p3 = pnand %p15246_p2, %p15240_p13 }
  0x46   :  { %15250 = shalt.err (!%p15247_p3)
}
  0x47   :  { %110 = dma.hbm_to_vmem [thread:$0]  %s16395_s7, 160, %s108_s20, [#allocation15]  }
  0x48   :  { %s15251_s16 = scalar_lea.hbm %s16388_s0, 896 }
  0x49   :  { %p15252_p4 = scmp.ne.s32.totalorder %s16388_s0, %s15251_s16  ;;  %p15255_p5 = scmp.lt.u32.totalorder %s15251_s16, %s16388_s0 }
  0x4b   :  { %p15257_p6 = pnand %p15255_p5, %p15252_p4 }
  0x4d   :  { %15260 = shalt.err (!%p15257_p6)
}
  0x4e   :  { %s15261_s21 = scalar_lea.vmem %s29_s22, 896  ;;  %p15266_p8 = scmp.lt.s32.totalorder %s29_s22, %s29_s22 }
  0x4f   :  { %p15262_p7 = scmp.ne.s32.totalorder %s29_s22, %s15261_s21  ;;  %p15267_p9 = scmp.lt.s32.totalorder %s15261_s21, %s15261_s21 }
  0x51   :  { %p15268_p10 = por %p15267_p9, %p15266_p8 }
  0x53   :  { %p15269_p11 = pnand %p15268_p10, %p15262_p7 }
  0x55   :  { %15272 = shalt.err (!%p15269_p11)
}
  0x56   :  { %s15426_s7 = smov 448   ;;  %s15427_s20 = smov 28  }
  0x57   :  { %34 = dma.hbm_to_vmem [thread:$0]  %s16388_s0, 896, %s29_s22, [#allocation3], %s15426_s7, %s15426_s7, %s15427_s20  }
  0x58   :  { %s15428_s18 = smov [#allocation7]   ;;  %s15429_s25 = smov [#allocation10]  }
  0x59   :  { %s53_s24 = sshll.u32 %s15428_s18, 4  ;;  %s72_s26 = sshll.u32 %s15429_s25, 4  ;;  %s54_s24 = int_to_ptr.vmem [resolvable:$true] %s53_s24  ;;  %s73_s26 = int_to_ptr.vmem [resolvable:$true] %s72_s26 }
  0x5a   :  { %s15273_s15 = scalar_lea.hbm %s16390_s2, 160 }
  0x5b   :  { %p15274_p12 = scmp.ne.s32.totalorder %s16390_s2, %s15273_s15  ;;  %p15277_p13 = scmp.lt.u32.totalorder %s15273_s15, %s16390_s2 }
  0x5d   :  { %p15279_p0 = pnand %p15277_p13, %p15274_p12 }
  0x5f   :  { %15282 = shalt.err (!%p15279_p0)
}
  0x60   :  { %s15283_s0 = scalar_lea.vmem %s54_s24, 160  ;;  %p15288_p2 = scmp.lt.s32.totalorder %s54_s24, %s54_s24 }
  0x61   :  { %p15284_p1 = scmp.ne.s32.totalorder %s54_s24, %s15283_s0  ;;  %p15289_p3 = scmp.lt.s32.totalorder %s15283_s0, %s15283_s0 }
  0x63   :  { %p15290_p4 = por %p15289_p3, %p15288_p2 }
  0x65   :  { %p15291_p5 = pnand %p15290_p4, %p15284_p1 }
  0x67   :  { %15294 = shalt.err (!%p15291_p5)
}
  0x68   :  { %56 = dma.hbm_to_vmem [thread:$0]  %s16390_s2, 160, %s54_s24, [#allocation6]  }
  0x69   :  { %s15295_s19 = scalar_lea.hbm %s16392_s4, 1280 }
  0x6a   :  { %p15296_p6 = scmp.ne.s32.totalorder %s16392_s4, %s15295_s19  ;;  %p15299_p7 = scmp.lt.u32.totalorder %s15295_s19, %s16392_s4 }
  0x6c   :  { %p15301_p8 = pnand %p15299_p7, %p15296_p6 }
  0x6e   :  { %15304 = shalt.err (!%p15301_p8)
}
  0x6f   :  { %s15305_s1 = scalar_lea.vmem %s73_s26, 1280  ;;  %p15310_p10 = scmp.lt.s32.totalorder %s73_s26, %s73_s26 }
  0x70   :  { %p15306_p9 = scmp.ne.s32.totalorder %s73_s26, %s15305_s1  ;;  %p15311_p11 = scmp.lt.s32.totalorder %s15305_s1, %s15305_s1 }
  0x72   :  { %p15312_p12 = por %p15311_p11, %p15310_p10 }
  0x74   :  { %p15313_p13 = pnand %p15312_p12, %p15306_p9 }
  0x76   :  { %15316 = shalt.err (!%p15313_p13)
}
  0x77   :  { %78 = dma.hbm_to_vmem [thread:$0]  %s16392_s4, 1280, %s73_s26, [#allocation9], %s15420_s27, %s15420_s27, %s15421_s28  }
  0x78   :  { %s15430_s24 = smov [#allocation13]   ;;  %s15431_s29 = smov [#allocation16]  }
  0x79   :  { %s97_s25 = sshll.u32 %s15430_s24, 4  ;;  %s116_s5 = sshll.u32 %s15431_s29, 4  ;;  %s98_s25 = int_to_ptr.vmem [resolvable:$true] %s97_s25  ;;  %s117_s5 = int_to_ptr.vmem [resolvable:$true] %s116_s5 }
  0x7a   :  { %s15317_s12 = scalar_lea.hbm %s16394_s6, 160 }
  0x7b   :  { %p15318_p0 = scmp.ne.s32.totalorder %s16394_s6, %s15317_s12  ;;  %p15321_p1 = scmp.lt.u32.totalorder %s15317_s12, %s16394_s6 }
  0x7d   :  { %p15323_p2 = pnand %p15321_p1, %p15318_p0 }
  0x7f   :  { %15326 = shalt.err (!%p15323_p2)
}
  0x80   :  { %s15327_s4 = scalar_lea.vmem %s98_s25, 160  ;;  %p15332_p4 = scmp.lt.s32.totalorder %s98_s25, %s98_s25 }
  0x81   :  { %p15328_p3 = scmp.ne.s32.totalorder %s98_s25, %s15327_s4  ;;  %p15333_p5 = scmp.lt.s32.totalorder %s15327_s4, %s15327_s4 }
  0x83   :  { %p15334_p6 = por %p15333_p5, %p15332_p4 }
  0x85   :  { %p15335_p7 = pnand %p15334_p6, %p15328_p3 }
  0x87   :  { %15338 = shalt.err (!%p15335_p7)
}
  0x88   :  { %100 = dma.hbm_to_vmem [thread:$0]  %s16394_s6, 160, %s98_s25, [#allocation12]  }
  0x89   :  { %s15339_s19 = scalar_lea.hbm %s16396_s8, 1280 }
  0x8a   :  { %p15340_p8 = scmp.ne.s32.totalorder %s16396_s8, %s15339_s19  ;;  %p15343_p9 = scmp.lt.u32.totalorder %s15339_s19, %s16396_s8 }
  0x8c   :  { %p15345_p10 = pnand %p15343_p9, %p15340_p8 }
  0x8e   :  { %15348 = shalt.err (!%p15345_p10)
}
  0x8f   :  { %s15349_s1 = scalar_lea.vmem %s117_s5, 1280  ;;  %p15354_p12 = scmp.lt.s32.totalorder %s117_s5, %s117_s5 }
  0x90   :  { %p15350_p11 = scmp.ne.s32.totalorder %s117_s5, %s15349_s1  ;;  %p15355_p13 = scmp.lt.s32.totalorder %s15349_s1, %s15349_s1 }
  0x92   :  { %p15356_p0 = por %p15355_p13, %p15354_p12 }
  0x94   :  { %p15357_p1 = pnand %p15356_p0, %p15350_p11 }
  0x96   :  { %15360 = shalt.err (!%p15357_p1)
}
  0x97   :  { %122 = dma.hbm_to_vmem [thread:$0]  %s16396_s8, 1280, %s117_s5, [#allocation15], %s15420_s27, %s15420_s27, %s15421_s28  }
  0x98   :  { %s15432_s18 = smov [#allocation17]   ;;  %s15361_s15 = scalar_lea.hbm %s16398_s10, 16 }
  0x99   :  { %s131_s24 = sshll.u32 %s15432_s18, 4  ;;  %p15362_p2 = scmp.ne.s32.totalorder %s16398_s10, %s15361_s15  ;;  %s132_s24 = int_to_ptr.vmem [resolvable:$true] %s131_s24 }
  0x9a   :  { %p15365_p3 = scmp.lt.u32.totalorder %s15361_s15, %s16398_s10 }
  0x9c   :  { %p15367_p4 = pnand %p15365_p3, %p15362_p2 }
  0x9e   :  { %15370 = shalt.err (!%p15367_p4)
}
  0x9f   :  { %s15371_s0 = scalar_lea.vmem %s132_s24, 16  ;;  %s15375_s8 = scalar_lea.vmem %s132_s24, 32 }
  0xa0   :  { %p15372_p5 = scmp.ne.s32.totalorder %s132_s24, %s15371_s0  ;;  %p15376_p6 = scmp.lt.s32.totalorder %s132_s24, %s132_s24 }
  0xa1   :  { %p15377_p7 = scmp.lt.s32.totalorder %s15375_s8, %s15371_s0 }
  0xa3   :  { %p15378_p8 = por %p15377_p7, %p15376_p6 }
  0xa5   :  { %p15379_p9 = pnand %p15378_p8, %p15372_p5 }
  0xa7   :  { %15382 = shalt.err (!%p15379_p9)
}
  0xa8   :  { %134 = dma.hbm_to_vmem [thread:$0]  %s16398_s10, 16, %s132_s24, [#allocation18]  }
  0xa9   :  { %15405 = dma.done.wait [#allocation3], 896  }
  0xaa   :  { %15406 = vsyncadd [#allocation3], 4294966400 }
  0xab   :  { %15407 = dma.done.wait [#allocation6], 62880  }
  0xac   :  { %15408 = vsyncadd [#allocation6], 4294904416 }
  0xad   :  { %15409 = dma.done.wait [#allocation9], 1440  }
  0xae   :  { %15410 = vsyncadd [#allocation9], 4294965856 }
  0xaf   :  { %15411 = dma.done.wait [#allocation12], 96160  }
  0xb0   :  { %15412 = vsyncadd [#allocation12], 4294871136 }
  0xb1   :  { %15413 = dma.done.wait [#allocation15], 1440  }
  0xb2   :  { %15414 = vsyncadd [#allocation15], 4294965856 }
  0xb3   :  { %15415 = dma.done.wait [#allocation18], 16  }
  0xb4   :  { %15416 = vsyncadd [#allocation18], 4294967280  ;;  %v13134_v0 = vld [vmem:[#allocation5 + $0x4] ss:$40 sps:$4 sm:$0xff]   ;;  %v13138_v2 = vld [vmem:[#allocation5] ss:$40 sps:$4 sm:$0xff]  }
  0xb5   :  { %v13136_v1 = vld [vmem:[#allocation5 + $0xc] ss:$40 sps:$4 sm:$0xff]   ;;  %3153 = vmatprep.subr.bf16.mxu0 %v13134_v0  ;;  %v13139_v3 = vld [vmem:[#allocation5 + $0x8] ss:$40 sps:$4 sm:$0xff]   ;;  %v13142_v5 = vld [vmem:[#allocation5 + $0x5c] ss:$40 sps:$4 sm:$0xff]  }
  0xb6   :  { %3325 = vmatprep.subr.bf16.mxu1 %v13136_v1  ;;  %v13140_v4 = vld [vmem:[#allocation5 + $0x54] ss:$40 sps:$4 sm:$0xff]   ;;  %3154 = vmatpush1.bf16.msra.mxu0 %v13138_v2  ;;  %v13144_v6 = vld [vmem:[#allocation5 + $0x50] ss:$40 sps:$4 sm:$0xff]   ;;  %v13146_v8 = vld [vmem:[#allocation5 + $0xa4] ss:$40 sps:$4 sm:$0xff]  }
  0xb7   :  { %3326 = vmatpush1.bf16.msra.mxu1 %v13139_v3  ;;  %3155 = vmatprep.subr.bf16.mxu0 %v13140_v4  ;;  %v13145_v7 = vld [vmem:[#allocation5 + $0x58] ss:$40 sps:$4 sm:$0xff]   ;;  %v13148_v9 = vld [vmem:[#allocation5 + $0xac] ss:$40 sps:$4 sm:$0xff]   ;;  %v13151_v11 = vld [vmem:[#allocation5 + $0xa8] ss:$40 sps:$4 sm:$0xff]  }
  0xb8   :  { %3327 = vmatprep.subr.bf16.mxu1 %v13142_v5  ;;  %v13150_v10 = vld [vmem:[#allocation5 + $0xa0] ss:$40 sps:$4 sm:$0xff]   ;;  %v13152_v12 = vld [vmem:[#allocation5 + $0xf4] ss:$40 sps:$4 sm:$0xff]   ;;  %v13156_v14 = vld [vmem:[#allocation5 + $0xf0] ss:$40 sps:$4 sm:$0xff]  }
  0xb9   :  { %v13154_v13 = vld [vmem:[#allocation5 + $0xfc] ss:$40 sps:$4 sm:$0xff]   ;;  %v13157_v15 = vld [vmem:[#allocation5 + $0xf8] ss:$40 sps:$4 sm:$0xff]   ;;  %v13160_v17 = vld [vmem:[#allocation5 + $0x14c] ss:$40 sps:$4 sm:$0xff]  }
  0xba   :  { %3156 = vmatpush1.bf16.msra.mxu0 %v13144_v6  ;;  %v13158_v16 = vld [vmem:[#allocation5 + $0x144] ss:$40 sps:$4 sm:$0xff]   ;;  %v13162_v18 = vld [vmem:[#allocation5 + $0x140] ss:$40 sps:$4 sm:$0xff]   ;;  %v13164_v20 = vld [vmem:[#allocation5 + $0x194] ss:$40 sps:$4 sm:$0xff]  }
  0xbb   :  { %3328 = vmatpush1.bf16.msra.mxu1 %v13145_v7  ;;  %3157 = vmatprep.subr.bf16.mxu0 %v13146_v8  ;;  %v13163_v19 = vld [vmem:[#allocation5 + $0x148] ss:$40 sps:$4 sm:$0xff]   ;;  %v13166_v21 = vld [vmem:[#allocation5 + $0x19c] ss:$40 sps:$4 sm:$0xff]   ;;  %v13169_v23 = vld [vmem:[#allocation5 + $0x198] ss:$40 sps:$4 sm:$0xff]  }
  0xbc   :  { %3329 = vmatprep.subr.bf16.mxu1 %v13148_v9  ;;  %v13168_v22 = vld [vmem:[#allocation5 + $0x190] ss:$40 sps:$4 sm:$0xff]   ;;  %v13170_v24 = vld [vmem:[#allocation5 + $0x1e4] ss:$40 sps:$4 sm:$0xff]   ;;  %v13174_v26 = vld [vmem:[#allocation5 + $0x1e0] ss:$40 sps:$4 sm:$0xff]  }
  0xbd   :  { %v13172_v25 = vld [vmem:[#allocation5 + $0x1ec] ss:$40 sps:$4 sm:$0xff]   ;;  %v13175_v27 = vld [vmem:[#allocation5 + $0x1e8] ss:$40 sps:$4 sm:$0xff]   ;;  %v13178_v29 = vld [vmem:[#allocation5 + $0x23c] ss:$40 sps:$4 sm:$0xff]  }
  0xbe   :  { %3158 = vmatpush1.bf16.msra.mxu0 %v13150_v10  ;;  %v13176_v28 = vld [vmem:[#allocation5 + $0x234] ss:$40 sps:$4 sm:$0xff]   ;;  %v13180_v30 = vld [vmem:[#allocation5 + $0x230] ss:$40 sps:$4 sm:$0xff]   ;;  %v13182_v32 = vld [vmem:[#allocation5 + $0x284] ss:$40 sps:$4 sm:$0xff]  }
  0xbf   :  { %3330 = vmatpush1.bf16.msra.mxu1 %v13151_v11  ;;  %3159 = vmatprep.subr.bf16.mxu0 %v13152_v12  ;;  %v13181_v31 = vld [vmem:[#allocation5 + $0x238] ss:$40 sps:$4 sm:$0xff]   ;;  %v13184_v33 = vld [vmem:[#allocation5 + $0x28c] ss:$40 sps:$4 sm:$0xff]   ;;  %v13187_v35 = vld [vmem:[#allocation5 + $0x288] ss:$40 sps:$4 sm:$0xff]  }
  0xc0   :  { %3331 = vmatprep.subr.bf16.mxu1 %v13154_v13  ;;  %v13186_v34 = vld [vmem:[#allocation5 + $0x280] ss:$40 sps:$4 sm:$0xff]   ;;  %v13188_v36 = vld [vmem:[#allocation5 + $0x2d4] ss:$40 sps:$4 sm:$0xff]   ;;  %v13192_v38 = vld [vmem:[#allocation5 + $0x2d0] ss:$40 sps:$4 sm:$0xff]  }
  0xc1   :  { %v13190_v37 = vld [vmem:[#allocation5 + $0x2dc] ss:$40 sps:$4 sm:$0xff]   ;;  %v13193_v39 = vld [vmem:[#allocation5 + $0x2d8] ss:$40 sps:$4 sm:$0xff]   ;;  %v13196_v41 = vld [vmem:[#allocation5 + $0x32c] ss:$40 sps:$4 sm:$0xff]  }
  0xc2   :  { %3160 = vmatpush1.bf16.msra.mxu0 %v13156_v14  ;;  %v13194_v40 = vld [vmem:[#allocation5 + $0x324] ss:$40 sps:$4 sm:$0xff]   ;;  %v13198_v42 = vld [vmem:[#allocation5 + $0x320] ss:$40 sps:$4 sm:$0xff]   ;;  %v13200_v44 = vld [vmem:[#allocation5 + $0x374] ss:$40 sps:$4 sm:$0xff]  }
  0xc3   :  { %3332 = vmatpush1.bf16.msra.mxu1 %v13157_v15  ;;  %3161 = vmatprep.subr.bf16.mxu0 %v13158_v16  ;;  %v13199_v43 = vld [vmem:[#allocation5 + $0x328] ss:$40 sps:$4 sm:$0xff]   ;;  %v13202_v45 = vld [vmem:[#allocation5 + $0x37c] ss:$40 sps:$4 sm:$0xff]   ;;  %v13205_v48 = vld [vmem:[#allocation5 + $0x378] ss:$40 sps:$4 sm:$0xff]  }
  0xc4   :  { %3333 = vmatprep.subr.bf16.mxu1 %v13160_v17  ;;  %v13204_v46 = vld [vmem:[#allocation5 + $0x370] ss:$40 sps:$4 sm:$0xff]   ;;  %v13230_v47 = vld [vmem:[#allocation2 + $0x4] ss:$28 sps:$4 sm:$0xff]   ;;  %v13212_v53 = vld [vmem:[#allocation5 + $0x414] ss:$40 sps:$4 sm:$0xff]  }
  0xc5   :  { %v13206_v49 = vld [vmem:[#allocation5 + $0x3c4] ss:$40 sps:$4 sm:$0xff]   ;;  %3185 = vmatprep.mubr.bf16.mxu0 %v13230_v47  ;;  %3357 = vmatprep.mubr.bf16.mxu1 %v13230_v47  ;;  %v13210_v51 = vld [vmem:[#allocation5 + $0x3c0] ss:$40 sps:$4 sm:$0xff]   ;;  %v13216_v55 = vld [vmem:[#allocation5 + $0x410] ss:$40 sps:$4 sm:$0xff]  }
  0xc6   :  { %3162 = vmatpush1.bf16.msra.mxu0 %v13162_v18  ;;  %v13208_v50 = vld [vmem:[#allocation5 + $0x3cc] ss:$40 sps:$4 sm:$0xff]   ;;  %v13211_v52 = vld [vmem:[#allocation5 + $0x3c8] ss:$40 sps:$4 sm:$0xff]   ;;  %v13214_v54 = vld [vmem:[#allocation5 + $0x41c] ss:$40 sps:$4 sm:$0xff]  }
  0xc7   :  { %3334 = vmatpush1.bf16.msra.mxu1 %v13163_v19  ;;  %3163 = vmatprep.subr.bf16.mxu0 %v13164_v20  ;;  %v13217_v56 = vld [vmem:[#allocation5 + $0x418] ss:$40 sps:$4 sm:$0xff]   ;;  %v13218_v57 = vld [vmem:[#allocation5 + $0x464] ss:$40 sps:$4 sm:$0xff]   ;;  %v13223_v60 = vld [vmem:[#allocation5 + $0x468] ss:$40 sps:$4 sm:$0xff]  }
  0xc8   :  { %3335 = vmatprep.subr.bf16.mxu1 %v13166_v21  ;;  %v13220_v58 = vld [vmem:[#allocation5 + $0x46c] ss:$40 sps:$4 sm:$0xff]   ;;  %v13222_v59 = vld [vmem:[#allocation5 + $0x460] ss:$40 sps:$4 sm:$0xff]   ;;  %v13226_v62 = vld [vmem:[#allocation5 + $0x4bc] ss:$40 sps:$4 sm:$0xff]  }
  0xc9   :  { %v13224_v61 = vld [vmem:[#allocation5 + $0x4b4] ss:$40 sps:$4 sm:$0xff]   ;;  %v13228_v63 = vld [vmem:[#allocation5 + $0x4b0] ss:$40 sps:$4 sm:$0xff]   ;;  %v13234_v1 = vld [vmem:[#allocation5 + $0x504] ss:$40 sps:$4 sm:$0xff]  }
  0xca   :  { %3164 = vmatpush1.bf16.msra.mxu0 %v13168_v22  ;;  %v13229_v0 = vld [vmem:[#allocation5 + $0x4b8] ss:$40 sps:$4 sm:$0xff]   ;;  %v13237_v2 = vld [vmem:[#allocation5 + $0x50c] ss:$40 sps:$4 sm:$0xff]   ;;  %v13235_v4 = vld [vmem:[#allocation5 + $0x508] ss:$40 sps:$4 sm:$0xff]  }
  0xcb   :  { %3336 = vmatpush1.bf16.msra.mxu1 %v13169_v23  ;;  %3165 = vmatprep.subr.bf16.mxu0 %v13170_v24  ;;  %v13232_v3 = vld [vmem:[#allocation5 + $0x500] ss:$40 sps:$4 sm:$0xff]   ;;  %v13241_v6 = vld [vmem:[#allocation5 + $0x554] ss:$40 sps:$4 sm:$0xff]   ;;  %v13239_v8 = vld [vmem:[#allocation5 + $0x550] ss:$40 sps:$4 sm:$0xff]  }
  0xcc   :  { %3337 = vmatprep.subr.bf16.mxu1 %v13172_v25  ;;  %v13238_v5 = vld [vmem:[#allocation2] ss:$28 sps:$4 sm:$0xff]   ;;  %v13242_v9 = vld [vmem:[#allocation5 + $0x558] ss:$40 sps:$4 sm:$0xff]   ;;  %v13250_v11 = vld [vmem:[#allocation5 + $0x5ac] ss:$40 sps:$4 sm:$0xff]  }
  0xcd   :  { %v13244_v7 = vld [vmem:[#allocation5 + $0x55c] ss:$40 sps:$4 sm:$0xff]   ;;  %v13245_v12 = vld [vmem:[#allocation5 + $0x5a0] ss:$40 sps:$4 sm:$0xff]   ;;  %v13251_v16 = vld [vmem:[#allocation5 + $0x5f0] ss:$40 sps:$4 sm:$0xff]  }
  0xce   :  { %3166 = vmatpush1.bf16.msra.mxu0 %v13174_v26  ;;  %v13247_v10 = vld [vmem:[#allocation5 + $0x5a4] ss:$40 sps:$4 sm:$0xff]   ;;  %v13248_v13 = vld [vmem:[#allocation5 + $0x5a8] ss:$40 sps:$4 sm:$0xff]   ;;  %v13253_v14 = vld [vmem:[#allocation5 + $0x5f4] ss:$40 sps:$4 sm:$0xff]  }
  0xcf   :  { %3338 = vmatpush1.bf16.msra.mxu1 %v13175_v27  ;;  %3167 = vmatprep.subr.bf16.mxu0 %v13176_v28  ;;  %v13256_v15 = vld [vmem:[#allocation5 + $0x5fc] ss:$40 sps:$4 sm:$0xff]   ;;  %v13254_v17 = vld [vmem:[#allocation5 + $0x5f8] ss:$40 sps:$4 sm:$0xff]   ;;  %v13262_v19 = vld [vmem:[#allocation5 + $0x64c] ss:$40 sps:$4 sm:$0xff]  }
  0xd0   :  { %3339 = vmatprep.subr.bf16.mxu1 %v13178_v29  ;;  %v13259_v18 = vld [vmem:[#allocation5 + $0x644] ss:$40 sps:$4 sm:$0xff]   ;;  %v13257_v20 = vld [vmem:[#allocation5 + $0x640] ss:$40 sps:$4 sm:$0xff]   ;;  %v13265_v22 = vld [vmem:[#allocation5 + $0x694] ss:$40 sps:$4 sm:$0xff]  }
  0xd1   :  { %v13260_v21 = vld [vmem:[#allocation5 + $0x648] ss:$40 sps:$4 sm:$0xff]   ;;  %v13268_v23 = vld [vmem:[#allocation5 + $0x69c] ss:$40 sps:$4 sm:$0xff]   ;;  %v13266_v25 = vld [vmem:[#allocation5 + $0x698] ss:$40 sps:$4 sm:$0xff]  }
  0xd2   :  { %3168 = vmatpush1.bf16.msra.mxu0 %v13180_v30  ;;  %v13263_v24 = vld [vmem:[#allocation5 + $0x690] ss:$40 sps:$4 sm:$0xff]   ;;  %v13271_v26 = vld [vmem:[#allocation5 + $0x6e4] ss:$40 sps:$4 sm:$0xff]   ;;  %v13269_v28 = vld [vmem:[#allocation5 + $0x6e0] ss:$40 sps:$4 sm:$0xff]  }
  0xd3   :  { %3340 = vmatpush1.bf16.msra.mxu1 %v13181_v31  ;;  %3169 = vmatprep.subr.bf16.mxu0 %v13182_v32  ;;  %v13274_v27 = vld [vmem:[#allocation5 + $0x6ec] ss:$40 sps:$4 sm:$0xff]   ;;  %v13272_v30 = vld [vmem:[#allocation5 + $0x6e8] ss:$40 sps:$4 sm:$0xff]   ;;  %v13280_v32 = vld [vmem:[#allocation5 + $0x73c] ss:$40 sps:$4 sm:$0xff]  }
  0xd4   :  { %3341 = vmatprep.subr.bf16.mxu1 %v13184_v33  ;;  %v13329_v29 = vld [vmem:[#allocation2 + $0xc] ss:$28 sps:$4 sm:$0xff]   ;;  %vm3149_vm0 = vcmask 130048   ;;  %vm4080_vm1 = vcmask 392192   ;;  %vm11508_vm2 = vcmask 80896  }
  0xd5   :  { %v13277_v31 = vld [vmem:[#allocation5 + $0x734] ss:$40 sps:$4 sm:$0xff]   ;;  %v13275_v33 = vld [vmem:[#allocation5 + $0x730] ss:$40 sps:$4 sm:$0xff]  }
  0xd6   :  { %3170 = vmatpush1.bf16.msra.mxu0 %v13186_v34  ;;  %v13278_v34 = vld [vmem:[#allocation5 + $0x738] ss:$40 sps:$4 sm:$0xff]   ;;  %v13301_v47 = vld [vmem:[#allocation5 + $0x874] ss:$40 sps:$4 sm:$0xff]  }
  0xd7   :  { %3342 = vmatpush1.bf16.msra.mxu1 %v13187_v35  ;;  %3171 = vmatprep.subr.bf16.mxu0 %v13188_v36  ;;  %v13283_v35 = vld [vmem:[#allocation5 + $0x784] ss:$40 sps:$4 sm:$0xff]  }
  0xd8   :  { %3343 = vmatprep.subr.bf16.mxu1 %v13190_v37  ;;  %v13286_v36 = vld [vmem:[#allocation5 + $0x78c] ss:$40 sps:$4 sm:$0xff]   ;;  %v13281_v37 = vld [vmem:[#allocation5 + $0x780] ss:$40 sps:$4 sm:$0xff]  }
  0xda   :  { %3172 = vmatpush1.bf16.msra.mxu0 %v13192_v38  ;;  %v13284_v38 = vld [vmem:[#allocation5 + $0x788] ss:$40 sps:$4 sm:$0xff]  }
  0xdb   :  { %3344 = vmatpush1.bf16.msra.mxu1 %v13193_v39  ;;  %3173 = vmatprep.subr.bf16.mxu0 %v13194_v40  ;;  %v13289_v39 = vld [vmem:[#allocation5 + $0x7d4] ss:$40 sps:$4 sm:$0xff]  }
  0xdc   :  { %3345 = vmatprep.subr.bf16.mxu1 %v13196_v41  ;;  %v13292_v40 = vld [vmem:[#allocation5 + $0x7dc] ss:$40 sps:$4 sm:$0xff]   ;;  %v13287_v41 = vld [vmem:[#allocation5 + $0x7d0] ss:$40 sps:$4 sm:$0xff]  }
  0xde   :  { %3174 = vmatpush1.bf16.msra.mxu0 %v13198_v42  ;;  %v13290_v42 = vld [vmem:[#allocation5 + $0x7d8] ss:$40 sps:$4 sm:$0xff]  }
  0xdf   :  { %3346 = vmatpush1.bf16.msra.mxu1 %v13199_v43  ;;  %3175 = vmatprep.subr.bf16.mxu0 %v13200_v44  ;;  %v13295_v43 = vld [vmem:[#allocation5 + $0x824] ss:$40 sps:$4 sm:$0xff]  }
  0xe0   :  { %3347 = vmatprep.subr.bf16.mxu1 %v13202_v45  ;;  %v13298_v44 = vld [vmem:[#allocation5 + $0x82c] ss:$40 sps:$4 sm:$0xff]   ;;  %v13293_v45 = vld [vmem:[#allocation5 + $0x820] ss:$40 sps:$4 sm:$0xff]  }
  0xe2   :  { %3176 = vmatpush1.bf16.msra.mxu0 %v13204_v46  ;;  %v13296_v46 = vld [vmem:[#allocation5 + $0x828] ss:$40 sps:$4 sm:$0xff]  }
  0xe3   :  { %3348 = vmatpush1.bf16.msra.mxu1 %v13205_v48  ;;  %3177 = vmatprep.subr.bf16.mxu0 %v13206_v49  ;;  %v13304_v48 = vld [vmem:[#allocation5 + $0x87c] ss:$40 sps:$4 sm:$0xff]   ;;  %v13299_v49 = vld [vmem:[#allocation5 + $0x870] ss:$40 sps:$4 sm:$0xff]  }
  0xe4   :  { %3349 = vmatprep.subr.bf16.mxu1 %v13208_v50  ;;  %v13302_v50 = vld [vmem:[#allocation5 + $0x878] ss:$40 sps:$4 sm:$0xff]  }
  0xe6   :  { %3178 = vmatpush1.bf16.msra.mxu0 %v13210_v51  ;;  %v13307_v51 = vld [vmem:[#allocation5 + $0x8c4] ss:$40 sps:$4 sm:$0xff]  }
  0xe7   :  { %3350 = vmatpush1.bf16.msra.mxu1 %v13211_v52  ;;  %3179 = vmatprep.subr.bf16.mxu0 %v13212_v53  ;;  %v13310_v52 = vld [vmem:[#allocation5 + $0x8cc] ss:$40 sps:$4 sm:$0xff]   ;;  %v13305_v53 = vld [vmem:[#allocation5 + $0x8c0] ss:$40 sps:$4 sm:$0xff]  }
  0xe8   :  { %3351 = vmatprep.subr.bf16.mxu1 %v13214_v54  ;;  %v13308_v54 = vld [vmem:[#allocation5 + $0x8c8] ss:$40 sps:$4 sm:$0xff]  }
  0xea   :  { %3180 = vmatpush1.bf16.msra.mxu0 %v13216_v55  ;;  %v13313_v55 = vld [vmem:[#allocation5 + $0x914] ss:$40 sps:$4 sm:$0xff]  }
  0xeb   :  { %3352 = vmatpush1.bf16.msra.mxu1 %v13217_v56  ;;  %3181 = vmatprep.subr.bf16.mxu0 %v13218_v57  ;;  %v13316_v56 = vld [vmem:[#allocation5 + $0x91c] ss:$40 sps:$4 sm:$0xff]   ;;  %v13311_v57 = vld [vmem:[#allocation5 + $0x910] ss:$40 sps:$4 sm:$0xff]  }
  0xec   :  { %3353 = vmatprep.subr.bf16.mxu1 %v13220_v58  ;;  %v13314_v58 = vld [vmem:[#allocation5 + $0x918] ss:$40 sps:$4 sm:$0xff]  }
  0xee   :  { %3182 = vmatpush1.bf16.msra.mxu0 %v13222_v59  ;;  %v13319_v59 = vld [vmem:[#allocation5 + $0x964] ss:$40 sps:$4 sm:$0xff]  }
  0xef   :  { %3354 = vmatpush1.bf16.msra.mxu1 %v13223_v60  ;;  %3183 = vmatprep.subr.bf16.mxu0 %v13224_v61  ;;  %v13322_v60 = vld [vmem:[#allocation5 + $0x96c] ss:$40 sps:$4 sm:$0xff]   ;;  %v13317_v61 = vld [vmem:[#allocation5 + $0x960] ss:$40 sps:$4 sm:$0xff]  }
  0xf0   :  { %3355 = vmatprep.subr.bf16.mxu1 %v13226_v62  ;;  %v13320_v62 = vld [vmem:[#allocation5 + $0x968] ss:$40 sps:$4 sm:$0xff]  }
  0xf2   :  { %3184 = vmatpush1.bf16.msra.mxu0 %v13228_v63  ;;  %v13325_v63 = vld [vmem:[#allocation5 + $0x9b4] ss:$40 sps:$4 sm:$0xff]  }
  0xf3   :  { %3356 = vmatpush1.bf16.msra.mxu1 %v13229_v0  ;;  %3196 = vmatprep.subr.bf16.mxu0 %v13234_v1  ;;  %v13328_v0 = vld [vmem:[#allocation5 + $0x9bc] ss:$40 sps:$4 sm:$0xff]   ;;  %v13323_v1 = vld [vmem:[#allocation5 + $0x9b0] ss:$40 sps:$4 sm:$0xff]  }
  0xf4   :  { %3368 = vmatprep.subr.bf16.mxu1 %v13237_v2  ;;  %v13326_v2 = vld [vmem:[#allocation5 + $0x9b8] ss:$40 sps:$4 sm:$0xff]  }
  0xf5   :  { %3186 = vmatmul.mubr.bf16.vlgmr.msra.gmra.mrb[0].mxu0 %v13238_v5 }
  0xf6   :  { %3358 = vmatmul.mubr.bf16.vlgmr.msra.gmra.mrb[0].mxu1 %v13238_v5  ;;  %3197 = vmatpush1.bf16.msra.mxu0 %v13232_v3  ;;  %v13333_v3 = vld [vmem:[#allocation5 + $0xa04] ss:$40 sps:$4 sm:$0xff]   ;;  %v13331_v5 = vld [vmem:[#allocation5 + $0xa00] ss:$40 sps:$4 sm:$0xff]  }
  0xf7   :  { %3369 = vmatpush1.bf16.msra.mxu1 %v13235_v4  ;;  %3198 = vmatprep.subr.bf16.mxu0 %v13241_v6  ;;  %v13336_v4 = vld [vmem:[#allocation5 + $0xa0c] ss:$40 sps:$4 sm:$0xff]   ;;  %v13334_v6 = vld [vmem:[#allocation5 + $0xa08] ss:$40 sps:$4 sm:$0xff]  }
  0xf8   :  { %3370 = vmatprep.subr.bf16.mxu1 %v13244_v7  ;;  %3228 = vmatprep.mubr.bf16.mxu0 %v13329_v29  ;;  %v13337_v7 = vld [vmem:[#allocation2 + $0x8] ss:$28 sps:$4 sm:$0xff]  }
  0xf9   :  { %3400 = vmatprep.mubr.bf16.mxu1 %v13329_v29  ;;  %v13370_v29 = vld [vmem:[#allocation5 + $0xbe4] ss:$40 sps:$4 sm:$0xff]  }
  0xfa   :  { %3199 = vmatpush1.bf16.msra.mxu0 %v13239_v8  ;;  %v13340_v8 = vld [vmem:[#allocation5 + $0xa54] ss:$40 sps:$4 sm:$0xff]  }
  0xfb   :  { %3371 = vmatpush1.bf16.msra.mxu1 %v13242_v9  ;;  %3200 = vmatprep.subr.bf16.mxu0 %v13247_v10  ;;  %v13343_v9 = vld [vmem:[#allocation5 + $0xa5c] ss:$40 sps:$4 sm:$0xff]   ;;  %v13338_v10 = vld [vmem:[#allocation5 + $0xa50] ss:$40 sps:$4 sm:$0xff]  }
  0xfc   :  { %3372 = vmatprep.subr.bf16.mxu1 %v13250_v11  ;;  %v13341_v11 = vld [vmem:[#allocation5 + $0xa58] ss:$40 sps:$4 sm:$0xff]  }
  0xfe   :  { %3201 = vmatpush1.bf16.msra.mxu0 %v13245_v12  ;;  %v13428_v12 = vld [vmem:[#allocation2 + $0x14] ss:$28 sps:$4 sm:$0xff]  }
  0xff   :  { %3373 = vmatpush1.bf16.msra.mxu1 %v13248_v13  ;;  %3202 = vmatprep.subr.bf16.mxu0 %v13253_v14  ;;  %v13346_v13 = vld [vmem:[#allocation5 + $0xaa4] ss:$40 sps:$4 sm:$0xff]  }
 0x100   :  { %3374 = vmatprep.subr.bf16.mxu1 %v13256_v15  ;;  %v13349_v14 = vld [vmem:[#allocation5 + $0xaac] ss:$40 sps:$4 sm:$0xff]   ;;  %v13344_v15 = vld [vmem:[#allocation5 + $0xaa0] ss:$40 sps:$4 sm:$0xff]  }
 0x102   :  { %3203 = vmatpush1.bf16.msra.mxu0 %v13251_v16  ;;  %v13347_v16 = vld [vmem:[#allocation5 + $0xaa8] ss:$40 sps:$4 sm:$0xff]  }
 0x103   :  { %3375 = vmatpush1.bf16.msra.mxu1 %v13254_v17  ;;  %3204 = vmatprep.subr.bf16.mxu0 %v13259_v18  ;;  %v13352_v17 = vld [vmem:[#allocation5 + $0xaf4] ss:$40 sps:$4 sm:$0xff]  }
 0x104   :  { %3376 = vmatprep.subr.bf16.mxu1 %v13262_v19  ;;  %v13355_v18 = vld [vmem:[#allocation5 + $0xafc] ss:$40 sps:$4 sm:$0xff]   ;;  %v13350_v19 = vld [vmem:[#allocation5 + $0xaf0] ss:$40 sps:$4 sm:$0xff]  }
 0x106   :  { %3205 = vmatpush1.bf16.msra.mxu0 %v13257_v20  ;;  %v13353_v20 = vld [vmem:[#allocation5 + $0xaf8] ss:$40 sps:$4 sm:$0xff]  }
 0x107   :  { %3377 = vmatpush1.bf16.msra.mxu1 %v13260_v21  ;;  %3206 = vmatprep.subr.bf16.mxu0 %v13265_v22  ;;  %v13358_v21 = vld [vmem:[#allocation5 + $0xb44] ss:$40 sps:$4 sm:$0xff]  }
 0x108   :  { %3378 = vmatprep.subr.bf16.mxu1 %v13268_v23  ;;  %v13361_v22 = vld [vmem:[#allocation5 + $0xb4c] ss:$40 sps:$4 sm:$0xff]   ;;  %v13356_v23 = vld [vmem:[#allocation5 + $0xb40] ss:$40 sps:$4 sm:$0xff]  }
 0x10a   :  { %3207 = vmatpush1.bf16.msra.mxu0 %v13263_v24  ;;  %v13359_v24 = vld [vmem:[#allocation5 + $0xb48] ss:$40 sps:$4 sm:$0xff]  }
 0x10b   :  { %3379 = vmatpush1.bf16.msra.mxu1 %v13266_v25  ;;  %3208 = vmatprep.subr.bf16.mxu0 %v13271_v26  ;;  %v13364_v25 = vld [vmem:[#allocation5 + $0xb94] ss:$40 sps:$4 sm:$0xff]  }
 0x10c   :  { %3380 = vmatprep.subr.bf16.mxu1 %v13274_v27  ;;  %v13367_v26 = vld [vmem:[#allocation5 + $0xb9c] ss:$40 sps:$4 sm:$0xff]   ;;  %v13362_v27 = vld [vmem:[#allocation5 + $0xb90] ss:$40 sps:$4 sm:$0xff]  }
 0x10e   :  { %3209 = vmatpush1.bf16.msra.mxu0 %v13269_v28  ;;  %v13365_v28 = vld [vmem:[#allocation5 + $0xb98] ss:$40 sps:$4 sm:$0xff]  }
 0x10f   :  { %3381 = vmatpush1.bf16.msra.mxu1 %v13272_v30  ;;  %3210 = vmatprep.subr.bf16.mxu0 %v13277_v31  ;;  %v13373_v30 = vld [vmem:[#allocation5 + $0xbec] ss:$40 sps:$4 sm:$0xff]   ;;  %v13368_v31 = vld [vmem:[#allocation5 + $0xbe0] ss:$40 sps:$4 sm:$0xff]  }
 0x110   :  { %3382 = vmatprep.subr.bf16.mxu1 %v13280_v32  ;;  %v13371_v32 = vld [vmem:[#allocation5 + $0xbe8] ss:$40 sps:$4 sm:$0xff]  }
 0x112   :  { %3211 = vmatpush1.bf16.msra.mxu0 %v13275_v33  ;;  %v13376_v33 = vld [vmem:[#allocation5 + $0xc34] ss:$40 sps:$4 sm:$0xff]  }
 0x113   :  { %3383 = vmatpush1.bf16.msra.mxu1 %v13278_v34  ;;  %3212 = vmatprep.subr.bf16.mxu0 %v13283_v35  ;;  %v13379_v34 = vld [vmem:[#allocation5 + $0xc3c] ss:$40 sps:$4 sm:$0xff]   ;;  %v13374_v35 = vld [vmem:[#allocation5 + $0xc30] ss:$40 sps:$4 sm:$0xff]  }
 0x114   :  { %3384 = vmatprep.subr.bf16.mxu1 %v13286_v36  ;;  %v13377_v36 = vld [vmem:[#allocation5 + $0xc38] ss:$40 sps:$4 sm:$0xff]  }
 0x116   :  { %3213 = vmatpush1.bf16.msra.mxu0 %v13281_v37  ;;  %v13382_v37 = vld [vmem:[#allocation5 + $0xc84] ss:$40 sps:$4 sm:$0xff]  }
 0x117   :  { %3385 = vmatpush1.bf16.msra.mxu1 %v13284_v38  ;;  %3214 = vmatprep.subr.bf16.mxu0 %v13289_v39  ;;  %v13385_v38 = vld [vmem:[#allocation5 + $0xc8c] ss:$40 sps:$4 sm:$0xff]   ;;  %v13380_v39 = vld [vmem:[#allocation5 + $0xc80] ss:$40 sps:$4 sm:$0xff]  }
 0x118   :  { %3386 = vmatprep.subr.bf16.mxu1 %v13292_v40  ;;  %v13383_v40 = vld [vmem:[#allocation5 + $0xc88] ss:$40 sps:$4 sm:$0xff]  }
 0x11a   :  { %3215 = vmatpush1.bf16.msra.mxu0 %v13287_v41  ;;  %v13388_v41 = vld [vmem:[#allocation5 + $0xcd4] ss:$40 sps:$4 sm:$0xff]  }
 0x11b   :  { %3387 = vmatpush1.bf16.msra.mxu1 %v13290_v42  ;;  %3216 = vmatprep.subr.bf16.mxu0 %v13295_v43  ;;  %v13391_v42 = vld [vmem:[#allocation5 + $0xcdc] ss:$40 sps:$4 sm:$0xff]   ;;  %v13386_v43 = vld [vmem:[#allocation5 + $0xcd0] ss:$40 sps:$4 sm:$0xff]  }
 0x11c   :  { %3388 = vmatprep.subr.bf16.mxu1 %v13298_v44  ;;  %v13389_v44 = vld [vmem:[#allocation5 + $0xcd8] ss:$40 sps:$4 sm:$0xff]  }
 0x11e   :  { %3217 = vmatpush1.bf16.msra.mxu0 %v13293_v45  ;;  %v13394_v45 = vld [vmem:[#allocation5 + $0xd24] ss:$40 sps:$4 sm:$0xff]  }
 0x11f   :  { %3389 = vmatpush1.bf16.msra.mxu1 %v13296_v46  ;;  %3218 = vmatprep.subr.bf16.mxu0 %v13301_v47  ;;  %v13397_v46 = vld [vmem:[#allocation5 + $0xd2c] ss:$40 sps:$4 sm:$0xff]   ;;  %v13392_v47 = vld [vmem:[#allocation5 + $0xd20] ss:$40 sps:$4 sm:$0xff]  }
 0x120   :  { %3390 = vmatprep.subr.bf16.mxu1 %v13304_v48  ;;  %v13395_v48 = vld [vmem:[#allocation5 + $0xd28] ss:$40 sps:$4 sm:$0xff]  }
 0x122   :  { %3219 = vmatpush1.bf16.msra.mxu0 %v13299_v49  ;;  %v13400_v49 = vld [vmem:[#allocation5 + $0xd74] ss:$40 sps:$4 sm:$0xff]  }
 0x123   :  { %3391 = vmatpush1.bf16.msra.mxu1 %v13302_v50  ;;  %3220 = vmatprep.subr.bf16.mxu0 %v13307_v51  ;;  %v13403_v50 = vld [vmem:[#allocation5 + $0xd7c] ss:$40 sps:$4 sm:$0xff]   ;;  %v13398_v51 = vld [vmem:[#allocation5 + $0xd70] ss:$40 sps:$4 sm:$0xff]  }
 0x124   :  { %3392 = vmatprep.subr.bf16.mxu1 %v13310_v52  ;;  %v13401_v52 = vld [vmem:[#allocation5 + $0xd78] ss:$40 sps:$4 sm:$0xff]  }
 0x126   :  { %3221 = vmatpush1.bf16.msra.mxu0 %v13305_v53  ;;  %v13406_v53 = vld [vmem:[#allocation5 + $0xdc4] ss:$40 sps:$4 sm:$0xff]  }
 0x127   :  { %3393 = vmatpush1.bf16.msra.mxu1 %v13308_v54  ;;  %3222 = vmatprep.subr.bf16.mxu0 %v13313_v55  ;;  %v13409_v54 = vld [vmem:[#allocation5 + $0xdcc] ss:$40 sps:$4 sm:$0xff]   ;;  %v13404_v55 = vld [vmem:[#allocation5 + $0xdc0] ss:$40 sps:$4 sm:$0xff]  }
 0x128   :  { %3394 = vmatprep.subr.bf16.mxu1 %v13316_v56  ;;  %v13407_v56 = vld [vmem:[#allocation5 + $0xdc8] ss:$40 sps:$4 sm:$0xff]  }
 0x12a   :  { %3223 = vmatpush1.bf16.msra.mxu0 %v13311_v57  ;;  %v13412_v57 = vld [vmem:[#allocation5 + $0xe14] ss:$40 sps:$4 sm:$0xff]  }
 0x12b   :  { %3395 = vmatpush1.bf16.msra.mxu1 %v13314_v58  ;;  %3224 = vmatprep.subr.bf16.mxu0 %v13319_v59  ;;  %v13415_v58 = vld [vmem:[#allocation5 + $0xe1c] ss:$40 sps:$4 sm:$0xff]   ;;  %v13410_v59 = vld [vmem:[#allocation5 + $0xe10] ss:$40 sps:$4 sm:$0xff]  }
 0x12c   :  { %3396 = vmatprep.subr.bf16.mxu1 %v13322_v60  ;;  %v13413_v60 = vld [vmem:[#allocation5 + $0xe18] ss:$40 sps:$4 sm:$0xff]  }
 0x12e   :  { %3225 = vmatpush1.bf16.msra.mxu0 %v13317_v61  ;;  %v13418_v61 = vld [vmem:[#allocation5 + $0xe64] ss:$40 sps:$4 sm:$0xff]  }
 0x12f   :  { %3397 = vmatpush1.bf16.msra.mxu1 %v13320_v62  ;;  %3226 = vmatprep.subr.bf16.mxu0 %v13325_v63  ;;  %v13421_v62 = vld [vmem:[#allocation5 + $0xe6c] ss:$40 sps:$4 sm:$0xff]   ;;  %v13416_v63 = vld [vmem:[#allocation5 + $0xe60] ss:$40 sps:$4 sm:$0xff]  }
 0x130   :  { %3398 = vmatprep.subr.bf16.mxu1 %v13328_v0  ;;  %v13419_v0 = vld [vmem:[#allocation5 + $0xe68] ss:$40 sps:$4 sm:$0xff]  }
 0x132   :  { %3227 = vmatpush1.bf16.msra.mxu0 %v13323_v1  ;;  %v13424_v1 = vld [vmem:[#allocation5 + $0xeb4] ss:$40 sps:$4 sm:$0xff]  }
 0x133   :  { %3399 = vmatpush1.bf16.msra.mxu1 %v13326_v2  ;;  %3239 = vmatprep.subr.bf16.mxu0 %v13333_v3  ;;  %v13427_v2 = vld [vmem:[#allocation5 + $0xebc] ss:$40 sps:$4 sm:$0xff]   ;;  %v13422_v3 = vld [vmem:[#allocation5 + $0xeb0] ss:$40 sps:$4 sm:$0xff]  }
 0x134   :  { %3411 = vmatprep.subr.bf16.mxu1 %v13336_v4  ;;  %v13425_v4 = vld [vmem:[#allocation5 + $0xeb8] ss:$40 sps:$4 sm:$0xff]  }
 0x135   :  { %3229 = vmatmul.mubr.bf16.vlgmr.msra.gmra.mrb[0].mxu0 %v13337_v7 }
 0x136   :  { %3401 = vmatmul.mubr.bf16.vlgmr.msra.gmra.mrb[0].mxu1 %v13337_v7  ;;  %3240 = vmatpush1.bf16.msra.mxu0 %v13331_v5  ;;  %v13433_v5 = vld [vmem:[#allocation5 + $0xf04] ss:$40 sps:$4 sm:$0xff]   ;;  %v13430_v7 = vld [vmem:[#allocation2 + $0x10] ss:$28 sps:$4 sm:$0xff]  }
 0x137   :  { %3412 = vmatpush1.bf16.msra.mxu1 %v13334_v6  ;;  %3241 = vmatprep.subr.bf16.mxu0 %v13340_v8  ;;  %v13436_v6 = vld [vmem:[#allocation5 + $0x1c] ss:$40 sps:$4 sm:$0xff]   ;;  %v13431_v8 = vld [vmem:[#allocation5 + $0xf00] ss:$40 sps:$4 sm:$0xff]  }
 0x138   :  { %3413 = vmatprep.subr.bf16.mxu1 %v13343_v9  ;;  %3271 = vmatprep.mubr.bf16.mxu0 %v13428_v12  ;;  %v13434_v9 = vld [vmem:[#allocation5 + $0x18] ss:$40 sps:$4 sm:$0xff]  }
 0x139   :  { %3443 = vmatprep.mubr.bf16.mxu1 %v13428_v12  ;;  %v13437_v12 = vld [vmem:[#allocation5 + $0x68] ss:$40 sps:$4 sm:$0xff]  }
 0x13a   :  { %3242 = vmatpush1.bf16.msra.mxu0 %v13338_v10  ;;  %v13439_v10 = vld [vmem:[#allocation5 + $0x6c] ss:$40 sps:$4 sm:$0xff]  }
 0x13b   :  { %3414 = vmatpush1.bf16.msra.mxu1 %v13341_v11  ;;  %3243 = vmatprep.subr.bf16.mxu0 %v13346_v13  ;;  %v13446_v11 = vld [vmem:[#allocation5 + $0xf0c] ss:$40 sps:$4 sm:$0xff]   ;;  %v13442_v13 = vld [vmem:[#allocation5 + $0xbc] ss:$40 sps:$4 sm:$0xff]  }
 0x13c   :  { %3415 = vmatprep.subr.bf16.mxu1 %v13349_v14  ;;  %v15433_v14 = vmov 0  }
 0x13e   :  { %3244 = vmatpush1.bf16.msra.mxu0 %v13344_v15  ;;  %v15149_v15 = vld [vmem:[#allocation2 + $0x4] ss:$28 sps:$4 sm:$0xff]  }
 0x13f   :  { %3416 = vmatpush1.bf16.msra.mxu1 %v13347_v16  ;;  %3245 = vmatprep.subr.bf16.mxu0 %v13352_v17  ;;  %v13440_v16 = vld [vmem:[#allocation5 + $0xb8] ss:$40 sps:$4 sm:$0xff]   ;;  %v13449_v17 = vld [vmem:[#allocation5 + $0x10c] ss:$40 sps:$4 sm:$0xff]  }
 0x140   :  { %3417 = vmatprep.subr.bf16.mxu1 %v13355_v18  ;;  %v13443_v18 = vld [vmem:[#allocation2 + $0x18] ss:$28 sps:$4 sm:$0xff]  }
 0x142   :  { %3246 = vmatpush1.bf16.msra.mxu0 %v13350_v19  ;;  %v13444_v19 = vld [vmem:[#allocation5 + $0xf08] ss:$40 sps:$4 sm:$0xff]  }
 0x143   :  { %3418 = vmatpush1.bf16.msra.mxu1 %v13353_v20  ;;  %3247 = vmatprep.subr.bf16.mxu0 %v13358_v21  ;;  %v13447_v20 = vld [vmem:[#allocation5 + $0x108] ss:$40 sps:$4 sm:$0xff]   ;;  %v13452_v21 = vld [vmem:[#allocation5 + $0x15c] ss:$40 sps:$4 sm:$0xff]  }
 0x144   :  { %3419 = vmatprep.subr.bf16.mxu1 %v13361_v22  ;;  %v13455_v22 = vld [vmem:[#allocation5 + $0x14] ss:$40 sps:$4 sm:$0xff]  }
 0x146   :  { %3248 = vmatpush1.bf16.msra.mxu0 %v13356_v23  ;;  %v13450_v23 = vld [vmem:[#allocation5 + $0x158] ss:$40 sps:$4 sm:$0xff]  }
 0x147   :  { %3420 = vmatpush1.bf16.msra.mxu1 %v13359_v24  ;;  %3249 = vmatprep.subr.bf16.mxu0 %v13364_v25  ;;  %v13458_v24 = vld [vmem:[#allocation5 + $0x1ac] ss:$40 sps:$4 sm:$0xff]   ;;  %v13453_v25 = vld [vmem:[#allocation5 + $0x10] ss:$40 sps:$4 sm:$0xff]  }
 0x148   :  { %3421 = vmatprep.subr.bf16.mxu1 %v13367_v26  ;;  %v13456_v26 = vld [vmem:[#allocation5 + $0x1a8] ss:$40 sps:$4 sm:$0xff]  }
 0x14a   :  { %3250 = vmatpush1.bf16.msra.mxu0 %v13362_v27  ;;  %v13461_v27 = vld [vmem:[#allocation5 + $0x64] ss:$40 sps:$4 sm:$0xff]  }
 0x14b   :  { %3422 = vmatpush1.bf16.msra.mxu1 %v13365_v28  ;;  %3251 = vmatprep.subr.bf16.mxu0 %v13370_v29  ;;  %v13464_v28 = vld [vmem:[#allocation5 + $0x1fc] ss:$40 sps:$4 sm:$0xff]   ;;  %v13459_v29 = vld [vmem:[#allocation5 + $0x60] ss:$40 sps:$4 sm:$0xff]  }
 0x14c   :  { %3423 = vmatprep.subr.bf16.mxu1 %v13373_v30  ;;  %v13462_v30 = vld [vmem:[#allocation5 + $0x1f8] ss:$40 sps:$4 sm:$0xff]  }
 0x14e   :  { %3252 = vmatpush1.bf16.msra.mxu0 %v13368_v31  ;;  %v13467_v31 = vld [vmem:[#allocation5 + $0xb4] ss:$40 sps:$4 sm:$0xff]  }
 0x14f   :  { %3424 = vmatpush1.bf16.msra.mxu1 %v13371_v32  ;;  %3253 = vmatprep.subr.bf16.mxu0 %v13376_v33  ;;  %v13470_v32 = vld [vmem:[#allocation5 + $0x24c] ss:$40 sps:$4 sm:$0xff]   ;;  %v13465_v33 = vld [vmem:[#allocation5 + $0xb0] ss:$40 sps:$4 sm:$0xff]  }
 0x150   :  { %3425 = vmatprep.subr.bf16.mxu1 %v13379_v34  ;;  %v13468_v34 = vld [vmem:[#allocation5 + $0x248] ss:$40 sps:$4 sm:$0xff]  }
 0x152   :  { %3254 = vmatpush1.bf16.msra.mxu0 %v13374_v35  ;;  %v13473_v35 = vld [vmem:[#allocation5 + $0x104] ss:$40 sps:$4 sm:$0xff]  }
 0x153   :  { %3426 = vmatpush1.bf16.msra.mxu1 %v13377_v36  ;;  %3255 = vmatprep.subr.bf16.mxu0 %v13382_v37  ;;  %v13476_v36 = vld [vmem:[#allocation5 + $0x29c] ss:$40 sps:$4 sm:$0xff]   ;;  %v13471_v37 = vld [vmem:[#allocation5 + $0x100] ss:$40 sps:$4 sm:$0xff]  }
 0x154   :  { %3427 = vmatprep.subr.bf16.mxu1 %v13385_v38  ;;  %v13474_v38 = vld [vmem:[#allocation5 + $0x298] ss:$40 sps:$4 sm:$0xff]  }
 0x156   :  { %3256 = vmatpush1.bf16.msra.mxu0 %v13380_v39  ;;  %v13479_v39 = vld [vmem:[#allocation5 + $0x154] ss:$40 sps:$4 sm:$0xff]  }
 0x157   :  { %3428 = vmatpush1.bf16.msra.mxu1 %v13383_v40  ;;  %3257 = vmatprep.subr.bf16.mxu0 %v13388_v41  ;;  %v13482_v40 = vld [vmem:[#allocation5 + $0x2ec] ss:$40 sps:$4 sm:$0xff]   ;;  %v13477_v41 = vld [vmem:[#allocation5 + $0x150] ss:$40 sps:$4 sm:$0xff]  }
 0x158   :  { %3429 = vmatprep.subr.bf16.mxu1 %v13391_v42  ;;  %v13480_v42 = vld [vmem:[#allocation5 + $0x2e8] ss:$40 sps:$4 sm:$0xff]  }
 0x15a   :  { %3258 = vmatpush1.bf16.msra.mxu0 %v13386_v43  ;;  %v13485_v43 = vld [vmem:[#allocation5 + $0x1a4] ss:$40 sps:$4 sm:$0xff]  }
 0x15b   :  { %3430 = vmatpush1.bf16.msra.mxu1 %v13389_v44  ;;  %3259 = vmatprep.subr.bf16.mxu0 %v13394_v45  ;;  %v13488_v44 = vld [vmem:[#allocation5 + $0x33c] ss:$40 sps:$4 sm:$0xff]   ;;  %v13483_v45 = vld [vmem:[#allocation5 + $0x1a0] ss:$40 sps:$4 sm:$0xff]  }
 0x15c   :  { %3431 = vmatprep.subr.bf16.mxu1 %v13397_v46  ;;  %v13486_v46 = vld [vmem:[#allocation5 + $0x338] ss:$40 sps:$4 sm:$0xff]  }
 0x15e   :  { %3260 = vmatpush1.bf16.msra.mxu0 %v13392_v47  ;;  %v13491_v47 = vld [vmem:[#allocation5 + $0x1f4] ss:$40 sps:$4 sm:$0xff]  }
 0x15f   :  { %3432 = vmatpush1.bf16.msra.mxu1 %v13395_v48  ;;  %3261 = vmatprep.subr.bf16.mxu0 %v13400_v49  ;;  %v13494_v48 = vld [vmem:[#allocation5 + $0x38c] ss:$40 sps:$4 sm:$0xff]   ;;  %v13489_v49 = vld [vmem:[#allocation5 + $0x1f0] ss:$40 sps:$4 sm:$0xff]  }
 0x160   :  { %3433 = vmatprep.subr.bf16.mxu1 %v13403_v50  ;;  %v13492_v50 = vld [vmem:[#allocation5 + $0x388] ss:$40 sps:$4 sm:$0xff]  }
 0x162   :  { %3262 = vmatpush1.bf16.msra.mxu0 %v13398_v51  ;;  %v13497_v51 = vld [vmem:[#allocation5 + $0x244] ss:$40 sps:$4 sm:$0xff]  }
 0x163   :  { %3434 = vmatpush1.bf16.msra.mxu1 %v13401_v52  ;;  %3263 = vmatprep.subr.bf16.mxu0 %v13406_v53  ;;  %v13500_v52 = vld [vmem:[#allocation5 + $0x3dc] ss:$40 sps:$4 sm:$0xff]   ;;  %v13495_v53 = vld [vmem:[#allocation5 + $0x240] ss:$40 sps:$4 sm:$0xff]  }
 0x164   :  { %3435 = vmatprep.subr.bf16.mxu1 %v13409_v54  ;;  %v13498_v54 = vld [vmem:[#allocation5 + $0x3d8] ss:$40 sps:$4 sm:$0xff]  }
 0x166   :  { %3264 = vmatpush1.bf16.msra.mxu0 %v13404_v55  ;;  %v13503_v55 = vld [vmem:[#allocation5 + $0x294] ss:$40 sps:$4 sm:$0xff]  }
 0x167   :  { %3436 = vmatpush1.bf16.msra.mxu1 %v13407_v56  ;;  %3265 = vmatprep.subr.bf16.mxu0 %v13412_v57  ;;  %v13506_v56 = vld [vmem:[#allocation5 + $0x42c] ss:$40 sps:$4 sm:$0xff]   ;;  %v13501_v57 = vld [vmem:[#allocation5 + $0x290] ss:$40 sps:$4 sm:$0xff]  }
 0x168   :  { %3437 = vmatprep.subr.bf16.mxu1 %v13415_v58  ;;  %v13504_v58 = vld [vmem:[#allocation5 + $0x428] ss:$40 sps:$4 sm:$0xff]  }
 0x16a   :  { %3266 = vmatpush1.bf16.msra.mxu0 %v13410_v59  ;;  %v13509_v59 = vld [vmem:[#allocation5 + $0x2e4] ss:$40 sps:$4 sm:$0xff]  }
 0x16b   :  { %3438 = vmatpush1.bf16.msra.mxu1 %v13413_v60  ;;  %3267 = vmatprep.subr.bf16.mxu0 %v13418_v61  ;;  %v13512_v60 = vld [vmem:[#allocation5 + $0x47c] ss:$40 sps:$4 sm:$0xff]   ;;  %v13507_v61 = vld [vmem:[#allocation5 + $0x2e0] ss:$40 sps:$4 sm:$0xff]  }
 0x16c   :  { %3439 = vmatprep.subr.bf16.mxu1 %v13421_v62  ;;  %v13510_v62 = vld [vmem:[#allocation5 + $0x478] ss:$40 sps:$4 sm:$0xff]  }
 0x16e   :  { %3268 = vmatpush1.bf16.msra.mxu0 %v13416_v63  ;;  %v13515_v63 = vld [vmem:[#allocation5 + $0x334] ss:$40 sps:$4 sm:$0xff]  }
 0x16f   :  { %3440 = vmatpush1.bf16.msra.mxu1 %v13419_v0  ;;  %3269 = vmatprep.subr.bf16.mxu0 %v13424_v1  ;;  %v13518_v0 = vld [vmem:[#allocation5 + $0x4cc] ss:$40 sps:$4 sm:$0xff]   ;;  %v13513_v1 = vld [vmem:[#allocation5 + $0x330] ss:$40 sps:$4 sm:$0xff]  }
 0x170   :  { %3441 = vmatprep.subr.bf16.mxu1 %v13427_v2  ;;  %v13516_v2 = vld [vmem:[#allocation5 + $0x4c8] ss:$40 sps:$4 sm:$0xff]  }
 0x172   :  { %3270 = vmatpush1.bf16.msra.mxu0 %v13422_v3  ;;  %v13521_v3 = vld [vmem:[#allocation5 + $0x384] ss:$40 sps:$4 sm:$0xff]  }
 0x173   :  { %3442 = vmatpush1.bf16.msra.mxu1 %v13425_v4  ;;  %3282 = vmatprep.subr.bf16.mxu0 %v13433_v5  ;;  %v13524_v4 = vld [vmem:[#allocation5 + $0x51c] ss:$40 sps:$4 sm:$0xff]   ;;  %v13519_v5 = vld [vmem:[#allocation5 + $0x380] ss:$40 sps:$4 sm:$0xff]  }
 0x174   :  { %3669 = vmatprep.subr.bf16.mxu1 %v13436_v6  ;;  %v13522_v6 = vld [vmem:[#allocation5 + $0x518] ss:$40 sps:$4 sm:$0xff]  }
 0x175   :  { %3272 = vmatmul.mubr.bf16.vlgmr.msra.gmra.mrb[0].mxu0 %v13430_v7 }
 0x176   :  { %3444 = vmatmul.mubr.bf16.vlgmr.msra.gmra.mrb[0].mxu1 %v13430_v7  ;;  %3283 = vmatpush1.bf16.msra.mxu0 %v13431_v8  ;;  %v13527_v7 = vld [vmem:[#allocation5 + $0x3d4] ss:$40 sps:$4 sm:$0xff]  }
 0x177   :  { %3670 = vmatpush1.bf16.msra.mxu1 %v13434_v9  ;;  %3314 = vmatprep.mubr.bf16.mxu0 %v15433_v14  ;;  %v13530_v8 = vld [vmem:[#allocation5 + $0x56c] ss:$40 sps:$4 sm:$0xff]   ;;  %v13525_v9 = vld [vmem:[#allocation5 + $0x3d0] ss:$40 sps:$4 sm:$0xff]  }
 0x178   :  { %3671 = vmatprep.subr.bf16.mxu1 %v13439_v10  ;;  %3454 = vmatprep.subr.bf16.mxu0 %v13446_v11  ;;  %v13528_v10 = vld [vmem:[#allocation5 + $0x568] ss:$40 sps:$4 sm:$0xff]  }
 0x179   :  { %3701 = vmatprep.mubr.bf16.mxu1 %v15149_v15  ;;  %v15150_v11 = vld [vmem:[#allocation2] ss:$28 sps:$4 sm:$0xff]  }
 0x17b   :  { %3672 = vmatpush1.bf16.msra.mxu1 %v13437_v12  ;;  %v13533_v12 = vld [vmem:[#allocation5 + $0x424] ss:$40 sps:$4 sm:$0xff]  }
 0x17c   :  { %3673 = vmatprep.subr.bf16.mxu1 %v13442_v13  ;;  %v13536_v13 = vld [vmem:[#allocation5 + $0x5bc] ss:$40 sps:$4 sm:$0xff]  }
 0x17f   :  { %3674 = vmatpush1.bf16.msra.mxu1 %v13440_v16  ;;  %v13534_v16 = vld [vmem:[#allocation5 + $0x5b8] ss:$40 sps:$4 sm:$0xff]  }
 0x180   :  { %3675 = vmatprep.subr.bf16.mxu1 %v13449_v17  ;;  %v15151_v17 = vld [vmem:[#allocation2 + $0xc] ss:$28 sps:$4 sm:$0xff]  }
 0x181   :  { %12030 = vmatmul.mubr.msk.bf16.vlgmr.msra.gmra.mrb[0].mxu0 %vm3149_vm0, %v13443_v18 }
 0x182   :  { %3455 = vmatpush1.bf16.msra.mxu0 %v13444_v19  ;;  %3486 = vmatprep.mubr.bf16.mxu0 %v15433_v14  ;;  %v13542_v19 = vld [vmem:[#allocation5 + $0x60c] ss:$40 sps:$4 sm:$0xff]  }
 0x183   :  { %3676 = vmatpush1.bf16.msra.mxu1 %v13447_v20  ;;  %3497 = vmatprep.subr.bf16.mxu0 %v13455_v22  ;;  %v13537_v20 = vld [vmem:[#allocation5 + $0x470] ss:$40 sps:$4 sm:$0xff]   ;;  %v13545_v22 = vld [vmem:[#allocation5 + $0x4c4] ss:$40 sps:$4 sm:$0xff]  }
 0x184   :  { %3677 = vmatprep.subr.bf16.mxu1 %v13452_v21  ;;  %v13540_v21 = vld [vmem:[#allocation5 + $0x608] ss:$40 sps:$4 sm:$0xff]  }
 0x187   :  { %3678 = vmatpush1.bf16.msra.mxu1 %v13450_v23  ;;  %v13548_v23 = vld [vmem:[#allocation5 + $0x65c] ss:$40 sps:$4 sm:$0xff]  }
 0x188   :  { %3679 = vmatprep.subr.bf16.mxu1 %v13458_v24  ;;  %v13543_v24 = vld [vmem:[#allocation5 + $0x4c0] ss:$40 sps:$4 sm:$0xff]  }
 0x189   :  { %12031 = vmatmul.mubr.msk.bf16.vlgmr.msra.gmra.mrb[4].mxu0 %vm3149_vm0, %v13443_v18  ;;  %v13539_v18 = vld [vmem:[#allocation5 + $0x474] ss:$40 sps:$4 sm:$0xff]  }
 0x18a   :  { %3498 = vmatpush1.bf16.msra.mxu0 %v13453_v25  ;;  %3529 = vmatprep.mubr.bf16.mxu0 %v15149_v15  ;;  %v13531_v15 = vld [vmem:[#allocation5 + $0x420] ss:$40 sps:$4 sm:$0xff]  }
 0x18b   :  { %3680 = vmatpush1.bf16.msra.mxu1 %v13456_v26  ;;  %3499 = vmatprep.subr.bf16.mxu0 %v13461_v27  ;;  %v13546_v25 = vld [vmem:[#allocation5 + $0x658] ss:$40 sps:$4 sm:$0xff]   ;;  %v13551_v26 = vld [vmem:[#allocation5 + $0x514] ss:$40 sps:$4 sm:$0xff]  }
 0x18c   :  { %3681 = vmatprep.subr.bf16.mxu1 %v13464_v28  ;;  %v13554_v27 = vld [vmem:[#allocation5 + $0x6ac] ss:$40 sps:$4 sm:$0xff]   ;;  %v13549_v28 = vld [vmem:[#allocation5 + $0x510] ss:$40 sps:$4 sm:$0xff]  }
 0x18e   :  { %3500 = vmatpush1.bf16.msra.mxu0 %v13459_v29  ;;  %v13552_v29 = vld [vmem:[#allocation5 + $0x6a8] ss:$40 sps:$4 sm:$0xff]  }
 0x18f   :  { %3682 = vmatpush1.bf16.msra.mxu1 %v13462_v30  ;;  %3501 = vmatprep.subr.bf16.mxu0 %v13467_v31  ;;  %v13557_v30 = vld [vmem:[#allocation5 + $0x564] ss:$40 sps:$4 sm:$0xff]  }
 0x190   :  { %3683 = vmatprep.subr.bf16.mxu1 %v13470_v32  ;;  %v13560_v31 = vld [vmem:[#allocation5 + $0x6fc] ss:$40 sps:$4 sm:$0xff]   ;;  %v13555_v32 = vld [vmem:[#allocation5 + $0x560] ss:$40 sps:$4 sm:$0xff]  }
 0x192   :  { %3502 = vmatpush1.bf16.msra.mxu0 %v13465_v33  ;;  %v13558_v33 = vld [vmem:[#allocation5 + $0x6f8] ss:$40 sps:$4 sm:$0xff]  }
 0x193   :  { %3684 = vmatpush1.bf16.msra.mxu1 %v13468_v34  ;;  %3503 = vmatprep.subr.bf16.mxu0 %v13473_v35  ;;  %v13563_v34 = vld [vmem:[#allocation5 + $0x5b4] ss:$40 sps:$4 sm:$0xff]  }
 0x194   :  { %3685 = vmatprep.subr.bf16.mxu1 %v13476_v36  ;;  %v13566_v35 = vld [vmem:[#allocation5 + $0x74c] ss:$40 sps:$4 sm:$0xff]   ;;  %v13561_v36 = vld [vmem:[#allocation5 + $0x5b0] ss:$40 sps:$4 sm:$0xff]  }
 0x196   :  { %3504 = vmatpush1.bf16.msra.mxu0 %v13471_v37  ;;  %v13564_v37 = vld [vmem:[#allocation5 + $0x748] ss:$40 sps:$4 sm:$0xff]  }
 0x197   :  { %3686 = vmatpush1.bf16.msra.mxu1 %v13474_v38  ;;  %3505 = vmatprep.subr.bf16.mxu0 %v13479_v39  ;;  %v13569_v38 = vld [vmem:[#allocation5 + $0x604] ss:$40 sps:$4 sm:$0xff]  }
 0x198   :  { %3687 = vmatprep.subr.bf16.mxu1 %v13482_v40  ;;  %v13572_v39 = vld [vmem:[#allocation5 + $0x79c] ss:$40 sps:$4 sm:$0xff]   ;;  %v13567_v40 = vld [vmem:[#allocation5 + $0x600] ss:$40 sps:$4 sm:$0xff]  }
 0x19a   :  { %3506 = vmatpush1.bf16.msra.mxu0 %v13477_v41  ;;  %v13570_v41 = vld [vmem:[#allocation5 + $0x798] ss:$40 sps:$4 sm:$0xff]  }
 0x19b   :  { %3688 = vmatpush1.bf16.msra.mxu1 %v13480_v42  ;;  %3507 = vmatprep.subr.bf16.mxu0 %v13485_v43  ;;  %v13575_v42 = vld [vmem:[#allocation5 + $0x654] ss:$40 sps:$4 sm:$0xff]  }
 0x19c   :  { %3689 = vmatprep.subr.bf16.mxu1 %v13488_v44  ;;  %v13578_v43 = vld [vmem:[#allocation5 + $0x7ec] ss:$40 sps:$4 sm:$0xff]   ;;  %v13573_v44 = vld [vmem:[#allocation5 + $0x650] ss:$40 sps:$4 sm:$0xff]  }
 0x19e   :  { %3508 = vmatpush1.bf16.msra.mxu0 %v13483_v45  ;;  %v13576_v45 = vld [vmem:[#allocation5 + $0x7e8] ss:$40 sps:$4 sm:$0xff]  }
 0x19f   :  { %3690 = vmatpush1.bf16.msra.mxu1 %v13486_v46  ;;  %3509 = vmatprep.subr.bf16.mxu0 %v13491_v47  ;;  %v13581_v46 = vld [vmem:[#allocation5 + $0x6a4] ss:$40 sps:$4 sm:$0xff]  }
 0x1a0   :  { %3691 = vmatprep.subr.bf16.mxu1 %v13494_v48  ;;  %v13584_v47 = vld [vmem:[#allocation5 + $0x83c] ss:$40 sps:$4 sm:$0xff]   ;;  %v13579_v48 = vld [vmem:[#allocation5 + $0x6a0] ss:$40 sps:$4 sm:$0xff]  }
 0x1a2   :  { %3510 = vmatpush1.bf16.msra.mxu0 %v13489_v49  ;;  %v13582_v49 = vld [vmem:[#allocation5 + $0x838] ss:$40 sps:$4 sm:$0xff]  }
 0x1a3   :  { %3692 = vmatpush1.bf16.msra.mxu1 %v13492_v50  ;;  %3511 = vmatprep.subr.bf16.mxu0 %v13497_v51  ;;  %v13587_v50 = vld [vmem:[#allocation5 + $0x6f4] ss:$40 sps:$4 sm:$0xff]  }
 0x1a4   :  { %3693 = vmatprep.subr.bf16.mxu1 %v13500_v52  ;;  %v13590_v51 = vld [vmem:[#allocation5 + $0x88c] ss:$40 sps:$4 sm:$0xff]   ;;  %v13585_v52 = vld [vmem:[#allocation5 + $0x6f0] ss:$40 sps:$4 sm:$0xff]  }
 0x1a6   :  { %3512 = vmatpush1.bf16.msra.mxu0 %v13495_v53  ;;  %v13588_v53 = vld [vmem:[#allocation5 + $0x888] ss:$40 sps:$4 sm:$0xff]  }
 0x1a7   :  { %3694 = vmatpush1.bf16.msra.mxu1 %v13498_v54  ;;  %3513 = vmatprep.subr.bf16.mxu0 %v13503_v55  ;;  %v13593_v54 = vld [vmem:[#allocation5 + $0x744] ss:$40 sps:$4 sm:$0xff]  }
 0x1a8   :  { %3695 = vmatprep.subr.bf16.mxu1 %v13506_v56  ;;  %v13596_v55 = vld [vmem:[#allocation5 + $0x8dc] ss:$40 sps:$4 sm:$0xff]   ;;  %v13591_v56 = vld [vmem:[#allocation5 + $0x740] ss:$40 sps:$4 sm:$0xff]  }
 0x1aa   :  { %3514 = vmatpush1.bf16.msra.mxu0 %v13501_v57  ;;  %v13594_v57 = vld [vmem:[#allocation5 + $0x8d8] ss:$40 sps:$4 sm:$0xff]  }
 0x1ab   :  { %3696 = vmatpush1.bf16.msra.mxu1 %v13504_v58  ;;  %3515 = vmatprep.subr.bf16.mxu0 %v13509_v59  ;;  %v13599_v58 = vld [vmem:[#allocation5 + $0x794] ss:$40 sps:$4 sm:$0xff]  }
 0x1ac   :  { %3697 = vmatprep.subr.bf16.mxu1 %v13512_v60  ;;  %v13602_v59 = vld [vmem:[#allocation5 + $0x92c] ss:$40 sps:$4 sm:$0xff]   ;;  %v13597_v60 = vld [vmem:[#allocation5 + $0x790] ss:$40 sps:$4 sm:$0xff]  }
 0x1ae   :  { %3516 = vmatpush1.bf16.msra.mxu0 %v13507_v61  ;;  %v13600_v61 = vld [vmem:[#allocation5 + $0x928] ss:$40 sps:$4 sm:$0xff]  }
 0x1af   :  { %3698 = vmatpush1.bf16.msra.mxu1 %v13510_v62  ;;  %3517 = vmatprep.subr.bf16.mxu0 %v13515_v63  ;;  %v13605_v62 = vld [vmem:[#allocation5 + $0x7e4] ss:$40 sps:$4 sm:$0xff]  }
 0x1b0   :  { %3699 = vmatprep.subr.bf16.mxu1 %v13518_v0  ;;  %v13608_v63 = vld [vmem:[#allocation5 + $0x97c] ss:$40 sps:$4 sm:$0xff]   ;;  %v13603_v0 = vld [vmem:[#allocation5 + $0x7e0] ss:$40 sps:$4 sm:$0xff]  }
 0x1b2   :  { %3518 = vmatpush1.bf16.msra.mxu0 %v13513_v1  ;;  %v13606_v1 = vld [vmem:[#allocation5 + $0x978] ss:$40 sps:$4 sm:$0xff]  }
 0x1b3   :  { %3700 = vmatpush1.bf16.msra.mxu1 %v13516_v2  ;;  %3519 = vmatprep.subr.bf16.mxu0 %v13521_v3  ;;  %v13611_v2 = vld [vmem:[#allocation5 + $0x834] ss:$40 sps:$4 sm:$0xff]  }
 0x1b4   :  { %3712 = vmatprep.subr.bf16.mxu1 %v13524_v4  ;;  %v13614_v3 = vld [vmem:[#allocation5 + $0x9cc] ss:$40 sps:$4 sm:$0xff]   ;;  %v13609_v4 = vld [vmem:[#allocation5 + $0x830] ss:$40 sps:$4 sm:$0xff]  }
 0x1b6   :  { %3702 = vmatmul.mubr.bf16.vlgmr.msra.gmra.mrb[4].mxu1 %v15150_v11  ;;  %3520 = vmatpush1.bf16.msra.mxu0 %v13519_v5  ;;  %v13612_v5 = vld [vmem:[#allocation5 + $0x9c8] ss:$40 sps:$4 sm:$0xff]  }
 0x1b7   :  { %3713 = vmatpush1.bf16.msra.mxu1 %v13522_v6  ;;  %3521 = vmatprep.subr.bf16.mxu0 %v13527_v7  ;;  %v13617_v6 = vld [vmem:[#allocation5 + $0x884] ss:$40 sps:$4 sm:$0xff]  }
 0x1b8   :  { %3714 = vmatprep.subr.bf16.mxu1 %v13530_v8  ;;  %3744 = vmatprep.mubr.bf16.mxu1 %v15151_v17  ;;  %v13620_v7 = vld [vmem:[#allocation5 + $0xa1c] ss:$40 sps:$4 sm:$0xff]   ;;  %v13615_v8 = vld [vmem:[#allocation5 + $0x880] ss:$40 sps:$4 sm:$0xff]  }
 0x1ba   :  { %3522 = vmatpush1.bf16.msra.mxu0 %v13525_v9  ;;  %v13618_v9 = vld [vmem:[#allocation5 + $0xa18] ss:$40 sps:$4 sm:$0xff]  }
 0x1bb   :  { %3715 = vmatpush1.bf16.msra.mxu1 %v13528_v10  ;;  %3523 = vmatprep.subr.bf16.mxu0 %v13533_v12  ;;  %v13623_v10 = vld [vmem:[#allocation5 + $0x8d4] ss:$40 sps:$4 sm:$0xff]   ;;  %v13621_v12 = vld [vmem:[#allocation5 + $0x8d0] ss:$40 sps:$4 sm:$0xff]  }
 0x1bc   :  { %3716 = vmatprep.subr.bf16.mxu1 %v13536_v13  ;;  %v13624_v13 = vld [vmem:[#allocation5 + $0xa68] ss:$40 sps:$4 sm:$0xff]  }
 0x1be   :  { %3524 = vmatpush1.bf16.msra.mxu0 %v13531_v15  ;;  %v15152_v15 = vld [vmem:[#allocation2 + $0x8] ss:$28 sps:$4 sm:$0xff]  }
 0x1bf   :  { %3717 = vmatpush1.bf16.msra.mxu1 %v13534_v16  ;;  %3525 = vmatprep.subr.bf16.mxu0 %v13539_v18  ;;  %v13629_v16 = vld [vmem:[#allocation5 + $0x924] ss:$40 sps:$4 sm:$0xff]   ;;  %v13627_v18 = vld [vmem:[#allocation5 + $0x920] ss:$40 sps:$4 sm:$0xff]  }
 0x1c0   :  { %3718 = vmatprep.subr.bf16.mxu1 %v13542_v19  ;;  %v13630_v19 = vld [vmem:[#allocation5 + $0xab8] ss:$40 sps:$4 sm:$0xff]  }
 0x1c2   :  { %3526 = vmatpush1.bf16.msra.mxu0 %v13537_v20  ;;  %v15153_v20 = vld [vmem:[#allocation2 + $0x14] ss:$28 sps:$4 sm:$0xff]  }
 0x1c3   :  { %3719 = vmatpush1.bf16.msra.mxu1 %v13540_v21  ;;  %3527 = vmatprep.subr.bf16.mxu0 %v13545_v22  ;;  %v13635_v21 = vld [vmem:[#allocation5 + $0x974] ss:$40 sps:$4 sm:$0xff]  }
 0x1c4   :  { %3720 = vmatprep.subr.bf16.mxu1 %v13548_v23  ;;  %v13638_v22 = vld [vmem:[#allocation5 + $0xb0c] ss:$40 sps:$4 sm:$0xff]   ;;  %v13633_v23 = vld [vmem:[#allocation5 + $0x970] ss:$40 sps:$4 sm:$0xff]  }
 0x1c6   :  { %3528 = vmatpush1.bf16.msra.mxu0 %v13543_v24  ;;  %v13636_v24 = vld [vmem:[#allocation5 + $0xb08] ss:$40 sps:$4 sm:$0xff]  }
 0x1c7   :  { %3721 = vmatpush1.bf16.msra.mxu1 %v13546_v25  ;;  %3540 = vmatprep.subr.bf16.mxu0 %v13551_v26  ;;  %v13641_v25 = vld [vmem:[#allocation5 + $0x9c4] ss:$40 sps:$4 sm:$0xff]  }
 0x1c8   :  { %3722 = vmatprep.subr.bf16.mxu1 %v13554_v27  ;;  %v13644_v26 = vld [vmem:[#allocation5 + $0xb5c] ss:$40 sps:$4 sm:$0xff]   ;;  %v13639_v27 = vld [vmem:[#allocation5 + $0x9c0] ss:$40 sps:$4 sm:$0xff]  }
 0x1c9   :  { %3530 = vmatmul.mubr.bf16.vlgmr.msra.gmra.mrb[8].mxu0 %v15150_v11  ;;  %v13626_v11 = vld [vmem:[#allocation5 + $0xa6c] ss:$40 sps:$4 sm:$0xff]  }
 0x1ca   :  { %3541 = vmatpush1.bf16.msra.mxu0 %v13549_v28  ;;  %3572 = vmatprep.mubr.bf16.mxu0 %v15151_v17  ;;  %v13632_v17 = vld [vmem:[#allocation5 + $0xabc] ss:$40 sps:$4 sm:$0xff]   ;;  %v13642_v28 = vld [vmem:[#allocation5 + $0xb58] ss:$40 sps:$4 sm:$0xff]  }
 0x1cb   :  { %3723 = vmatpush1.bf16.msra.mxu1 %v13552_v29  ;;  %3542 = vmatprep.subr.bf16.mxu0 %v13557_v30  ;;  %v13647_v29 = vld [vmem:[#allocation5 + $0xa14] ss:$40 sps:$4 sm:$0xff]  }
 0x1cc   :  { %3724 = vmatprep.subr.bf16.mxu1 %v13560_v31  ;;  %v13650_v30 = vld [vmem:[#allocation5 + $0xbac] ss:$40 sps:$4 sm:$0xff]   ;;  %v13645_v31 = vld [vmem:[#allocation5 + $0xa10] ss:$40 sps:$4 sm:$0xff]  }
 0x1ce   :  { %3543 = vmatpush1.bf16.msra.mxu0 %v13555_v32  ;;  %v13648_v32 = vld [vmem:[#allocation5 + $0xba8] ss:$40 sps:$4 sm:$0xff]  }
 0x1cf   :  { %3725 = vmatpush1.bf16.msra.mxu1 %v13558_v33  ;;  %3544 = vmatprep.subr.bf16.mxu0 %v13563_v34  ;;  %v13653_v33 = vld [vmem:[#allocation5 + $0xa64] ss:$40 sps:$4 sm:$0xff]  }
 0x1d0   :  { %3726 = vmatprep.subr.bf16.mxu1 %v13566_v35  ;;  %v13656_v34 = vld [vmem:[#allocation5 + $0xbfc] ss:$40 sps:$4 sm:$0xff]   ;;  %v13651_v35 = vld [vmem:[#allocation5 + $0xa60] ss:$40 sps:$4 sm:$0xff]  }
 0x1d2   :  { %3545 = vmatpush1.bf16.msra.mxu0 %v13561_v36  ;;  %v13654_v36 = vld [vmem:[#allocation5 + $0xbf8] ss:$40 sps:$4 sm:$0xff]  }
 0x1d3   :  { %3727 = vmatpush1.bf16.msra.mxu1 %v13564_v37  ;;  %3546 = vmatprep.subr.bf16.mxu0 %v13569_v38  ;;  %v13659_v37 = vld [vmem:[#allocation5 + $0xab4] ss:$40 sps:$4 sm:$0xff]  }
 0x1d4   :  { %3728 = vmatprep.subr.bf16.mxu1 %v13572_v39  ;;  %v13662_v38 = vld [vmem:[#allocation5 + $0xc4c] ss:$40 sps:$4 sm:$0xff]   ;;  %v13657_v39 = vld [vmem:[#allocation5 + $0xab0] ss:$40 sps:$4 sm:$0xff]  }
 0x1d6   :  { %3547 = vmatpush1.bf16.msra.mxu0 %v13567_v40  ;;  %v13660_v40 = vld [vmem:[#allocation5 + $0xc48] ss:$40 sps:$4 sm:$0xff]  }
 0x1d7   :  { %3729 = vmatpush1.bf16.msra.mxu1 %v13570_v41  ;;  %3548 = vmatprep.subr.bf16.mxu0 %v13575_v42  ;;  %v13665_v41 = vld [vmem:[#allocation5 + $0xb04] ss:$40 sps:$4 sm:$0xff]  }
 0x1d8   :  { %3730 = vmatprep.subr.bf16.mxu1 %v13578_v43  ;;  %v13668_v42 = vld [vmem:[#allocation5 + $0xc9c] ss:$40 sps:$4 sm:$0xff]   ;;  %v13663_v43 = vld [vmem:[#allocation5 + $0xb00] ss:$40 sps:$4 sm:$0xff]  }
 0x1da   :  { %3549 = vmatpush1.bf16.msra.mxu0 %v13573_v44  ;;  %v13666_v44 = vld [vmem:[#allocation5 + $0xc98] ss:$40 sps:$4 sm:$0xff]  }
 0x1db   :  { %3731 = vmatpush1.bf16.msra.mxu1 %v13576_v45  ;;  %3550 = vmatprep.subr.bf16.mxu0 %v13581_v46  ;;  %v13671_v45 = vld [vmem:[#allocation5 + $0xb54] ss:$40 sps:$4 sm:$0xff]  }
 0x1dc   :  { %3732 = vmatprep.subr.bf16.mxu1 %v13584_v47  ;;  %v13674_v46 = vld [vmem:[#allocation5 + $0xcec] ss:$40 sps:$4 sm:$0xff]   ;;  %v13669_v47 = vld [vmem:[#allocation5 + $0xb50] ss:$40 sps:$4 sm:$0xff]  }
 0x1de   :  { %3551 = vmatpush1.bf16.msra.mxu0 %v13579_v48  ;;  %v13672_v48 = vld [vmem:[#allocation5 + $0xce8] ss:$40 sps:$4 sm:$0xff]  }
 0x1df   :  { %3733 = vmatpush1.bf16.msra.mxu1 %v13582_v49  ;;  %3552 = vmatprep.subr.bf16.mxu0 %v13587_v50  ;;  %v13677_v49 = vld [vmem:[#allocation5 + $0xba4] ss:$40 sps:$4 sm:$0xff]  }
 0x1e0   :  { %3734 = vmatprep.subr.bf16.mxu1 %v13590_v51  ;;  %v13680_v50 = vld [vmem:[#allocation5 + $0xd3c] ss:$40 sps:$4 sm:$0xff]   ;;  %v13675_v51 = vld [vmem:[#allocation5 + $0xba0] ss:$40 sps:$4 sm:$0xff]  }
 0x1e2   :  { %3553 = vmatpush1.bf16.msra.mxu0 %v13585_v52  ;;  %v13678_v52 = vld [vmem:[#allocation5 + $0xd38] ss:$40 sps:$4 sm:$0xff]  }
 0x1e3   :  { %3735 = vmatpush1.bf16.msra.mxu1 %v13588_v53  ;;  %3554 = vmatprep.subr.bf16.mxu0 %v13593_v54  ;;  %v13683_v53 = vld [vmem:[#allocation5 + $0xbf4] ss:$40 sps:$4 sm:$0xff]  }
 0x1e4   :  { %3736 = vmatprep.subr.bf16.mxu1 %v13596_v55  ;;  %v13686_v54 = vld [vmem:[#allocation5 + $0xd8c] ss:$40 sps:$4 sm:$0xff]   ;;  %v13681_v55 = vld [vmem:[#allocation5 + $0xbf0] ss:$40 sps:$4 sm:$0xff]  }
 0x1e6   :  { %3555 = vmatpush1.bf16.msra.mxu0 %v13591_v56  ;;  %v13684_v56 = vld [vmem:[#allocation5 + $0xd88] ss:$40 sps:$4 sm:$0xff]  }
 0x1e7   :  { %3737 = vmatpush1.bf16.msra.mxu1 %v13594_v57  ;;  %3556 = vmatprep.subr.bf16.mxu0 %v13599_v58  ;;  %v13689_v57 = vld [vmem:[#allocation5 + $0xc44] ss:$40 sps:$4 sm:$0xff]  }
 0x1e8   :  { %3738 = vmatprep.subr.bf16.mxu1 %v13602_v59  ;;  %v13692_v58 = vld [vmem:[#allocation5 + $0xddc] ss:$40 sps:$4 sm:$0xff]   ;;  %v13687_v59 = vld [vmem:[#allocation5 + $0xc40] ss:$40 sps:$4 sm:$0xff]  }
 0x1ea   :  { %3557 = vmatpush1.bf16.msra.mxu0 %v13597_v60  ;;  %v13690_v60 = vld [vmem:[#allocation5 + $0xdd8] ss:$40 sps:$4 sm:$0xff]  }
 0x1eb   :  { %3739 = vmatpush1.bf16.msra.mxu1 %v13600_v61  ;;  %3558 = vmatprep.subr.bf16.mxu0 %v13605_v62  ;;  %v13695_v61 = vld [vmem:[#allocation5 + $0xc94] ss:$40 sps:$4 sm:$0xff]  }
 0x1ec   :  { %3740 = vmatprep.subr.bf16.mxu1 %v13608_v63  ;;  %v13698_v62 = vld [vmem:[#allocation5 + $0xe2c] ss:$40 sps:$4 sm:$0xff]   ;;  %v13693_v63 = vld [vmem:[#allocation5 + $0xc90] ss:$40 sps:$4 sm:$0xff]  }
 0x1ee   :  { %3559 = vmatpush1.bf16.msra.mxu0 %v13603_v0  ;;  %v13696_v0 = vld [vmem:[#allocation5 + $0xe28] ss:$40 sps:$4 sm:$0xff]  }
 0x1ef   :  { %3741 = vmatpush1.bf16.msra.mxu1 %v13606_v1  ;;  %3560 = vmatprep.subr.bf16.mxu0 %v13611_v2  ;;  %v13701_v1 = vld [vmem:[#allocation5 + $0xce4] ss:$40 sps:$4 sm:$0xff]  }
 0x1f0   :  { %3742 = vmatprep.subr.bf16.mxu1 %v13614_v3  ;;  %v13704_v2 = vld [vmem:[#allocation5 + $0xe7c] ss:$40 sps:$4 sm:$0xff]   ;;  %v13699_v3 = vld [vmem:[#allocation5 + $0xce0] ss:$40 sps:$4 sm:$0xff]  }
 0x1f2   :  { %3561 = vmatpush1.bf16.msra.mxu0 %v13609_v4  ;;  %v13702_v4 = vld [vmem:[#allocation5 + $0xe78] ss:$40 sps:$4 sm:$0xff]  }
 0x1f3   :  { %3743 = vmatpush1.bf16.msra.mxu1 %v13612_v5  ;;  %3562 = vmatprep.subr.bf16.mxu0 %v13617_v6  ;;  %v13707_v5 = vld [vmem:[#allocation5 + $0xd34] ss:$40 sps:$4 sm:$0xff]  }
 0x1f4   :  { %3755 = vmatprep.subr.bf16.mxu1 %v13620_v7  ;;  %v13710_v6 = vld [vmem:[#allocation5 + $0xecc] ss:$40 sps:$4 sm:$0xff]   ;;  %v13705_v7 = vld [vmem:[#allocation5 + $0xd30] ss:$40 sps:$4 sm:$0xff]  }
 0x1f6   :  { %3745 = vmatmul.mubr.bf16.vlgmr.msra.gmra.mrb[4].mxu1 %v15152_v15  ;;  %3563 = vmatpush1.bf16.msra.mxu0 %v13615_v8  ;;  %v13708_v8 = vld [vmem:[#allocation5 + $0xec8] ss:$40 sps:$4 sm:$0xff]  }
 0x1f7   :  { %3756 = vmatpush1.bf16.msra.mxu1 %v13618_v9  ;;  %3564 = vmatprep.subr.bf16.mxu0 %v13623_v10  ;;  %v13713_v9 = vld [vmem:[#allocation5 + $0xd84] ss:$40 sps:$4 sm:$0xff]  }
 0x1f8   :  { %3757 = vmatprep.subr.bf16.mxu1 %v13626_v11  ;;  %3787 = vmatprep.mubr.bf16.mxu1 %v15153_v20  ;;  %v13722_v10 = vld [vmem:[#allocation5 + $0xf1c] ss:$40 sps:$4 sm:$0xff]   ;;  %v13711_v11 = vld [vmem:[#allocation5 + $0xd80] ss:$40 sps:$4 sm:$0xff]  }
 0x1fa   :  { %3565 = vmatpush1.bf16.msra.mxu0 %v13621_v12  ;;  %v13716_v12 = vld [vmem:[#allocation5 + $0xdd4] ss:$40 sps:$4 sm:$0xff]  }
 0x1fb   :  { %3758 = vmatpush1.bf16.msra.mxu1 %v13624_v13  ;;  %3566 = vmatprep.subr.bf16.mxu0 %v13629_v16  ;;  %v13720_v13 = vld [vmem:[#allocation5 + $0xf18] ss:$40 sps:$4 sm:$0xff]  }
 0x1fc   :  { %3759 = vmatprep.subr.bf16.mxu1 %v13632_v17  ;;  %v13714_v16 = vld [vmem:[#allocation5 + $0xdd0] ss:$40 sps:$4 sm:$0xff]   ;;  %v13719_v17 = vld [vmem:[#allocation5 + $0xe24] ss:$40 sps:$4 sm:$0xff]  }
 0x1fe   :  { %3567 = vmatpush1.bf16.msra.mxu0 %v13627_v18  ;;  %v13717_v18 = vld [vmem:[#allocation5 + $0xe20] ss:$40 sps:$4 sm:$0xff]  }
 0x1ff   :  { %3760 = vmatpush1.bf16.msra.mxu1 %v13630_v19  ;;  %3568 = vmatprep.subr.bf16.mxu0 %v13635_v21  ;;  %v13725_v19 = vld [vmem:[#allocation5 + $0xe74] ss:$40 sps:$4 sm:$0xff]   ;;  %v13728_v21 = vld [vmem:[#allocation5 + $0xec4] ss:$40 sps:$4 sm:$0xff]  }
 0x200   :  { %3761 = vmatprep.subr.bf16.mxu1 %v13638_v22  ;;  %v15155_v22 = vld [vmem:[#allocation2 + $0x18] ss:$28 sps:$4 sm:$0xff]  }
 0x202   :  { %3569 = vmatpush1.bf16.msra.mxu0 %v13633_v23  ;;  %v13726_v23 = vld [vmem:[#allocation5 + $0xec0] ss:$40 sps:$4 sm:$0xff]  }
 0x203   :  { %3762 = vmatpush1.bf16.msra.mxu1 %v13636_v24  ;;  %3570 = vmatprep.subr.bf16.mxu0 %v13641_v25  ;;  %v13731_v24 = vld [vmem:[#allocation5 + $0xf14] ss:$40 sps:$4 sm:$0xff]   ;;  %v13729_v25 = vld [vmem:[#allocation5 + $0xf10] ss:$40 sps:$4 sm:$0xff]  }
 0x204   :  { %3763 = vmatprep.subr.bf16.mxu1 %v13644_v26  ;;  %v13734_v26 = vld [vmem:[#allocation5 + $0x24] ss:$40 sps:$4 sm:$0xff]  }
 0x206   :  { %3571 = vmatpush1.bf16.msra.mxu0 %v13639_v27 }
 0x207   :  { %3764 = vmatpush1.bf16.msra.mxu1 %v13642_v28  ;;  %3583 = vmatprep.subr.bf16.mxu0 %v13647_v29 }
 0x208   :  { %3765 = vmatprep.subr.bf16.mxu1 %v13650_v30 }
 0x209   :  { %3573 = vmatmul.mubr.bf16.vlgmr.msra.gmra.mrb[8].mxu0 %v15152_v15  ;;  %v15154_v15 = vld [vmem:[#allocation2 + $0x10] ss:$28 sps:$4 sm:$0xff]  }
 0x20a   :  { %3584 = vmatpush1.bf16.msra.mxu0 %v13645_v31  ;;  %3615 = vmatprep.mubr.bf16.mxu0 %v15153_v20  ;;  %v13723_v20 = vld [vmem:[#allocation5 + $0xe70] ss:$40 sps:$4 sm:$0xff]   ;;  %v13732_v31 = vld [vmem:[#allocation5 + $0x20] ss:$40 sps:$4 sm:$0xff]  }
 0x20b   :  { %3766 = vmatpush1.bf16.msra.mxu1 %v13648_v32  ;;  %3585 = vmatprep.subr.bf16.mxu0 %v13653_v33  ;;  %v13737_v32 = vld [vmem:[#allocation5 + $0x74] ss:$40 sps:$4 sm:$0xff]  }
 0x20c   :  { %3767 = vmatprep.subr.bf16.mxu1 %v13656_v34 }
 0x20e   :  { %3586 = vmatpush1.bf16.msra.mxu0 %v13651_v35 }
 0x20f   :  { %3768 = vmatpush1.bf16.msra.mxu1 %v13654_v36  ;;  %3587 = vmatprep.subr.bf16.mxu0 %v13659_v37  ;;  %v13735_v36 = vld [vmem:[#allocation5 + $0x70] ss:$40 sps:$4 sm:$0xff]   ;;  %v13740_v37 = vld [vmem:[#allocation5 + $0xc4] ss:$40 sps:$4 sm:$0xff]  }
 0x210   :  { %3769 = vmatprep.subr.bf16.mxu1 %v13662_v38  ;;  %v15156_v38 = vld [vmem:[#allocation2 + $0x4] ss:$28 sps:$4 sm:$0xff]  }
 0x212   :  { %3588 = vmatpush1.bf16.msra.mxu0 %v13657_v39 }
 0x213   :  { %3770 = vmatpush1.bf16.msra.mxu1 %v13660_v40  ;;  %3589 = vmatprep.subr.bf16.mxu0 %v13665_v41 }
 0x214   :  { %3771 = vmatprep.subr.bf16.mxu1 %v13668_v42 }
 0x216   :  { %3590 = vmatpush1.bf16.msra.mxu0 %v13663_v43 }
 0x217   :  { %3772 = vmatpush1.bf16.msra.mxu1 %v13666_v44  ;;  %3591 = vmatprep.subr.bf16.mxu0 %v13671_v45  ;;  %v13738_v44 = vld [vmem:[#allocation5 + $0xc0] ss:$40 sps:$4 sm:$0xff]   ;;  %v13743_v45 = vld [vmem:[#allocation5 + $0x114] ss:$40 sps:$4 sm:$0xff]  }
 0x218   :  { %3773 = vmatprep.subr.bf16.mxu1 %v13674_v46 }
 0x21a   :  { %3592 = vmatpush1.bf16.msra.mxu0 %v13669_v47 }
 0x21b   :  { %3774 = vmatpush1.bf16.msra.mxu1 %v13672_v48  ;;  %3593 = vmatprep.subr.bf16.mxu0 %v13677_v49 }
 0x21c   :  { %3775 = vmatprep.subr.bf16.mxu1 %v13680_v50 }
 0x21e   :  { %3594 = vmatpush1.bf16.msra.mxu0 %v13675_v51 }
 0x21f   :  { %3776 = vmatpush1.bf16.msra.mxu1 %v13678_v52  ;;  %3595 = vmatprep.subr.bf16.mxu0 %v13683_v53 }
 0x220   :  { %3777 = vmatprep.subr.bf16.mxu1 %v13686_v54 }
 0x222   :  { %3596 = vmatpush1.bf16.msra.mxu0 %v13681_v55  ;;  %v13741_v55 = vld [vmem:[#allocation5 + $0x110] ss:$40 sps:$4 sm:$0xff]  }
 0x223   :  { %3778 = vmatpush1.bf16.msra.mxu1 %v13684_v56  ;;  %3597 = vmatprep.subr.bf16.mxu0 %v13689_v57  ;;  %v13746_v56 = vld [vmem:[#allocation5 + $0x164] ss:$40 sps:$4 sm:$0xff]  }
 0x224   :  { %3779 = vmatprep.subr.bf16.mxu1 %v13692_v58 }
 0x226   :  { %3598 = vmatpush1.bf16.msra.mxu0 %v13687_v59 }
 0x227   :  { %3780 = vmatpush1.bf16.msra.mxu1 %v13690_v60  ;;  %3599 = vmatprep.subr.bf16.mxu0 %v13695_v61 }
 0x228   :  { %3781 = vmatprep.subr.bf16.mxu1 %v13698_v62 }
 0x22a   :  { %3600 = vmatpush1.bf16.msra.mxu0 %v13693_v63 }
 0x22b   :  { %3782 = vmatpush1.bf16.msra.mxu1 %v13696_v0  ;;  %3601 = vmatprep.subr.bf16.mxu0 %v13701_v1 }
 0x22c   :  { %3783 = vmatprep.subr.bf16.mxu1 %v13704_v2  ;;  %v13744_v2 = vld [vmem:[#allocation5 + $0x160] ss:$40 sps:$4 sm:$0xff]  }
 0x22e   :  { %3602 = vmatpush1.bf16.msra.mxu0 %v13699_v3  ;;  %v13749_v3 = vld [vmem:[#allocation5 + $0x1b4] ss:$40 sps:$4 sm:$0xff]  }
 0x22f   :  { %3784 = vmatpush1.bf16.msra.mxu1 %v13702_v4  ;;  %3603 = vmatprep.subr.bf16.mxu0 %v13707_v5 }
 0x230   :  { %3785 = vmatprep.subr.bf16.mxu1 %v13710_v6 }
 0x232   :  { %3604 = vmatpush1.bf16.msra.mxu0 %v13705_v7 }
 0x233   :  { %3786 = vmatpush1.bf16.msra.mxu1 %v13708_v8  ;;  %3605 = vmatprep.subr.bf16.mxu0 %v13713_v9 }
 0x234   :  { %3798 = vmatprep.subr.bf16.mxu1 %v13722_v10 }
 0x236   :  { %3788 = vmatmul.mubr.bf16.vlgmr.msra.gmra.mrb[4].mxu1 %v15154_v15  ;;  %3606 = vmatpush1.bf16.msra.mxu0 %v13711_v11 }
 0x237   :  { %3799 = vmatpush1.bf16.msra.mxu1 %v13720_v13  ;;  %3607 = vmatprep.subr.bf16.mxu0 %v13716_v12  ;;  %v13747_v12 = vld [vmem:[#allocation5 + $0x1b0] ss:$40 sps:$4 sm:$0xff]   ;;  %v13752_v13 = vld [vmem:[#allocation5 + $0x204] ss:$40 sps:$4 sm:$0xff]  }
 0x238   :  { %3830 = vmatprep.mubr.bf16.mxu1 %v15433_v14 }
 0x23a   :  { %3608 = vmatpush1.bf16.msra.mxu0 %v13714_v16 }
 0x23b   :  { %3609 = vmatprep.subr.bf16.mxu0 %v13719_v17 }
 0x23e   :  { %3610 = vmatpush1.bf16.msra.mxu0 %v13717_v18 }
 0x23f   :  { %3611 = vmatprep.subr.bf16.mxu0 %v13725_v19 }
 0x242   :  { %12033 = vmatmul.mubr.msk.bf16.vlgmr.msra.gmra.mrb[4].mxu1 %vm3149_vm0, %v15155_v22  ;;  %3612 = vmatpush1.bf16.msra.mxu0 %v13723_v20 }
 0x243   :  { %3613 = vmatprep.subr.bf16.mxu0 %v13728_v21 }
 0x246   :  { %3614 = vmatpush1.bf16.msra.mxu0 %v13726_v23 }
 0x247   :  { %3626 = vmatprep.subr.bf16.mxu0 %v13731_v24 }
 0x249   :  { %v3445_v27 = vpop.f32.mrb[0].mxu1  ;;  %3616 = vmatmul.mubr.bf16.vlgmr.msra.gmra.mrb[8].mxu0 %v15154_v15 }
 0x24a   :  { %v3447_v28 = vpop.f32.mrb[1].mxu1  ;;  %3627 = vmatpush1.bf16.msra.mxu0 %v13729_v25  ;;  %3658 = vmatprep.mubr.bf16.mxu0 %v15433_v14 }
 0x24b   :  { %v3449_v29 = vpop.f32.mrb[2].mxu1  ;;  %3841 = vmatprep.subr.bf16.mxu0 %v13734_v26 }
 0x24c   :  { %v3451_v30 = vpop.f32.mrb[3].mxu1 }
 0x254   :  { %v3316_v33 = vpop.f32.mrb[0].mxu0 }
 0x255   :  { %12032 = vmatmul.mubr.msk.bf16.vlgmr.msra.gmra.mrb[8].mxu0 %vm3149_vm0, %v15155_v22  ;;  %v3318_v34 = vpop.f32.mrb[1].mxu0 }
 0x256   :  { %3842 = vmatpush1.bf16.msra.mxu0 %v13732_v31  ;;  %v3320_v35 = vpop.f32.mrb[2].mxu0  ;;  %3873 = vmatprep.mubr.bf16.mxu0 %v15156_v38  ;;  %v13758_v38 = vld [vmem:[#allocation5 + $0x2a4] ss:$40 sps:$4 sm:$0xff]  }
 0x257   :  { %v4017_v39 = vadd.f32 %v3320_v35, %v3316_v33  ;;  %v3322_v40 = vpop.f32.mrb[3].mxu0  ;;  %3843 = vmatprep.subr.bf16.mxu0 %v13737_v32 }
 0x258   :  { %v4024_v41 = vadd.f32 %v3322_v40, %v3318_v34 }
 0x259   :  { %v4018_v42 = vrot.slane %v4017_v39, 4 }
 0x25a   :  { %v4025_v43 = vrot.slane %v4024_v41, 4  ;;  %3844 = vmatpush1.bf16.msra.mxu0 %v13735_v36 }
 0x25b   :  { %v4019_v46 = vadd.f32 %v4018_v42, %v4017_v39  ;;  %3845 = vmatprep.subr.bf16.mxu0 %v13740_v37  ;;  %v13753_v37 = vld [vmem:[#allocation5 + $0x250] ss:$40 sps:$4 sm:$0xff]  }
 0x25c   :  { %v4026_v47 = vadd.f32 %v4025_v43, %v4024_v41  ;;  %v3488_v48 = vpop.f32.mrb[4].mxu0 }
 0x25d   :  { %v4020_v49 = vrot.slane %v4019_v46, 2  ;;  %v15638_v50 = vadd.f32 %v3488_v48, %v3445_v27  ;;  %v3490_v51 = vpop.f32.mrb[5].mxu0  ;;  %v13750_v27 = vld [vmem:[#allocation5 + $0x200] ss:$40 sps:$4 sm:$0xff]  }
 0x25e   :  { %v4027_v52 = vrot.slane %v4026_v47, 2  ;;  %3846 = vmatpush1.bf16.msra.mxu0 %v13738_v44  ;;  %v15640_v53 = vadd.f32 %v3490_v51, %v3447_v28  ;;  %v3492_v54 = vpop.f32.mrb[6].mxu0  ;;  %v13755_v28 = vld [vmem:[#allocation5 + $0x254] ss:$40 sps:$4 sm:$0xff]  }
 0x25f   :  { %v4021_v57 = vadd.f32 %v4020_v49, %v4019_v46  ;;  %v12977_v58 = vadd.f32 %v3492_v54, %v3449_v29  ;;  %v3494_v59 = vpop.f32.mrb[7].mxu0  ;;  %3847 = vmatprep.subr.bf16.mxu0 %v13743_v45  ;;  %v13756_v49 = vld [vmem:[#allocation5 + $0x2a0] ss:$40 sps:$4 sm:$0xff]   ;;  %v13761_v51 = vld [vmem:[#allocation5 + $0x2f4] ss:$40 sps:$4 sm:$0xff]  }
 0x260   :  { %v4028_v60 = vadd.f32 %v4027_v52, %v4026_v47  ;;  %v12978_v61 = vadd.f32 %v3494_v59, %v3451_v30 }
 0x261   :  { %v4022_v62 = vrot.slane %v4021_v57, 1  ;;  %v4031_v63 = vadd.f32 %v12977_v58, %v15638_v50 }
 0x262   :  { %v4029_v0 = vrot.slane %v4028_v60, 1  ;;  %v4038_v1 = vadd.f32 %v12978_v61, %v15640_v53  ;;  %3848 = vmatpush1.bf16.msra.mxu0 %v13741_v55 }
 0x263   :  { %v4023_v4 = vadd.f32 %v4022_v62, %v4021_v57  ;;  %v4032_v5 = vrot.slane %v4031_v63, 4  ;;  %3849 = vmatprep.subr.bf16.mxu0 %v13746_v56  ;;  %v13764_v62 = vld [vmem:[#allocation5 + $0x344] ss:$40 sps:$4 sm:$0xff]  }
 0x264   :  { %v4030_v6 = vadd.f32 %v4029_v0, %v4028_v60  ;;  %v4039_v7 = vrot.slane %v4038_v1, 4 }
 0x265   :  { %v4091_v8 = vmul.f32 0.0625, %v4023_v4  ;;  %v4033_v9 = vadd.f32 %v4032_v5, %v4031_v63 }
 0x266   :  { %v4092_v10 = vmul.f32 0.0625, %v4030_v6  ;;  %v4040_v11 = vadd.f32 %v4039_v7, %v4038_v1  ;;  %3850 = vmatpush1.bf16.msra.mxu0 %v13744_v2  ;;  %v13762_v7 = vld [vmem:[#allocation5 + $0x340] ss:$40 sps:$4 sm:$0xff]  }
 0x267   :  { %v15644_v15 = vsub.f32 %v3316_v33, %v4091_v8  ;;  %v15646_v16 = vsub.f32 %v3320_v35, %v4091_v8  ;;  %v4034_v17 = vrot.slane %v4033_v9, 2  ;;  %3851 = vmatprep.subr.bf16.mxu0 %v13749_v3  ;;  %v13767_v8 = vld [vmem:[#allocation5 + $0x394] ss:$40 sps:$4 sm:$0xff]  }
 0x268   :  { %v15648_v18 = vsub.f32 %v3318_v34, %v4092_v10  ;;  %v15650_v19 = vsub.f32 %v3322_v40, %v4092_v10  ;;  %v4041_v20 = vrot.slane %v4040_v11, 2 }
 0x269   :  { %v4121_v21 = vmul.f32 %v15644_v15, %v15644_v15  ;;  %v4131_v22 = vmul.f32 %v15646_v16, %v15646_v16  ;;  %v4035_v23 = vadd.f32 %v4034_v17, %v4033_v9 }
 0x26a   :  { %v4122_v24 = vmul.f32 %v15648_v18, %v15648_v18  ;;  %v4132_v25 = vmul.f32 %v15650_v19, %v15650_v19  ;;  %v4042_v26 = vadd.f32 %v4041_v20, %v4040_v11  ;;  %3852 = vmatpush1.bf16.msra.mxu0 %v13747_v12  ;;  %v13765_v20 = vld [vmem:[#allocation5 + $0x390] ss:$40 sps:$4 sm:$0xff]  }
 0x26b   :  { %v4141_v29 = vadd.f32 %v4131_v22, %v4121_v21  ;;  %v4036_v30 = vrot.slane %v4035_v23, 1  ;;  %3853 = vmatprep.subr.bf16.mxu0 %v13752_v13  ;;  %v13770_v21 = vld [vmem:[#allocation5 + $0x3e4] ss:$40 sps:$4 sm:$0xff]  }
 0x26c   :  { %v4148_v31 = vadd.f32 %v4132_v25, %v4122_v24  ;;  %v4043_v32 = vrot.slane %v4042_v26, 1 }
 0x26d   :  { %v4142_v33 = vrot.slane %v4141_v29, 4  ;;  %v4037_v34 = vadd.f32 %v4036_v30, %v4035_v23 }
 0x26e   :  { %v4149_v35 = vrot.slane %v4148_v31, 4  ;;  %v4044_v36 = vadd.f32 %v4043_v32, %v4042_v26  ;;  %3854 = vmatpush1.bf16.msra.mxu0 %v13750_v27  ;;  %v13768_v26 = vld [vmem:[#allocation5 + $0x3e0] ss:$40 sps:$4 sm:$0xff]   ;;  %v13773_v27 = vld [vmem:[#allocation5 + $0x434] ss:$40 sps:$4 sm:$0xff]  }
 0x26f   :  { %v4143_v39 = vadd.f32 %v4142_v33, %v4141_v29  ;;  %v4093_v40 = vmul.f32 0.0625, %v4037_v34  ;;  %3855 = vmatprep.subr.bf16.mxu0 %v13755_v28  ;;  %v13771_v32 = vld [vmem:[#allocation5 + $0x430] ss:$40 sps:$4 sm:$0xff]   ;;  %v13776_v33 = vld [vmem:[#allocation5 + $0x484] ss:$40 sps:$4 sm:$0xff]  }
 0x270   :  { %v4150_v41 = vadd.f32 %v4149_v35, %v4148_v31  ;;  %v4094_v42 = vmul.f32 0.0625, %v4044_v36 }
 0x271   :  { %v4144_v43 = vrot.slane %v4143_v39, 2  ;;  %v15661_v44 = vsub.f32 %v15638_v50, %v4093_v40  ;;  %v15663_v45 = vsub.f32 %v12977_v58, %v4093_v40  ;;  %v13774_v40 = vld [vmem:[#allocation5 + $0x480] ss:$40 sps:$4 sm:$0xff]  }
 0x272   :  { %v4151_v46 = vrot.slane %v4150_v41, 2  ;;  %v15666_v47 = vsub.f32 %v15640_v53, %v4094_v42  ;;  %v15668_v48 = vsub.f32 %v12978_v61, %v4094_v42  ;;  %3856 = vmatpush1.bf16.msra.mxu0 %v13753_v37  ;;  %v13759_v61 = vld [vmem:[#allocation5 + $0x2f0] ss:$40 sps:$4 sm:$0xff]   ;;  %v15434_v37 = vmov 1966171168  }
 0x273   :  { %v4145_v52 = vadd.f32 %v4144_v43, %v4143_v39  ;;  %v4123_v54 = vmul.f32 %v15661_v44, %v15661_v44  ;;  %v4133_v55 = vmul.f32 %v15663_v45, %v15663_v45  ;;  %3857 = vmatprep.subr.bf16.mxu0 %v13758_v38  ;;  %v4258_v38 = vunpack.c.l.s4 %v15434_v37  ;;  %v13905_v37 = vld [vmem:[#allocation11 + $0x140] ss:$40 sps:$4 sm:$0xff]  }
 0x274   :  { %v4152_v50 = vadd.f32 %v4151_v46, %v4150_v41  ;;  %v4124_v56 = vmul.f32 %v15666_v47, %v15666_v47  ;;  %v4134_v53 = vmul.f32 %v15668_v48, %v15668_v48  ;;  %v4260_v39 = vlaneseq  ;;  %v13779_v41 = vld [vmem:[#allocation5 + $0x4d4] ss:$40 sps:$4 sm:$0xff]   ;;  %v13777_v46 = vld [vmem:[#allocation5 + $0x4d0] ss:$40 sps:$4 sm:$0xff]  }
 0x275   :  { %v4146_v57 = vrot.slane %v4145_v52, 1  ;;  %v4155_v58 = vadd.f32 %v4133_v55, %v4123_v54  ;;  %v4259_v42 = vunpack.c.0.s8 %v4258_v38  ;;  %v13785_v55 = vld [vmem:[#allocation5 + $0x574] ss:$40 sps:$4 sm:$0xff]   ;;  %v13822_v38 = vld [vmem:[#allocation5 + $0x980] ss:$40 sps:$4 sm:$0xff]  }
 0x276   :  { %v4153_v59 = vrot.slane %v4152_v50, 1  ;;  %v4162_v60 = vadd.f32 %v4134_v53, %v4124_v56  ;;  %3858 = vmatpush1.bf16.msra.mxu0 %v13756_v49  ;;  %v15678_v43 = vshrl.u32 %v4260_v39, 7  ;;  %v13782_v49 = vld [vmem:[#allocation5 + $0x524] ss:$40 sps:$4 sm:$0xff]   ;;  %v13783_v53 = vld [vmem:[#allocation5 + $0x570] ss:$40 sps:$4 sm:$0xff]  }
 0x277   :  { %v4147_v63 = vadd.f32 %v4146_v57, %v4145_v52  ;;  %v4156_v0 = vrot.slane %v4155_v58, 4  ;;  %3859 = vmatprep.subr.bf16.mxu0 %v13761_v51  ;;  %v13780_v51 = vld [vmem:[#allocation5 + $0x520] ss:$40 sps:$4 sm:$0xff]  }
 0x278   :  { %v4154_v1 = vadd.f32 %v4153_v59, %v4152_v50  ;;  %v4163_v2 = vrot.slane %v4162_v60, 4  ;;  %v15681_v54 = vsub.s32 %v4259_v42, %v15678_v43  ;;  %v15157_v59 = vld [vmem:[#allocation2] ss:$28 sps:$4 sm:$0xff]   ;;  %v13825_v42 = vld [vmem:[#allocation5 + $0x9d0] ss:$40 sps:$4 sm:$0xff]  }
 0x279   :  { %v4213_v3 = vmul.f32 0.0625, %v4147_v63  ;;  %v4157_v4 = vadd.f32 %v4156_v0, %v4155_v58  ;;  %v13786_v63 = vld [vmem:[#allocation5 + $0x5c0] ss:$40 sps:$4 sm:$0xff]   ;;  %v13791_v0 = vld [vmem:[#allocation5 + $0x614] ss:$40 sps:$4 sm:$0xff]  }
 0x27a   :  { %v4214_v5 = vmul.f32 0.0625, %v4154_v1  ;;  %v4164_v6 = vadd.f32 %v4163_v2, %v4162_v60  ;;  %3860 = vmatpush1.bf16.msra.mxu0 %v13759_v61  ;;  %v13788_v60 = vld [vmem:[#allocation5 + $0x5c4] ss:$40 sps:$4 sm:$0xff]   ;;  %v15158_v61 = vld [vmem:[#allocation2 + $0xc] ss:$28 sps:$4 sm:$0xff]  }
 0x27b   :  { %v4223_v9 = vadd.f32 1e-05, %v4213_v3  ;;  %v4158_v10 = vrot.slane %v4157_v4, 2  ;;  %3861 = vmatprep.subr.bf16.mxu0 %v13764_v62  ;;  %v13789_v1 = vld [vmem:[#allocation5 + $0x610] ss:$40 sps:$4 sm:$0xff]  }
 0x27c   :  { %v4224_v11 = vadd.f32 1e-05, %v4214_v5  ;;  %v4165_v12 = vrot.slane %v4164_v6, 2  ;;  %v13794_v2 = vld [vmem:[#allocation5 + $0x664] ss:$40 sps:$4 sm:$0xff]  }
 0x27d   :  { %15109 = vrsqrt.f32 %v4223_v9  ;;  %v4159_v13 = vadd.f32 %v4158_v10, %v4157_v4  ;;  %v13792_v3 = vld [vmem:[#allocation5 + $0x660] ss:$40 sps:$4 sm:$0xff]   ;;  %v13797_v4 = vld [vmem:[#allocation5 + $0x6b4] ss:$40 sps:$4 sm:$0xff]   ;;  %v13795_v5 = vld [vmem:[#allocation5 + $0x6b0] ss:$40 sps:$4 sm:$0xff]  }
 0x27e   :  { %15111 = vrsqrt.f32 %v4224_v11  ;;  %v4166_v17 = vadd.f32 %v4165_v12, %v4164_v6  ;;  %3862 = vmatpush1.bf16.msra.mxu0 %v13762_v7  ;;  %v13800_v6 = vld [vmem:[#allocation5 + $0x704] ss:$40 sps:$4 sm:$0xff]   ;;  %v13798_v7 = vld [vmem:[#allocation5 + $0x700] ss:$40 sps:$4 sm:$0xff]   ;;  %v13801_v9 = vld [vmem:[#allocation5 + $0x750] ss:$40 sps:$4 sm:$0xff]  }
 0x27f   :  { %v4160_v22 = vrot.slane %v4159_v13, 1  ;;  %3863 = vmatprep.subr.bf16.mxu0 %v13767_v8  ;;  %v13803_v8 = vld [vmem:[#allocation5 + $0x754] ss:$40 sps:$4 sm:$0xff]   ;;  %v13806_v10 = vld [vmem:[#allocation5 + $0x7a4] ss:$40 sps:$4 sm:$0xff]  }
 0x280   :  { %v4167_v23 = vrot.slane %v4166_v17, 1  ;;  %v13804_v11 = vld [vmem:[#allocation5 + $0x7a0] ss:$40 sps:$4 sm:$0xff]   ;;  %v13809_v12 = vld [vmem:[#allocation5 + $0x7f4] ss:$40 sps:$4 sm:$0xff]  }
 0x281   :  { %v4161_v24 = vadd.f32 %v4160_v22, %v4159_v13  ;;  %v13807_v13 = vld [vmem:[#allocation5 + $0x7f0] ss:$40 sps:$4 sm:$0xff]   ;;  %v13810_v22 = vld [vmem:[#allocation5 + $0x840] ss:$40 sps:$4 sm:$0xff]  }
 0x282   :  { %v4168_v25 = vadd.f32 %v4167_v23, %v4166_v17  ;;  %3864 = vmatpush1.bf16.msra.mxu0 %v13765_v20  ;;  %v13883_v17 = vld [vmem:[#allocation11 + $0x4] ss:$40 sps:$4 sm:$0xff]   ;;  %v13812_v20 = vld [vmem:[#allocation5 + $0x844] ss:$40 sps:$4 sm:$0xff]   ;;  %v13889_v23 = vld [vmem:[#allocation11 + $0x54] ss:$40 sps:$4 sm:$0xff]  }
 0x283   :  { %v4215_v28 = vmul.f32 0.0625, %v4161_v24  ;;  %3865 = vmatprep.subr.bf16.mxu0 %v13770_v21  ;;  %v13881_v21 = vld [vmem:[#allocation11] ss:$40 sps:$4 sm:$0xff]   ;;  %9068 = vmatprep.subr.bf16.mxu1 %v13883_v17  ;;  %v13913_v39 = vld [vmem:[#allocation11 + $0x194] ss:$40 sps:$4 sm:$0xff]  }
 0x284   :  { %v4216_v29 = vmul.f32 0.0625, %v4168_v25  ;;  %9069 = vmatpush1.bf16.msra.mxu1 %v13881_v21  ;;  %v13815_v24 = vld [vmem:[#allocation5 + $0x894] ss:$40 sps:$4 sm:$0xff]   ;;  %v13887_v25 = vld [vmem:[#allocation11 + $0x50] ss:$40 sps:$4 sm:$0xff]  }
 0x285   :  { %v4225_v30 = vadd.f32 1e-05, %v4215_v28  ;;  %9070 = vmatprep.subr.bf16.mxu1 %v13889_v23  ;;  %v13818_v28 = vld [vmem:[#allocation5 + $0x8e4] ss:$40 sps:$4 sm:$0xff]   ;;  %v13955_v17 = vld [vmem:[#allocation11 + $0x3c4] ss:$40 sps:$4 sm:$0xff]  }
 0x286   :  { %v4226_v31 = vadd.f32 1e-05, %v4216_v29  ;;  %3866 = vmatpush1.bf16.msra.mxu0 %v13768_v26  ;;  %v13813_v26 = vld [vmem:[#allocation5 + $0x890] ss:$40 sps:$4 sm:$0xff]   ;;  %v13893_v29 = vld [vmem:[#allocation11 + $0xa0] ss:$40 sps:$4 sm:$0xff]  }
 0x287   :  { %v15110_v34 = vpop.eup %15109  ;;  %15113 = vrsqrt.f32 %v4225_v30  ;;  %3867 = vmatprep.subr.bf16.mxu0 %v13773_v27  ;;  %v13895_v27 = vld [vmem:[#allocation11 + $0xa4] ss:$40 sps:$4 sm:$0xff]   ;;  %v13953_v21 = vld [vmem:[#allocation11 + $0x3c0] ss:$40 sps:$4 sm:$0xff]  }
 0x288   :  { %v15112_v35 = vpop.eup %15111  ;;  %15115 = vrsqrt.f32 %v4226_v31  ;;  %9071 = vmatpush1.bf16.msra.mxu1 %v13887_v25  ;;  %v13816_v30 = vld [vmem:[#allocation5 + $0x8e0] ss:$40 sps:$4 sm:$0xff]   ;;  %v13959_v25 = vld [vmem:[#allocation11 + $0x410] ss:$40 sps:$4 sm:$0xff]  }
 0x289   :  { %v4253_v36 = vcombine.low %v15110_v34, %v15112_v35  ;;  %9072 = vmatprep.subr.bf16.mxu1 %v13895_v27  ;;  %v13901_v31 = vld [vmem:[#allocation11 + $0xf4] ss:$40 sps:$4 sm:$0xff]   ;;  %v13907_v35 = vld [vmem:[#allocation11 + $0x144] ss:$40 sps:$4 sm:$0xff]  }
 0x28a   :  { %3868 = vmatpush1.bf16.msra.mxu0 %v13771_v32  ;;  %v13821_v32 = vld [vmem:[#allocation5 + $0x934] ss:$40 sps:$4 sm:$0xff]   ;;  %v13819_v34 = vld [vmem:[#allocation5 + $0x930] ss:$40 sps:$4 sm:$0xff]   ;;  %v13846_v23 = vld [vmem:[#allocation5 + $0xc00] ss:$40 sps:$4 sm:$0xff]  }
 0x28b   :  { %3869 = vmatprep.subr.bf16.mxu0 %v13776_v33  ;;  %v15684_v57 = vrot.slane %v4253_v36, %v15681_v54  ;;  %v13899_v33 = vld [vmem:[#allocation11 + $0xf0] ss:$40 sps:$4 sm:$0xff]   ;;  %v13967_v27 = vld [vmem:[#allocation11 + $0x464] ss:$40 sps:$4 sm:$0xff]  }
 0x28c   :  { %9073 = vmatpush1.bf16.msra.mxu1 %v13893_v29  ;;  %v13824_v36 = vld [vmem:[#allocation5 + $0x984] ss:$40 sps:$4 sm:$0xff]   ;;  %v13965_v29 = vld [vmem:[#allocation11 + $0x460] ss:$40 sps:$4 sm:$0xff]  }
 0x28d   :  { %9074 = vmatprep.subr.bf16.mxu1 %v13901_v31  ;;  %v13971_v31 = vld [vmem:[#allocation11 + $0x4b0] ss:$40 sps:$4 sm:$0xff]  }
 0x28e   :  { %3870 = vmatpush1.bf16.msra.mxu0 %v13774_v40  ;;  %v13827_v40 = vld [vmem:[#allocation5 + $0x9d4] ss:$40 sps:$4 sm:$0xff]  }
 0x28f   :  { %3871 = vmatprep.subr.bf16.mxu0 %v13779_v41  ;;  %v13911_v41 = vld [vmem:[#allocation11 + $0x190] ss:$40 sps:$4 sm:$0xff]  }
 0x290   :  { %9075 = vmatpush1.bf16.msra.mxu1 %v13899_v33  ;;  %v13857_v33 = vld [vmem:[#allocation5 + $0xcf4] ss:$40 sps:$4 sm:$0xff]  }
 0x291   :  { %v15114_v52 = vpop.eup %15113  ;;  %9076 = vmatprep.subr.bf16.mxu1 %v13907_v35  ;;  %v13855_v35 = vld [vmem:[#allocation5 + $0xcf0] ss:$40 sps:$4 sm:$0xff]  }
 0x292   :  { %v15116_v50 = vpop.eup %15115  ;;  %3872 = vmatpush1.bf16.msra.mxu0 %v13777_v46  ;;  %v13919_v46 = vld [vmem:[#allocation11 + $0x1e4] ss:$40 sps:$4 sm:$0xff]  }
 0x293   :  { %v4254_v56 = vcombine.low %v15114_v52, %v15116_v50  ;;  %3884 = vmatprep.subr.bf16.mxu0 %v13782_v49  ;;  %v13830_v49 = vld [vmem:[#allocation5 + $0xa24] ss:$40 sps:$4 sm:$0xff]   ;;  %v13925_v52 = vld [vmem:[#allocation11 + $0x234] ss:$40 sps:$4 sm:$0xff]  }
 0x294   :  { %9077 = vmatpush1.bf16.msra.mxu1 %v13905_v37  ;;  %v13923_v50 = vld [vmem:[#allocation11 + $0x230] ss:$40 sps:$4 sm:$0xff]   ;;  %v13858_v37 = vld [vmem:[#allocation5 + $0xd40] ss:$40 sps:$4 sm:$0xff]  }
 0x295   :  { %v15687_v58 = vrot.slane %v4254_v56, %v15681_v54  ;;  %3874 = vmatmul.mubr.bf16.vlgmr.msra.gmra.mrb[12].mxu0 %v15157_v59  ;;  %9078 = vmatprep.subr.bf16.mxu1 %v13913_v39  ;;  %v13833_v56 = vld [vmem:[#allocation5 + $0xa74] ss:$40 sps:$4 sm:$0xff]   ;;  %v13931_v59 = vld [vmem:[#allocation11 + $0x284] ss:$40 sps:$4 sm:$0xff]  }
 0x296   :  { %3885 = vmatpush1.bf16.msra.mxu0 %v13780_v51  ;;  %3916 = vmatprep.mubr.bf16.mxu0 %v15158_v61  ;;  %v13917_v51 = vld [vmem:[#allocation11 + $0x1e0] ss:$40 sps:$4 sm:$0xff]   ;;  %v13836_v61 = vld [vmem:[#allocation5 + $0xac4] ss:$40 sps:$4 sm:$0xff]   ;;  %v13861_v39 = vld [vmem:[#allocation5 + $0xd90] ss:$40 sps:$4 sm:$0xff]  }
 0x297   :  { %v4285_v62 = vcombine.low %v15684_v57, %v15687_v58  ;;  %3886 = vmatprep.subr.bf16.mxu0 %v13785_v55  ;;  %v13828_v55 = vld [vmem:[#allocation5 + $0xa20] ss:$40 sps:$4 sm:$0xff]   ;;  %v15753_v57 = vsub.s32 7, %v15678_v43  ;;  %v15756_v58 = vsub.s32 6, %v15678_v43 }
 0x298   :  { %9079 = vmatpush1.bf16.msra.mxu1 %v13911_v41  ;;  %v13864_v41 = vld [vmem:[#allocation5 + $0xde0] ss:$40 sps:$4 sm:$0xff]  }
 0x299   :  { %9080 = vmatprep.subr.bf16.mxu1 %v13919_v46  ;;  %v13867_v46 = vld [vmem:[#allocation5 + $0xe30] ss:$40 sps:$4 sm:$0xff]  }
 0x29a   :  { %3887 = vmatpush1.bf16.msra.mxu0 %v13783_v53  ;;  %v13831_v53 = vld [vmem:[#allocation5 + $0xa70] ss:$40 sps:$4 sm:$0xff]  }
 0x29b   :  { %3888 = vmatprep.subr.bf16.mxu0 %v13788_v60  ;;  %v15159_v60 = vld [vmem:[#allocation2 + $0x8] ss:$28 sps:$4 sm:$0xff]  }
 0x29c   :  { %9081 = vmatpush1.bf16.msra.mxu1 %v13917_v51  ;;  %v13870_v51 = vld [vmem:[#allocation5 + $0xe80] ss:$40 sps:$4 sm:$0xff]  }
 0x29d   :  { %9082 = vmatprep.subr.bf16.mxu1 %v13925_v52  ;;  %v13875_v52 = vld [vmem:[#allocation5 + $0xed4] ss:$40 sps:$4 sm:$0xff]  }
 0x29e   :  { %3889 = vmatpush1.bf16.msra.mxu0 %v13786_v63  ;;  %v13929_v63 = vld [vmem:[#allocation11 + $0x280] ss:$40 sps:$4 sm:$0xff]  }
 0x29f   :  { %3890 = vmatprep.subr.bf16.mxu0 %v13791_v0  ;;  %v15160_v0 = vld [vmem:[#allocation2 + $0x14] ss:$28 sps:$4 sm:$0xff]  }
 0x2a0   :  { %9083 = vmatpush1.bf16.msra.mxu1 %v13923_v50  ;;  %v13878_v50 = vld [vmem:[#allocation5 + $0xf24] ss:$40 sps:$4 sm:$0xff]  }
 0x2a1   :  { %9084 = vmatprep.subr.bf16.mxu1 %v13931_v59 }
 0x2a2   :  { %3891 = vmatpush1.bf16.msra.mxu0 %v13789_v1  ;;  %v13834_v1 = vld [vmem:[#allocation5 + $0xac0] ss:$40 sps:$4 sm:$0xff]  }
 0x2a3   :  { %3892 = vmatprep.subr.bf16.mxu0 %v13794_v2  ;;  %v13937_v2 = vld [vmem:[#allocation11 + $0x2d4] ss:$40 sps:$4 sm:$0xff]  }
 0x2a4   :  { %9085 = vmatpush1.bf16.msra.mxu1 %v13929_v63 }
 0x2a5   :  { %9086 = vmatprep.subr.bf16.mxu1 %v13937_v2 }
 0x2a6   :  { %3893 = vmatpush1.bf16.msra.mxu0 %v13792_v3  ;;  %v13839_v3 = vld [vmem:[#allocation5 + $0xb14] ss:$40 sps:$4 sm:$0xff]  }
 0x2a7   :  { %3894 = vmatprep.subr.bf16.mxu0 %v13797_v4  ;;  %v13935_v4 = vld [vmem:[#allocation11 + $0x2d0] ss:$40 sps:$4 sm:$0xff]  }
 0x2a8   :  { %9087 = vmatpush1.bf16.msra.mxu1 %v13935_v4 }
 0x2aa   :  { %3895 = vmatpush1.bf16.msra.mxu0 %v13795_v5  ;;  %v13837_v5 = vld [vmem:[#allocation5 + $0xb10] ss:$40 sps:$4 sm:$0xff]  }
 0x2ab   :  { %3896 = vmatprep.subr.bf16.mxu0 %v13800_v6  ;;  %v13943_v6 = vld [vmem:[#allocation11 + $0x324] ss:$40 sps:$4 sm:$0xff]  }
 0x2ac   :  { %9088 = vmatprep.subr.bf16.mxu1 %v13943_v6 }
 0x2ae   :  { %3897 = vmatpush1.bf16.msra.mxu0 %v13798_v7  ;;  %v13842_v7 = vld [vmem:[#allocation5 + $0xb64] ss:$40 sps:$4 sm:$0xff]  }
 0x2af   :  { %3898 = vmatprep.subr.bf16.mxu0 %v13803_v8  ;;  %v13941_v8 = vld [vmem:[#allocation11 + $0x320] ss:$40 sps:$4 sm:$0xff]  }
 0x2b0   :  { %9089 = vmatpush1.bf16.msra.mxu1 %v13941_v8 }
 0x2b2   :  { %3899 = vmatpush1.bf16.msra.mxu0 %v13801_v9  ;;  %v13840_v9 = vld [vmem:[#allocation5 + $0xb60] ss:$40 sps:$4 sm:$0xff]  }
 0x2b3   :  { %3900 = vmatprep.subr.bf16.mxu0 %v13806_v10  ;;  %v13949_v10 = vld [vmem:[#allocation11 + $0x374] ss:$40 sps:$4 sm:$0xff]  }
 0x2b4   :  { %9090 = vmatprep.subr.bf16.mxu1 %v13949_v10 }
 0x2b6   :  { %3901 = vmatpush1.bf16.msra.mxu0 %v13804_v11  ;;  %v13845_v11 = vld [vmem:[#allocation5 + $0xbb4] ss:$40 sps:$4 sm:$0xff]  }
 0x2b7   :  { %3902 = vmatprep.subr.bf16.mxu0 %v13809_v12  ;;  %v13947_v12 = vld [vmem:[#allocation11 + $0x370] ss:$40 sps:$4 sm:$0xff]  }
 0x2b8   :  { %9091 = vmatpush1.bf16.msra.mxu1 %v13947_v12 }
 0x2b9   :  { %9092 = vmatprep.subr.bf16.mxu1 %v13955_v17 }
 0x2ba   :  { %3903 = vmatpush1.bf16.msra.mxu0 %v13807_v13  ;;  %v13843_v13 = vld [vmem:[#allocation5 + $0xbb0] ss:$40 sps:$4 sm:$0xff]  }
 0x2bb   :  { %3904 = vmatprep.subr.bf16.mxu0 %v13812_v20  ;;  %v13848_v20 = vld [vmem:[#allocation5 + $0xc04] ss:$40 sps:$4 sm:$0xff]  }
 0x2bc   :  { %9093 = vmatpush1.bf16.msra.mxu1 %v13953_v21 }
 0x2be   :  { %3905 = vmatpush1.bf16.msra.mxu0 %v13810_v22  ;;  %v13961_v22 = vld [vmem:[#allocation11 + $0x414] ss:$40 sps:$4 sm:$0xff]  }
 0x2bf   :  { %3906 = vmatprep.subr.bf16.mxu0 %v13815_v24  ;;  %v13851_v24 = vld [vmem:[#allocation5 + $0xc54] ss:$40 sps:$4 sm:$0xff]   ;;  %9094 = vmatprep.subr.bf16.mxu1 %v13961_v22 }
 0x2c0   :  { %9095 = vmatpush1.bf16.msra.mxu1 %v13959_v25  ;;  %v13896_v25 = vld [vmem:[#allocation11 + $0xa8] ss:$40 sps:$4 sm:$0xff]  }
 0x2c1   :  { %9096 = vmatprep.subr.bf16.mxu1 %v13967_v27 }
 0x2c2   :  { %3907 = vmatpush1.bf16.msra.mxu0 %v13813_v26  ;;  %v13849_v26 = vld [vmem:[#allocation5 + $0xc50] ss:$40 sps:$4 sm:$0xff]  }
 0x2c3   :  { %3908 = vmatprep.subr.bf16.mxu0 %v13818_v28  ;;  %v13854_v28 = vld [vmem:[#allocation5 + $0xca4] ss:$40 sps:$4 sm:$0xff]  }
 0x2c4   :  { %9097 = vmatpush1.bf16.msra.mxu1 %v13965_v29 }
 0x2c6   :  { %3909 = vmatpush1.bf16.msra.mxu0 %v13816_v30  ;;  %v13973_v30 = vld [vmem:[#allocation11 + $0x4b4] ss:$40 sps:$4 sm:$0xff]  }
 0x2c7   :  { %3910 = vmatprep.subr.bf16.mxu0 %v13821_v32  ;;  %v13852_v32 = vld [vmem:[#allocation5 + $0xca0] ss:$40 sps:$4 sm:$0xff]   ;;  %9098 = vmatprep.subr.bf16.mxu1 %v13973_v30  ;;  %v13904_v30 = vld [vmem:[#allocation11 + $0xfc] ss:$40 sps:$4 sm:$0xff]  }
 0x2c8   :  { %9099 = vmatpush1.bf16.msra.mxu1 %v13971_v31 }
 0x2ca   :  { %3911 = vmatpush1.bf16.msra.mxu0 %v13819_v34  ;;  %v13981_v34 = vld [vmem:[#allocation11 + $0x504] ss:$40 sps:$4 sm:$0xff]  }
 0x2cb   :  { %3912 = vmatprep.subr.bf16.mxu0 %v13824_v36  ;;  %9111 = vmatprep.subr.bf16.mxu1 %v13981_v34  ;;  %v13860_v36 = vld [vmem:[#allocation5 + $0xd44] ss:$40 sps:$4 sm:$0xff]  }
 0x2cc   :  { %v13902_v34 = vld [vmem:[#allocation11 + $0xf8] ss:$40 sps:$4 sm:$0xff]  }
 0x2ce   :  { %3913 = vmatpush1.bf16.msra.mxu0 %v13822_v38  ;;  %v13863_v38 = vld [vmem:[#allocation5 + $0xd94] ss:$40 sps:$4 sm:$0xff]  }
 0x2cf   :  { %3914 = vmatprep.subr.bf16.mxu0 %v13827_v40  ;;  %v13866_v40 = vld [vmem:[#allocation5 + $0xde4] ss:$40 sps:$4 sm:$0xff]  }
 0x2d2   :  { %3915 = vmatpush1.bf16.msra.mxu0 %v13825_v42  ;;  %v13869_v42 = vld [vmem:[#allocation5 + $0xe34] ss:$40 sps:$4 sm:$0xff]  }
 0x2d3   :  { %3927 = vmatprep.subr.bf16.mxu0 %v13830_v49  ;;  %v13872_v49 = vld [vmem:[#allocation5 + $0xe84] ss:$40 sps:$4 sm:$0xff]  }
 0x2d5   :  { %3917 = vmatmul.mubr.bf16.vlgmr.msra.gmra.mrb[12].mxu0 %v15159_v60  ;;  %v15161_v60 = vld [vmem:[#allocation2 + $0x10] ss:$28 sps:$4 sm:$0xff]  }
 0x2d6   :  { %3928 = vmatpush1.bf16.msra.mxu0 %v13828_v55  ;;  %3959 = vmatprep.mubr.bf16.mxu0 %v15160_v0  ;;  %v13873_v55 = vld [vmem:[#allocation5 + $0xed0] ss:$40 sps:$4 sm:$0xff]  }
 0x2d7   :  { %3929 = vmatprep.subr.bf16.mxu0 %v13833_v56  ;;  %v13876_v56 = vld [vmem:[#allocation5 + $0xf20] ss:$40 sps:$4 sm:$0xff]  }
 0x2da   :  { %3930 = vmatpush1.bf16.msra.mxu0 %v13831_v53  ;;  %v13886_v53 = vld [vmem:[#allocation11 + $0xc] ss:$40 sps:$4 sm:$0xff]  }
 0x2db   :  { %3931 = vmatprep.subr.bf16.mxu0 %v13836_v61 }
 0x2de   :  { %3932 = vmatpush1.bf16.msra.mxu0 %v13834_v1 }
 0x2df   :  { %3933 = vmatprep.subr.bf16.mxu0 %v13839_v3 }
 0x2e2   :  { %3934 = vmatpush1.bf16.msra.mxu0 %v13837_v5 }
 0x2e3   :  { %3935 = vmatprep.subr.bf16.mxu0 %v13842_v7  ;;  %v13884_v7 = vld [vmem:[#allocation11 + $0x8] ss:$40 sps:$4 sm:$0xff]  }
 0x2e6   :  { %3936 = vmatpush1.bf16.msra.mxu0 %v13840_v9 }
 0x2e7   :  { %3937 = vmatprep.subr.bf16.mxu0 %v13845_v11  ;;  %v13892_v11 = vld [vmem:[#allocation11 + $0x5c] ss:$40 sps:$4 sm:$0xff]  }
 0x2ea   :  { %3938 = vmatpush1.bf16.msra.mxu0 %v13843_v13  ;;  %v13890_v13 = vld [vmem:[#allocation11 + $0x58] ss:$40 sps:$4 sm:$0xff]  }
 0x2eb   :  { %3939 = vmatprep.subr.bf16.mxu0 %v13848_v20  ;;  %v15162_v20 = vld [vmem:[#allocation2 + $0x18] ss:$28 sps:$4 sm:$0xff]  }
 0x2ee   :  { %3940 = vmatpush1.bf16.msra.mxu0 %v13846_v23  ;;  %v13898_v23 = vld [vmem:[#allocation11 + $0xac] ss:$40 sps:$4 sm:$0xff]  }
 0x2ef   :  { %3941 = vmatprep.subr.bf16.mxu0 %v13851_v24 }
 0x2f2   :  { %3942 = vmatpush1.bf16.msra.mxu0 %v13849_v26 }
 0x2f3   :  { %3943 = vmatprep.subr.bf16.mxu0 %v13854_v28 }
 0x2f6   :  { %3944 = vmatpush1.bf16.msra.mxu0 %v13852_v32 }
 0x2f7   :  { %3945 = vmatprep.subr.bf16.mxu0 %v13857_v33 }
 0x2fa   :  { %3946 = vmatpush1.bf16.msra.mxu0 %v13855_v35 }
 0x2fb   :  { %3947 = vmatprep.subr.bf16.mxu0 %v13860_v36 }
 0x2fe   :  { %3948 = vmatpush1.bf16.msra.mxu0 %v13858_v37 }
 0x2ff   :  { %3949 = vmatprep.subr.bf16.mxu0 %v13863_v38 }
 0x302   :  { %3950 = vmatpush1.bf16.msra.mxu0 %v13861_v39 }
 0x303   :  { %3951 = vmatprep.subr.bf16.mxu0 %v13866_v40 }
 0x306   :  { %3952 = vmatpush1.bf16.msra.mxu0 %v13864_v41 }
 0x307   :  { %3953 = vmatprep.subr.bf16.mxu0 %v13869_v42 }
 0x30a   :  { %3954 = vmatpush1.bf16.msra.mxu0 %v13867_v46 }
 0x30b   :  { %3955 = vmatprep.subr.bf16.mxu0 %v13872_v49  ;;  %v13910_v49 = vld [vmem:[#allocation11 + $0x14c] ss:$40 sps:$4 sm:$0xff]  }
 0x30e   :  { %3956 = vmatpush1.bf16.msra.mxu0 %v13870_v51 }
 0x30f   :  { %3957 = vmatprep.subr.bf16.mxu0 %v13875_v52 }
 0x312   :  { %3958 = vmatpush1.bf16.msra.mxu0 %v13873_v55  ;;  %v13908_v55 = vld [vmem:[#allocation11 + $0x148] ss:$40 sps:$4 sm:$0xff]  }
 0x313   :  { %3970 = vmatprep.subr.bf16.mxu0 %v13878_v50 }
 0x315   :  { %v3832_v59 = vpop.f32.mrb[4].mxu1  ;;  %3960 = vmatmul.mubr.bf16.vlgmr.msra.gmra.mrb[12].mxu0 %v15161_v60 }
 0x316   :  { %v3834_v61 = vpop.f32.mrb[5].mxu1  ;;  %3971 = vmatpush1.bf16.msra.mxu0 %v13876_v56  ;;  %4002 = vmatprep.mubr.bf16.mxu0 %v15433_v14 }
 0x317   :  { %v3836_v63 = vpop.f32.mrb[6].mxu1  ;;  %9283 = vmatprep.subr.bf16.mxu0 %v13886_v53 }
 0x318   :  { %v4059_v0 = vadd.f32 %v3836_v63, %v3832_v59  ;;  %v3838_v1 = vpop.f32.mrb[7].mxu1 }
 0x319   :  { %v4066_v2 = vadd.f32 %v3838_v1, %v3834_v61 }
 0x31a   :  { %v4060_v3 = vrot.slane %v4059_v0, 4 }
 0x31b   :  { %v4067_v4 = vrot.slane %v4066_v2, 4 }
 0x31c   :  { %v4061_v5 = vadd.f32 %v4060_v3, %v4059_v0 }
 0x31d   :  { %v4068_v6 = vadd.f32 %v4067_v4, %v4066_v2  ;;  %v13922_v4 = vld [vmem:[#allocation11 + $0x1ec] ss:$40 sps:$4 sm:$0xff]  }
 0x31e   :  { %v4062_v8 = vrot.slane %v4061_v5, 2 }
 0x31f   :  { %v4069_v9 = vrot.slane %v4068_v6, 2 }
 0x320   :  { %v4063_v10 = vadd.f32 %v4062_v8, %v4061_v5 }
 0x321   :  { %v4070_v12 = vadd.f32 %v4069_v9, %v4068_v6  ;;  %12034 = vmatmul.mubr.msk.bf16.vlgmr.msra.gmra.mrb[12].mxu0 %vm3149_vm0, %v15162_v20 }
 0x322   :  { %v4064_v17 = vrot.slane %v4063_v10, 1  ;;  %9284 = vmatpush1.bf16.msra.mxu0 %v13884_v7 }
 0x323   :  { %v4071_v21 = vrot.slane %v4070_v12, 1  ;;  %9285 = vmatprep.subr.bf16.mxu0 %v13892_v11 }
 0x324   :  { %v4065_v22 = vadd.f32 %v4064_v17, %v4063_v10  ;;  %v13928_v17 = vld [vmem:[#allocation11 + $0x23c] ss:$40 sps:$4 sm:$0xff]  }
 0x325   :  { %v4072_v24 = vadd.f32 %v4071_v21, %v4070_v12  ;;  %v13920_v12 = vld [vmem:[#allocation11 + $0x1e8] ss:$40 sps:$4 sm:$0xff]  }
 0x326   :  { %v4097_v26 = vmul.f32 0.0625, %v4065_v22  ;;  %9286 = vmatpush1.bf16.msra.mxu0 %v13890_v13 }
 0x327   :  { %v4098_v27 = vmul.f32 0.0625, %v4072_v24  ;;  %9287 = vmatprep.subr.bf16.mxu0 %v13898_v23  ;;  %v13926_v24 = vld [vmem:[#allocation11 + $0x238] ss:$40 sps:$4 sm:$0xff]  }
 0x328   :  { %v15693_v28 = vsub.f32 %v3832_v59, %v4097_v26  ;;  %v15695_v29 = vsub.f32 %v3836_v63, %v4097_v26  ;;  %v3660_v33 = vpop.f32.mrb[8].mxu0 }
 0x329   :  { %v15697_v31 = vsub.f32 %v3834_v61, %v4098_v27  ;;  %v15699_v32 = vsub.f32 %v3838_v1, %v4098_v27  ;;  %v3662_v37 = vpop.f32.mrb[9].mxu0  ;;  %v13916_v61 = vld [vmem:[#allocation11 + $0x19c] ss:$40 sps:$4 sm:$0xff]   ;;  %v13914_v1 = vld [vmem:[#allocation11 + $0x198] ss:$40 sps:$4 sm:$0xff]  }
 0x32a   :  { %v4127_v35 = vmul.f32 %v15693_v28, %v15693_v28  ;;  %v4137_v36 = vmul.f32 %v15695_v29, %v15695_v29  ;;  %v3664_v40 = vpop.f32.mrb[10].mxu0  ;;  %9288 = vmatpush1.bf16.msra.mxu0 %v13896_v25  ;;  %v13934_v25 = vld [vmem:[#allocation11 + $0x28c] ss:$40 sps:$4 sm:$0xff]  }
 0x32b   :  { %v4128_v38 = vmul.f32 %v15697_v31, %v15697_v31  ;;  %v4138_v39 = vmul.f32 %v15699_v32, %v15699_v32  ;;  %v4045_v42 = vadd.f32 %v3664_v40, %v3660_v33  ;;  %v3666_v46 = vpop.f32.mrb[11].mxu0  ;;  %9289 = vmatprep.subr.bf16.mxu0 %v13904_v30 }
 0x32c   :  { %v4183_v41 = vadd.f32 %v4137_v36, %v4127_v35  ;;  %v4052_v52 = vadd.f32 %v3666_v46, %v3662_v37 }
 0x32d   :  { %v4190_v51 = vadd.f32 %v4138_v39, %v4128_v38  ;;  %v4046_v56 = vrot.slane %v4045_v42, 4  ;;  %v13932_v38 = vld [vmem:[#allocation11 + $0x288] ss:$40 sps:$4 sm:$0xff]  }
 0x32e   :  { %v4184_v50 = vrot.slane %v4183_v41, 4  ;;  %v4053_v59 = vrot.slane %v4052_v52, 4  ;;  %9290 = vmatpush1.bf16.msra.mxu0 %v13902_v34 }
 0x32f   :  { %v4191_v53 = vrot.slane %v4190_v51, 4  ;;  %v4047_v60 = vadd.f32 %v4046_v56, %v4045_v42  ;;  %9291 = vmatprep.subr.bf16.mxu0 %v13910_v49  ;;  %v13940_v49 = vld [vmem:[#allocation11 + $0x2dc] ss:$40 sps:$4 sm:$0xff]   ;;  %v13946_v56 = vld [vmem:[#allocation11 + $0x32c] ss:$40 sps:$4 sm:$0xff]  }
 0x330   :  { %v4185_v63 = vadd.f32 %v4184_v50, %v4183_v41  ;;  %v4054_v0 = vadd.f32 %v4053_v59, %v4052_v52  ;;  %v13938_v52 = vld [vmem:[#allocation11 + $0x2d8] ss:$40 sps:$4 sm:$0xff]  }
 0x331   :  { %v4192_v2 = vadd.f32 %v4191_v53, %v4190_v51  ;;  %v4048_v3 = vrot.slane %v4047_v60, 2 }
 0x332   :  { %v4055_v5 = vrot.slane %v4054_v0, 2  ;;  %9292 = vmatpush1.bf16.msra.mxu0 %v13908_v55  ;;  %v4186_v7 = vrot.slane %v4185_v63, 2 }
 0x333   :  { %v4049_v6 = vadd.f32 %v4048_v3, %v4047_v60  ;;  %9293 = vmatprep.subr.bf16.mxu0 %v13916_v61  ;;  %v4193_v9 = vrot.slane %v4192_v2, 2 }
 0x334   :  { %v4056_v8 = vadd.f32 %v4055_v5, %v4054_v0  ;;  %v4187_v20 = vadd.f32 %v4186_v7, %v4185_v63  ;;  %v13944_v63 = vld [vmem:[#allocation11 + $0x328] ss:$40 sps:$4 sm:$0xff]   ;;  %v13950_v7 = vld [vmem:[#allocation11 + $0x378] ss:$40 sps:$4 sm:$0xff]  }
 0x335   :  { %v4050_v10 = vrot.slane %v4049_v6, 1  ;;  %v4194_v22 = vadd.f32 %v4193_v9, %v4192_v2  ;;  %v13952_v2 = vld [vmem:[#allocation11 + $0x37c] ss:$40 sps:$4 sm:$0xff]  }
 0x336   :  { %v4057_v11 = vrot.slane %v4056_v8, 1  ;;  %9294 = vmatpush1.bf16.msra.mxu0 %v13914_v1  ;;  %v4188_v34 = vrot.slane %v4187_v20, 1 }
 0x337   :  { %v4051_v13 = vadd.f32 %v4050_v10, %v4049_v6  ;;  %9295 = vmatprep.subr.bf16.mxu0 %v13922_v4  ;;  %v4195_v39 = vrot.slane %v4194_v22, 1  ;;  %v13958_v10 = vld [vmem:[#allocation11 + $0x3cc] ss:$40 sps:$4 sm:$0xff]  }
 0x338   :  { %v4058_v21 = vadd.f32 %v4057_v11, %v4056_v8 }
 0x339   :  { %v4095_v23 = vmul.f32 0.0625, %v4051_v13  ;;  %v4196_v55 = vadd.f32 %v4195_v39, %v4194_v22 }
 0x33a   :  { %v4096_v26 = vmul.f32 0.0625, %v4058_v21  ;;  %9296 = vmatpush1.bf16.msra.mxu0 %v13920_v12  ;;  %v13964_v21 = vld [vmem:[#allocation11 + $0x41c] ss:$40 sps:$4 sm:$0xff]  }
 0x33b   :  { %v15709_v27 = vsub.f32 %v3660_v33, %v4095_v23  ;;  %v15711_v30 = vsub.f32 %v3664_v40, %v4095_v23  ;;  %9297 = vmatprep.subr.bf16.mxu0 %v13928_v17  ;;  %v4220_v0 = vmul.f32 0.0625, %v4196_v55  ;;  %v13956_v17 = vld [vmem:[#allocation11 + $0x3c8] ss:$40 sps:$4 sm:$0xff]  }
 0x33c   :  { %v15713_v35 = vsub.f32 %v3662_v37, %v4096_v26  ;;  %v15715_v36 = vsub.f32 %v3666_v46, %v4096_v26  ;;  %v4189_v46 = vadd.f32 %v4188_v34, %v4187_v20  ;;  %v13970_v26 = vld [vmem:[#allocation11 + $0x46c] ss:$40 sps:$4 sm:$0xff]   ;;  %v13968_v34 = vld [vmem:[#allocation11 + $0x468] ss:$40 sps:$4 sm:$0xff]  }
 0x33d   :  { %v4125_v41 = vmul.f32 %v15709_v27, %v15709_v27  ;;  %v4135_v42 = vmul.f32 %v15711_v30, %v15711_v30  ;;  %v4230_v8 = vadd.f32 1e-05, %v4220_v0  ;;  %v15744_v0 = vsub.s32 3, %v15678_v43 }
 0x33e   :  { %v4126_v33 = vmul.f32 %v15713_v35, %v15713_v35  ;;  %v4136_v40 = vmul.f32 %v15715_v36, %v15715_v36  ;;  %9298 = vmatpush1.bf16.msra.mxu0 %v13926_v24  ;;  %v4219_v60 = vmul.f32 0.0625, %v4189_v46 }
 0x33f   :  { %v4169_v37 = vadd.f32 %v4135_v42, %v4125_v41  ;;  %9299 = vmatprep.subr.bf16.mxu0 %v13934_v25  ;;  %v13962_v25 = vld [vmem:[#allocation11 + $0x418] ss:$40 sps:$4 sm:$0xff]  }
 0x340   :  { %v4176_v51 = vadd.f32 %v4136_v40, %v4126_v33  ;;  %v4229_v5 = vadd.f32 1e-05, %v4219_v60  ;;  %v13974_v42 = vld [vmem:[#allocation11 + $0x4b8] ss:$40 sps:$4 sm:$0xff]  }
 0x341   :  { %v4170_v50 = vrot.slane %v4169_v37, 4  ;;  %v4013_v60 = vld [vmem:[#allocation7] sm:$0xff] }
 0x342   :  { %v4177_v53 = vrot.slane %v4176_v51, 4  ;;  %9300 = vmatpush1.bf16.msra.mxu0 %v13932_v38  ;;  %15117 = vrsqrt.f32 %v4229_v5  ;;  %v13976_v38 = vld [vmem:[#allocation11 + $0x4bc] ss:$40 sps:$4 sm:$0xff]  }
 0x343   :  { %v4171_v59 = vadd.f32 %v4170_v50, %v4169_v37  ;;  %9301 = vmatprep.subr.bf16.mxu0 %v13940_v49  ;;  %15119 = vrsqrt.f32 %v4230_v8  ;;  %v13984_v49 = vld [vmem:[#allocation11 + $0x50c] ss:$40 sps:$4 sm:$0xff]   ;;  %v15728_v50 = vsub.s32 5, %v15678_v43 }
 0x344   :  { %v4178_v61 = vadd.f32 %v4177_v53, %v4176_v51  ;;  %v4293_v53 = vrot.slane %v4285_v62, %v15681_v54 }
 0x345   :  { %v4172_v1 = vrot.slane %v4171_v59, 2 }
 0x346   :  { %v4179_v3 = vrot.slane %v4178_v61, 2  ;;  %9302 = vmatpush1.bf16.msra.mxu0 %v13938_v52 }
 0x347   :  { %v4173_v4 = vadd.f32 %v4172_v1, %v4171_v59  ;;  %9303 = vmatprep.subr.bf16.mxu0 %v13946_v56  ;;  %v15731_v56 = vsub.s32 1, %v15678_v43  ;;  %v15747_v1 = vsub.s32 2, %v15678_v43 }
 0x348   :  { %v4180_v6 = vadd.f32 %v4179_v3, %v4178_v61  ;;  %v15738_v61 = vld [vmem:[#allocation8] sm:$0xff] }
 0x349   :  { %v4174_v9 = vrot.slane %v4173_v4, 1  ;;  %v4402_v5 = vrot.slane %v15738_v61, %v15731_v56  ;;  %v4406_v8 = vrot.slane %v15738_v61, %v15747_v1 }
 0x34a   :  { %v4181_v11 = vrot.slane %v4180_v6, 1  ;;  %9304 = vmatpush1.bf16.msra.mxu0 %v13944_v63  ;;  %v15741_v63 = vsub.s32 0, %v15678_v43 }
 0x34b   :  { %v4175_v12 = vadd.f32 %v4174_v9, %v4173_v4  ;;  %9305 = vmatprep.subr.bf16.mxu0 %v13952_v2  ;;  %v15750_v2 = vsub.s32 4, %v15678_v43  ;;  %v4418_v4 = vrot.slane %v15738_v61, %v15728_v50 }
 0x34c   :  { %v4182_v13 = vadd.f32 %v4181_v11, %v4180_v6  ;;  %v15118_v39 = vpop.eup %15117  ;;  %v4398_v6 = vrot.slane %v15738_v61, %v15741_v63 }
 0x34d   :  { %v4217_v20 = vmul.f32 0.0625, %v4175_v12  ;;  %v15120_v41 = vpop.eup %15119  ;;  %v4414_v43 = vrot.slane %v15738_v61, %v15750_v2 }
 0x34e   :  { %v4218_v22 = vmul.f32 0.0625, %v4182_v13  ;;  %9306 = vmatpush1.bf16.msra.mxu0 %v13950_v7  ;;  %v4256_v40 = vcombine.low %v15118_v39, %v15120_v41  ;;  %v4410_v7 = vrot.slane %v15738_v61, %v15744_v0 }
 0x34f   :  { %v4227_v23 = vadd.f32 1e-05, %v4217_v20  ;;  %9307 = vmatprep.subr.bf16.mxu0 %v13958_v10 }
 0x350   :  { %v4228_v24 = vadd.f32 1e-05, %v4218_v22  ;;  %v4284_v51 = vrot.slane %v4256_v40, %v15681_v54  ;;  %v13977_v40 = vld [vmem:[#allocation10 + $0x4] ss:$40 sps:$4 sm:$0xff]  }
 0x351   :  { %15121 = vrsqrt.f32 %v4227_v23 }
 0x352   :  { %15123 = vrsqrt.f32 %v4228_v24  ;;  %9308 = vmatpush1.bf16.msra.mxu0 %v13956_v17 }
 0x353   :  { %9309 = vmatprep.subr.bf16.mxu0 %v13964_v21 }
 0x356   :  { %9310 = vmatpush1.bf16.msra.mxu0 %v13962_v25 }
 0x357   :  { %9311 = vmatprep.subr.bf16.mxu0 %v13970_v26 }
 0x35a   :  { %9312 = vmatpush1.bf16.msra.mxu0 %v13968_v34 }
 0x35b   :  { %v15122_v33 = vpop.eup %15121  ;;  %9313 = vmatprep.subr.bf16.mxu0 %v13976_v38 }
 0x35c   :  { %v15124_v37 = vpop.eup %15123 }
 0x35d   :  { %v4255_v46 = vcombine.low %v15122_v33, %v15124_v37 }
 0x35e   :  { %9314 = vmatpush1.bf16.msra.mxu0 %v13974_v42 }
 0x35f   :  { %v4277_v52 = vrot.slane %v4255_v46, %v15681_v54  ;;  %9326 = vmatprep.subr.bf16.mxu0 %v13984_v49 }
 0x361   :  { %v4286_v55 = vcombine.low %v4277_v52, %v4284_v51 }
 0x363   :  { %v4300_v59 = vrot.slane %v4286_v55, %v15681_v54 }
 0x365   :  { %v4301_v3 = vcombine.low %v4293_v53, %v4300_v59 }
 0x367   :  { %v4319_v62 = vmul.f32 %v4301_v3, %v4013_v60  ;;  %v13979_v60 = vld [vmem:[#allocation11 + $0x500] ss:$40 sps:$4 sm:$0xff]  }
 0x368   :  { %v13982_v3 = vld [vmem:[#allocation11 + $0x508] ss:$40 sps:$4 sm:$0xff]  }
 0x369   :  { %v4346_v9 = vrot.slane %v4319_v62, %v15728_v50  ;;  %v4330_v10 = vrot.slane %v4319_v62, %v15731_v56  ;;  %v4326_v11 = vrot.slane %v4319_v62, %v15741_v63  ;;  %v4338_v12 = vrot.slane %v4319_v62, %v15744_v0 }
 0x36a   :  { %v4334_v13 = vrot.slane %v4319_v62, %v15747_v1  ;;  %v4342_v17 = vrot.slane %v4319_v62, %v15750_v2  ;;  %v15777_v20 = vrot.slane %v4319_v62, %v15753_v57  ;;  %v15780_v21 = vrot.slane %v4319_v62, %v15756_v58  ;;  %v13986_v62 = vld [vmem:[#allocation10 + $0xc] ss:$40 sps:$4 sm:$0xff]  }
 0x36b   :  { %v4378_v22 = vmul.f32 %v4346_v9, %v15713_v35  ;;  %v4388_v23 = vmul.f32 %v4346_v9, %v15715_v36  ;;  %v4374_v24 = vmul.f32 %v4330_v10, %v15648_v18  ;;  %v4384_v25 = vmul.f32 %v4330_v10, %v15650_v19 }
 0x36c   :  { %v4373_v26 = vmul.f32 %v4326_v11, %v15644_v15  ;;  %v4383_v34 = vmul.f32 %v4326_v11, %v15646_v16  ;;  %v4376_v38 = vmul.f32 %v4338_v12, %v15666_v47  ;;  %v4386_v39 = vmul.f32 %v4338_v12, %v15668_v48  ;;  %v13985_v16 = vld [vmem:[#allocation10] ss:$40 sps:$4 sm:$0xff]   ;;  %v13990_v12 = vld [vmem:[#allocation11 + $0x554] ss:$40 sps:$4 sm:$0xff]  }
 0x36d   :  { %v4450_v41 = vadd.f32 %v4418_v4, %v4378_v22  ;;  %v4460_v42 = vadd.f32 %v4418_v4, %v4388_v23  ;;  %v4446_v49 = vadd.f32 %v4402_v5, %v4374_v24  ;;  %v4456_v33 = vadd.f32 %v4402_v5, %v4384_v25  ;;  %v13993_v22 = vld [vmem:[#allocation11 + $0x55c] ss:$40 sps:$4 sm:$0xff]  }
 0x36e   :  { %v4445_v35 = vadd.f32 %v4398_v6, %v4373_v26  ;;  %v4455_v37 = vadd.f32 %v4398_v6, %v4383_v34  ;;  %v4448_v36 = vadd.f32 %v4410_v7, %v4376_v38  ;;  %v4458_v46 = vadd.f32 %v4410_v7, %v4386_v39  ;;  %v13999_v39 = vld [vmem:[#allocation11 + $0x5ac] ss:$40 sps:$4 sm:$0xff]  }
 0x36f   :  { %v4470_v18 = vmax.f32 %v4450_v41, 0.0  ;;  %v4480_v51 = vmax.f32 %v4460_v42, 0.0  ;;  %v4466_v19 = vmax.f32 %v4446_v49, 0.0  ;;  %v4476_v52 = vmax.f32 %v4456_v33, 0.0 }
 0x370   :  { %v4465_v15 = vmax.f32 %v4445_v35, 0.0  ;;  %v4475_v55 = vmax.f32 %v4455_v37, 0.0  ;;  %v4468_v53 = vmax.f32 %v4448_v36, 0.0  ;;  %v4478_v47 = vmax.f32 %v4458_v46, 0.0  ;;  %v13997_v46 = vld [vmem:[#allocation11 + $0x5a8] ss:$40 sps:$4 sm:$0xff]  }
 0x371   :  { %v15790_v59 = vpack.c.bf16 %v4480_v51, %v4470_v18  ;;  %v4486_v48 = vpack.c.bf16 %v4476_v52, %v4466_v19  ;;  %v4375_v4 = vmul.f32 %v4334_v13, %v15661_v44  ;;  %v4385_v5 = vmul.f32 %v4334_v13, %v15663_v45  ;;  %v13991_v13 = vld [vmem:[#allocation11 + $0x558] ss:$40 sps:$4 sm:$0xff]   ;;  %v14002_v19 = vld [vmem:[#allocation11 + $0x5f4] ss:$40 sps:$4 sm:$0xff]  }
 0x372   :  { %v4485_v6 = vpack.c.bf16 %v4475_v55, %v4465_v15  ;;  %v4488_v7 = vpack.c.bf16 %v4478_v47, %v4468_v53  ;;  %v4377_v9 = vmul.f32 %v4342_v17, %v15709_v27  ;;  %v4387_v10 = vmul.f32 %v4342_v17, %v15711_v30  ;;  %v13988_v30 = vld [vmem:[#allocation11 + $0x550] ss:$40 sps:$4 sm:$0xff]   ;;  %v14008_v53 = vld [vmem:[#allocation11 + $0x644] ss:$40 sps:$4 sm:$0xff]  }
 0x373   :  { %v15796_v11 = vmul.bf16 %v13977_v40, %v4486_v48  ;;  %v4447_v23 = vadd.f32 %v4406_v8, %v4375_v4  ;;  %v4457_v24 = vadd.f32 %v4406_v8, %v4385_v5  ;;  %v4426_v25 = vrot.slane %v15738_v61, %v15753_v57  ;;  %v14000_v55 = vld [vmem:[#allocation11 + $0x5f0] ss:$40 sps:$4 sm:$0xff]   ;;  %v14011_v47 = vld [vmem:[#allocation11 + $0x64c] ss:$40 sps:$4 sm:$0xff]   ;;  %v14006_v48 = vld [vmem:[#allocation11 + $0x640] ss:$40 sps:$4 sm:$0xff]  }
 0x374   :  { %v15800_v26 = vmul.bf16 %v13985_v16, %v4485_v6  ;;  %v4449_v44 = vadd.f32 %v4414_v43, %v4377_v9  ;;  %v4459_v34 = vadd.f32 %v4414_v43, %v4387_v10  ;;  %v4422_v45 = vrot.slane %v15738_v61, %v15756_v58  ;;  %v13996_v43 = vld [vmem:[#allocation11 + $0x5a4] ss:$40 sps:$4 sm:$0xff]   ;;  %v14003_v16 = vld [vmem:[#allocation11 + $0x5f8] ss:$40 sps:$4 sm:$0xff]   ;;  %v14021_v10 = vld [vmem:[#allocation11 + $0x6e8] ss:$40 sps:$4 sm:$0xff]  }
 0x375   :  { %9100 = vmatprep.mubr.bf16.mxu1 %v15796_v11  ;;  %9315 = vmatprep.mubr.bf16.mxu0 %v15796_v11  ;;  %v15806_v27 = vmul.bf16 %v13986_v62, %v4488_v7  ;;  %v4467_v17 = vmax.f32 %v4447_v23, 0.0  ;;  %v4477_v8 = vmax.f32 %v4457_v24, 0.0  ;;  %v4380_v38 = vmul.f32 %v15777_v20, %v15697_v31  ;;  %v14017_v62 = vld [vmem:[#allocation11 + $0x69c] ss:$40 sps:$4 sm:$0xff]   ;;  %v14012_v4 = vld [vmem:[#allocation11 + $0x690] ss:$40 sps:$4 sm:$0xff]  }
 0x376   :  { %9101 = vmatmul.mubr.bf16.vlgmr.msra.gmra.mrb[8].mxu1 %v15800_v26  ;;  %9316 = vmatmul.mubr.bf16.vlgmr.msra.gmra.mrb[16].mxu0 %v15800_v26  ;;  %v4469_v61 = vmax.f32 %v4449_v44, 0.0  ;;  %v4479_v41 = vmax.f32 %v4459_v34, 0.0  ;;  %v4390_v42 = vmul.f32 %v15777_v20, %v15699_v32  ;;  %v4379_v49 = vmul.f32 %v15780_v21, %v15693_v28  ;;  %v13994_v20 = vld [vmem:[#allocation11 + $0x5a0] ss:$40 sps:$4 sm:$0xff]   ;;  %v14020_v6 = vld [vmem:[#allocation11 + $0x6e4] ss:$40 sps:$4 sm:$0xff]  }
 0x377   :  { %9112 = vmatpush1.bf16.msra.mxu1 %v13979_v60  ;;  %9327 = vmatpush1.bf16.msra.mxu0 %v13982_v3  ;;  %v15816_v33 = vpack.c.bf16 %v4477_v8, %v4467_v17  ;;  %v4452_v40 = vadd.f32 %v4426_v25, %v4380_v38  ;;  %v4389_v31 = vmul.f32 %v15780_v21, %v15695_v29  ;;  %v14005_v29 = vld [vmem:[#allocation11 + $0x5fc] ss:$40 sps:$4 sm:$0xff]   ;;  %v14009_v60 = vld [vmem:[#allocation11 + $0x648] ss:$40 sps:$4 sm:$0xff]   ;;  %v14015_v5 = vld [vmem:[#allocation11 + $0x698] ss:$40 sps:$4 sm:$0xff]  }
 0x378   :  { %9143 = vmatprep.mubr.bf16.mxu1 %v15806_v27  ;;  %9358 = vmatprep.mubr.bf16.mxu0 %v15806_v27  ;;  %v15822_v35 = vpack.c.bf16 %v4479_v41, %v4469_v61  ;;  %v4462_v37 = vadd.f32 %v4426_v25, %v4390_v42  ;;  %v4451_v36 = vadd.f32 %v4422_v45, %v4379_v49  ;;  %v14014_v3 = vld [vmem:[#allocation11 + $0x694] ss:$40 sps:$4 sm:$0xff]   ;;  %v14018_v9 = vld [vmem:[#allocation11 + $0x6e0] ss:$40 sps:$4 sm:$0xff]   ;;  %v14024_v23 = vld [vmem:[#allocation11 + $0x730] ss:$40 sps:$4 sm:$0xff]  }
 0x379   :  { %9113 = vmatprep.subr.bf16.mxu1 %v13990_v12  ;;  %9328 = vmatprep.subr.bf16.mxu0 %v13993_v22  ;;  %v4472_v32 = vmax.f32 %v4452_v40, 0.0  ;;  %v4461_v28 = vadd.f32 %v4422_v45, %v4389_v31  ;;  %v14023_v7 = vld [vmem:[#allocation11 + $0x6ec] ss:$40 sps:$4 sm:$0xff]   ;;  %v14029_v22 = vld [vmem:[#allocation11 + $0x73c] ss:$40 sps:$4 sm:$0xff]  }
 0x37a   :  { %v4482_v18 = vmax.f32 %v4462_v37, 0.0  ;;  %v4471_v51 = vmax.f32 %v4451_v36, 0.0  ;;  %v14026_v12 = vld [vmem:[#allocation11 + $0x734] ss:$40 sps:$4 sm:$0xff]   ;;  %v14027_v24 = vld [vmem:[#allocation11 + $0x738] ss:$40 sps:$4 sm:$0xff]  }
 0x37b   :  { %9114 = vmatpush1.bf16.msra.mxu1 %v13988_v30  ;;  %9329 = vmatpush1.bf16.msra.mxu0 %v13991_v13  ;;  %v4481_v21 = vmax.f32 %v4461_v28, 0.0  ;;  %v14032_v25 = vld [vmem:[#allocation11 + $0x784] ss:$40 sps:$4 sm:$0xff]   ;;  %v14030_v34 = vld [vmem:[#allocation11 + $0x780] ss:$40 sps:$4 sm:$0xff]  }
 0x37c   :  { %9115 = vmatprep.subr.bf16.mxu1 %v13996_v43  ;;  %9330 = vmatprep.subr.bf16.mxu0 %v13999_v39  ;;  %v15824_v52 = vpack.c.bf16 %v4482_v18, %v4472_v32  ;;  %v14035_v44 = vld [vmem:[#allocation11 + $0x78c] ss:$40 sps:$4 sm:$0xff]   ;;  %v14033_v45 = vld [vmem:[#allocation11 + $0x788] ss:$40 sps:$4 sm:$0xff]   ;;  %v14041_v13 = vld [vmem:[#allocation11 + $0x7dc] ss:$40 sps:$4 sm:$0xff]  }
 0x37d   :  { %v15826_v15 = vpack.c.bf16 %v4481_v21, %v4471_v51  ;;  %v14038_v30 = vld [vmem:[#allocation11 + $0x7d4] ss:$40 sps:$4 sm:$0xff]   ;;  %v14036_v17 = vld [vmem:[#allocation11 + $0x7d0] ss:$40 sps:$4 sm:$0xff]   ;;  %v14044_v38 = vld [vmem:[#allocation11 + $0x824] ss:$40 sps:$4 sm:$0xff]  }
 0x37e   :  { %v14039_v8 = vld [vmem:[#allocation11 + $0x7d8] ss:$40 sps:$4 sm:$0xff]   ;;  %v14047_v43 = vld [vmem:[#allocation11 + $0x82c] ss:$40 sps:$4 sm:$0xff]   ;;  %v14045_v61 = vld [vmem:[#allocation11 + $0x828] ss:$40 sps:$4 sm:$0xff]  }
 0x37f   :  { %9116 = vmatpush1.bf16.msra.mxu1 %v13994_v20  ;;  %9331 = vmatpush1.bf16.msra.mxu0 %v13997_v46  ;;  %v14042_v39 = vld [vmem:[#allocation11 + $0x820] ss:$40 sps:$4 sm:$0xff]   ;;  %v14050_v41 = vld [vmem:[#allocation11 + $0x874] ss:$40 sps:$4 sm:$0xff]   ;;  %v14048_v49 = vld [vmem:[#allocation11 + $0x870] ss:$40 sps:$4 sm:$0xff]  }
 0x380   :  { %9117 = vmatprep.subr.bf16.mxu1 %v14002_v19  ;;  %9332 = vmatprep.subr.bf16.mxu0 %v14005_v29  ;;  %v14053_v42 = vld [vmem:[#allocation11 + $0x87c] ss:$40 sps:$4 sm:$0xff]   ;;  %v14051_v40 = vld [vmem:[#allocation11 + $0x878] ss:$40 sps:$4 sm:$0xff]   ;;  %v14059_v37 = vld [vmem:[#allocation11 + $0x8cc] ss:$40 sps:$4 sm:$0xff]  }
 0x381   :  { %v14056_v31 = vld [vmem:[#allocation11 + $0x8c4] ss:$40 sps:$4 sm:$0xff]   ;;  %v14054_v36 = vld [vmem:[#allocation11 + $0x8c0] ss:$40 sps:$4 sm:$0xff]   ;;  %v14062_v28 = vld [vmem:[#allocation11 + $0x914] ss:$40 sps:$4 sm:$0xff]  }
 0x382   :  { %v14057_v32 = vld [vmem:[#allocation11 + $0x8c8] ss:$40 sps:$4 sm:$0xff]   ;;  %v14065_v20 = vld [vmem:[#allocation11 + $0x91c] ss:$40 sps:$4 sm:$0xff]   ;;  %v14063_v18 = vld [vmem:[#allocation11 + $0x918] ss:$40 sps:$4 sm:$0xff]  }
 0x383   :  { %9118 = vmatpush1.bf16.msra.mxu1 %v14000_v55  ;;  %9333 = vmatpush1.bf16.msra.mxu0 %v14003_v16  ;;  %v14060_v46 = vld [vmem:[#allocation11 + $0x910] ss:$40 sps:$4 sm:$0xff]   ;;  %v14068_v51 = vld [vmem:[#allocation11 + $0x964] ss:$40 sps:$4 sm:$0xff]   ;;  %v14066_v29 = vld [vmem:[#allocation11 + $0x960] ss:$40 sps:$4 sm:$0xff]  }
 0x384   :  { %9119 = vmatprep.subr.bf16.mxu1 %v14008_v53  ;;  %9334 = vmatprep.subr.bf16.mxu0 %v14011_v47  ;;  %v14071_v19 = vld [vmem:[#allocation11 + $0x96c] ss:$40 sps:$4 sm:$0xff]   ;;  %v14069_v21 = vld [vmem:[#allocation11 + $0x968] ss:$40 sps:$4 sm:$0xff]   ;;  %v14077_v16 = vld [vmem:[#allocation11 + $0x9bc] ss:$40 sps:$4 sm:$0xff]  }
 0x385   :  { %v14074_v55 = vld [vmem:[#allocation11 + $0x9b4] ss:$40 sps:$4 sm:$0xff]   ;;  %v14072_v53 = vld [vmem:[#allocation11 + $0x9b0] ss:$40 sps:$4 sm:$0xff]  }
 0x386   :  { %v14075_v47 = vld [vmem:[#allocation11 + $0x9b8] ss:$40 sps:$4 sm:$0xff]  }
 0x387   :  { %9120 = vmatpush1.bf16.msra.mxu1 %v14006_v48  ;;  %9335 = vmatpush1.bf16.msra.mxu0 %v14009_v60  ;;  %v14078_v48 = vld [vmem:[#allocation10 + $0x8] ss:$40 sps:$4 sm:$0xff]   ;;  %v14081_v60 = vld [vmem:[#allocation11 + $0xa04] ss:$40 sps:$4 sm:$0xff]  }
 0x388   :  { %9121 = vmatprep.subr.bf16.mxu1 %v14014_v3  ;;  %9336 = vmatprep.subr.bf16.mxu0 %v14017_v62  ;;  %v14084_v3 = vld [vmem:[#allocation11 + $0xa0c] ss:$40 sps:$4 sm:$0xff]  }
 0x389   :  { %v13879_v62 = vld [vmem:[#allocation10 + $0x14] ss:$40 sps:$4 sm:$0xff]  }
 0x38b   :  { %9122 = vmatpush1.bf16.msra.mxu1 %v14012_v4  ;;  %9337 = vmatpush1.bf16.msra.mxu0 %v14015_v5  ;;  %v14079_v4 = vld [vmem:[#allocation11 + $0xa00] ss:$40 sps:$4 sm:$0xff]   ;;  %v15829_v5 = vmul.bf16 %v14078_v48, %v15816_v33  ;;  %v14147_v48 = vld [vmem:[#allocation11 + $0xd74] ss:$40 sps:$4 sm:$0xff]  }
 0x38c   :  { %9123 = vmatprep.subr.bf16.mxu1 %v14020_v6  ;;  %9338 = vmatprep.subr.bf16.mxu0 %v14023_v7  ;;  %v14082_v6 = vld [vmem:[#allocation11 + $0xa08] ss:$40 sps:$4 sm:$0xff]   ;;  %v15832_v7 = vmul.bf16 %v13879_v62, %v15790_v59  ;;  %v14088_v33 = vld [vmem:[#allocation11 + $0xa58] ss:$40 sps:$4 sm:$0xff]  }
 0x38d   :  { %v14091_v59 = vld [vmem:[#allocation11 + $0xaa0] ss:$40 sps:$4 sm:$0xff]  }
 0x38e   :  { %v14148_v62 = vld [vmem:[#allocation11 + $0xd78] ss:$40 sps:$4 sm:$0xff]  }
 0x38f   :  { %9124 = vmatpush1.bf16.msra.mxu1 %v14018_v9  ;;  %9339 = vmatpush1.bf16.msra.mxu0 %v14021_v10  ;;  %v14087_v9 = vld [vmem:[#allocation11 + $0xa54] ss:$40 sps:$4 sm:$0xff]  }
 0x390   :  { %9125 = vmatprep.subr.bf16.mxu1 %v14026_v12  ;;  %9340 = vmatprep.subr.bf16.mxu0 %v14029_v22  ;;  %v14090_v10 = vld [vmem:[#allocation11 + $0xa5c] ss:$40 sps:$4 sm:$0xff]   ;;  %v14085_v12 = vld [vmem:[#allocation11 + $0xa50] ss:$40 sps:$4 sm:$0xff]  }
 0x391   :  { %v14093_v22 = vld [vmem:[#allocation11 + $0xaa4] ss:$40 sps:$4 sm:$0xff]  }
 0x393   :  { %9126 = vmatpush1.bf16.msra.mxu1 %v14024_v23  ;;  %9341 = vmatpush1.bf16.msra.mxu0 %v14027_v24  ;;  %v14096_v23 = vld [vmem:[#allocation11 + $0xaac] ss:$40 sps:$4 sm:$0xff]   ;;  %v14094_v24 = vld [vmem:[#allocation11 + $0xaa8] ss:$40 sps:$4 sm:$0xff]  }
 0x394   :  { %9127 = vmatprep.subr.bf16.mxu1 %v14032_v25  ;;  %9342 = vmatprep.subr.bf16.mxu0 %v14035_v44  ;;  %v14099_v25 = vld [vmem:[#allocation11 + $0xaf4] ss:$40 sps:$4 sm:$0xff]  }
 0x395   :  { %v14102_v44 = vld [vmem:[#allocation11 + $0xafc] ss:$40 sps:$4 sm:$0xff]  }
 0x397   :  { %9128 = vmatpush1.bf16.msra.mxu1 %v14030_v34  ;;  %9343 = vmatpush1.bf16.msra.mxu0 %v14033_v45  ;;  %v14097_v34 = vld [vmem:[#allocation11 + $0xaf0] ss:$40 sps:$4 sm:$0xff]  }
 0x398   :  { %9129 = vmatprep.subr.bf16.mxu1 %v14038_v30  ;;  %9344 = vmatprep.subr.bf16.mxu0 %v14041_v13  ;;  %v14100_v45 = vld [vmem:[#allocation11 + $0xaf8] ss:$40 sps:$4 sm:$0xff]   ;;  %v14105_v30 = vld [vmem:[#allocation11 + $0xb44] ss:$40 sps:$4 sm:$0xff]  }
 0x399   :  { %v14108_v13 = vld [vmem:[#allocation11 + $0xb4c] ss:$40 sps:$4 sm:$0xff]  }
 0x39b   :  { %9130 = vmatpush1.bf16.msra.mxu1 %v14036_v17  ;;  %9345 = vmatpush1.bf16.msra.mxu0 %v14039_v8  ;;  %v14103_v17 = vld [vmem:[#allocation11 + $0xb40] ss:$40 sps:$4 sm:$0xff]  }
 0x39c   :  { %9131 = vmatprep.subr.bf16.mxu1 %v14044_v38  ;;  %9346 = vmatprep.subr.bf16.mxu0 %v14047_v43  ;;  %v14106_v8 = vld [vmem:[#allocation11 + $0xb48] ss:$40 sps:$4 sm:$0xff]   ;;  %v14111_v38 = vld [vmem:[#allocation11 + $0xb94] ss:$40 sps:$4 sm:$0xff]  }
 0x39d   :  { %v14114_v43 = vld [vmem:[#allocation11 + $0xb9c] ss:$40 sps:$4 sm:$0xff]  }
 0x39f   :  { %9132 = vmatpush1.bf16.msra.mxu1 %v14042_v39  ;;  %9347 = vmatpush1.bf16.msra.mxu0 %v14045_v61  ;;  %v14109_v39 = vld [vmem:[#allocation11 + $0xb90] ss:$40 sps:$4 sm:$0xff]  }
 0x3a0   :  { %9133 = vmatprep.subr.bf16.mxu1 %v14050_v41  ;;  %9348 = vmatprep.subr.bf16.mxu0 %v14053_v42  ;;  %v14112_v61 = vld [vmem:[#allocation11 + $0xb98] ss:$40 sps:$4 sm:$0xff]   ;;  %v14117_v41 = vld [vmem:[#allocation11 + $0xbe4] ss:$40 sps:$4 sm:$0xff]  }
 0x3a1   :  { %v14120_v42 = vld [vmem:[#allocation11 + $0xbec] ss:$40 sps:$4 sm:$0xff]  }
 0x3a3   :  { %9134 = vmatpush1.bf16.msra.mxu1 %v14048_v49  ;;  %9349 = vmatpush1.bf16.msra.mxu0 %v14051_v40  ;;  %v14115_v49 = vld [vmem:[#allocation11 + $0xbe0] ss:$40 sps:$4 sm:$0xff]  }
 0x3a4   :  { %9135 = vmatprep.subr.bf16.mxu1 %v14056_v31  ;;  %9350 = vmatprep.subr.bf16.mxu0 %v14059_v37  ;;  %v14118_v40 = vld [vmem:[#allocation11 + $0xbe8] ss:$40 sps:$4 sm:$0xff]   ;;  %v14123_v31 = vld [vmem:[#allocation11 + $0xc34] ss:$40 sps:$4 sm:$0xff]  }
 0x3a5   :  { %v14126_v37 = vld [vmem:[#allocation11 + $0xc3c] ss:$40 sps:$4 sm:$0xff]  }
 0x3a7   :  { %9136 = vmatpush1.bf16.msra.mxu1 %v14054_v36  ;;  %9351 = vmatpush1.bf16.msra.mxu0 %v14057_v32  ;;  %v14121_v36 = vld [vmem:[#allocation11 + $0xc30] ss:$40 sps:$4 sm:$0xff]  }
 0x3a8   :  { %9137 = vmatprep.subr.bf16.mxu1 %v14062_v28  ;;  %9352 = vmatprep.subr.bf16.mxu0 %v14065_v20  ;;  %v14124_v32 = vld [vmem:[#allocation11 + $0xc38] ss:$40 sps:$4 sm:$0xff]   ;;  %v14129_v28 = vld [vmem:[#allocation11 + $0xc84] ss:$40 sps:$4 sm:$0xff]  }
 0x3a9   :  { %v14132_v20 = vld [vmem:[#allocation11 + $0xc8c] ss:$40 sps:$4 sm:$0xff]  }
 0x3ab   :  { %9138 = vmatpush1.bf16.msra.mxu1 %v14060_v46  ;;  %9353 = vmatpush1.bf16.msra.mxu0 %v14063_v18  ;;  %v14127_v46 = vld [vmem:[#allocation11 + $0xc80] ss:$40 sps:$4 sm:$0xff]  }
 0x3ac   :  { %9139 = vmatprep.subr.bf16.mxu1 %v14068_v51  ;;  %9354 = vmatprep.subr.bf16.mxu0 %v14071_v19  ;;  %v14130_v18 = vld [vmem:[#allocation11 + $0xc88] ss:$40 sps:$4 sm:$0xff]   ;;  %v14135_v51 = vld [vmem:[#allocation11 + $0xcd4] ss:$40 sps:$4 sm:$0xff]  }
 0x3ad   :  { %v14138_v19 = vld [vmem:[#allocation11 + $0xcdc] ss:$40 sps:$4 sm:$0xff]  }
 0x3af   :  { %9140 = vmatpush1.bf16.msra.mxu1 %v14066_v29  ;;  %9355 = vmatpush1.bf16.msra.mxu0 %v14069_v21  ;;  %v14133_v29 = vld [vmem:[#allocation11 + $0xcd0] ss:$40 sps:$4 sm:$0xff]  }
 0x3b0   :  { %9141 = vmatprep.subr.bf16.mxu1 %v14074_v55  ;;  %9356 = vmatprep.subr.bf16.mxu0 %v14077_v16  ;;  %v14136_v21 = vld [vmem:[#allocation11 + $0xcd8] ss:$40 sps:$4 sm:$0xff]   ;;  %v14141_v55 = vld [vmem:[#allocation11 + $0xd24] ss:$40 sps:$4 sm:$0xff]  }
 0x3b1   :  { %v14144_v16 = vld [vmem:[#allocation11 + $0xd2c] ss:$40 sps:$4 sm:$0xff]  }
 0x3b3   :  { %9142 = vmatpush1.bf16.msra.mxu1 %v14072_v53  ;;  %9357 = vmatpush1.bf16.msra.mxu0 %v14075_v47  ;;  %v14139_v53 = vld [vmem:[#allocation11 + $0xd20] ss:$40 sps:$4 sm:$0xff]  }
 0x3b4   :  { %9154 = vmatprep.subr.bf16.mxu1 %v14081_v60  ;;  %9369 = vmatprep.subr.bf16.mxu0 %v14084_v3  ;;  %v14142_v47 = vld [vmem:[#allocation11 + $0xd28] ss:$40 sps:$4 sm:$0xff]   ;;  %v14150_v60 = vld [vmem:[#allocation11 + $0xd7c] ss:$40 sps:$4 sm:$0xff]  }
 0x3b5   :  { %v14145_v3 = vld [vmem:[#allocation11 + $0xd70] ss:$40 sps:$4 sm:$0xff]  }
 0x3b6   :  { %9144 = vmatmul.mubr.bf16.vlgmr.msra.gmra.mrb[8].mxu1 %v15829_v5  ;;  %9359 = vmatmul.mubr.bf16.vlgmr.msra.gmra.mrb[16].mxu0 %v15829_v5 }
 0x3b7   :  { %9155 = vmatpush1.bf16.msra.mxu1 %v14079_v4  ;;  %9186 = vmatprep.mubr.bf16.mxu1 %v15832_v7  ;;  %v14153_v4 = vld [vmem:[#allocation11 + $0xdc4] ss:$40 sps:$4 sm:$0xff]  }
 0x3b8   :  { %9370 = vmatpush1.bf16.msra.mxu0 %v14082_v6  ;;  %9401 = vmatprep.mubr.bf16.mxu0 %v15832_v7  ;;  %v14156_v6 = vld [vmem:[#allocation11 + $0xdcc] ss:$40 sps:$4 sm:$0xff]  }
 0x3b9   :  { %9156 = vmatprep.subr.bf16.mxu1 %v14087_v9  ;;  %9371 = vmatprep.subr.bf16.mxu0 %v14090_v10  ;;  %v14151_v9 = vld [vmem:[#allocation11 + $0xdc0] ss:$40 sps:$4 sm:$0xff]  }
 0x3ba   :  { %v14154_v10 = vld [vmem:[#allocation11 + $0xdc8] ss:$40 sps:$4 sm:$0xff]  }
 0x3bb   :  { %9157 = vmatpush1.bf16.msra.mxu1 %v14085_v12  ;;  %v14159_v12 = vld [vmem:[#allocation11 + $0xe14] ss:$40 sps:$4 sm:$0xff]  }
 0x3bc   :  { %9372 = vmatpush1.bf16.msra.mxu0 %v14088_v33  ;;  %9158 = vmatprep.subr.bf16.mxu1 %v14093_v22  ;;  %v14162_v33 = vld [vmem:[#allocation11 + $0xe1c] ss:$40 sps:$4 sm:$0xff]   ;;  %v14157_v22 = vld [vmem:[#allocation11 + $0xe10] ss:$40 sps:$4 sm:$0xff]  }
 0x3bd   :  { %9373 = vmatprep.subr.bf16.mxu0 %v14096_v23  ;;  %v14160_v23 = vld [vmem:[#allocation11 + $0xe18] ss:$40 sps:$4 sm:$0xff]  }
 0x3bf   :  { %9159 = vmatpush1.bf16.msra.mxu1 %v14091_v59  ;;  %v14165_v59 = vld [vmem:[#allocation11 + $0xe64] ss:$40 sps:$4 sm:$0xff]  }
 0x3c0   :  { %9374 = vmatpush1.bf16.msra.mxu0 %v14094_v24  ;;  %9160 = vmatprep.subr.bf16.mxu1 %v14099_v25  ;;  %v14168_v24 = vld [vmem:[#allocation11 + $0xe6c] ss:$40 sps:$4 sm:$0xff]   ;;  %v14163_v25 = vld [vmem:[#allocation11 + $0xe60] ss:$40 sps:$4 sm:$0xff]  }
 0x3c1   :  { %9375 = vmatprep.subr.bf16.mxu0 %v14102_v44  ;;  %v14166_v44 = vld [vmem:[#allocation11 + $0xe68] ss:$40 sps:$4 sm:$0xff]  }
 0x3c3   :  { %9161 = vmatpush1.bf16.msra.mxu1 %v14097_v34  ;;  %v14171_v34 = vld [vmem:[#allocation11 + $0xeb4] ss:$40 sps:$4 sm:$0xff]  }
 0x3c4   :  { %9376 = vmatpush1.bf16.msra.mxu0 %v14100_v45  ;;  %9162 = vmatprep.subr.bf16.mxu1 %v14105_v30  ;;  %v14174_v45 = vld [vmem:[#allocation11 + $0xebc] ss:$40 sps:$4 sm:$0xff]   ;;  %v14169_v30 = vld [vmem:[#allocation11 + $0xeb0] ss:$40 sps:$4 sm:$0xff]  }
 0x3c5   :  { %9377 = vmatprep.subr.bf16.mxu0 %v14108_v13  ;;  %v14172_v13 = vld [vmem:[#allocation11 + $0xeb8] ss:$40 sps:$4 sm:$0xff]  }
 0x3c7   :  { %9163 = vmatpush1.bf16.msra.mxu1 %v14103_v17  ;;  %v14175_v17 = vld [vmem:[#allocation10 + $0x10] ss:$40 sps:$4 sm:$0xff]  }
 0x3c8   :  { %9378 = vmatpush1.bf16.msra.mxu0 %v14106_v8  ;;  %9164 = vmatprep.subr.bf16.mxu1 %v14111_v38  ;;  %v14178_v8 = vld [vmem:[#allocation11 + $0xf04] ss:$40 sps:$4 sm:$0xff]  }
 0x3c9   :  { %9379 = vmatprep.subr.bf16.mxu0 %v14114_v43  ;;  %v14181_v38 = vld [vmem:[#allocation11 + $0xf0c] ss:$40 sps:$4 sm:$0xff]  }
 0x3ca   :  { %v14184_v43 = vld [vmem:[#allocation10 + $0x1c] ss:$40 sps:$4 sm:$0xff]  }
 0x3cb   :  { %9165 = vmatpush1.bf16.msra.mxu1 %v14109_v39  ;;  %v14176_v39 = vld [vmem:[#allocation11 + $0xf00] ss:$40 sps:$4 sm:$0xff]  }
 0x3cc   :  { %9380 = vmatpush1.bf16.msra.mxu0 %v14112_v61  ;;  %9166 = vmatprep.subr.bf16.mxu1 %v14117_v41  ;;  %v15841_v41 = vmul.bf16 %v14175_v17, %v15822_v35 }
 0x3cd   :  { %9381 = vmatprep.subr.bf16.mxu0 %v14120_v42  ;;  %v14179_v42 = vld [vmem:[#allocation11 + $0xf08] ss:$40 sps:$4 sm:$0xff]  }
 0x3cf   :  { %9167 = vmatpush1.bf16.msra.mxu1 %v14115_v49 }
 0x3d0   :  { %9382 = vmatpush1.bf16.msra.mxu0 %v14118_v40  ;;  %9168 = vmatprep.subr.bf16.mxu1 %v14123_v31  ;;  %v14188_v40 = vld [vmem:[#allocation11 + $0xf54] ss:$40 sps:$4 sm:$0xff]  }
 0x3d1   :  { %9383 = vmatprep.subr.bf16.mxu0 %v14126_v37  ;;  %v15847_v37 = vmul.bf16 %v14184_v43, %v15824_v52  ;;  %v14189_v52 = vld [vmem:[#allocation11 + $0xf58] ss:$40 sps:$4 sm:$0xff]  }
 0x3d2   :  { %v14213_v43 = vld [vmem:[#allocation11 + $0x1098] ss:$40 sps:$4 sm:$0xff]  }
 0x3d3   :  { %9169 = vmatpush1.bf16.msra.mxu1 %v14121_v36  ;;  %v14191_v36 = vld [vmem:[#allocation11 + $0xf5c] ss:$40 sps:$4 sm:$0xff]  }
 0x3d4   :  { %9384 = vmatpush1.bf16.msra.mxu0 %v14124_v32  ;;  %9170 = vmatprep.subr.bf16.mxu1 %v14129_v28  ;;  %v14186_v28 = vld [vmem:[#allocation11 + $0xf50] ss:$40 sps:$4 sm:$0xff]  }
 0x3d5   :  { %9385 = vmatprep.subr.bf16.mxu0 %v14132_v20 }
 0x3d7   :  { %9171 = vmatpush1.bf16.msra.mxu1 %v14127_v46 }
 0x3d8   :  { %9386 = vmatpush1.bf16.msra.mxu0 %v14130_v18  ;;  %9172 = vmatprep.subr.bf16.mxu1 %v14135_v51  ;;  %v14194_v18 = vld [vmem:[#allocation11 + $0xfa4] ss:$40 sps:$4 sm:$0xff]  }
 0x3d9   :  { %9387 = vmatprep.subr.bf16.mxu0 %v14138_v19 }
 0x3db   :  { %9173 = vmatpush1.bf16.msra.mxu1 %v14133_v29  ;;  %v14197_v29 = vld [vmem:[#allocation11 + $0xfac] ss:$40 sps:$4 sm:$0xff]  }
 0x3dc   :  { %9388 = vmatpush1.bf16.msra.mxu0 %v14136_v21  ;;  %9174 = vmatprep.subr.bf16.mxu1 %v14141_v55 }
 0x3dd   :  { %9389 = vmatprep.subr.bf16.mxu0 %v14144_v16  ;;  %v14192_v16 = vld [vmem:[#allocation11 + $0xfa0] ss:$40 sps:$4 sm:$0xff]  }
 0x3df   :  { %9175 = vmatpush1.bf16.msra.mxu1 %v14139_v53  ;;  %v14195_v53 = vld [vmem:[#allocation11 + $0xfa8] ss:$40 sps:$4 sm:$0xff]  }
 0x3e0   :  { %9390 = vmatpush1.bf16.msra.mxu0 %v14142_v47  ;;  %9176 = vmatprep.subr.bf16.mxu1 %v14147_v48  ;;  %v14200_v47 = vld [vmem:[#allocation11 + $0xff4] ss:$40 sps:$4 sm:$0xff]  }
 0x3e1   :  { %9391 = vmatprep.subr.bf16.mxu0 %v14150_v60 }
 0x3e3   :  { %9177 = vmatpush1.bf16.msra.mxu1 %v14145_v3  ;;  %v14203_v3 = vld [vmem:[#allocation11 + $0xffc] ss:$40 sps:$4 sm:$0xff]  }
 0x3e4   :  { %9392 = vmatpush1.bf16.msra.mxu0 %v14148_v62  ;;  %9178 = vmatprep.subr.bf16.mxu1 %v14153_v4 }
 0x3e5   :  { %9393 = vmatprep.subr.bf16.mxu0 %v14156_v6  ;;  %v14198_v6 = vld [vmem:[#allocation11 + $0xff0] ss:$40 sps:$4 sm:$0xff]  }
 0x3e7   :  { %9179 = vmatpush1.bf16.msra.mxu1 %v14151_v9  ;;  %v14201_v9 = vld [vmem:[#allocation11 + $0xff8] ss:$40 sps:$4 sm:$0xff]  }
 0x3e8   :  { %9394 = vmatpush1.bf16.msra.mxu0 %v14154_v10  ;;  %9180 = vmatprep.subr.bf16.mxu1 %v14159_v12  ;;  %v14206_v10 = vld [vmem:[#allocation11 + $0x1044] ss:$40 sps:$4 sm:$0xff]  }
 0x3e9   :  { %9395 = vmatprep.subr.bf16.mxu0 %v14162_v33 }
 0x3eb   :  { %9181 = vmatpush1.bf16.msra.mxu1 %v14157_v22  ;;  %v14209_v22 = vld [vmem:[#allocation11 + $0x104c] ss:$40 sps:$4 sm:$0xff]  }
 0x3ec   :  { %9396 = vmatpush1.bf16.msra.mxu0 %v14160_v23  ;;  %9182 = vmatprep.subr.bf16.mxu1 %v14165_v59 }
 0x3ed   :  { %9397 = vmatprep.subr.bf16.mxu0 %v14168_v24  ;;  %v14204_v24 = vld [vmem:[#allocation11 + $0x1040] ss:$40 sps:$4 sm:$0xff]  }
 0x3ef   :  { %9183 = vmatpush1.bf16.msra.mxu1 %v14163_v25  ;;  %v14207_v25 = vld [vmem:[#allocation11 + $0x1048] ss:$40 sps:$4 sm:$0xff]  }
 0x3f0   :  { %9398 = vmatpush1.bf16.msra.mxu0 %v14166_v44  ;;  %9184 = vmatprep.subr.bf16.mxu1 %v14171_v34  ;;  %v14212_v44 = vld [vmem:[#allocation11 + $0x1094] ss:$40 sps:$4 sm:$0xff]  }
 0x3f1   :  { %9399 = vmatprep.subr.bf16.mxu0 %v14174_v45 }
 0x3f3   :  { %9185 = vmatpush1.bf16.msra.mxu1 %v14169_v30  ;;  %v14215_v30 = vld [vmem:[#allocation11 + $0x109c] ss:$40 sps:$4 sm:$0xff]  }
 0x3f4   :  { %9400 = vmatpush1.bf16.msra.mxu0 %v14172_v13  ;;  %v15838_v61 = vpop.f32.mrb[12].mxu0  ;;  %9197 = vmatprep.subr.bf16.mxu1 %v14178_v8 }
 0x3f5   :  { %v15843_v49 = vpop.f32.mrb[13].mxu0  ;;  %9412 = vmatprep.subr.bf16.mxu0 %v14181_v38  ;;  %v14210_v38 = vld [vmem:[#allocation11 + $0x1090] ss:$40 sps:$4 sm:$0xff]  }
 0x3f6   :  { %v4008_v31 = vpop.f32.mrb[14].mxu0  ;;  %9187 = vmatmul.mubr.bf16.vlgmr.msra.gmra.mrb[8].mxu1 %v15841_v41  ;;  %v4081_v20 = vsel %vm4080_vm1, %v15843_v49, 0.0 }
 0x3f7   :  { %v4073_v32 = vadd.f32 %v4008_v31, %v15838_v61  ;;  %9402 = vmatmul.mubr.bf16.vlgmr.msra.gmra.mrb[16].mxu0 %v15841_v41  ;;  %v15851_v35 = vpop.f32.mrb[15].mxu0  ;;  %9198 = vmatpush1.bf16.msra.mxu1 %v14176_v39  ;;  %v14218_v39 = vld [vmem:[#allocation11 + $0x10e4] ss:$40 sps:$4 sm:$0xff]  }
 0x3f8   :  { %v4082_v46 = vsel %vm4080_vm1, %v15851_v35, 0.0  ;;  %9229 = vmatprep.mubr.bf16.mxu1 %v15847_v37  ;;  %9413 = vmatpush1.bf16.msra.mxu0 %v14179_v42 }
 0x3f9   :  { %v4074_v51 = vrot.slane %v4073_v32, 4  ;;  %v4083_v19 = vadd.f32 %v4082_v46, %v4081_v20  ;;  %9444 = vmatprep.mubr.bf16.mxu0 %v15847_v37  ;;  %9199 = vmatprep.subr.bf16.mxu1 %v14188_v40  ;;  %v14216_v46 = vld [vmem:[#allocation11 + $0x10e0] ss:$40 sps:$4 sm:$0xff]  }
 0x3fa   :  { %9414 = vmatprep.subr.bf16.mxu0 %v14191_v36 }
 0x3fb   :  { %v4075_v21 = vadd.f32 %v4074_v51, %v4073_v32  ;;  %v4084_v55 = vrot.slane %v4083_v19, 4  ;;  %9200 = vmatpush1.bf16.msra.mxu1 %v14186_v28 }
 0x3fc   :  { %9415 = vmatpush1.bf16.msra.mxu0 %v14189_v52  ;;  %9201 = vmatprep.subr.bf16.mxu1 %v14194_v18  ;;  %v14219_v52 = vld [vmem:[#allocation11 + $0x10e8] ss:$40 sps:$4 sm:$0xff]   ;;  %v14224_v18 = vld [vmem:[#allocation11 + $0x1134] ss:$40 sps:$4 sm:$0xff]  }
 0x3fd   :  { %v4076_v48 = vrot.slane %v4075_v21, 2  ;;  %v4085_v60 = vadd.f32 %v4084_v55, %v4083_v19  ;;  %9416 = vmatprep.subr.bf16.mxu0 %v14197_v29  ;;  %v14227_v19 = vld [vmem:[#allocation11 + $0x113c] ss:$40 sps:$4 sm:$0xff]   ;;  %v14222_v55 = vld [vmem:[#allocation11 + $0x1130] ss:$40 sps:$4 sm:$0xff]  }
 0x3ff   :  { %v4077_v62 = vadd.f32 %v4076_v48, %v4075_v21  ;;  %v4086_v4 = vrot.slane %v4085_v60, 2  ;;  %9202 = vmatpush1.bf16.msra.mxu1 %v14192_v16 }
 0x400   :  { %9417 = vmatpush1.bf16.msra.mxu0 %v14195_v53  ;;  %9203 = vmatprep.subr.bf16.mxu1 %v14200_v47  ;;  %v14225_v53 = vld [vmem:[#allocation11 + $0x1138] ss:$40 sps:$4 sm:$0xff]   ;;  %v14230_v47 = vld [vmem:[#allocation11 + $0x1184] ss:$40 sps:$4 sm:$0xff]  }
 0x401   :  { %v4078_v12 = vrot.slane %v4077_v62, 1  ;;  %v4087_v33 = vadd.f32 %v4086_v4, %v4085_v60  ;;  %9418 = vmatprep.subr.bf16.mxu0 %v14203_v3  ;;  %v14233_v60 = vld [vmem:[#allocation11 + $0x118c] ss:$40 sps:$4 sm:$0xff]   ;;  %v14228_v4 = vld [vmem:[#allocation11 + $0x1180] ss:$40 sps:$4 sm:$0xff]  }
 0x403   :  { %v4079_v23 = vadd.f32 %v4078_v12, %v4077_v62  ;;  %v4088_v59 = vrot.slane %v4087_v33, 1  ;;  %9204 = vmatpush1.bf16.msra.mxu1 %v14198_v6 }
 0x404   :  { %9419 = vmatpush1.bf16.msra.mxu0 %v14201_v9  ;;  %9205 = vmatprep.subr.bf16.mxu1 %v14206_v10  ;;  %v14231_v9 = vld [vmem:[#allocation11 + $0x1188] ss:$40 sps:$4 sm:$0xff]   ;;  %v14236_v10 = vld [vmem:[#allocation11 + $0x11d4] ss:$40 sps:$4 sm:$0xff]  }
 0x405   :  { %v4099_v34 = vmul.f32 0.0625, %v4079_v23  ;;  %v4089_v45 = vadd.f32 %v4088_v59, %v4087_v33  ;;  %9420 = vmatprep.subr.bf16.mxu0 %v14209_v22  ;;  %v14239_v33 = vld [vmem:[#allocation11 + $0x11dc] ss:$40 sps:$4 sm:$0xff]   ;;  %v14234_v59 = vld [vmem:[#allocation11 + $0x11d0] ss:$40 sps:$4 sm:$0xff]  }
 0x407   :  { %v15860_v13 = vsub.f32 %v15838_v61, %v4099_v34  ;;  %v15862_v17 = vsub.f32 %v4008_v31, %v4099_v34  ;;  %v4100_v8 = vmul.f32 0.0625, %v4089_v45  ;;  %9206 = vmatpush1.bf16.msra.mxu1 %v14204_v24  ;;  %v14221_v31 = vld [vmem:[#allocation11 + $0x10ec] ss:$40 sps:$4 sm:$0xff]  }
 0x408   :  { %9421 = vmatpush1.bf16.msra.mxu0 %v14207_v25  ;;  %9207 = vmatprep.subr.bf16.mxu1 %v14212_v44  ;;  %v14237_v25 = vld [vmem:[#allocation11 + $0x11d8] ss:$40 sps:$4 sm:$0xff]   ;;  %v14242_v44 = vld [vmem:[#allocation11 + $0x1224] ss:$40 sps:$4 sm:$0xff]  }
 0x409   :  { %v4129_v42 = vmul.f32 %v15860_v13, %v15860_v13  ;;  %v4139_v40 = vmul.f32 %v15862_v17, %v15862_v17  ;;  %v15869_v36 = vsub.f32 %v15843_v49, %v4100_v8  ;;  %v15872_v61 = vsub.f32 %v15851_v35, %v4100_v8  ;;  %9422 = vmatprep.subr.bf16.mxu0 %v14215_v30  ;;  %v14245_v45 = vld [vmem:[#allocation11 + $0x122c] ss:$40 sps:$4 sm:$0xff]  }
 0x40b   :  { %v4197_v32 = vadd.f32 %v4139_v40, %v4129_v42  ;;  %v4130_v28 = vmul.f32 %v15869_v36, %v15869_v36  ;;  %v4140_v20 = vmul.f32 %v15872_v61, %v15872_v61  ;;  %9208 = vmatpush1.bf16.msra.mxu1 %v14210_v38  ;;  %v14240_v38 = vld [vmem:[#allocation11 + $0x1220] ss:$40 sps:$4 sm:$0xff]   ;;  %v14248_v42 = vld [vmem:[#allocation11 + $0x1274] ss:$40 sps:$4 sm:$0xff]  }
 0x40c   :  { %9423 = vmatpush1.bf16.msra.mxu0 %v14213_v43  ;;  %9209 = vmatprep.subr.bf16.mxu1 %v14218_v39  ;;  %v14243_v39 = vld [vmem:[#allocation11 + $0x1228] ss:$40 sps:$4 sm:$0xff]   ;;  %v14251_v40 = vld [vmem:[#allocation11 + $0x127c] ss:$40 sps:$4 sm:$0xff]  }
 0x40d   :  { %v4198_v49 = vrot.slane %v4197_v32, 4  ;;  %v4204_v51 = vsel %vm4080_vm1, %v4130_v28, 0.0  ;;  %v4205_v35 = vsel %vm4080_vm1, %v4140_v20, 0.0  ;;  %9424 = vmatprep.subr.bf16.mxu0 %v14221_v31  ;;  %v14249_v28 = vld [vmem:[#allocation11 + $0x1278] ss:$40 sps:$4 sm:$0xff]  }
 0x40e   :  { %v4206_v29 = vadd.f32 %v4205_v35, %v4204_v51  ;;  %v14254_v20 = vld [vmem:[#allocation11 + $0x12c4] ss:$40 sps:$4 sm:$0xff]   ;;  %v14258_v35 = vld [vmem:[#allocation11 + $0x1310] ss:$40 sps:$4 sm:$0xff]  }
 0x40f   :  { %v4199_v21 = vadd.f32 %v4198_v49, %v4197_v32  ;;  %9210 = vmatpush1.bf16.msra.mxu1 %v14216_v46  ;;  %v14246_v32 = vld [vmem:[#allocation11 + $0x1270] ss:$40 sps:$4 sm:$0xff]   ;;  %v14257_v46 = vld [vmem:[#allocation11 + $0x12cc] ss:$40 sps:$4 sm:$0xff]   ;;  %v14263_v51 = vld [vmem:[#allocation11 + $0x131c] ss:$40 sps:$4 sm:$0xff]  }
 0x410   :  { %v4207_v16 = vrot.slane %v4206_v29, 4  ;;  %9425 = vmatpush1.bf16.msra.mxu0 %v14219_v52  ;;  %9211 = vmatprep.subr.bf16.mxu1 %v14224_v18  ;;  %v14252_v52 = vld [vmem:[#allocation11 + $0x12c0] ss:$40 sps:$4 sm:$0xff]   ;;  %v14260_v49 = vld [vmem:[#allocation11 + $0x1314] ss:$40 sps:$4 sm:$0xff]  }
 0x411   :  { %v4200_v48 = vrot.slane %v4199_v21, 2  ;;  %9426 = vmatprep.subr.bf16.mxu0 %v14227_v19  ;;  %v14255_v18 = vld [vmem:[#allocation11 + $0x12c8] ss:$40 sps:$4 sm:$0xff]   ;;  %v14261_v19 = vld [vmem:[#allocation11 + $0x1318] ss:$40 sps:$4 sm:$0xff]  }
 0x412   :  { %v4208_v3 = vadd.f32 %v4207_v16, %v4206_v29  ;;  %v14266_v29 = vld [vmem:[#allocation11 + $0x1364] ss:$40 sps:$4 sm:$0xff]  }
 0x413   :  { %v4201_v62 = vadd.f32 %v4200_v48, %v4199_v21  ;;  %9212 = vmatpush1.bf16.msra.mxu1 %v14222_v55  ;;  %v14269_v55 = vld [vmem:[#allocation11 + $0x136c] ss:$40 sps:$4 sm:$0xff]   ;;  %v14267_v48 = vld [vmem:[#allocation11 + $0x1368] ss:$40 sps:$4 sm:$0xff]  }
 0x414   :  { %v4209_v6 = vrot.slane %v4208_v3, 2  ;;  %9427 = vmatpush1.bf16.msra.mxu0 %v14225_v53  ;;  %9213 = vmatprep.subr.bf16.mxu1 %v14230_v47  ;;  %v14264_v47 = vld [vmem:[#allocation11 + $0x1360] ss:$40 sps:$4 sm:$0xff]  }
 0x415   :  { %v4202_v12 = vrot.slane %v4201_v62, 1  ;;  %9428 = vmatprep.subr.bf16.mxu0 %v14233_v60  ;;  %v14272_v60 = vld [vmem:[#allocation11 + $0x13b4] ss:$40 sps:$4 sm:$0xff]  }
 0x416   :  { %v4210_v22 = vadd.f32 %v4209_v6, %v4208_v3 }
 0x417   :  { %v4203_v23 = vadd.f32 %v4202_v12, %v4201_v62  ;;  %9214 = vmatpush1.bf16.msra.mxu1 %v14228_v4  ;;  %v14275_v62 = vld [vmem:[#allocation11 + $0x13bc] ss:$40 sps:$4 sm:$0xff]   ;;  %v4016_v12 = vld [vmem:[#allocation8 + $0x8] sm:$0x3] }
 0x418   :  { %v4211_v24 = vrot.slane %v4210_v22, 1  ;;  %9429 = vmatpush1.bf16.msra.mxu0 %v14231_v9  ;;  %9215 = vmatprep.subr.bf16.mxu1 %v14236_v10  ;;  %v4014_v4 = vld [vmem:[#allocation7 + $0x8] sm:$0x3]  ;;  %v14270_v9 = vld [vmem:[#allocation11 + $0x13b0] ss:$40 sps:$4 sm:$0xff]  }
 0x419   :  { %v4221_v34 = vmul.f32 0.0625, %v4203_v23  ;;  %9430 = vmatprep.subr.bf16.mxu0 %v14239_v33  ;;  %v14276_v10 = vld [vmem:[#allocation10 + $0x18] ss:$40 sps:$4 sm:$0xff]   ;;  %v14273_v33 = vld [vmem:[#allocation11 + $0x13b8] ss:$40 sps:$4 sm:$0xff]  }
 0x41a   :  { %v4212_v30 = vadd.f32 %v4211_v24, %v4210_v22  ;;  %v14279_v22 = vld [vmem:[#allocation11 + $0x1404] ss:$40 sps:$4 sm:$0xff]  }
 0x41b   :  { %v4231_v8 = vadd.f32 1e-05, %v4221_v34  ;;  %9216 = vmatpush1.bf16.msra.mxu1 %v14234_v59  ;;  %v14282_v59 = vld [vmem:[#allocation11 + $0x140c] ss:$40 sps:$4 sm:$0xff]   ;;  %v4434_v34 = vrot.slane %v4016_v12, %v15731_v56 }
 0x41c   :  { %v4222_v43 = vmul.f32 0.0625, %v4212_v30  ;;  %9431 = vmatpush1.bf16.msra.mxu0 %v14237_v25  ;;  %9217 = vmatprep.subr.bf16.mxu1 %v14242_v44  ;;  %v4430_v44 = vrot.slane %v4016_v12, %v15741_v63  ;;  %v14277_v30 = vld [vmem:[#allocation11 + $0x1400] ss:$40 sps:$4 sm:$0xff]  }
 0x41d   :  { %9432 = vmatprep.subr.bf16.mxu0 %v14245_v45  ;;  %15125 = vrsqrt.f32 %v4231_v8  ;;  %v15887_v45 = vmul.bf16 %v14276_v10, %v15826_v15  ;;  %v14280_v8 = vld [vmem:[#allocation11 + $0x1408] ss:$40 sps:$4 sm:$0xff]   ;;  %v14310_v12 = vld [vmem:[#allocation11 + $0x1598] ss:$40 sps:$4 sm:$0xff]  }
 0x41e   :  { %v4232_v31 = vadd.f32 1e-05, %v4222_v43  ;;  %v14307_v10 = vld [vmem:[#allocation11 + $0x1590] ss:$40 sps:$4 sm:$0xff]  }
 0x41f   :  { %9218 = vmatpush1.bf16.msra.mxu1 %v14240_v38 }
 0x420   :  { %15127 = vrsqrt.f32 %v4232_v31  ;;  %9433 = vmatpush1.bf16.msra.mxu0 %v14243_v39  ;;  %9219 = vmatprep.subr.bf16.mxu1 %v14248_v42  ;;  %v14288_v31 = vld [vmem:[#allocation11 + $0x145c] ss:$40 sps:$4 sm:$0xff]  }
 0x421   :  { %9434 = vmatprep.subr.bf16.mxu0 %v14251_v40  ;;  %v14285_v40 = vld [vmem:[#allocation11 + $0x1454] ss:$40 sps:$4 sm:$0xff]  }
 0x423   :  { %9220 = vmatpush1.bf16.msra.mxu1 %v14246_v32 }
 0x424   :  { %9435 = vmatpush1.bf16.msra.mxu0 %v14249_v28  ;;  %9221 = vmatprep.subr.bf16.mxu1 %v14254_v20 }
 0x425   :  { %9436 = vmatprep.subr.bf16.mxu0 %v14257_v46  ;;  %v14182_v46 = vld [vmem:[#allocation10 + $0x24] ss:$40 sps:$4 sm:$0xff]  }
 0x427   :  { %9222 = vmatpush1.bf16.msra.mxu1 %v14252_v52  ;;  %v15126_v21 = vpop.eup %15125  ;;  %v14291_v52 = vld [vmem:[#allocation11 + $0x14a4] ss:$40 sps:$4 sm:$0xff]  }
 0x428   :  { %9437 = vmatpush1.bf16.msra.mxu0 %v14255_v18  ;;  %9223 = vmatprep.subr.bf16.mxu1 %v14260_v49 }
 0x429   :  { %9438 = vmatprep.subr.bf16.mxu0 %v14263_v51  ;;  %v14294_v51 = vld [vmem:[#allocation11 + $0x14ac] ss:$40 sps:$4 sm:$0xff]  }
 0x42a   :  { %v15128_v16 = vpop.eup %15127 }
 0x42b   :  { %v4302_v53 = vcombine.low %v15126_v21, %v15128_v16  ;;  %9224 = vmatpush1.bf16.msra.mxu1 %v14258_v35  ;;  %v14292_v21 = vld [vmem:[#allocation11 + $0x14a8] ss:$40 sps:$4 sm:$0xff]   ;;  %v14297_v16 = vld [vmem:[#allocation11 + $0x14f4] ss:$40 sps:$4 sm:$0xff]  }
 0x42c   :  { %9439 = vmatpush1.bf16.msra.mxu0 %v14261_v19  ;;  %9225 = vmatprep.subr.bf16.mxu1 %v14266_v29  ;;  %v14289_v29 = vld [vmem:[#allocation11 + $0x14a0] ss:$40 sps:$4 sm:$0xff]  }
 0x42d   :  { %v4309_v3 = vrot.slane %v4302_v53, %v15681_v54  ;;  %9440 = vmatprep.subr.bf16.mxu0 %v14269_v55  ;;  %v14300_v53 = vld [vmem:[#allocation11 + $0x14fc] ss:$40 sps:$4 sm:$0xff]  }
 0x42f   :  { %v4316_v6 = vrot.slane %v4309_v3, %v15681_v54  ;;  %9226 = vmatpush1.bf16.msra.mxu1 %v14264_v47  ;;  %v14295_v47 = vld [vmem:[#allocation11 + $0x14f0] ss:$40 sps:$4 sm:$0xff]   ;;  %v14306_v3 = vld [vmem:[#allocation11 + $0x154c] ss:$40 sps:$4 sm:$0xff]  }
 0x430   :  { %9441 = vmatpush1.bf16.msra.mxu0 %v14267_v48  ;;  %9227 = vmatprep.subr.bf16.mxu1 %v14272_v60  ;;  %v14298_v48 = vld [vmem:[#allocation11 + $0x14f8] ss:$40 sps:$4 sm:$0xff]   ;;  %v14303_v60 = vld [vmem:[#allocation11 + $0x1544] ss:$40 sps:$4 sm:$0xff]  }
 0x431   :  { %v4320_v23 = vmul.f32 %v4316_v6, %v4014_v4  ;;  %9442 = vmatprep.subr.bf16.mxu0 %v14275_v62  ;;  %v14301_v62 = vld [vmem:[#allocation11 + $0x1540] ss:$40 sps:$4 sm:$0xff]   ;;  %v14309_v6 = vld [vmem:[#allocation11 + $0x1594] ss:$40 sps:$4 sm:$0xff]  }
 0x432   :  { %v14304_v4 = vld [vmem:[#allocation11 + $0x1548] ss:$40 sps:$4 sm:$0xff]  }
 0x433   :  { %v4358_v24 = vrot.slane %v4320_v23, %v15741_v63  ;;  %v4362_v25 = vrot.slane %v4320_v23, %v15731_v56  ;;  %9228 = vmatpush1.bf16.msra.mxu1 %v14270_v9  ;;  %v14312_v9 = vld [vmem:[#allocation11 + $0x159c] ss:$40 sps:$4 sm:$0xff]   ;;  %v14313_v23 = vld [vmem:[#allocation11 + $0x15e0] ss:$40 sps:$4 sm:$0xff]  }
 0x434   :  { %9443 = vmatpush1.bf16.msra.mxu0 %v14273_v33  ;;  %9240 = vmatprep.subr.bf16.mxu1 %v14279_v22  ;;  %v14315_v33 = vld [vmem:[#allocation11 + $0x15e4] ss:$40 sps:$4 sm:$0xff]  }
 0x435   :  { %v4381_v38 = vmul.f32 %v4358_v24, %v15860_v13  ;;  %v4382_v43 = vmul.f32 %v4362_v25, %v15869_v36  ;;  %v4391_v39 = vmul.f32 %v4358_v24, %v15862_v17  ;;  %v4392_v42 = vmul.f32 %v4362_v25, %v15872_v61  ;;  %9455 = vmatprep.subr.bf16.mxu0 %v14282_v59  ;;  %v14283_v13 = vld [vmem:[#allocation11 + $0x1450] ss:$40 sps:$4 sm:$0xff]   ;;  %v14318_v22 = vld [vmem:[#allocation11 + $0x15ec] ss:$40 sps:$4 sm:$0xff]   ;;  %v14324_v25 = vld [vmem:[#allocation11 + $0x163c] ss:$40 sps:$4 sm:$0xff]  }
 0x436   :  { %9230 = vmatmul.mubr.bf16.vlgmr.msra.gmra.mrb[8].mxu1 %v15887_v45  ;;  %v14286_v36 = vld [vmem:[#allocation11 + $0x1458] ss:$40 sps:$4 sm:$0xff]   ;;  %v14316_v59 = vld [vmem:[#allocation11 + $0x15e8] ss:$40 sps:$4 sm:$0xff]   ;;  %v14321_v24 = vld [vmem:[#allocation11 + $0x1634] ss:$40 sps:$4 sm:$0xff]  }
 0x437   :  { %v4453_v32 = vadd.f32 %v4430_v44, %v4381_v38  ;;  %v4454_v28 = vadd.f32 %v4434_v34, %v4382_v43  ;;  %v4463_v15 = vadd.f32 %v4430_v44, %v4391_v39  ;;  %v4464_v20 = vadd.f32 %v4434_v34, %v4392_v42  ;;  %9445 = vmatmul.mubr.bf16.vlgmr.msra.gmra.mrb[16].mxu0 %v15887_v45  ;;  %v14319_v44 = vld [vmem:[#allocation11 + $0x1630] ss:$40 sps:$4 sm:$0xff]   ;;  %v14325_v38 = vld [vmem:[#allocation11 + $0x1680] ss:$40 sps:$4 sm:$0xff]   ;;  %v14333_v39 = vld [vmem:[#allocation11 + $0x16d4] ss:$40 sps:$4 sm:$0xff]  }
 0x438   :  { %9241 = vmatpush1.bf16.msra.mxu1 %v14277_v30  ;;  %9456 = vmatpush1.bf16.msra.mxu0 %v14280_v8  ;;  %v14322_v34 = vld [vmem:[#allocation11 + $0x1638] ss:$40 sps:$4 sm:$0xff]   ;;  %v14327_v30 = vld [vmem:[#allocation11 + $0x1684] ss:$40 sps:$4 sm:$0xff]   ;;  %v14328_v43 = vld [vmem:[#allocation11 + $0x1688] ss:$40 sps:$4 sm:$0xff]  }
 0x439   :  { %v4473_v17 = vmax.f32 %v4453_v32, 0.0  ;;  %v4474_v18 = vmax.f32 %v4454_v28, 0.0  ;;  %v4483_v61 = vmax.f32 %v4463_v15, 0.0  ;;  %v4484_v49 = vmax.f32 %v4464_v20, 0.0  ;;  %9242 = vmatprep.subr.bf16.mxu1 %v14285_v40  ;;  %9457 = vmatprep.subr.bf16.mxu0 %v14288_v31  ;;  %v14330_v8 = vld [vmem:[#allocation11 + $0x168c] ss:$40 sps:$4 sm:$0xff]  }
 0x43a   :  { %v14336_v42 = vld [vmem:[#allocation11 + $0x16dc] ss:$40 sps:$4 sm:$0xff]   ;;  %v14331_v40 = vld [vmem:[#allocation11 + $0x16d0] ss:$40 sps:$4 sm:$0xff]   ;;  %v14342_v28 = vld [vmem:[#allocation11 + $0x172c] ss:$40 sps:$4 sm:$0xff]  }
 0x43b   :  { %v4494_v35 = vpack.c.bf16 %v4484_v49, %v4474_v18  ;;  %v15895_v19 = vpack.c.bf16 %v4483_v61, %v4473_v17  ;;  %v14334_v31 = vld [vmem:[#allocation11 + $0x16d8] ss:$40 sps:$4 sm:$0xff]   ;;  %v14339_v32 = vld [vmem:[#allocation11 + $0x1724] ss:$40 sps:$4 sm:$0xff]   ;;  %v14340_v20 = vld [vmem:[#allocation11 + $0x1728] ss:$40 sps:$4 sm:$0xff]  }
 0x43c   :  { %9243 = vmatpush1.bf16.msra.mxu1 %v14283_v13  ;;  %9458 = vmatpush1.bf16.msra.mxu0 %v14286_v36  ;;  %v14337_v15 = vld [vmem:[#allocation11 + $0x1720] ss:$40 sps:$4 sm:$0xff]   ;;  %v14346_v13 = vld [vmem:[#allocation11 + $0x14] ss:$40 sps:$4 sm:$0xff]   ;;  %v14352_v61 = vld [vmem:[#allocation11 + $0x64] ss:$40 sps:$4 sm:$0xff]  }
 0x43d   :  { %v15897_v55 = vmul.bf16 %v14182_v46, %v4494_v35  ;;  %9244 = vmatprep.subr.bf16.mxu1 %v14291_v52  ;;  %9459 = vmatprep.subr.bf16.mxu0 %v14294_v51  ;;  %v14343_v46 = vld [vmem:[#allocation10 + $0x20] ss:$40 sps:$4 sm:$0xff]   ;;  %v14349_v36 = vld [vmem:[#allocation11 + $0x1c] ss:$40 sps:$4 sm:$0xff]   ;;  %v14355_v49 = vld [vmem:[#allocation11 + $0x6c] ss:$40 sps:$4 sm:$0xff]  }
 0x43e   :  { %v14344_v52 = vld [vmem:[#allocation11 + $0x10] ss:$40 sps:$4 sm:$0xff]   ;;  %v15904_v17 = vmul.bf16 %v14343_v46, %v15895_v19  ;;  %v14350_v51 = vld [vmem:[#allocation11 + $0x60] ss:$40 sps:$4 sm:$0xff]   ;;  %v14361_v19 = vld [vmem:[#allocation11 + $0xbc] ss:$40 sps:$4 sm:$0xff]  }
 0x43f   :  { %12795 = vmatprep.mubr.msk.bf16.mxu1 %vm4080_vm1, %v15897_v55  ;;  %12796 = vmatprep.mubr.msk.bf16.mxu0 %vm4080_vm1, %v15897_v55  ;;  %v14347_v18 = vld [vmem:[#allocation11 + $0x18] ss:$40 sps:$4 sm:$0xff]   ;;  %v14353_v35 = vld [vmem:[#allocation11 + $0x68] ss:$40 sps:$4 sm:$0xff]  }
 0x440   :  { %9245 = vmatpush1.bf16.msra.mxu1 %v14289_v29  ;;  %9460 = vmatpush1.bf16.msra.mxu0 %v14292_v21  ;;  %v14358_v29 = vld [vmem:[#allocation11 + $0xb4] ss:$40 sps:$4 sm:$0xff]   ;;  %v14356_v21 = vld [vmem:[#allocation11 + $0xb0] ss:$40 sps:$4 sm:$0xff]  }
 0x441   :  { %9246 = vmatprep.subr.bf16.mxu1 %v14297_v16  ;;  %9461 = vmatprep.subr.bf16.mxu0 %v14300_v53  ;;  %v14359_v16 = vld [vmem:[#allocation11 + $0xb8] ss:$40 sps:$4 sm:$0xff]   ;;  %v14364_v53 = vld [vmem:[#allocation11 + $0x104] ss:$40 sps:$4 sm:$0xff]  }
 0x442   :  { %v14407_v46 = vld [vmem:[#allocation11 + $0x338] ss:$40 sps:$4 sm:$0xff]  }
 0x444   :  { %9247 = vmatpush1.bf16.msra.mxu1 %v14295_v47  ;;  %9462 = vmatpush1.bf16.msra.mxu0 %v14298_v48  ;;  %v14367_v47 = vld [vmem:[#allocation11 + $0x10c] ss:$40 sps:$4 sm:$0xff]   ;;  %v14362_v48 = vld [vmem:[#allocation11 + $0x100] ss:$40 sps:$4 sm:$0xff]  }
 0x445   :  { %9248 = vmatprep.subr.bf16.mxu1 %v14303_v60  ;;  %9463 = vmatprep.subr.bf16.mxu0 %v14306_v3  ;;  %v14365_v60 = vld [vmem:[#allocation11 + $0x108] ss:$40 sps:$4 sm:$0xff]   ;;  %v14370_v3 = vld [vmem:[#allocation11 + $0x154] ss:$40 sps:$4 sm:$0xff]  }
 0x448   :  { %9249 = vmatpush1.bf16.msra.mxu1 %v14301_v62  ;;  %9464 = vmatpush1.bf16.msra.mxu0 %v14304_v4  ;;  %v14373_v62 = vld [vmem:[#allocation11 + $0x15c] ss:$40 sps:$4 sm:$0xff]   ;;  %v14368_v4 = vld [vmem:[#allocation11 + $0x150] ss:$40 sps:$4 sm:$0xff]  }
 0x449   :  { %9250 = vmatprep.subr.bf16.mxu1 %v14309_v6  ;;  %9465 = vmatprep.subr.bf16.mxu0 %v14312_v9  ;;  %v14371_v6 = vld [vmem:[#allocation11 + $0x158] ss:$40 sps:$4 sm:$0xff]   ;;  %v14376_v9 = vld [vmem:[#allocation11 + $0x1a4] ss:$40 sps:$4 sm:$0xff]  }
 0x44c   :  { %9251 = vmatpush1.bf16.msra.mxu1 %v14307_v10  ;;  %9466 = vmatpush1.bf16.msra.mxu0 %v14310_v12  ;;  %v14379_v10 = vld [vmem:[#allocation11 + $0x1ac] ss:$40 sps:$4 sm:$0xff]   ;;  %v14374_v12 = vld [vmem:[#allocation11 + $0x1a0] ss:$40 sps:$4 sm:$0xff]  }
 0x44d   :  { %9252 = vmatprep.subr.bf16.mxu1 %v14315_v33  ;;  %9467 = vmatprep.subr.bf16.mxu0 %v14318_v22  ;;  %v14377_v33 = vld [vmem:[#allocation11 + $0x1a8] ss:$40 sps:$4 sm:$0xff]   ;;  %v14382_v22 = vld [vmem:[#allocation11 + $0x1f4] ss:$40 sps:$4 sm:$0xff]  }
 0x450   :  { %9253 = vmatpush1.bf16.msra.mxu1 %v14313_v23  ;;  %9468 = vmatpush1.bf16.msra.mxu0 %v14316_v59  ;;  %v14385_v23 = vld [vmem:[#allocation11 + $0x1fc] ss:$40 sps:$4 sm:$0xff]   ;;  %v14380_v59 = vld [vmem:[#allocation11 + $0x1f0] ss:$40 sps:$4 sm:$0xff]  }
 0x451   :  { %9254 = vmatprep.subr.bf16.mxu1 %v14321_v24  ;;  %9469 = vmatprep.subr.bf16.mxu0 %v14324_v25  ;;  %v14383_v24 = vld [vmem:[#allocation11 + $0x1f8] ss:$40 sps:$4 sm:$0xff]   ;;  %v14388_v25 = vld [vmem:[#allocation11 + $0x244] ss:$40 sps:$4 sm:$0xff]  }
 0x454   :  { %9255 = vmatpush1.bf16.msra.mxu1 %v14319_v44  ;;  %9470 = vmatpush1.bf16.msra.mxu0 %v14322_v34  ;;  %v14391_v44 = vld [vmem:[#allocation11 + $0x24c] ss:$40 sps:$4 sm:$0xff]   ;;  %v14386_v34 = vld [vmem:[#allocation11 + $0x240] ss:$40 sps:$4 sm:$0xff]  }
 0x455   :  { %9256 = vmatprep.subr.bf16.mxu1 %v14327_v30  ;;  %9471 = vmatprep.subr.bf16.mxu0 %v14330_v8  ;;  %v14389_v30 = vld [vmem:[#allocation11 + $0x248] ss:$40 sps:$4 sm:$0xff]   ;;  %v14394_v8 = vld [vmem:[#allocation11 + $0x294] ss:$40 sps:$4 sm:$0xff]  }
 0x458   :  { %9257 = vmatpush1.bf16.msra.mxu1 %v14325_v38  ;;  %9472 = vmatpush1.bf16.msra.mxu0 %v14328_v43  ;;  %v14397_v38 = vld [vmem:[#allocation11 + $0x29c] ss:$40 sps:$4 sm:$0xff]   ;;  %v14392_v43 = vld [vmem:[#allocation11 + $0x290] ss:$40 sps:$4 sm:$0xff]  }
 0x459   :  { %9258 = vmatprep.subr.bf16.mxu1 %v14333_v39  ;;  %9473 = vmatprep.subr.bf16.mxu0 %v14336_v42  ;;  %v14395_v39 = vld [vmem:[#allocation11 + $0x298] ss:$40 sps:$4 sm:$0xff]   ;;  %v14400_v42 = vld [vmem:[#allocation11 + $0x2e4] ss:$40 sps:$4 sm:$0xff]  }
 0x45c   :  { %9259 = vmatpush1.bf16.msra.mxu1 %v14331_v40  ;;  %9474 = vmatpush1.bf16.msra.mxu0 %v14334_v31  ;;  %v14403_v40 = vld [vmem:[#allocation11 + $0x2ec] ss:$40 sps:$4 sm:$0xff]   ;;  %v14398_v31 = vld [vmem:[#allocation11 + $0x2e0] ss:$40 sps:$4 sm:$0xff]  }
 0x45d   :  { %9260 = vmatprep.subr.bf16.mxu1 %v14339_v32  ;;  %9475 = vmatprep.subr.bf16.mxu0 %v14342_v28  ;;  %v14401_v32 = vld [vmem:[#allocation11 + $0x2e8] ss:$40 sps:$4 sm:$0xff]   ;;  %v14406_v28 = vld [vmem:[#allocation11 + $0x334] ss:$40 sps:$4 sm:$0xff]  }
 0x460   :  { %9261 = vmatpush1.bf16.msra.mxu1 %v14337_v15  ;;  %9476 = vmatpush1.bf16.msra.mxu0 %v14340_v20  ;;  %v14409_v15 = vld [vmem:[#allocation11 + $0x33c] ss:$40 sps:$4 sm:$0xff]   ;;  %v14404_v20 = vld [vmem:[#allocation11 + $0x330] ss:$40 sps:$4 sm:$0xff]  }
 0x461   :  { %9498 = vmatprep.subr.bf16.mxu1 %v14346_v13  ;;  %9713 = vmatprep.subr.bf16.mxu0 %v14349_v36  ;;  %v14412_v13 = vld [vmem:[#allocation11 + $0x384] ss:$40 sps:$4 sm:$0xff]  }
 0x462   :  { %v14415_v36 = vld [vmem:[#allocation11 + $0x38c] ss:$40 sps:$4 sm:$0xff]  }
 0x463   :  { %9273 = vmatmul.mubr.bf16.vlgmr.msra.gmra.mrb[8].mxu1 %v15904_v17  ;;  %9488 = vmatmul.mubr.bf16.vlgmr.msra.gmra.mrb[16].mxu0 %v15904_v17 }
 0x464   :  { %9499 = vmatpush1.bf16.msra.mxu1 %v14344_v52  ;;  %9530 = vmatprep.mubr.bf16.mxu1 %v15796_v11  ;;  %v14410_v52 = vld [vmem:[#allocation11 + $0x380] ss:$40 sps:$4 sm:$0xff]  }
 0x465   :  { %9714 = vmatpush1.bf16.msra.mxu0 %v14347_v18  ;;  %9745 = vmatprep.mubr.bf16.mxu0 %v15796_v11  ;;  %v14413_v18 = vld [vmem:[#allocation11 + $0x388] ss:$40 sps:$4 sm:$0xff]  }
 0x466   :  { %9500 = vmatprep.subr.bf16.mxu1 %v14352_v61  ;;  %9715 = vmatprep.subr.bf16.mxu0 %v14355_v49  ;;  %v14418_v61 = vld [vmem:[#allocation11 + $0x3d4] ss:$40 sps:$4 sm:$0xff]  }
 0x467   :  { %v14421_v49 = vld [vmem:[#allocation11 + $0x3dc] ss:$40 sps:$4 sm:$0xff]  }
 0x468   :  { %9501 = vmatpush1.bf16.msra.mxu1 %v14350_v51  ;;  %v14416_v51 = vld [vmem:[#allocation11 + $0x3d0] ss:$40 sps:$4 sm:$0xff]  }
 0x469   :  { %9716 = vmatpush1.bf16.msra.mxu0 %v14353_v35  ;;  %9502 = vmatprep.subr.bf16.mxu1 %v14358_v29  ;;  %v14419_v35 = vld [vmem:[#allocation11 + $0x3d8] ss:$40 sps:$4 sm:$0xff]   ;;  %v14424_v29 = vld [vmem:[#allocation11 + $0x424] ss:$40 sps:$4 sm:$0xff]  }
 0x46a   :  { %9717 = vmatprep.subr.bf16.mxu0 %v14361_v19  ;;  %v14427_v19 = vld [vmem:[#allocation11 + $0x42c] ss:$40 sps:$4 sm:$0xff]  }
 0x46c   :  { %9503 = vmatpush1.bf16.msra.mxu1 %v14356_v21  ;;  %v14422_v21 = vld [vmem:[#allocation11 + $0x420] ss:$40 sps:$4 sm:$0xff]  }
 0x46d   :  { %9718 = vmatpush1.bf16.msra.mxu0 %v14359_v16  ;;  %9504 = vmatprep.subr.bf16.mxu1 %v14364_v53  ;;  %v14425_v16 = vld [vmem:[#allocation11 + $0x428] ss:$40 sps:$4 sm:$0xff]   ;;  %v14430_v53 = vld [vmem:[#allocation11 + $0x474] ss:$40 sps:$4 sm:$0xff]  }
 0x46e   :  { %9719 = vmatprep.subr.bf16.mxu0 %v14367_v47  ;;  %v14433_v47 = vld [vmem:[#allocation11 + $0x47c] ss:$40 sps:$4 sm:$0xff]  }
 0x470   :  { %9505 = vmatpush1.bf16.msra.mxu1 %v14362_v48  ;;  %v14428_v48 = vld [vmem:[#allocation11 + $0x470] ss:$40 sps:$4 sm:$0xff]  }
 0x471   :  { %9720 = vmatpush1.bf16.msra.mxu0 %v14365_v60  ;;  %9506 = vmatprep.subr.bf16.mxu1 %v14370_v3  ;;  %v14431_v60 = vld [vmem:[#allocation11 + $0x478] ss:$40 sps:$4 sm:$0xff]   ;;  %v14436_v3 = vld [vmem:[#allocation11 + $0x4c4] ss:$40 sps:$4 sm:$0xff]  }
 0x472   :  { %9721 = vmatprep.subr.bf16.mxu0 %v14373_v62  ;;  %v14439_v62 = vld [vmem:[#allocation11 + $0x4cc] ss:$40 sps:$4 sm:$0xff]  }
 0x474   :  { %9507 = vmatpush1.bf16.msra.mxu1 %v14368_v4  ;;  %v14434_v4 = vld [vmem:[#allocation11 + $0x4c0] ss:$40 sps:$4 sm:$0xff]  }
 0x475   :  { %9722 = vmatpush1.bf16.msra.mxu0 %v14371_v6  ;;  %9508 = vmatprep.subr.bf16.mxu1 %v14376_v9  ;;  %v14437_v6 = vld [vmem:[#allocation11 + $0x4c8] ss:$40 sps:$4 sm:$0xff]   ;;  %v14442_v9 = vld [vmem:[#allocation11 + $0x514] ss:$40 sps:$4 sm:$0xff]  }
 0x476   :  { %9723 = vmatprep.subr.bf16.mxu0 %v14379_v10  ;;  %v14445_v10 = vld [vmem:[#allocation11 + $0x51c] ss:$40 sps:$4 sm:$0xff]  }
 0x478   :  { %9509 = vmatpush1.bf16.msra.mxu1 %v14374_v12  ;;  %v14440_v12 = vld [vmem:[#allocation11 + $0x510] ss:$40 sps:$4 sm:$0xff]  }
 0x479   :  { %9724 = vmatpush1.bf16.msra.mxu0 %v14377_v33  ;;  %9510 = vmatprep.subr.bf16.mxu1 %v14382_v22  ;;  %v14443_v33 = vld [vmem:[#allocation11 + $0x518] ss:$40 sps:$4 sm:$0xff]   ;;  %v14448_v22 = vld [vmem:[#allocation11 + $0x564] ss:$40 sps:$4 sm:$0xff]  }
 0x47a   :  { %9725 = vmatprep.subr.bf16.mxu0 %v14385_v23  ;;  %v14451_v23 = vld [vmem:[#allocation11 + $0x56c] ss:$40 sps:$4 sm:$0xff]  }
 0x47c   :  { %9511 = vmatpush1.bf16.msra.mxu1 %v14380_v59  ;;  %v14446_v59 = vld [vmem:[#allocation11 + $0x560] ss:$40 sps:$4 sm:$0xff]  }
 0x47d   :  { %9726 = vmatpush1.bf16.msra.mxu0 %v14383_v24  ;;  %9512 = vmatprep.subr.bf16.mxu1 %v14388_v25  ;;  %v14449_v24 = vld [vmem:[#allocation11 + $0x568] ss:$40 sps:$4 sm:$0xff]   ;;  %v14454_v25 = vld [vmem:[#allocation11 + $0x5b4] ss:$40 sps:$4 sm:$0xff]  }
 0x47e   :  { %9727 = vmatprep.subr.bf16.mxu0 %v14391_v44  ;;  %v14457_v44 = vld [vmem:[#allocation11 + $0x5bc] ss:$40 sps:$4 sm:$0xff]  }
 0x480   :  { %9513 = vmatpush1.bf16.msra.mxu1 %v14386_v34  ;;  %v14452_v34 = vld [vmem:[#allocation11 + $0x5b0] ss:$40 sps:$4 sm:$0xff]  }
 0x481   :  { %9728 = vmatpush1.bf16.msra.mxu0 %v14389_v30  ;;  %9514 = vmatprep.subr.bf16.mxu1 %v14394_v8  ;;  %v14455_v30 = vld [vmem:[#allocation11 + $0x5b8] ss:$40 sps:$4 sm:$0xff]   ;;  %v14460_v8 = vld [vmem:[#allocation11 + $0x604] ss:$40 sps:$4 sm:$0xff]  }
 0x482   :  { %9729 = vmatprep.subr.bf16.mxu0 %v14397_v38  ;;  %v14463_v38 = vld [vmem:[#allocation11 + $0x60c] ss:$40 sps:$4 sm:$0xff]  }
 0x484   :  { %9515 = vmatpush1.bf16.msra.mxu1 %v14392_v43  ;;  %v14458_v43 = vld [vmem:[#allocation11 + $0x600] ss:$40 sps:$4 sm:$0xff]  }
 0x485   :  { %9730 = vmatpush1.bf16.msra.mxu0 %v14395_v39  ;;  %9516 = vmatprep.subr.bf16.mxu1 %v14400_v42  ;;  %v14461_v39 = vld [vmem:[#allocation11 + $0x608] ss:$40 sps:$4 sm:$0xff]   ;;  %v14466_v42 = vld [vmem:[#allocation11 + $0x654] ss:$40 sps:$4 sm:$0xff]  }
 0x486   :  { %9731 = vmatprep.subr.bf16.mxu0 %v14403_v40  ;;  %v14469_v40 = vld [vmem:[#allocation11 + $0x65c] ss:$40 sps:$4 sm:$0xff]  }
 0x488   :  { %9517 = vmatpush1.bf16.msra.mxu1 %v14398_v31  ;;  %v14464_v31 = vld [vmem:[#allocation11 + $0x650] ss:$40 sps:$4 sm:$0xff]  }
 0x489   :  { %9732 = vmatpush1.bf16.msra.mxu0 %v14401_v32  ;;  %9518 = vmatprep.subr.bf16.mxu1 %v14406_v28  ;;  %v14467_v32 = vld [vmem:[#allocation11 + $0x658] ss:$40 sps:$4 sm:$0xff]   ;;  %v14472_v28 = vld [vmem:[#allocation11 + $0x6a4] ss:$40 sps:$4 sm:$0xff]  }
 0x48a   :  { %9733 = vmatprep.subr.bf16.mxu0 %v14409_v15  ;;  %v14475_v15 = vld [vmem:[#allocation11 + $0x6ac] ss:$40 sps:$4 sm:$0xff]  }
 0x48c   :  { %9519 = vmatpush1.bf16.msra.mxu1 %v14404_v20  ;;  %v14470_v20 = vld [vmem:[#allocation11 + $0x6a0] ss:$40 sps:$4 sm:$0xff]  }
 0x48d   :  { %9734 = vmatpush1.bf16.msra.mxu0 %v14407_v46  ;;  %9520 = vmatprep.subr.bf16.mxu1 %v14412_v13  ;;  %v14473_v46 = vld [vmem:[#allocation11 + $0x6a8] ss:$40 sps:$4 sm:$0xff]   ;;  %v14478_v13 = vld [vmem:[#allocation11 + $0x6f4] ss:$40 sps:$4 sm:$0xff]  }
 0x48e   :  { %9735 = vmatprep.subr.bf16.mxu0 %v14415_v36  ;;  %v14481_v36 = vld [vmem:[#allocation11 + $0x6fc] ss:$40 sps:$4 sm:$0xff]  }
 0x490   :  { %9521 = vmatpush1.bf16.msra.mxu1 %v14410_v52  ;;  %v14476_v52 = vld [vmem:[#allocation11 + $0x6f0] ss:$40 sps:$4 sm:$0xff]  }
 0x491   :  { %9736 = vmatpush1.bf16.msra.mxu0 %v14413_v18  ;;  %9522 = vmatprep.subr.bf16.mxu1 %v14418_v61  ;;  %v14479_v18 = vld [vmem:[#allocation11 + $0x6f8] ss:$40 sps:$4 sm:$0xff]   ;;  %v14484_v61 = vld [vmem:[#allocation11 + $0x744] ss:$40 sps:$4 sm:$0xff]  }
 0x492   :  { %9737 = vmatprep.subr.bf16.mxu0 %v14421_v49  ;;  %v14487_v49 = vld [vmem:[#allocation11 + $0x74c] ss:$40 sps:$4 sm:$0xff]  }
 0x494   :  { %9523 = vmatpush1.bf16.msra.mxu1 %v14416_v51  ;;  %v14482_v51 = vld [vmem:[#allocation11 + $0x740] ss:$40 sps:$4 sm:$0xff]  }
 0x495   :  { %9738 = vmatpush1.bf16.msra.mxu0 %v14419_v35  ;;  %9524 = vmatprep.subr.bf16.mxu1 %v14424_v29  ;;  %v14485_v35 = vld [vmem:[#allocation11 + $0x748] ss:$40 sps:$4 sm:$0xff]   ;;  %v14490_v29 = vld [vmem:[#allocation11 + $0x794] ss:$40 sps:$4 sm:$0xff]  }
 0x496   :  { %9739 = vmatprep.subr.bf16.mxu0 %v14427_v19  ;;  %v14493_v19 = vld [vmem:[#allocation11 + $0x79c] ss:$40 sps:$4 sm:$0xff]  }
 0x498   :  { %9525 = vmatpush1.bf16.msra.mxu1 %v14422_v21  ;;  %v14488_v21 = vld [vmem:[#allocation11 + $0x790] ss:$40 sps:$4 sm:$0xff]  }
 0x499   :  { %9740 = vmatpush1.bf16.msra.mxu0 %v14425_v16  ;;  %9526 = vmatprep.subr.bf16.mxu1 %v14430_v53  ;;  %v14491_v16 = vld [vmem:[#allocation11 + $0x798] ss:$40 sps:$4 sm:$0xff]   ;;  %v14496_v53 = vld [vmem:[#allocation11 + $0x7e4] ss:$40 sps:$4 sm:$0xff]  }
 0x49a   :  { %9741 = vmatprep.subr.bf16.mxu0 %v14433_v47  ;;  %v14499_v47 = vld [vmem:[#allocation11 + $0x7ec] ss:$40 sps:$4 sm:$0xff]  }
 0x49c   :  { %9527 = vmatpush1.bf16.msra.mxu1 %v14428_v48  ;;  %v14494_v48 = vld [vmem:[#allocation11 + $0x7e0] ss:$40 sps:$4 sm:$0xff]  }
 0x49d   :  { %9742 = vmatpush1.bf16.msra.mxu0 %v14431_v60  ;;  %9528 = vmatprep.subr.bf16.mxu1 %v14436_v3  ;;  %v14497_v60 = vld [vmem:[#allocation11 + $0x7e8] ss:$40 sps:$4 sm:$0xff]   ;;  %v14502_v3 = vld [vmem:[#allocation11 + $0x834] ss:$40 sps:$4 sm:$0xff]  }
 0x49e   :  { %9743 = vmatprep.subr.bf16.mxu0 %v14439_v62  ;;  %v14505_v62 = vld [vmem:[#allocation11 + $0x83c] ss:$40 sps:$4 sm:$0xff]  }
 0x4a0   :  { %9529 = vmatpush1.bf16.msra.mxu1 %v14434_v4  ;;  %v14500_v4 = vld [vmem:[#allocation11 + $0x830] ss:$40 sps:$4 sm:$0xff]  }
 0x4a1   :  { %9744 = vmatpush1.bf16.msra.mxu0 %v14437_v6  ;;  %9541 = vmatprep.subr.bf16.mxu1 %v14442_v9  ;;  %v14503_v6 = vld [vmem:[#allocation11 + $0x838] ss:$40 sps:$4 sm:$0xff]   ;;  %v14508_v9 = vld [vmem:[#allocation11 + $0x884] ss:$40 sps:$4 sm:$0xff]  }
 0x4a2   :  { %9756 = vmatprep.subr.bf16.mxu0 %v14445_v10  ;;  %v14511_v10 = vld [vmem:[#allocation11 + $0x88c] ss:$40 sps:$4 sm:$0xff]  }
 0x4a3   :  { %9531 = vmatmul.mubr.bf16.vlgmr.msra.gmra.mrb[12].mxu1 %v15800_v26 }
 0x4a4   :  { %9746 = vmatmul.mubr.bf16.vlgmr.msra.gmra.mrb[20].mxu0 %v15800_v26  ;;  %9542 = vmatpush1.bf16.msra.mxu1 %v14440_v12  ;;  %v14506_v12 = vld [vmem:[#allocation11 + $0x880] ss:$40 sps:$4 sm:$0xff]  }
 0x4a5   :  { %9573 = vmatprep.mubr.bf16.mxu1 %v15806_v27  ;;  %9757 = vmatpush1.bf16.msra.mxu0 %v14443_v33  ;;  %v14509_v33 = vld [vmem:[#allocation11 + $0x888] ss:$40 sps:$4 sm:$0xff]  }
 0x4a6   :  { %9788 = vmatprep.mubr.bf16.mxu0 %v15806_v27  ;;  %9543 = vmatprep.subr.bf16.mxu1 %v14448_v22  ;;  %v14514_v22 = vld [vmem:[#allocation11 + $0x8d4] ss:$40 sps:$4 sm:$0xff]  }
 0x4a7   :  { %9758 = vmatprep.subr.bf16.mxu0 %v14451_v23  ;;  %v14517_v23 = vld [vmem:[#allocation11 + $0x8dc] ss:$40 sps:$4 sm:$0xff]  }
 0x4a8   :  { %9544 = vmatpush1.bf16.msra.mxu1 %v14446_v59  ;;  %v14512_v59 = vld [vmem:[#allocation11 + $0x8d0] ss:$40 sps:$4 sm:$0xff]  }
 0x4a9   :  { %9759 = vmatpush1.bf16.msra.mxu0 %v14449_v24  ;;  %9545 = vmatprep.subr.bf16.mxu1 %v14454_v25  ;;  %v14515_v24 = vld [vmem:[#allocation11 + $0x8d8] ss:$40 sps:$4 sm:$0xff]   ;;  %v14520_v25 = vld [vmem:[#allocation11 + $0x924] ss:$40 sps:$4 sm:$0xff]  }
 0x4aa   :  { %9760 = vmatprep.subr.bf16.mxu0 %v14457_v44  ;;  %v14523_v44 = vld [vmem:[#allocation11 + $0x92c] ss:$40 sps:$4 sm:$0xff]  }
 0x4ac   :  { %9546 = vmatpush1.bf16.msra.mxu1 %v14452_v34  ;;  %v14518_v34 = vld [vmem:[#allocation11 + $0x920] ss:$40 sps:$4 sm:$0xff]  }
 0x4ad   :  { %9761 = vmatpush1.bf16.msra.mxu0 %v14455_v30  ;;  %9547 = vmatprep.subr.bf16.mxu1 %v14460_v8  ;;  %v14521_v30 = vld [vmem:[#allocation11 + $0x928] ss:$40 sps:$4 sm:$0xff]   ;;  %v14526_v8 = vld [vmem:[#allocation11 + $0x974] ss:$40 sps:$4 sm:$0xff]  }
 0x4ae   :  { %9762 = vmatprep.subr.bf16.mxu0 %v14463_v38  ;;  %v14529_v38 = vld [vmem:[#allocation11 + $0x97c] ss:$40 sps:$4 sm:$0xff]  }
 0x4b0   :  { %9548 = vmatpush1.bf16.msra.mxu1 %v14458_v43  ;;  %v14524_v43 = vld [vmem:[#allocation11 + $0x970] ss:$40 sps:$4 sm:$0xff]  }
 0x4b1   :  { %9763 = vmatpush1.bf16.msra.mxu0 %v14461_v39  ;;  %9549 = vmatprep.subr.bf16.mxu1 %v14466_v42  ;;  %v14527_v39 = vld [vmem:[#allocation11 + $0x978] ss:$40 sps:$4 sm:$0xff]   ;;  %v14532_v42 = vld [vmem:[#allocation11 + $0x9c4] ss:$40 sps:$4 sm:$0xff]  }
 0x4b2   :  { %9764 = vmatprep.subr.bf16.mxu0 %v14469_v40  ;;  %v14535_v40 = vld [vmem:[#allocation11 + $0x9cc] ss:$40 sps:$4 sm:$0xff]  }
 0x4b4   :  { %9550 = vmatpush1.bf16.msra.mxu1 %v14464_v31  ;;  %v14530_v31 = vld [vmem:[#allocation11 + $0x9c0] ss:$40 sps:$4 sm:$0xff]  }
 0x4b5   :  { %9765 = vmatpush1.bf16.msra.mxu0 %v14467_v32  ;;  %9551 = vmatprep.subr.bf16.mxu1 %v14472_v28  ;;  %v14533_v32 = vld [vmem:[#allocation11 + $0x9c8] ss:$40 sps:$4 sm:$0xff]   ;;  %v14538_v28 = vld [vmem:[#allocation11 + $0xa14] ss:$40 sps:$4 sm:$0xff]  }
 0x4b6   :  { %9766 = vmatprep.subr.bf16.mxu0 %v14475_v15  ;;  %v14541_v15 = vld [vmem:[#allocation11 + $0xa1c] ss:$40 sps:$4 sm:$0xff]  }
 0x4b8   :  { %9552 = vmatpush1.bf16.msra.mxu1 %v14470_v20  ;;  %v14536_v20 = vld [vmem:[#allocation11 + $0xa10] ss:$40 sps:$4 sm:$0xff]  }
 0x4b9   :  { %9767 = vmatpush1.bf16.msra.mxu0 %v14473_v46  ;;  %9553 = vmatprep.subr.bf16.mxu1 %v14478_v13  ;;  %v14539_v46 = vld [vmem:[#allocation11 + $0xa18] ss:$40 sps:$4 sm:$0xff]   ;;  %v14544_v13 = vld [vmem:[#allocation11 + $0xa64] ss:$40 sps:$4 sm:$0xff]  }
 0x4ba   :  { %9768 = vmatprep.subr.bf16.mxu0 %v14481_v36  ;;  %v14547_v36 = vld [vmem:[#allocation11 + $0xa6c] ss:$40 sps:$4 sm:$0xff]  }
 0x4bc   :  { %9554 = vmatpush1.bf16.msra.mxu1 %v14476_v52  ;;  %v14542_v52 = vld [vmem:[#allocation11 + $0xa60] ss:$40 sps:$4 sm:$0xff]  }
 0x4bd   :  { %9769 = vmatpush1.bf16.msra.mxu0 %v14479_v18  ;;  %9555 = vmatprep.subr.bf16.mxu1 %v14484_v61  ;;  %v14545_v18 = vld [vmem:[#allocation11 + $0xa68] ss:$40 sps:$4 sm:$0xff]   ;;  %v14550_v61 = vld [vmem:[#allocation11 + $0xab4] ss:$40 sps:$4 sm:$0xff]  }
 0x4be   :  { %9770 = vmatprep.subr.bf16.mxu0 %v14487_v49  ;;  %v14553_v49 = vld [vmem:[#allocation11 + $0xabc] ss:$40 sps:$4 sm:$0xff]  }
 0x4c0   :  { %9556 = vmatpush1.bf16.msra.mxu1 %v14482_v51  ;;  %v14548_v51 = vld [vmem:[#allocation11 + $0xab0] ss:$40 sps:$4 sm:$0xff]  }
 0x4c1   :  { %9771 = vmatpush1.bf16.msra.mxu0 %v14485_v35  ;;  %9557 = vmatprep.subr.bf16.mxu1 %v14490_v29  ;;  %v14551_v35 = vld [vmem:[#allocation11 + $0xab8] ss:$40 sps:$4 sm:$0xff]   ;;  %v14556_v29 = vld [vmem:[#allocation11 + $0xb04] ss:$40 sps:$4 sm:$0xff]  }
 0x4c2   :  { %9772 = vmatprep.subr.bf16.mxu0 %v14493_v19  ;;  %v14559_v19 = vld [vmem:[#allocation11 + $0xb0c] ss:$40 sps:$4 sm:$0xff]  }
 0x4c4   :  { %9558 = vmatpush1.bf16.msra.mxu1 %v14488_v21  ;;  %v14554_v21 = vld [vmem:[#allocation11 + $0xb00] ss:$40 sps:$4 sm:$0xff]  }
 0x4c5   :  { %9773 = vmatpush1.bf16.msra.mxu0 %v14491_v16  ;;  %9559 = vmatprep.subr.bf16.mxu1 %v14496_v53  ;;  %v14557_v16 = vld [vmem:[#allocation11 + $0xb08] ss:$40 sps:$4 sm:$0xff]   ;;  %v14562_v53 = vld [vmem:[#allocation11 + $0xb54] ss:$40 sps:$4 sm:$0xff]  }
 0x4c6   :  { %9774 = vmatprep.subr.bf16.mxu0 %v14499_v47  ;;  %v14565_v47 = vld [vmem:[#allocation11 + $0xb5c] ss:$40 sps:$4 sm:$0xff]  }
 0x4c8   :  { %9560 = vmatpush1.bf16.msra.mxu1 %v14494_v48  ;;  %v14560_v48 = vld [vmem:[#allocation11 + $0xb50] ss:$40 sps:$4 sm:$0xff]  }
 0x4c9   :  { %9775 = vmatpush1.bf16.msra.mxu0 %v14497_v60  ;;  %9561 = vmatprep.subr.bf16.mxu1 %v14502_v3  ;;  %v14563_v60 = vld [vmem:[#allocation11 + $0xb58] ss:$40 sps:$4 sm:$0xff]   ;;  %v14568_v3 = vld [vmem:[#allocation11 + $0xba4] ss:$40 sps:$4 sm:$0xff]  }
 0x4ca   :  { %9776 = vmatprep.subr.bf16.mxu0 %v14505_v62  ;;  %v14571_v62 = vld [vmem:[#allocation11 + $0xbac] ss:$40 sps:$4 sm:$0xff]  }
 0x4cc   :  { %9562 = vmatpush1.bf16.msra.mxu1 %v14500_v4  ;;  %v14566_v4 = vld [vmem:[#allocation11 + $0xba0] ss:$40 sps:$4 sm:$0xff]  }
 0x4cd   :  { %9777 = vmatpush1.bf16.msra.mxu0 %v14503_v6  ;;  %9563 = vmatprep.subr.bf16.mxu1 %v14508_v9  ;;  %v14569_v6 = vld [vmem:[#allocation11 + $0xba8] ss:$40 sps:$4 sm:$0xff]   ;;  %v14574_v9 = vld [vmem:[#allocation11 + $0xbf4] ss:$40 sps:$4 sm:$0xff]  }
 0x4ce   :  { %9778 = vmatprep.subr.bf16.mxu0 %v14511_v10  ;;  %v14577_v10 = vld [vmem:[#allocation11 + $0xbfc] ss:$40 sps:$4 sm:$0xff]  }
 0x4d0   :  { %9564 = vmatpush1.bf16.msra.mxu1 %v14506_v12  ;;  %v14572_v12 = vld [vmem:[#allocation11 + $0xbf0] ss:$40 sps:$4 sm:$0xff]  }
 0x4d1   :  { %9779 = vmatpush1.bf16.msra.mxu0 %v14509_v33  ;;  %9565 = vmatprep.subr.bf16.mxu1 %v14514_v22  ;;  %v14575_v33 = vld [vmem:[#allocation11 + $0xbf8] ss:$40 sps:$4 sm:$0xff]   ;;  %v14580_v22 = vld [vmem:[#allocation11 + $0xc44] ss:$40 sps:$4 sm:$0xff]  }
 0x4d2   :  { %9780 = vmatprep.subr.bf16.mxu0 %v14517_v23  ;;  %v14583_v23 = vld [vmem:[#allocation11 + $0xc4c] ss:$40 sps:$4 sm:$0xff]  }
 0x4d4   :  { %9566 = vmatpush1.bf16.msra.mxu1 %v14512_v59  ;;  %v14578_v59 = vld [vmem:[#allocation11 + $0xc40] ss:$40 sps:$4 sm:$0xff]  }
 0x4d5   :  { %9781 = vmatpush1.bf16.msra.mxu0 %v14515_v24  ;;  %9567 = vmatprep.subr.bf16.mxu1 %v14520_v25  ;;  %v14581_v24 = vld [vmem:[#allocation11 + $0xc48] ss:$40 sps:$4 sm:$0xff]   ;;  %v14586_v25 = vld [vmem:[#allocation11 + $0xc94] ss:$40 sps:$4 sm:$0xff]  }
 0x4d6   :  { %9782 = vmatprep.subr.bf16.mxu0 %v14523_v44  ;;  %v14589_v44 = vld [vmem:[#allocation11 + $0xc9c] ss:$40 sps:$4 sm:$0xff]  }
 0x4d8   :  { %9568 = vmatpush1.bf16.msra.mxu1 %v14518_v34  ;;  %v14584_v34 = vld [vmem:[#allocation11 + $0xc90] ss:$40 sps:$4 sm:$0xff]  }
 0x4d9   :  { %9783 = vmatpush1.bf16.msra.mxu0 %v14521_v30  ;;  %9569 = vmatprep.subr.bf16.mxu1 %v14526_v8  ;;  %v14587_v30 = vld [vmem:[#allocation11 + $0xc98] ss:$40 sps:$4 sm:$0xff]   ;;  %v14592_v8 = vld [vmem:[#allocation11 + $0xce4] ss:$40 sps:$4 sm:$0xff]  }
 0x4da   :  { %9784 = vmatprep.subr.bf16.mxu0 %v14529_v38  ;;  %v14595_v38 = vld [vmem:[#allocation11 + $0xcec] ss:$40 sps:$4 sm:$0xff]  }
 0x4dc   :  { %9570 = vmatpush1.bf16.msra.mxu1 %v14524_v43  ;;  %v14590_v43 = vld [vmem:[#allocation11 + $0xce0] ss:$40 sps:$4 sm:$0xff]  }
 0x4dd   :  { %9785 = vmatpush1.bf16.msra.mxu0 %v14527_v39  ;;  %9571 = vmatprep.subr.bf16.mxu1 %v14532_v42  ;;  %v14593_v39 = vld [vmem:[#allocation11 + $0xce8] ss:$40 sps:$4 sm:$0xff]   ;;  %v14598_v42 = vld [vmem:[#allocation11 + $0xd34] ss:$40 sps:$4 sm:$0xff]  }
 0x4de   :  { %9786 = vmatprep.subr.bf16.mxu0 %v14535_v40  ;;  %v14601_v40 = vld [vmem:[#allocation11 + $0xd3c] ss:$40 sps:$4 sm:$0xff]  }
 0x4e0   :  { %9572 = vmatpush1.bf16.msra.mxu1 %v14530_v31  ;;  %v14596_v31 = vld [vmem:[#allocation11 + $0xd30] ss:$40 sps:$4 sm:$0xff]  }
 0x4e1   :  { %9787 = vmatpush1.bf16.msra.mxu0 %v14533_v32  ;;  %9584 = vmatprep.subr.bf16.mxu1 %v14538_v28  ;;  %v14599_v32 = vld [vmem:[#allocation11 + $0xd38] ss:$40 sps:$4 sm:$0xff]   ;;  %v14604_v28 = vld [vmem:[#allocation11 + $0xd84] ss:$40 sps:$4 sm:$0xff]  }
 0x4e2   :  { %9799 = vmatprep.subr.bf16.mxu0 %v14541_v15  ;;  %v14607_v15 = vld [vmem:[#allocation11 + $0xd8c] ss:$40 sps:$4 sm:$0xff]  }
 0x4e3   :  { %9574 = vmatmul.mubr.bf16.vlgmr.msra.gmra.mrb[12].mxu1 %v15829_v5 }
 0x4e4   :  { %9789 = vmatmul.mubr.bf16.vlgmr.msra.gmra.mrb[20].mxu0 %v15829_v5  ;;  %9585 = vmatpush1.bf16.msra.mxu1 %v14536_v20  ;;  %v14602_v20 = vld [vmem:[#allocation11 + $0xd80] ss:$40 sps:$4 sm:$0xff]  }
 0x4e5   :  { %9616 = vmatprep.mubr.bf16.mxu1 %v15832_v7  ;;  %9800 = vmatpush1.bf16.msra.mxu0 %v14539_v46  ;;  %v14605_v46 = vld [vmem:[#allocation11 + $0xd88] ss:$40 sps:$4 sm:$0xff]  }
 0x4e6   :  { %9831 = vmatprep.mubr.bf16.mxu0 %v15832_v7  ;;  %9586 = vmatprep.subr.bf16.mxu1 %v14544_v13  ;;  %v14610_v13 = vld [vmem:[#allocation11 + $0xdd4] ss:$40 sps:$4 sm:$0xff]  }
 0x4e7   :  { %9801 = vmatprep.subr.bf16.mxu0 %v14547_v36  ;;  %v14613_v36 = vld [vmem:[#allocation11 + $0xddc] ss:$40 sps:$4 sm:$0xff]  }
 0x4e8   :  { %9587 = vmatpush1.bf16.msra.mxu1 %v14542_v52  ;;  %v14608_v52 = vld [vmem:[#allocation11 + $0xdd0] ss:$40 sps:$4 sm:$0xff]  }
 0x4e9   :  { %9802 = vmatpush1.bf16.msra.mxu0 %v14545_v18  ;;  %9588 = vmatprep.subr.bf16.mxu1 %v14550_v61  ;;  %v14611_v18 = vld [vmem:[#allocation11 + $0xdd8] ss:$40 sps:$4 sm:$0xff]   ;;  %v14616_v61 = vld [vmem:[#allocation11 + $0xe24] ss:$40 sps:$4 sm:$0xff]  }
 0x4ea   :  { %9803 = vmatprep.subr.bf16.mxu0 %v14553_v49  ;;  %v14619_v49 = vld [vmem:[#allocation11 + $0xe2c] ss:$40 sps:$4 sm:$0xff]  }
 0x4ec   :  { %9589 = vmatpush1.bf16.msra.mxu1 %v14548_v51  ;;  %v14614_v51 = vld [vmem:[#allocation11 + $0xe20] ss:$40 sps:$4 sm:$0xff]  }
 0x4ed   :  { %9804 = vmatpush1.bf16.msra.mxu0 %v14551_v35  ;;  %9590 = vmatprep.subr.bf16.mxu1 %v14556_v29  ;;  %v14617_v35 = vld [vmem:[#allocation11 + $0xe28] ss:$40 sps:$4 sm:$0xff]   ;;  %v14622_v29 = vld [vmem:[#allocation11 + $0xe74] ss:$40 sps:$4 sm:$0xff]  }
 0x4ee   :  { %9805 = vmatprep.subr.bf16.mxu0 %v14559_v19  ;;  %v14625_v19 = vld [vmem:[#allocation11 + $0xe7c] ss:$40 sps:$4 sm:$0xff]  }
 0x4f0   :  { %9591 = vmatpush1.bf16.msra.mxu1 %v14554_v21  ;;  %v14620_v21 = vld [vmem:[#allocation11 + $0xe70] ss:$40 sps:$4 sm:$0xff]  }
 0x4f1   :  { %9806 = vmatpush1.bf16.msra.mxu0 %v14557_v16  ;;  %9592 = vmatprep.subr.bf16.mxu1 %v14562_v53  ;;  %v14623_v16 = vld [vmem:[#allocation11 + $0xe78] ss:$40 sps:$4 sm:$0xff]   ;;  %v14628_v53 = vld [vmem:[#allocation11 + $0xec4] ss:$40 sps:$4 sm:$0xff]  }
 0x4f2   :  { %9807 = vmatprep.subr.bf16.mxu0 %v14565_v47  ;;  %v14631_v47 = vld [vmem:[#allocation11 + $0xecc] ss:$40 sps:$4 sm:$0xff]  }
 0x4f4   :  { %9593 = vmatpush1.bf16.msra.mxu1 %v14560_v48  ;;  %v14626_v48 = vld [vmem:[#allocation11 + $0xec0] ss:$40 sps:$4 sm:$0xff]  }
 0x4f5   :  { %9808 = vmatpush1.bf16.msra.mxu0 %v14563_v60  ;;  %9594 = vmatprep.subr.bf16.mxu1 %v14568_v3  ;;  %v14629_v60 = vld [vmem:[#allocation11 + $0xec8] ss:$40 sps:$4 sm:$0xff]   ;;  %v14634_v3 = vld [vmem:[#allocation11 + $0xf14] ss:$40 sps:$4 sm:$0xff]  }
 0x4f6   :  { %9809 = vmatprep.subr.bf16.mxu0 %v14571_v62  ;;  %v14637_v62 = vld [vmem:[#allocation11 + $0xf1c] ss:$40 sps:$4 sm:$0xff]  }
 0x4f8   :  { %9595 = vmatpush1.bf16.msra.mxu1 %v14566_v4  ;;  %v14632_v4 = vld [vmem:[#allocation11 + $0xf10] ss:$40 sps:$4 sm:$0xff]  }
 0x4f9   :  { %9810 = vmatpush1.bf16.msra.mxu0 %v14569_v6  ;;  %9596 = vmatprep.subr.bf16.mxu1 %v14574_v9  ;;  %v14635_v6 = vld [vmem:[#allocation11 + $0xf18] ss:$40 sps:$4 sm:$0xff]   ;;  %v14640_v9 = vld [vmem:[#allocation11 + $0xf64] ss:$40 sps:$4 sm:$0xff]  }
 0x4fa   :  { %9811 = vmatprep.subr.bf16.mxu0 %v14577_v10  ;;  %v14643_v10 = vld [vmem:[#allocation11 + $0xf6c] ss:$40 sps:$4 sm:$0xff]  }
 0x4fc   :  { %9597 = vmatpush1.bf16.msra.mxu1 %v14572_v12  ;;  %v14638_v12 = vld [vmem:[#allocation11 + $0xf60] ss:$40 sps:$4 sm:$0xff]  }
 0x4fd   :  { %9812 = vmatpush1.bf16.msra.mxu0 %v14575_v33  ;;  %9598 = vmatprep.subr.bf16.mxu1 %v14580_v22  ;;  %v14641_v33 = vld [vmem:[#allocation11 + $0xf68] ss:$40 sps:$4 sm:$0xff]   ;;  %v14646_v22 = vld [vmem:[#allocation11 + $0xfb4] ss:$40 sps:$4 sm:$0xff]  }
 0x4fe   :  { %9813 = vmatprep.subr.bf16.mxu0 %v14583_v23  ;;  %v14649_v23 = vld [vmem:[#allocation11 + $0xfbc] ss:$40 sps:$4 sm:$0xff]  }
 0x500   :  { %9599 = vmatpush1.bf16.msra.mxu1 %v14578_v59  ;;  %v14644_v59 = vld [vmem:[#allocation11 + $0xfb0] ss:$40 sps:$4 sm:$0xff]  }
 0x501   :  { %9814 = vmatpush1.bf16.msra.mxu0 %v14581_v24  ;;  %9600 = vmatprep.subr.bf16.mxu1 %v14586_v25  ;;  %v14647_v24 = vld [vmem:[#allocation11 + $0xfb8] ss:$40 sps:$4 sm:$0xff]   ;;  %v14652_v25 = vld [vmem:[#allocation11 + $0x1004] ss:$40 sps:$4 sm:$0xff]  }
 0x502   :  { %9815 = vmatprep.subr.bf16.mxu0 %v14589_v44  ;;  %v14655_v44 = vld [vmem:[#allocation11 + $0x100c] ss:$40 sps:$4 sm:$0xff]  }
 0x504   :  { %9601 = vmatpush1.bf16.msra.mxu1 %v14584_v34  ;;  %v14650_v34 = vld [vmem:[#allocation11 + $0x1000] ss:$40 sps:$4 sm:$0xff]  }
 0x505   :  { %9816 = vmatpush1.bf16.msra.mxu0 %v14587_v30  ;;  %9602 = vmatprep.subr.bf16.mxu1 %v14592_v8  ;;  %v14653_v30 = vld [vmem:[#allocation11 + $0x1008] ss:$40 sps:$4 sm:$0xff]   ;;  %v14658_v8 = vld [vmem:[#allocation11 + $0x1054] ss:$40 sps:$4 sm:$0xff]  }
 0x506   :  { %9817 = vmatprep.subr.bf16.mxu0 %v14595_v38  ;;  %v14661_v38 = vld [vmem:[#allocation11 + $0x105c] ss:$40 sps:$4 sm:$0xff]  }
 0x508   :  { %9603 = vmatpush1.bf16.msra.mxu1 %v14590_v43  ;;  %v14656_v43 = vld [vmem:[#allocation11 + $0x1050] ss:$40 sps:$4 sm:$0xff]  }
 0x509   :  { %9818 = vmatpush1.bf16.msra.mxu0 %v14593_v39  ;;  %9604 = vmatprep.subr.bf16.mxu1 %v14598_v42  ;;  %v14659_v39 = vld [vmem:[#allocation11 + $0x1058] ss:$40 sps:$4 sm:$0xff]   ;;  %v14664_v42 = vld [vmem:[#allocation11 + $0x10a4] ss:$40 sps:$4 sm:$0xff]  }
 0x50a   :  { %9819 = vmatprep.subr.bf16.mxu0 %v14601_v40  ;;  %v14667_v40 = vld [vmem:[#allocation11 + $0x10ac] ss:$40 sps:$4 sm:$0xff]  }
 0x50c   :  { %9605 = vmatpush1.bf16.msra.mxu1 %v14596_v31  ;;  %v14662_v31 = vld [vmem:[#allocation11 + $0x10a0] ss:$40 sps:$4 sm:$0xff]  }
 0x50d   :  { %9820 = vmatpush1.bf16.msra.mxu0 %v14599_v32  ;;  %9606 = vmatprep.subr.bf16.mxu1 %v14604_v28  ;;  %v14665_v32 = vld [vmem:[#allocation11 + $0x10a8] ss:$40 sps:$4 sm:$0xff]   ;;  %v14670_v28 = vld [vmem:[#allocation11 + $0x10f4] ss:$40 sps:$4 sm:$0xff]  }
 0x50e   :  { %9821 = vmatprep.subr.bf16.mxu0 %v14607_v15 }
 0x510   :  { %9607 = vmatpush1.bf16.msra.mxu1 %v14602_v20 }
 0x511   :  { %9822 = vmatpush1.bf16.msra.mxu0 %v14605_v46  ;;  %9608 = vmatprep.subr.bf16.mxu1 %v14610_v13  ;;  %v14673_v46 = vld [vmem:[#allocation11 + $0x10fc] ss:$40 sps:$4 sm:$0xff]  }
 0x512   :  { %9823 = vmatprep.subr.bf16.mxu0 %v14613_v36 }
 0x514   :  { %9609 = vmatpush1.bf16.msra.mxu1 %v14608_v52 }
 0x515   :  { %9824 = vmatpush1.bf16.msra.mxu0 %v14611_v18  ;;  %9610 = vmatprep.subr.bf16.mxu1 %v14616_v61  ;;  %v14668_v61 = vld [vmem:[#allocation11 + $0x10f0] ss:$40 sps:$4 sm:$0xff]  }
 0x516   :  { %9825 = vmatprep.subr.bf16.mxu0 %v14619_v49 }
 0x518   :  { %9611 = vmatpush1.bf16.msra.mxu1 %v14614_v51 }
 0x519   :  { %9826 = vmatpush1.bf16.msra.mxu0 %v14617_v35  ;;  %9612 = vmatprep.subr.bf16.mxu1 %v14622_v29 }
 0x51a   :  { %9827 = vmatprep.subr.bf16.mxu0 %v14625_v19  ;;  %v14671_v19 = vld [vmem:[#allocation11 + $0x10f8] ss:$40 sps:$4 sm:$0xff]  }
 0x51c   :  { %9613 = vmatpush1.bf16.msra.mxu1 %v14620_v21  ;;  %v14676_v21 = vld [vmem:[#allocation11 + $0x1144] ss:$40 sps:$4 sm:$0xff]  }
 0x51d   :  { %9828 = vmatpush1.bf16.msra.mxu0 %v14623_v16  ;;  %9614 = vmatprep.subr.bf16.mxu1 %v14628_v53 }
 0x51e   :  { %9829 = vmatprep.subr.bf16.mxu0 %v14631_v47  ;;  %v14679_v47 = vld [vmem:[#allocation11 + $0x114c] ss:$40 sps:$4 sm:$0xff]  }
 0x520   :  { %9615 = vmatpush1.bf16.msra.mxu1 %v14626_v48 }
 0x521   :  { %9830 = vmatpush1.bf16.msra.mxu0 %v14629_v60  ;;  %9627 = vmatprep.subr.bf16.mxu1 %v14634_v3 }
 0x522   :  { %9842 = vmatprep.subr.bf16.mxu0 %v14637_v62 }
 0x523   :  { %9617 = vmatmul.mubr.bf16.vlgmr.msra.gmra.mrb[12].mxu1 %v15841_v41 }
 0x524   :  { %9832 = vmatmul.mubr.bf16.vlgmr.msra.gmra.mrb[20].mxu0 %v15841_v41  ;;  %9628 = vmatpush1.bf16.msra.mxu1 %v14632_v4  ;;  %v14674_v4 = vld [vmem:[#allocation11 + $0x1140] ss:$40 sps:$4 sm:$0xff]  }
 0x525   :  { %9659 = vmatprep.mubr.bf16.mxu1 %v15847_v37  ;;  %9843 = vmatpush1.bf16.msra.mxu0 %v14635_v6 }
 0x526   :  { %9874 = vmatprep.mubr.bf16.mxu0 %v15847_v37  ;;  %9629 = vmatprep.subr.bf16.mxu1 %v14640_v9 }
 0x527   :  { %9844 = vmatprep.subr.bf16.mxu0 %v14643_v10  ;;  %v14677_v10 = vld [vmem:[#allocation11 + $0x1148] ss:$40 sps:$4 sm:$0xff]  }
 0x528   :  { %9630 = vmatpush1.bf16.msra.mxu1 %v14638_v12  ;;  %v14682_v12 = vld [vmem:[#allocation11 + $0x1194] ss:$40 sps:$4 sm:$0xff]  }
 0x529   :  { %9845 = vmatpush1.bf16.msra.mxu0 %v14641_v33  ;;  %9631 = vmatprep.subr.bf16.mxu1 %v14646_v22 }
 0x52a   :  { %9846 = vmatprep.subr.bf16.mxu0 %v14649_v23  ;;  %v14685_v23 = vld [vmem:[#allocation11 + $0x119c] ss:$40 sps:$4 sm:$0xff]  }
 0x52c   :  { %9632 = vmatpush1.bf16.msra.mxu1 %v14644_v59 }
 0x52d   :  { %9847 = vmatpush1.bf16.msra.mxu0 %v14647_v24  ;;  %9633 = vmatprep.subr.bf16.mxu1 %v14652_v25 }
 0x52e   :  { %9848 = vmatprep.subr.bf16.mxu0 %v14655_v44 }
 0x530   :  { %9634 = vmatpush1.bf16.msra.mxu1 %v14650_v34  ;;  %v14680_v34 = vld [vmem:[#allocation11 + $0x1190] ss:$40 sps:$4 sm:$0xff]  }
 0x531   :  { %9849 = vmatpush1.bf16.msra.mxu0 %v14653_v30  ;;  %9635 = vmatprep.subr.bf16.mxu1 %v14658_v8 }
 0x532   :  { %9850 = vmatprep.subr.bf16.mxu0 %v14661_v38  ;;  %v14683_v38 = vld [vmem:[#allocation11 + $0x1198] ss:$40 sps:$4 sm:$0xff]  }
 0x534   :  { %9636 = vmatpush1.bf16.msra.mxu1 %v14656_v43  ;;  %v14688_v43 = vld [vmem:[#allocation11 + $0x11e4] ss:$40 sps:$4 sm:$0xff]  }
 0x535   :  { %9851 = vmatpush1.bf16.msra.mxu0 %v14659_v39  ;;  %9637 = vmatprep.subr.bf16.mxu1 %v14664_v42 }
 0x536   :  { %v15922_v15 = vpop.f32.mrb[8].mxu1  ;;  %v15924_v20 = vpop.f32.mrb[16].mxu0  ;;  %9852 = vmatprep.subr.bf16.mxu0 %v14667_v40  ;;  %v14691_v40 = vld [vmem:[#allocation11 + $0x11ec] ss:$40 sps:$4 sm:$0xff]  }
 0x537   :  { %v15926_v13 = vpop.f32.mrb[9].mxu1  ;;  %v15928_v36 = vpop.f32.mrb[17].mxu0 }
 0x538   :  { %v15930_v52 = vpop.f32.mrb[10].mxu1  ;;  %v15932_v18 = vpop.f32.mrb[18].mxu0  ;;  %9638 = vmatpush1.bf16.msra.mxu1 %v14662_v31 }
 0x539   :  { %v10147_v49 = vadd.f32 %v15930_v52, %v15922_v15  ;;  %v10161_v51 = vadd.f32 %v15932_v18, %v15924_v20  ;;  %9853 = vmatpush1.bf16.msra.mxu0 %v14665_v32  ;;  %v15938_v35 = vpop.f32.mrb[11].mxu1  ;;  %v15940_v29 = vpop.f32.mrb[19].mxu0  ;;  %9639 = vmatprep.subr.bf16.mxu1 %v14670_v28 }
 0x53a   :  { %v10154_v16 = vadd.f32 %v15938_v35, %v15926_v13  ;;  %v10168_v53 = vadd.f32 %v15940_v29, %v15928_v36  ;;  %9854 = vmatprep.subr.bf16.mxu0 %v14673_v46 }
 0x53b   :  { %v10148_v48 = vrot.slane %v10147_v49, 4  ;;  %v10162_v60 = vrot.slane %v10161_v51, 4 }
 0x53c   :  { %v10155_v3 = vrot.slane %v10154_v16, 4  ;;  %v10169_v62 = vrot.slane %v10168_v53, 4  ;;  %9640 = vmatpush1.bf16.msra.mxu1 %v14668_v61  ;;  %v14686_v61 = vld [vmem:[#allocation11 + $0x11e0] ss:$40 sps:$4 sm:$0xff]  }
 0x53d   :  { %v10149_v6 = vadd.f32 %v10148_v48, %v10147_v49  ;;  %v10163_v9 = vadd.f32 %v10162_v60, %v10161_v51  ;;  %9855 = vmatpush1.bf16.msra.mxu0 %v14671_v19  ;;  %9641 = vmatprep.subr.bf16.mxu1 %v14676_v21  ;;  %v14689_v19 = vld [vmem:[#allocation11 + $0x11e8] ss:$40 sps:$4 sm:$0xff]   ;;  %v14697_v60 = vld [vmem:[#allocation11 + $0x123c] ss:$40 sps:$4 sm:$0xff]  }
 0x53e   :  { %v10156_v33 = vadd.f32 %v10155_v3, %v10154_v16  ;;  %v10170_v22 = vadd.f32 %v10169_v62, %v10168_v53  ;;  %9856 = vmatprep.subr.bf16.mxu0 %v14679_v47  ;;  %v14694_v53 = vld [vmem:[#allocation11 + $0x1234] ss:$40 sps:$4 sm:$0xff]  }
 0x53f   :  { %v10150_v59 = vrot.slane %v10149_v6, 2  ;;  %v10164_v24 = vrot.slane %v10163_v9, 2 }
 0x540   :  { %v10157_v25 = vrot.slane %v10156_v33, 2  ;;  %v10171_v44 = vrot.slane %v10170_v22, 2  ;;  %9642 = vmatpush1.bf16.msra.mxu1 %v14674_v4  ;;  %v14692_v4 = vld [vmem:[#allocation11 + $0x1230] ss:$40 sps:$4 sm:$0xff]  }
 0x541   :  { %v10151_v30 = vadd.f32 %v10150_v59, %v10149_v6  ;;  %v10165_v8 = vadd.f32 %v10164_v24, %v10163_v9  ;;  %9857 = vmatpush1.bf16.msra.mxu0 %v14677_v10  ;;  %9643 = vmatprep.subr.bf16.mxu1 %v14682_v12 }
 0x542   :  { %v10158_v39 = vadd.f32 %v10157_v25, %v10156_v33  ;;  %v10172_v42 = vadd.f32 %v10171_v44, %v10170_v22  ;;  %9858 = vmatprep.subr.bf16.mxu0 %v14685_v23  ;;  %v14695_v33 = vld [vmem:[#allocation11 + $0x1238] ss:$40 sps:$4 sm:$0xff]   ;;  %v14700_v22 = vld [vmem:[#allocation11 + $0x1284] ss:$40 sps:$4 sm:$0xff]  }
 0x543   :  { %v10152_v31 = vrot.slane %v10151_v30, 1  ;;  %v10166_v32 = vrot.slane %v10165_v8, 1 }
 0x544   :  { %v10159_v28 = vrot.slane %v10158_v39, 1  ;;  %v10173_v46 = vrot.slane %v10172_v42, 1  ;;  %9644 = vmatpush1.bf16.msra.mxu1 %v14680_v34  ;;  %v14698_v34 = vld [vmem:[#allocation11 + $0x1280] ss:$40 sps:$4 sm:$0xff]  }
 0x545   :  { %v10153_v49 = vadd.f32 %v10152_v31, %v10151_v30  ;;  %v10167_v51 = vadd.f32 %v10166_v32, %v10165_v8  ;;  %9859 = vmatpush1.bf16.msra.mxu0 %v14683_v38  ;;  %9645 = vmatprep.subr.bf16.mxu1 %v14688_v43  ;;  %v14701_v38 = vld [vmem:[#allocation11 + $0x1288] ss:$40 sps:$4 sm:$0xff]   ;;  %v14706_v43 = vld [vmem:[#allocation11 + $0x12d4] ss:$40 sps:$4 sm:$0xff]  }
 0x546   :  { %v10160_v21 = vadd.f32 %v10159_v28, %v10158_v39  ;;  %v10174_v16 = vadd.f32 %v10173_v46, %v10172_v42  ;;  %9860 = vmatprep.subr.bf16.mxu0 %v14691_v40  ;;  %v14709_v40 = vld [vmem:[#allocation11 + $0x12dc] ss:$40 sps:$4 sm:$0xff]  }
 0x547   :  { %v10219_v47 = vmul.f32 0.0625, %v10153_v49  ;;  %v10221_v48 = vmul.f32 0.0625, %v10167_v51 }
 0x548   :  { %v10220_v3 = vmul.f32 0.0625, %v10160_v21  ;;  %v10222_v62 = vmul.f32 0.0625, %v10174_v16  ;;  %9646 = vmatpush1.bf16.msra.mxu1 %v14686_v61  ;;  %v14704_v61 = vld [vmem:[#allocation11 + $0x12d0] ss:$40 sps:$4 sm:$0xff]   ;;  %v14712_v21 = vld [vmem:[#allocation11 + $0x1324] ss:$40 sps:$4 sm:$0xff]  }
 0x549   :  { %v15947_v6 = vsub.f32 %v15922_v15, %v10219_v47  ;;  %v15950_v9 = vsub.f32 %v15930_v52, %v10219_v47  ;;  %v15953_v10 = vsub.f32 %v15924_v20, %v10221_v48  ;;  %v15956_v12 = vsub.f32 %v15932_v18, %v10221_v48  ;;  %9861 = vmatpush1.bf16.msra.mxu0 %v14689_v19  ;;  %v14703_v20 = vld [vmem:[#allocation11 + $0x128c] ss:$40 sps:$4 sm:$0xff]   ;;  %v14707_v19 = vld [vmem:[#allocation11 + $0x12d8] ss:$40 sps:$4 sm:$0xff]  }
 0x54a   :  { %v15959_v23 = vsub.f32 %v15926_v13, %v10220_v3  ;;  %v15962_v59 = vsub.f32 %v15938_v35, %v10220_v3  ;;  %v15965_v15 = vsub.f32 %v15928_v36, %v10222_v62  ;;  %v15968_v52 = vsub.f32 %v15940_v29, %v10222_v62  ;;  %9647 = vmatprep.subr.bf16.mxu1 %v14694_v53  ;;  %v14715_v47 = vld [vmem:[#allocation11 + $0x132c] ss:$40 sps:$4 sm:$0xff]  }
 0x54b   :  { %v10249_v18 = vmul.f32 %v15947_v6, %v15947_v6  ;;  %v10259_v24 = vmul.f32 %v15950_v9, %v15950_v9  ;;  %v10251_v13 = vmul.f32 %v15953_v10, %v15953_v10  ;;  %v10261_v35 = vmul.f32 %v15956_v12, %v15956_v12  ;;  %9862 = vmatprep.subr.bf16.mxu0 %v14697_v60 }
 0x54c   :  { %v10250_v36 = vmul.f32 %v15959_v23, %v15959_v23  ;;  %v10260_v29 = vmul.f32 %v15962_v59, %v15962_v59  ;;  %v10252_v25 = vmul.f32 %v15965_v15, %v15965_v15  ;;  %v10262_v44 = vmul.f32 %v15968_v52, %v15968_v52  ;;  %9648 = vmatpush1.bf16.msra.mxu1 %v14692_v4  ;;  %v14710_v4 = vld [vmem:[#allocation11 + $0x1320] ss:$40 sps:$4 sm:$0xff]  }
 0x54d   :  { %v10269_v30 = vadd.f32 %v10259_v24, %v10249_v18  ;;  %v10283_v8 = vadd.f32 %v10261_v35, %v10251_v13  ;;  %9863 = vmatpush1.bf16.msra.mxu0 %v14695_v33  ;;  %9649 = vmatprep.subr.bf16.mxu1 %v14700_v22  ;;  %v14718_v18 = vld [vmem:[#allocation11 + $0x1374] ss:$40 sps:$4 sm:$0xff]  }
 0x54e   :  { %v10276_v39 = vadd.f32 %v10260_v29, %v10250_v36  ;;  %v10290_v42 = vadd.f32 %v10262_v44, %v10252_v25  ;;  %9864 = vmatprep.subr.bf16.mxu0 %v14703_v20  ;;  %v14713_v20 = vld [vmem:[#allocation11 + $0x1328] ss:$40 sps:$4 sm:$0xff]   ;;  %v14721_v35 = vld [vmem:[#allocation11 + $0x137c] ss:$40 sps:$4 sm:$0xff]  }
 0x54f   :  { %v10270_v31 = vrot.slane %v10269_v30, 4  ;;  %v10284_v32 = vrot.slane %v10283_v8, 4 }
 0x550   :  { %v10277_v28 = vrot.slane %v10276_v39, 4  ;;  %v10291_v46 = vrot.slane %v10290_v42, 4  ;;  %9650 = vmatpush1.bf16.msra.mxu1 %v14698_v34  ;;  %v14716_v34 = vld [vmem:[#allocation11 + $0x1370] ss:$40 sps:$4 sm:$0xff]  }
 0x551   :  { %v10271_v49 = vadd.f32 %v10270_v31, %v10269_v30  ;;  %v10285_v51 = vadd.f32 %v10284_v32, %v10283_v8  ;;  %9865 = vmatpush1.bf16.msra.mxu0 %v14701_v38  ;;  %9651 = vmatprep.subr.bf16.mxu1 %v14706_v43  ;;  %v14719_v38 = vld [vmem:[#allocation11 + $0x1378] ss:$40 sps:$4 sm:$0xff]   ;;  %v14724_v43 = vld [vmem:[#allocation11 + $0x13c4] ss:$40 sps:$4 sm:$0xff]  }
 0x552   :  { %v10278_v16 = vadd.f32 %v10277_v28, %v10276_v39  ;;  %v10292_v53 = vadd.f32 %v10291_v46, %v10290_v42  ;;  %9866 = vmatprep.subr.bf16.mxu0 %v14709_v40  ;;  %v14727_v40 = vld [vmem:[#allocation11 + $0x13cc] ss:$40 sps:$4 sm:$0xff]  }
 0x553   :  { %v10272_v48 = vrot.slane %v10271_v49, 2  ;;  %v10286_v60 = vrot.slane %v10285_v51, 2 }
 0x554   :  { %v10279_v3 = vrot.slane %v10278_v16, 2  ;;  %v10293_v62 = vrot.slane %v10292_v53, 2  ;;  %9652 = vmatpush1.bf16.msra.mxu1 %v14704_v61  ;;  %v14722_v61 = vld [vmem:[#allocation11 + $0x13c0] ss:$40 sps:$4 sm:$0xff]  }
 0x555   :  { %v10273_v33 = vadd.f32 %v10272_v48, %v10271_v49  ;;  %v10287_v22 = vadd.f32 %v10286_v60, %v10285_v51  ;;  %9867 = vmatpush1.bf16.msra.mxu0 %v14707_v19  ;;  %9653 = vmatprep.subr.bf16.mxu1 %v14712_v21  ;;  %v14725_v49 = vld [vmem:[#allocation11 + $0x13c8] ss:$40 sps:$4 sm:$0xff]   ;;  %v14730_v21 = vld [vmem:[#allocation11 + $0x1414] ss:$40 sps:$4 sm:$0xff]   ;;  %v14731_v60 = vld [vmem:[#allocation11 + $0x1418] ss:$40 sps:$4 sm:$0xff]  }
 0x556   :  { %v10280_v24 = vadd.f32 %v10279_v3, %v10278_v16  ;;  %v10294_v13 = vadd.f32 %v10293_v62, %v10292_v53  ;;  %9868 = vmatprep.subr.bf16.mxu0 %v14715_v47  ;;  %v14733_v47 = vld [vmem:[#allocation11 + $0x141c] ss:$40 sps:$4 sm:$0xff]   ;;  %v14728_v48 = vld [vmem:[#allocation11 + $0x1410] ss:$40 sps:$4 sm:$0xff]   ;;  %v14739_v62 = vld [vmem:[#allocation11 + $0x146c] ss:$40 sps:$4 sm:$0xff]  }
 0x557   :  { %v10274_v36 = vrot.slane %v10273_v33, 1  ;;  %v10288_v29 = vrot.slane %v10287_v22, 1  ;;  %v14736_v3 = vld [vmem:[#allocation11 + $0x1464] ss:$40 sps:$4 sm:$0xff]  }
 0x558   :  { %v10281_v25 = vrot.slane %v10280_v24, 1  ;;  %v10295_v44 = vrot.slane %v10294_v13, 1  ;;  %9654 = vmatpush1.bf16.msra.mxu1 %v14710_v4  ;;  %v14734_v4 = vld [vmem:[#allocation11 + $0x1460] ss:$40 sps:$4 sm:$0xff]  }
 0x559   :  { %v10275_v30 = vadd.f32 %v10274_v36, %v10273_v33  ;;  %v10289_v8 = vadd.f32 %v10288_v29, %v10287_v22  ;;  %9869 = vmatpush1.bf16.msra.mxu0 %v14713_v20  ;;  %9655 = vmatprep.subr.bf16.mxu1 %v14718_v18  ;;  %v14737_v33 = vld [vmem:[#allocation11 + $0x1468] ss:$40 sps:$4 sm:$0xff]   ;;  %v14742_v22 = vld [vmem:[#allocation11 + $0x14b4] ss:$40 sps:$4 sm:$0xff]  }
 0x55a   :  { %v10282_v39 = vadd.f32 %v10281_v25, %v10280_v24  ;;  %v10296_v42 = vadd.f32 %v10295_v44, %v10294_v13  ;;  %9870 = vmatprep.subr.bf16.mxu0 %v14721_v35  ;;  %v14745_v20 = vld [vmem:[#allocation11 + $0x14bc] ss:$40 sps:$4 sm:$0xff]   ;;  %v14740_v18 = vld [vmem:[#allocation11 + $0x14b0] ss:$40 sps:$4 sm:$0xff]   ;;  %v14751_v29 = vld [vmem:[#allocation11 + $0x150c] ss:$40 sps:$4 sm:$0xff]  }
 0x55b   :  { %v10341_v31 = vmul.f32 0.0625, %v10275_v30  ;;  %v10343_v32 = vmul.f32 0.0625, %v10289_v8  ;;  %v14743_v13 = vld [vmem:[#allocation11 + $0x14b8] ss:$40 sps:$4 sm:$0xff]   ;;  %v14748_v35 = vld [vmem:[#allocation11 + $0x1504] ss:$40 sps:$4 sm:$0xff]  }
 0x55c   :  { %v10342_v28 = vmul.f32 0.0625, %v10282_v39  ;;  %v10344_v46 = vmul.f32 0.0625, %v10296_v42  ;;  %9656 = vmatpush1.bf16.msra.mxu1 %v14716_v34  ;;  %v14746_v30 = vld [vmem:[#allocation11 + $0x1500] ss:$40 sps:$4 sm:$0xff]   ;;  %v14757_v42 = vld [vmem:[#allocation11 + $0x155c] ss:$40 sps:$4 sm:$0xff]  }
 0x55d   :  { %v10351_v51 = vadd.f32 1e-05, %v10341_v31  ;;  %v10353_v19 = vadd.f32 1e-05, %v10343_v32  ;;  %9871 = vmatpush1.bf16.msra.mxu0 %v14719_v38  ;;  %9657 = vmatprep.subr.bf16.mxu1 %v14724_v43  ;;  %v14749_v38 = vld [vmem:[#allocation11 + $0x1508] ss:$40 sps:$4 sm:$0xff]  }
 0x55e   :  { %v10352_v16 = vadd.f32 1e-05, %v10342_v28  ;;  %v10354_v53 = vadd.f32 1e-05, %v10344_v46  ;;  %9872 = vmatprep.subr.bf16.mxu0 %v14727_v40  ;;  %v14754_v43 = vld [vmem:[#allocation11 + $0x1554] ss:$40 sps:$4 sm:$0xff]  }
 0x55f   :  { %15129 = vrsqrt.f32 %v10351_v51  ;;  %v14752_v31 = vld [vmem:[#allocation11 + $0x1550] ss:$40 sps:$4 sm:$0xff]   ;;  %v14760_v46 = vld [vmem:[#allocation11 + $0x15a4] ss:$40 sps:$4 sm:$0xff]  }
 0x560   :  { %15131 = vrsqrt.f32 %v10353_v19  ;;  %9658 = vmatpush1.bf16.msra.mxu1 %v14722_v61  ;;  %v14755_v28 = vld [vmem:[#allocation11 + $0x1558] ss:$40 sps:$4 sm:$0xff]   ;;  %v14763_v61 = vld [vmem:[#allocation11 + $0x15ac] ss:$40 sps:$4 sm:$0xff]   ;;  %v14761_v51 = vld [vmem:[#allocation11 + $0x15a8] ss:$40 sps:$4 sm:$0xff]  }
 0x561   :  { %15133 = vrsqrt.f32 %v10352_v16  ;;  %9873 = vmatpush1.bf16.msra.mxu0 %v14725_v49  ;;  %9670 = vmatprep.subr.bf16.mxu1 %v14730_v21  ;;  %v14758_v49 = vld [vmem:[#allocation11 + $0x15a0] ss:$40 sps:$4 sm:$0xff]   ;;  %v14766_v19 = vld [vmem:[#allocation11 + $0x15f4] ss:$40 sps:$4 sm:$0xff]   ;;  %v14764_v16 = vld [vmem:[#allocation11 + $0x15f0] ss:$40 sps:$4 sm:$0xff]  }
 0x562   :  { %15135 = vrsqrt.f32 %v10354_v53  ;;  %9885 = vmatprep.subr.bf16.mxu0 %v14733_v47  ;;  %v14769_v21 = vld [vmem:[#allocation11 + $0x15fc] ss:$40 sps:$4 sm:$0xff]   ;;  %v14767_v53 = vld [vmem:[#allocation11 + $0x15f8] ss:$40 sps:$4 sm:$0xff]  }
 0x563   :  { %9660 = vmatmul.mubr.bf16.vlgmr.msra.gmra.mrb[12].mxu1 %v15887_v45  ;;  %v14772_v47 = vld [vmem:[#allocation11 + $0x1644] ss:$40 sps:$4 sm:$0xff]  }
 0x564   :  { %9875 = vmatmul.mubr.bf16.vlgmr.msra.gmra.mrb[20].mxu0 %v15887_v45  ;;  %9671 = vmatpush1.bf16.msra.mxu1 %v14728_v48  ;;  %v14775_v48 = vld [vmem:[#allocation11 + $0x164c] ss:$40 sps:$4 sm:$0xff]  }
 0x565   :  { %12797 = vmatprep.mubr.msk.bf16.mxu1 %vm4080_vm1, %v15897_v55  ;;  %9886 = vmatpush1.bf16.msra.mxu0 %v14731_v60  ;;  %v14770_v60 = vld [vmem:[#allocation11 + $0x1640] ss:$40 sps:$4 sm:$0xff]  }
 0x566   :  { %12798 = vmatprep.mubr.msk.bf16.mxu0 %vm4080_vm1, %v15897_v55  ;;  %9672 = vmatprep.subr.bf16.mxu1 %v14736_v3  ;;  %v14773_v3 = vld [vmem:[#allocation11 + $0x1648] ss:$40 sps:$4 sm:$0xff]  }
 0x567   :  { %9887 = vmatprep.subr.bf16.mxu0 %v14739_v62  ;;  %v14778_v62 = vld [vmem:[#allocation11 + $0x1694] ss:$40 sps:$4 sm:$0xff]  }
 0x568   :  { %9673 = vmatpush1.bf16.msra.mxu1 %v14734_v4  ;;  %v14781_v4 = vld [vmem:[#allocation11 + $0x169c] ss:$40 sps:$4 sm:$0xff]  }
 0x569   :  { %v15130_v24 = vpop.eup %15129  ;;  %9888 = vmatpush1.bf16.msra.mxu0 %v14737_v33  ;;  %9674 = vmatprep.subr.bf16.mxu1 %v14742_v22  ;;  %v14776_v33 = vld [vmem:[#allocation11 + $0x1690] ss:$40 sps:$4 sm:$0xff]  }
 0x56a   :  { %v15132_v36 = vpop.eup %15131  ;;  %9889 = vmatprep.subr.bf16.mxu0 %v14745_v20  ;;  %v14779_v22 = vld [vmem:[#allocation11 + $0x1698] ss:$40 sps:$4 sm:$0xff]   ;;  %v14784_v20 = vld [vmem:[#allocation11 + $0x16e4] ss:$40 sps:$4 sm:$0xff]  }
 0x56b   :  { %v15134_v25 = vpop.eup %15133 }
 0x56c   :  { %v15136_v44 = vpop.eup %15135  ;;  %v10381_v34 = vcombine.low %v15130_v24, %v15134_v25  ;;  %9675 = vmatpush1.bf16.msra.mxu1 %v14740_v18  ;;  %v14787_v18 = vld [vmem:[#allocation11 + $0x16ec] ss:$40 sps:$4 sm:$0xff]   ;;  %v14782_v24 = vld [vmem:[#allocation11 + $0x16e0] ss:$40 sps:$4 sm:$0xff]  }
 0x56d   :  { %v10382_v8 = vcombine.low %v15132_v36, %v15136_v44  ;;  %9890 = vmatpush1.bf16.msra.mxu0 %v14743_v13  ;;  %9676 = vmatprep.subr.bf16.mxu1 %v14748_v35  ;;  %v14785_v13 = vld [vmem:[#allocation11 + $0x16e8] ss:$40 sps:$4 sm:$0xff]   ;;  %v14790_v35 = vld [vmem:[#allocation11 + $0x1734] ss:$40 sps:$4 sm:$0xff]   ;;  %v14791_v25 = vld [vmem:[#allocation11 + $0x1738] ss:$40 sps:$4 sm:$0xff]  }
 0x56e   :  { %v15993_v39 = vrot.slane %v10381_v34, %v15681_v54  ;;  %9891 = vmatprep.subr.bf16.mxu0 %v14751_v29  ;;  %v14793_v36 = vld [vmem:[#allocation11 + $0x173c] ss:$40 sps:$4 sm:$0xff]   ;;  %v14788_v29 = vld [vmem:[#allocation11 + $0x1730] ss:$40 sps:$4 sm:$0xff]   ;;  %v14794_v34 = vld [vmem:[#allocation11 + $0x20] ss:$40 sps:$4 sm:$0xff]  }
 0x56f   :  { %v15996_v40 = vrot.slane %v10382_v8, %v15681_v54  ;;  %v14796_v44 = vld [vmem:[#allocation11 + $0x24] ss:$40 sps:$4 sm:$0xff]   ;;  %v14797_v8 = vld [vmem:[#allocation11 + $0x70] ss:$40 sps:$4 sm:$0xff]  }
 0x570   :  { %9677 = vmatpush1.bf16.msra.mxu1 %v14746_v30  ;;  %v14799_v30 = vld [vmem:[#allocation11 + $0x74] ss:$40 sps:$4 sm:$0xff]  }
 0x571   :  { %v10413_v32 = vcombine.low %v15993_v39, %v15996_v40  ;;  %9892 = vmatpush1.bf16.msra.mxu0 %v14749_v38  ;;  %9678 = vmatprep.subr.bf16.mxu1 %v14754_v43  ;;  %v14802_v38 = vld [vmem:[#allocation11 + $0xc4] ss:$40 sps:$4 sm:$0xff]   ;;  %v14800_v43 = vld [vmem:[#allocation11 + $0xc0] ss:$40 sps:$4 sm:$0xff]  }
 0x572   :  { %9893 = vmatprep.subr.bf16.mxu0 %v14757_v42  ;;  %v14805_v42 = vld [vmem:[#allocation11 + $0x114] ss:$40 sps:$4 sm:$0xff]  }
 0x574   :  { %9679 = vmatpush1.bf16.msra.mxu1 %v14752_v31  ;;  %v14803_v31 = vld [vmem:[#allocation11 + $0x110] ss:$40 sps:$4 sm:$0xff]  }
 0x575   :  { %9894 = vmatpush1.bf16.msra.mxu0 %v14755_v28  ;;  %9680 = vmatprep.subr.bf16.mxu1 %v14760_v46  ;;  %v14808_v28 = vld [vmem:[#allocation11 + $0x164] ss:$40 sps:$4 sm:$0xff]   ;;  %v14806_v46 = vld [vmem:[#allocation11 + $0x160] ss:$40 sps:$4 sm:$0xff]  }
 0x576   :  { %9895 = vmatprep.subr.bf16.mxu0 %v14763_v61  ;;  %v14811_v61 = vld [vmem:[#allocation11 + $0x1b4] ss:$40 sps:$4 sm:$0xff]  }
 0x578   :  { %9681 = vmatpush1.bf16.msra.mxu1 %v14758_v49  ;;  %v14809_v49 = vld [vmem:[#allocation11 + $0x1b0] ss:$40 sps:$4 sm:$0xff]  }
 0x579   :  { %9896 = vmatpush1.bf16.msra.mxu0 %v14761_v51  ;;  %9682 = vmatprep.subr.bf16.mxu1 %v14766_v19  ;;  %v14814_v51 = vld [vmem:[#allocation11 + $0x204] ss:$40 sps:$4 sm:$0xff]   ;;  %v14817_v19 = vld [vmem:[#allocation11 + $0x254] ss:$40 sps:$4 sm:$0xff]  }
 0x57a   :  { %9897 = vmatprep.subr.bf16.mxu0 %v14769_v21  ;;  %v14815_v21 = vld [vmem:[#allocation11 + $0x250] ss:$40 sps:$4 sm:$0xff]  }
 0x57c   :  { %9683 = vmatpush1.bf16.msra.mxu1 %v14764_v16  ;;  %v14820_v16 = vld [vmem:[#allocation11 + $0x2a4] ss:$40 sps:$4 sm:$0xff]  }
 0x57d   :  { %9898 = vmatpush1.bf16.msra.mxu0 %v14767_v53  ;;  %9684 = vmatprep.subr.bf16.mxu1 %v14772_v47  ;;  %v14818_v53 = vld [vmem:[#allocation11 + $0x2a0] ss:$40 sps:$4 sm:$0xff]   ;;  %v14823_v47 = vld [vmem:[#allocation11 + $0x2f4] ss:$40 sps:$4 sm:$0xff]  }
 0x57e   :  { %9899 = vmatprep.subr.bf16.mxu0 %v14775_v48  ;;  %v14821_v48 = vld [vmem:[#allocation11 + $0x2f0] ss:$40 sps:$4 sm:$0xff]  }
 0x580   :  { %9685 = vmatpush1.bf16.msra.mxu1 %v14770_v60  ;;  %v14826_v60 = vld [vmem:[#allocation11 + $0x344] ss:$40 sps:$4 sm:$0xff]  }
 0x581   :  { %9900 = vmatpush1.bf16.msra.mxu0 %v14773_v3  ;;  %9686 = vmatprep.subr.bf16.mxu1 %v14778_v62  ;;  %v14824_v3 = vld [vmem:[#allocation11 + $0x340] ss:$40 sps:$4 sm:$0xff]   ;;  %v14829_v62 = vld [vmem:[#allocation11 + $0x394] ss:$40 sps:$4 sm:$0xff]  }
 0x582   :  { %9901 = vmatprep.subr.bf16.mxu0 %v14781_v4  ;;  %v14827_v4 = vld [vmem:[#allocation11 + $0x390] ss:$40 sps:$4 sm:$0xff]  }
 0x584   :  { %9687 = vmatpush1.bf16.msra.mxu1 %v14776_v33  ;;  %v14832_v33 = vld [vmem:[#allocation11 + $0x3e4] ss:$40 sps:$4 sm:$0xff]  }
 0x585   :  { %9902 = vmatpush1.bf16.msra.mxu0 %v14779_v22  ;;  %9688 = vmatprep.subr.bf16.mxu1 %v14784_v20  ;;  %v14830_v22 = vld [vmem:[#allocation11 + $0x3e0] ss:$40 sps:$4 sm:$0xff]   ;;  %v14835_v20 = vld [vmem:[#allocation11 + $0x434] ss:$40 sps:$4 sm:$0xff]  }
 0x586   :  { %9903 = vmatprep.subr.bf16.mxu0 %v14787_v18  ;;  %v14833_v18 = vld [vmem:[#allocation11 + $0x430] ss:$40 sps:$4 sm:$0xff]  }
 0x588   :  { %9689 = vmatpush1.bf16.msra.mxu1 %v14782_v24  ;;  %v14838_v24 = vld [vmem:[#allocation11 + $0x484] ss:$40 sps:$4 sm:$0xff]  }
 0x589   :  { %9904 = vmatpush1.bf16.msra.mxu0 %v14785_v13  ;;  %9690 = vmatprep.subr.bf16.mxu1 %v14790_v35  ;;  %v14836_v13 = vld [vmem:[#allocation11 + $0x480] ss:$40 sps:$4 sm:$0xff]   ;;  %v14841_v35 = vld [vmem:[#allocation11 + $0x4d4] ss:$40 sps:$4 sm:$0xff]  }
 0x58a   :  { %9905 = vmatprep.subr.bf16.mxu0 %v14793_v36  ;;  %v14839_v36 = vld [vmem:[#allocation11 + $0x4d0] ss:$40 sps:$4 sm:$0xff]  }
 0x58c   :  { %9691 = vmatpush1.bf16.msra.mxu1 %v14788_v29  ;;  %v14844_v29 = vld [vmem:[#allocation11 + $0x524] ss:$40 sps:$4 sm:$0xff]  }
 0x58d   :  { %9906 = vmatpush1.bf16.msra.mxu0 %v14791_v25  ;;  %9928 = vmatprep.subr.bf16.mxu1 %v14796_v44  ;;  %v14842_v25 = vld [vmem:[#allocation11 + $0x520] ss:$40 sps:$4 sm:$0xff]   ;;  %v14847_v44 = vld [vmem:[#allocation11 + $0x574] ss:$40 sps:$4 sm:$0xff]  }
 0x58f   :  { %9703 = vmatmul.mubr.bf16.vlgmr.msra.gmra.mrb[12].mxu1 %v15904_v17 }
 0x590   :  { %9918 = vmatmul.mubr.bf16.vlgmr.msra.gmra.mrb[20].mxu0 %v15904_v17  ;;  %9929 = vmatpush1.bf16.msra.mxu1 %v14794_v34  ;;  %v14845_v34 = vld [vmem:[#allocation11 + $0x570] ss:$40 sps:$4 sm:$0xff]  }
 0x591   :  { %9960 = vmatprep.mubr.bf16.mxu1 %v15796_v11  ;;  %9930 = vmatprep.subr.bf16.mxu1 %v14799_v30  ;;  %v14812_v11 = vld [vmem:[#allocation11 + $0x200] ss:$40 sps:$4 sm:$0xff]   ;;  %v14850_v30 = vld [vmem:[#allocation11 + $0x5c4] ss:$40 sps:$4 sm:$0xff]  }
 0x594   :  { %9931 = vmatpush1.bf16.msra.mxu1 %v14797_v8  ;;  %v14848_v8 = vld [vmem:[#allocation11 + $0x5c0] ss:$40 sps:$4 sm:$0xff]  }
 0x595   :  { %9932 = vmatprep.subr.bf16.mxu1 %v14802_v38  ;;  %v14853_v38 = vld [vmem:[#allocation11 + $0x614] ss:$40 sps:$4 sm:$0xff]  }
 0x598   :  { %9933 = vmatpush1.bf16.msra.mxu1 %v14800_v43  ;;  %v14851_v43 = vld [vmem:[#allocation11 + $0x610] ss:$40 sps:$4 sm:$0xff]  }
 0x599   :  { %9934 = vmatprep.subr.bf16.mxu1 %v14805_v42  ;;  %v14856_v42 = vld [vmem:[#allocation11 + $0x664] ss:$40 sps:$4 sm:$0xff]  }
 0x59c   :  { %9935 = vmatpush1.bf16.msra.mxu1 %v14803_v31  ;;  %v14854_v31 = vld [vmem:[#allocation11 + $0x660] ss:$40 sps:$4 sm:$0xff]  }
 0x59d   :  { %9936 = vmatprep.subr.bf16.mxu1 %v14808_v28  ;;  %v14859_v28 = vld [vmem:[#allocation11 + $0x6b4] ss:$40 sps:$4 sm:$0xff]  }
 0x5a0   :  { %9937 = vmatpush1.bf16.msra.mxu1 %v14806_v46  ;;  %v14862_v46 = vld [vmem:[#allocation11 + $0x704] ss:$40 sps:$4 sm:$0xff]  }
 0x5a1   :  { %9938 = vmatprep.subr.bf16.mxu1 %v14811_v61  ;;  %v14865_v61 = vld [vmem:[#allocation11 + $0x754] ss:$40 sps:$4 sm:$0xff]  }
 0x5a4   :  { %9939 = vmatpush1.bf16.msra.mxu1 %v14809_v49  ;;  %v14863_v49 = vld [vmem:[#allocation11 + $0x750] ss:$40 sps:$4 sm:$0xff]  }
 0x5a5   :  { %9940 = vmatprep.subr.bf16.mxu1 %v14814_v51  ;;  %v14868_v51 = vld [vmem:[#allocation11 + $0x7a4] ss:$40 sps:$4 sm:$0xff]  }
 0x5a8   :  { %9941 = vmatpush1.bf16.msra.mxu1 %v14812_v11  ;;  %v14866_v11 = vld [vmem:[#allocation11 + $0x7a0] ss:$40 sps:$4 sm:$0xff]  }
 0x5a9   :  { %9942 = vmatprep.subr.bf16.mxu1 %v14817_v19  ;;  %v14871_v19 = vld [vmem:[#allocation11 + $0x7f4] ss:$40 sps:$4 sm:$0xff]  }
 0x5ac   :  { %9943 = vmatpush1.bf16.msra.mxu1 %v14815_v21  ;;  %v14869_v21 = vld [vmem:[#allocation11 + $0x7f0] ss:$40 sps:$4 sm:$0xff]  }
 0x5ad   :  { %9944 = vmatprep.subr.bf16.mxu1 %v14820_v16  ;;  %v14874_v16 = vld [vmem:[#allocation11 + $0x844] ss:$40 sps:$4 sm:$0xff]  }
 0x5b0   :  { %9945 = vmatpush1.bf16.msra.mxu1 %v14818_v53  ;;  %v14872_v53 = vld [vmem:[#allocation11 + $0x840] ss:$40 sps:$4 sm:$0xff]  }
 0x5b1   :  { %9946 = vmatprep.subr.bf16.mxu1 %v14823_v47  ;;  %v14877_v47 = vld [vmem:[#allocation11 + $0x894] ss:$40 sps:$4 sm:$0xff]  }
 0x5b4   :  { %9947 = vmatpush1.bf16.msra.mxu1 %v14821_v48  ;;  %v14875_v48 = vld [vmem:[#allocation11 + $0x890] ss:$40 sps:$4 sm:$0xff]  }
 0x5b5   :  { %9948 = vmatprep.subr.bf16.mxu1 %v14826_v60  ;;  %v14880_v60 = vld [vmem:[#allocation11 + $0x8e4] ss:$40 sps:$4 sm:$0xff]  }
 0x5b8   :  { %9949 = vmatpush1.bf16.msra.mxu1 %v14824_v3  ;;  %v14878_v3 = vld [vmem:[#allocation11 + $0x8e0] ss:$40 sps:$4 sm:$0xff]  }
 0x5b9   :  { %9950 = vmatprep.subr.bf16.mxu1 %v14829_v62  ;;  %v14883_v62 = vld [vmem:[#allocation11 + $0x934] ss:$40 sps:$4 sm:$0xff]  }
 0x5bc   :  { %9951 = vmatpush1.bf16.msra.mxu1 %v14827_v4  ;;  %v14881_v4 = vld [vmem:[#allocation11 + $0x930] ss:$40 sps:$4 sm:$0xff]  }
 0x5bd   :  { %9952 = vmatprep.subr.bf16.mxu1 %v14832_v33  ;;  %v14886_v33 = vld [vmem:[#allocation11 + $0x984] ss:$40 sps:$4 sm:$0xff]  }
 0x5c0   :  { %9953 = vmatpush1.bf16.msra.mxu1 %v14830_v22  ;;  %v14884_v22 = vld [vmem:[#allocation11 + $0x980] ss:$40 sps:$4 sm:$0xff]  }
 0x5c1   :  { %9954 = vmatprep.subr.bf16.mxu1 %v14835_v20  ;;  %v14889_v20 = vld [vmem:[#allocation11 + $0x9d4] ss:$40 sps:$4 sm:$0xff]  }
 0x5c4   :  { %9955 = vmatpush1.bf16.msra.mxu1 %v14833_v18  ;;  %v14887_v18 = vld [vmem:[#allocation11 + $0x9d0] ss:$40 sps:$4 sm:$0xff]  }
 0x5c5   :  { %9956 = vmatprep.subr.bf16.mxu1 %v14838_v24  ;;  %v14892_v24 = vld [vmem:[#allocation11 + $0xa24] ss:$40 sps:$4 sm:$0xff]  }
 0x5c8   :  { %9957 = vmatpush1.bf16.msra.mxu1 %v14836_v13  ;;  %v14890_v13 = vld [vmem:[#allocation11 + $0xa20] ss:$40 sps:$4 sm:$0xff]  }
 0x5c9   :  { %9958 = vmatprep.subr.bf16.mxu1 %v14841_v35  ;;  %v14895_v35 = vld [vmem:[#allocation11 + $0xa74] ss:$40 sps:$4 sm:$0xff]  }
 0x5cc   :  { %9959 = vmatpush1.bf16.msra.mxu1 %v14839_v36  ;;  %v14893_v36 = vld [vmem:[#allocation11 + $0xa70] ss:$40 sps:$4 sm:$0xff]  }
 0x5cd   :  { %9971 = vmatprep.subr.bf16.mxu1 %v14844_v29  ;;  %v14898_v29 = vld [vmem:[#allocation11 + $0xac4] ss:$40 sps:$4 sm:$0xff]  }
 0x5cf   :  { %9961 = vmatmul.mubr.bf16.vlgmr.msra.gmra.mrb[16].mxu1 %v15800_v26  ;;  %v14857_v26 = vld [vmem:[#allocation11 + $0x6b0] ss:$40 sps:$4 sm:$0xff]  }
 0x5d0   :  { %9972 = vmatpush1.bf16.msra.mxu1 %v14842_v25  ;;  %10003 = vmatprep.mubr.bf16.mxu1 %v15806_v27  ;;  %v14860_v27 = vld [vmem:[#allocation11 + $0x700] ss:$40 sps:$4 sm:$0xff]  }
 0x5d1   :  { %9973 = vmatprep.subr.bf16.mxu1 %v14847_v44  ;;  %v14896_v25 = vld [vmem:[#allocation11 + $0xac0] ss:$40 sps:$4 sm:$0xff]   ;;  %v14901_v44 = vld [vmem:[#allocation11 + $0xb14] ss:$40 sps:$4 sm:$0xff]  }
 0x5d4   :  { %9974 = vmatpush1.bf16.msra.mxu1 %v14845_v34  ;;  %v14989_v34 = vld [vmem:[%s16397_s9 + $0x40] sm:$0xff]  }
 0x5d5   :  { %9975 = vmatprep.subr.bf16.mxu1 %v14850_v30  ;;  %v14899_v30 = vld [vmem:[#allocation11 + $0xb10] ss:$40 sps:$4 sm:$0xff]   ;;  %12887 = vmatprep.subr.bf16.mxu0 %v14989_v34  ;;  %v14934_v34 = vld [vmem:[#allocation11 + $0xe84] ss:$40 sps:$4 sm:$0xff]  }
 0x5d8   :  { %9976 = vmatpush1.bf16.msra.mxu1 %v14848_v8  ;;  %v14904_v8 = vld [vmem:[#allocation11 + $0xb64] ss:$40 sps:$4 sm:$0xff]  }
 0x5d9   :  { %9977 = vmatprep.subr.bf16.mxu1 %v14853_v38  ;;  %v14902_v38 = vld [vmem:[#allocation11 + $0xb60] ss:$40 sps:$4 sm:$0xff]  }
 0x5dc   :  { %9978 = vmatpush1.bf16.msra.mxu1 %v14851_v43  ;;  %v14995_v43 = vld [vmem:[%s16397_s9 + $0x8] sm:$0xff]  }
 0x5dd   :  { %9979 = vmatprep.subr.bf16.mxu1 %v14856_v42  ;;  %v14907_v42 = vld [vmem:[#allocation11 + $0xbb4] ss:$40 sps:$4 sm:$0xff]  }
 0x5e0   :  { %9980 = vmatpush1.bf16.msra.mxu1 %v14854_v31  ;;  %v14999_v31 = vld [vmem:[%s16397_s9 + $0x50] sm:$0xff]  }
 0x5e1   :  { %9981 = vmatprep.subr.bf16.mxu1 %v14859_v28  ;;  %v14905_v28 = vld [vmem:[#allocation11 + $0xbb0] ss:$40 sps:$4 sm:$0xff]  }
 0x5e4   :  { %9982 = vmatpush1.bf16.msra.mxu1 %v14857_v26  ;;  %v15000_v26 = vld [vmem:[%s16397_s9 + $0x10] sm:$0xff]  }
 0x5e5   :  { %9983 = vmatprep.subr.bf16.mxu1 %v14862_v46  ;;  %v14910_v46 = vld [vmem:[#allocation11 + $0xc04] ss:$40 sps:$4 sm:$0xff]  }
 0x5e8   :  { %9984 = vmatpush1.bf16.msra.mxu1 %v14860_v27  ;;  %v15004_v27 = vld [vmem:[%s16397_s9 + $0x58] sm:$0xff]  }
 0x5e9   :  { %9985 = vmatprep.subr.bf16.mxu1 %v14865_v61  ;;  %v14908_v61 = vld [vmem:[#allocation11 + $0xc00] ss:$40 sps:$4 sm:$0xff]  }
 0x5ec   :  { %9986 = vmatpush1.bf16.msra.mxu1 %v14863_v49  ;;  %v15005_v49 = vld [vmem:[%s16397_s9 + $0x18] sm:$0xff]  }
 0x5ed   :  { %9987 = vmatprep.subr.bf16.mxu1 %v14868_v51  ;;  %v14913_v51 = vld [vmem:[#allocation11 + $0xc54] ss:$40 sps:$4 sm:$0xff]  }
 0x5f0   :  { %9988 = vmatpush1.bf16.msra.mxu1 %v14866_v11  ;;  %v15009_v11 = vld [vmem:[%s16397_s9 + $0x60] sm:$0xff]  }
 0x5f1   :  { %9989 = vmatprep.subr.bf16.mxu1 %v14871_v19  ;;  %v14911_v19 = vld [vmem:[#allocation11 + $0xc50] ss:$40 sps:$4 sm:$0xff]  }
 0x5f4   :  { %9990 = vmatpush1.bf16.msra.mxu1 %v14869_v21  ;;  %v15010_v21 = vld [vmem:[%s16397_s9 + $0x20] sm:$0xff]  }
 0x5f5   :  { %9991 = vmatprep.subr.bf16.mxu1 %v14874_v16  ;;  %v14916_v16 = vld [vmem:[#allocation11 + $0xca4] ss:$40 sps:$4 sm:$0xff]  }
 0x5f8   :  { %9992 = vmatpush1.bf16.msra.mxu1 %v14872_v53  ;;  %v15014_v53 = vld [vmem:[%s16397_s9 + $0x68] sm:$0xff]  }
 0x5f9   :  { %9993 = vmatprep.subr.bf16.mxu1 %v14877_v47  ;;  %v14914_v47 = vld [vmem:[#allocation11 + $0xca0] ss:$40 sps:$4 sm:$0xff]  }
 0x5fc   :  { %9994 = vmatpush1.bf16.msra.mxu1 %v14875_v48  ;;  %v15015_v48 = vld [vmem:[%s16397_s9 + $0x28] sm:$0xff]  }
 0x5fd   :  { %9995 = vmatprep.subr.bf16.mxu1 %v14880_v60  ;;  %v14919_v60 = vld [vmem:[#allocation11 + $0xcf4] ss:$40 sps:$4 sm:$0xff]  }
 0x600   :  { %9996 = vmatpush1.bf16.msra.mxu1 %v14878_v3  ;;  %v15019_v3 = vld [vmem:[%s16397_s9 + $0x70] sm:$0xff]  }
 0x601   :  { %9997 = vmatprep.subr.bf16.mxu1 %v14883_v62  ;;  %v15020_v62 = vld [vmem:[%s16397_s9 + $0x30] sm:$0xff]  }
 0x604   :  { %9998 = vmatpush1.bf16.msra.mxu1 %v14881_v4  ;;  %v15024_v4 = vld [vmem:[%s16397_s9 + $0x78] sm:$0xff]  }
 0x605   :  { %9999 = vmatprep.subr.bf16.mxu1 %v14886_v33  ;;  %v14917_v33 = vld [vmem:[#allocation11 + $0xcf0] ss:$40 sps:$4 sm:$0xff]  }
 0x608   :  { %10000 = vmatpush1.bf16.msra.mxu1 %v14884_v22  ;;  %v14922_v22 = vld [vmem:[#allocation11 + $0xd44] ss:$40 sps:$4 sm:$0xff]  }
 0x609   :  { %10001 = vmatprep.subr.bf16.mxu1 %v14889_v20  ;;  %v15025_v20 = vld [vmem:[%s16397_s9 + $0x38] sm:$0xff]  }
 0x60c   :  { %10002 = vmatpush1.bf16.msra.mxu1 %v14887_v18  ;;  %v15032_v18 = vld [vmem:[%s16397_s9 + $0xc0] sm:$0xff]  }
 0x60d   :  { %10014 = vmatprep.subr.bf16.mxu1 %v14892_v24  ;;  %v14920_v24 = vld [vmem:[#allocation11 + $0xd40] ss:$40 sps:$4 sm:$0xff]  }
 0x60f   :  { %10004 = vmatmul.mubr.bf16.vlgmr.msra.gmra.mrb[16].mxu1 %v15829_v5  ;;  %v14990_v5 = vld [vmem:[%s16397_s9] sm:$0xff]  }
 0x610   :  { %10015 = vmatpush1.bf16.msra.mxu1 %v14890_v13  ;;  %10046 = vmatprep.mubr.bf16.mxu1 %v15832_v7  ;;  %v14994_v7 = vld [vmem:[%s16397_s9 + $0x48] sm:$0xff]  }
 0x611   :  { %10016 = vmatprep.subr.bf16.mxu1 %v14895_v35  ;;  %12888 = vmatpush3.bf16.msra.mxu0 %v14990_v5  ;;  %v14925_v13 = vld [vmem:[#allocation11 + $0xd94] ss:$40 sps:$4 sm:$0xff]   ;;  %v14923_v35 = vld [vmem:[#allocation11 + $0xd90] ss:$40 sps:$4 sm:$0xff]  }
 0x612   :  { %12889 = vmatprep.subr.bf16.mxu0 %v14994_v7  ;;  %v14937_v5 = vld [vmem:[#allocation11 + $0xed4] ss:$40 sps:$4 sm:$0xff]   ;;  %v14940_v7 = vld [vmem:[#allocation11 + $0xf24] ss:$40 sps:$4 sm:$0xff]  }
 0x614   :  { %10017 = vmatpush1.bf16.msra.mxu1 %v14893_v36  ;;  %v14928_v36 = vld [vmem:[#allocation11 + $0xde4] ss:$40 sps:$4 sm:$0xff]  }
 0x615   :  { %10018 = vmatprep.subr.bf16.mxu1 %v14898_v29  ;;  %12890 = vmatpush3.bf16.msra.mxu0 %v14995_v43  ;;  %v14926_v29 = vld [vmem:[#allocation11 + $0xde0] ss:$40 sps:$4 sm:$0xff]   ;;  %v14943_v43 = vld [vmem:[#allocation11 + $0xf74] ss:$40 sps:$4 sm:$0xff]  }
 0x616   :  { %12891 = vmatprep.subr.bf16.mxu0 %v14999_v31  ;;  %v14946_v31 = vld [vmem:[#allocation11 + $0xfc4] ss:$40 sps:$4 sm:$0xff]  }
 0x618   :  { %10019 = vmatpush1.bf16.msra.mxu1 %v14896_v25  ;;  %v14931_v25 = vld [vmem:[#allocation11 + $0xe34] ss:$40 sps:$4 sm:$0xff]  }
 0x619   :  { %10020 = vmatprep.subr.bf16.mxu1 %v14901_v44  ;;  %12892 = vmatpush3.bf16.msra.mxu0 %v15000_v26  ;;  %v14929_v44 = vld [vmem:[#allocation11 + $0xe30] ss:$40 sps:$4 sm:$0xff]   ;;  %v14949_v26 = vld [vmem:[#allocation11 + $0x1014] ss:$40 sps:$4 sm:$0xff]  }
 0x61a   :  { %12893 = vmatprep.subr.bf16.mxu0 %v15004_v27  ;;  %v14952_v27 = vld [vmem:[#allocation11 + $0x1064] ss:$40 sps:$4 sm:$0xff]  }
 0x61c   :  { %10021 = vmatpush1.bf16.msra.mxu1 %v14899_v30  ;;  %v14932_v30 = vld [vmem:[#allocation11 + $0xe80] ss:$40 sps:$4 sm:$0xff]  }
 0x61d   :  { %10022 = vmatprep.subr.bf16.mxu1 %v14904_v8  ;;  %12894 = vmatpush3.bf16.msra.mxu0 %v15005_v49  ;;  %v14935_v8 = vld [vmem:[#allocation11 + $0xed0] ss:$40 sps:$4 sm:$0xff]   ;;  %v14955_v49 = vld [vmem:[#allocation11 + $0x10b4] ss:$40 sps:$4 sm:$0xff]  }
 0x61e   :  { %12895 = vmatprep.subr.bf16.mxu0 %v15009_v11 }
 0x620   :  { %10023 = vmatpush1.bf16.msra.mxu1 %v14902_v38  ;;  %v14938_v38 = vld [vmem:[#allocation11 + $0xf20] ss:$40 sps:$4 sm:$0xff]  }
 0x621   :  { %10024 = vmatprep.subr.bf16.mxu1 %v14907_v42  ;;  %12896 = vmatpush3.bf16.msra.mxu0 %v15010_v21  ;;  %v14941_v42 = vld [vmem:[#allocation11 + $0xf70] ss:$40 sps:$4 sm:$0xff]  }
 0x622   :  { %12897 = vmatprep.subr.bf16.mxu0 %v15014_v53  ;;  %v14956_v53 = vld [vmem:[#allocation11 + $0x1100] ss:$40 sps:$4 sm:$0xff]  }
 0x624   :  { %10025 = vmatpush1.bf16.msra.mxu1 %v14905_v28  ;;  %v14944_v28 = vld [vmem:[#allocation11 + $0xfc0] ss:$40 sps:$4 sm:$0xff]  }
 0x625   :  { %10026 = vmatprep.subr.bf16.mxu1 %v14910_v46  ;;  %12898 = vmatpush3.bf16.msra.mxu0 %v15015_v48  ;;  %v14947_v46 = vld [vmem:[#allocation11 + $0x1010] ss:$40 sps:$4 sm:$0xff]  }
 0x626   :  { %12899 = vmatprep.subr.bf16.mxu0 %v15019_v3  ;;  %v14961_v3 = vld [vmem:[#allocation11 + $0x1154] ss:$40 sps:$4 sm:$0xff]  }
 0x628   :  { %10027 = vmatpush1.bf16.msra.mxu1 %v14908_v61  ;;  %v14950_v61 = vld [vmem:[#allocation11 + $0x1060] ss:$40 sps:$4 sm:$0xff]  }
 0x629   :  { %10028 = vmatprep.subr.bf16.mxu1 %v14913_v51  ;;  %12900 = vmatpush3.bf16.msra.mxu0 %v15020_v62  ;;  %v14958_v51 = vld [vmem:[#allocation11 + $0x1104] ss:$40 sps:$4 sm:$0xff]  }
 0x62a   :  { %12901 = vmatprep.subr.bf16.mxu0 %v15024_v4 }
 0x62c   :  { %10029 = vmatpush1.bf16.msra.mxu1 %v14911_v19 }
 0x62d   :  { %10030 = vmatprep.subr.bf16.mxu1 %v14916_v16  ;;  %12902 = vmatpush3.bf16.msra.mxu0 %v15025_v20 }
 0x62e   :  { %12909 = vmatprep.subr.bf16.mxu0 %v15032_v18 }
 0x630   :  { %10031 = vmatpush1.bf16.msra.mxu1 %v14914_v47 }
 0x631   :  { %10032 = vmatprep.subr.bf16.mxu1 %v14919_v60 }
 0x634   :  { %10033 = vmatpush1.bf16.msra.mxu1 %v14917_v33 }
 0x635   :  { %10034 = vmatprep.subr.bf16.mxu1 %v14922_v22 }
 0x638   :  { %10035 = vmatpush1.bf16.msra.mxu1 %v14920_v24 }
 0x639   :  { %10036 = vmatprep.subr.bf16.mxu1 %v14925_v13  ;;  %v14959_v13 = vld [vmem:[#allocation11 + $0x1150] ss:$40 sps:$4 sm:$0xff]  }
 0x63c   :  { %10037 = vmatpush1.bf16.msra.mxu1 %v14923_v35 }
 0x63d   :  { %10038 = vmatprep.subr.bf16.mxu1 %v14928_v36 }
 0x640   :  { %10039 = vmatpush1.bf16.msra.mxu1 %v14926_v29  ;;  %v14964_v29 = vld [vmem:[#allocation11 + $0x11a4] ss:$40 sps:$4 sm:$0xff]  }
 0x641   :  { %10040 = vmatprep.subr.bf16.mxu1 %v14931_v25 }
 0x644   :  { %10041 = vmatpush1.bf16.msra.mxu1 %v14929_v44 }
 0x645   :  { %10042 = vmatprep.subr.bf16.mxu1 %v14934_v34 }
 0x648   :  { %10043 = vmatpush1.bf16.msra.mxu1 %v14932_v30 }
 0x649   :  { %10044 = vmatprep.subr.bf16.mxu1 %v14937_v5 }
 0x64c   :  { %10045 = vmatpush1.bf16.msra.mxu1 %v14935_v8 }
 0x64d   :  { %10057 = vmatprep.subr.bf16.mxu1 %v14940_v7  ;;  %v14962_v7 = vld [vmem:[#allocation11 + $0x11a0] ss:$40 sps:$4 sm:$0xff]  }
 0x64f   :  { %10047 = vmatmul.mubr.bf16.vlgmr.msra.gmra.mrb[16].mxu1 %v15841_v41  ;;  %v14953_v41 = vld [vmem:[#allocation11 + $0x10b0] ss:$40 sps:$4 sm:$0xff]  }
 0x650   :  { %10058 = vmatpush1.bf16.msra.mxu1 %v14938_v38  ;;  %10089 = vmatprep.mubr.bf16.mxu1 %v15847_v37 }
 0x651   :  { %10059 = vmatprep.subr.bf16.mxu1 %v14943_v43 }
 0x654   :  { %10060 = vmatpush1.bf16.msra.mxu1 %v14941_v42  ;;  %v14967_v42 = vld [vmem:[#allocation11 + $0x11f4] ss:$40 sps:$4 sm:$0xff]  }
 0x655   :  { %10061 = vmatprep.subr.bf16.mxu1 %v14946_v31 }
 0x658   :  { %10062 = vmatpush1.bf16.msra.mxu1 %v14944_v28 }
 0x659   :  { %10063 = vmatprep.subr.bf16.mxu1 %v14949_v26 }
 0x65c   :  { %10064 = vmatpush1.bf16.msra.mxu1 %v14947_v46 }
 0x65d   :  { %10065 = vmatprep.subr.bf16.mxu1 %v14952_v27 }
 0x660   :  { %10066 = vmatpush1.bf16.msra.mxu1 %v14950_v61 }
 0x661   :  { %10067 = vmatprep.subr.bf16.mxu1 %v14955_v49  ;;  %v14965_v49 = vld [vmem:[#allocation11 + $0x11f0] ss:$40 sps:$4 sm:$0xff]  }
 0x662   :  { %v9704_v37 = vpop.f32.mrb[12].mxu1 }
 0x663   :  { %v9919_v11 = vpop.f32.mrb[20].mxu0  ;;  %v9706_v19 = vpop.f32.mrb[13].mxu1 }
 0x664   :  { %v16060_v21 = vpop.f32.mrb[21].mxu0  ;;  %v9708_v16 = vpop.f32.mrb[14].mxu1  ;;  %10068 = vmatpush1.bf16.msra.mxu1 %v14953_v41 }
 0x665   :  { %v10175_v47 = vadd.f32 %v9708_v16, %v9704_v37  ;;  %v9923_v48 = vpop.f32.mrb[22].mxu0  ;;  %v9710_v60 = vpop.f32.mrb[15].mxu1  ;;  %10069 = vmatprep.subr.bf16.mxu1 %v14958_v51 }
 0x666   :  { %v10189_v62 = vadd.f32 %v9923_v48, %v9919_v11  ;;  %v10182_v4 = vadd.f32 %v9710_v60, %v9706_v19  ;;  %v9925_v33 = vpop.f32.mrb[23].mxu0 }
 0x667   :  { %v10176_v22 = vrot.slane %v10175_v47, 4  ;;  %v10196_v20 = vadd.f32 %v9925_v33, %v16060_v21 }
 0x668   :  { %v10190_v18 = vrot.slane %v10189_v62, 4  ;;  %v10183_v24 = vrot.slane %v10182_v4, 4  ;;  %10070 = vmatpush1.bf16.msra.mxu1 %v14956_v53  ;;  %v14970_v53 = vld [vmem:[#allocation11 + $0x1244] ss:$40 sps:$4 sm:$0xff]  }
 0x669   :  { %v10177_v35 = vadd.f32 %v10176_v22, %v10175_v47  ;;  %v10197_v36 = vrot.slane %v10196_v20, 4  ;;  %10071 = vmatprep.subr.bf16.mxu1 %v14961_v3 }
 0x66a   :  { %v10191_v25 = vadd.f32 %v10190_v18, %v10189_v62  ;;  %v10184_v44 = vadd.f32 %v10183_v24, %v10182_v4  ;;  %v14968_v18 = vld [vmem:[#allocation11 + $0x1240] ss:$40 sps:$4 sm:$0xff]  }
 0x66b   :  { %v10178_v34 = vrot.slane %v10177_v35, 2  ;;  %v10198_v30 = vadd.f32 %v10197_v36, %v10196_v20  ;;  %v14973_v36 = vld [vmem:[#allocation11 + $0x1294] ss:$40 sps:$4 sm:$0xff]  }
 0x66c   :  { %v10192_v5 = vrot.slane %v10191_v25, 2  ;;  %v10185_v8 = vrot.slane %v10184_v44, 2  ;;  %10072 = vmatpush1.bf16.msra.mxu1 %v14959_v13 }
 0x66d   :  { %v10179_v38 = vadd.f32 %v10178_v34, %v10177_v35  ;;  %v10199_v43 = vrot.slane %v10198_v30, 2  ;;  %10073 = vmatprep.subr.bf16.mxu1 %v14964_v29 }
 0x66e   :  { %v10193_v31 = vadd.f32 %v10192_v5, %v10191_v25  ;;  %v10186_v28 = vadd.f32 %v10185_v8, %v10184_v44  ;;  %v14971_v8 = vld [vmem:[#allocation11 + $0x1290] ss:$40 sps:$4 sm:$0xff]  }
 0x66f   :  { %v10180_v26 = vrot.slane %v10179_v38, 1  ;;  %v10200_v46 = vadd.f32 %v10199_v43, %v10198_v30 }
 0x670   :  { %v10194_v27 = vrot.slane %v10193_v31, 1  ;;  %v10187_v61 = vrot.slane %v10186_v28, 1  ;;  %10074 = vmatpush1.bf16.msra.mxu1 %v14962_v7 }
 0x671   :  { %v10181_v41 = vadd.f32 %v10180_v26, %v10179_v38  ;;  %v10201_v51 = vrot.slane %v10200_v46, 1  ;;  %10075 = vmatprep.subr.bf16.mxu1 %v14967_v42  ;;  %v14976_v38 = vld [vmem:[#allocation11 + $0x12e4] ss:$40 sps:$4 sm:$0xff]  }
 0x672   :  { %v10195_v47 = vadd.f32 %v10194_v27, %v10193_v31  ;;  %v10188_v3 = vadd.f32 %v10187_v61, %v10186_v28  ;;  %v14974_v27 = vld [vmem:[#allocation11 + $0x12e0] ss:$40 sps:$4 sm:$0xff]  }
 0x673   :  { %v10223_v62 = vmul.f32 0.0625, %v10181_v41  ;;  %v10202_v4 = vadd.f32 %v10201_v51, %v10200_v46  ;;  %v14979_v41 = vld [vmem:[#allocation11 + $0x1334] ss:$40 sps:$4 sm:$0xff]  }
 0x674   :  { %v10225_v22 = vmul.f32 0.0625, %v10195_v47  ;;  %v10224_v20 = vmul.f32 0.0625, %v10188_v3  ;;  %10076 = vmatpush1.bf16.msra.mxu1 %v14965_v49 }
 0x675   :  { %v16063_v24 = vsub.f32 %v9704_v37, %v10223_v62  ;;  %v16065_v13 = vsub.f32 %v9708_v16, %v10223_v62  ;;  %v10226_v35 = vmul.f32 0.0625, %v10202_v4  ;;  %10077 = vmatprep.subr.bf16.mxu1 %v14970_v53 }
 0x676   :  { %v16067_v29 = vsub.f32 %v9919_v11, %v10225_v22  ;;  %v16069_v25 = vsub.f32 %v9923_v48, %v10225_v22  ;;  %v16071_v44 = vsub.f32 %v9706_v19, %v10224_v20  ;;  %v16073_v34 = vsub.f32 %v9710_v60, %v10224_v20  ;;  %v14977_v22 = vld [vmem:[#allocation11 + $0x1330] ss:$40 sps:$4 sm:$0xff]  }
 0x677   :  { %v10253_v30 = vmul.f32 %v16063_v24, %v16063_v24  ;;  %v10263_v37 = vmul.f32 %v16065_v13, %v16065_v13  ;;  %v16080_v16 = vsub.f32 %v16060_v21, %v10226_v35  ;;  %v16082_v5 = vsub.f32 %v9925_v33, %v10226_v35  ;;  %v14982_v35 = vld [vmem:[#allocation11 + $0x1384] ss:$40 sps:$4 sm:$0xff]  }
 0x678   :  { %v10255_v11 = vmul.f32 %v16067_v29, %v16067_v29  ;;  %v10265_v19 = vmul.f32 %v16069_v25, %v16069_v25  ;;  %v10254_v48 = vmul.f32 %v16071_v44, %v16071_v44  ;;  %v10264_v60 = vmul.f32 %v16073_v34, %v16073_v34  ;;  %10078 = vmatpush1.bf16.msra.mxu1 %v14968_v18 }
 0x679   :  { %v10297_v7 = vadd.f32 %v10263_v37, %v10253_v30  ;;  %v10256_v21 = vmul.f32 %v16080_v16, %v16080_v16  ;;  %v10266_v33 = vmul.f32 %v16082_v5, %v16082_v5  ;;  %10079 = vmatprep.subr.bf16.mxu1 %v14973_v36 }
 0x67a   :  { %v10311_v43 = vadd.f32 %v10265_v19, %v10255_v11  ;;  %v10304_v42 = vadd.f32 %v10264_v60, %v10254_v48  ;;  %v14980_v60 = vld [vmem:[#allocation11 + $0x1380] ss:$40 sps:$4 sm:$0xff]  }
 0x67b   :  { %v10298_v31 = vrot.slane %v10297_v7, 4  ;;  %v10318_v28 = vadd.f32 %v10266_v33, %v10256_v21  ;;  %v14985_v21 = vld [vmem:[#allocation11 + $0x13d4] ss:$40 sps:$4 sm:$0xff]  }
 0x67c   :  { %v10312_v26 = vrot.slane %v10311_v43, 4  ;;  %v10305_v46 = vrot.slane %v10304_v42, 4  ;;  %10080 = vmatpush1.bf16.msra.mxu1 %v14971_v8 }
 0x67d   :  { %v10299_v61 = vadd.f32 %v10298_v31, %v10297_v7  ;;  %v10319_v49 = vrot.slane %v10318_v28, 4  ;;  %10081 = vmatprep.subr.bf16.mxu1 %v14976_v38 }
 0x67e   :  { %v10313_v51 = vadd.f32 %v10312_v26, %v10311_v43  ;;  %v10306_v53 = vadd.f32 %v10305_v46, %v10304_v42  ;;  %v14983_v26 = vld [vmem:[#allocation11 + $0x13d0] ss:$40 sps:$4 sm:$0xff]  }
 0x67f   :  { %v10300_v47 = vrot.slane %v10299_v61, 2  ;;  %v10320_v3 = vadd.f32 %v10319_v49, %v10318_v28 }
 0x680   :  { %v10314_v62 = vrot.slane %v10313_v51, 2  ;;  %v10307_v4 = vrot.slane %v10306_v53, 2  ;;  %10082 = vmatpush1.bf16.msra.mxu1 %v14974_v27 }
 0x681   :  { %v10301_v20 = vadd.f32 %v10300_v47, %v10299_v61  ;;  %v10321_v18 = vrot.slane %v10320_v3, 2  ;;  %10083 = vmatprep.subr.bf16.mxu1 %v14979_v41  ;;  %v14988_v61 = vld [vmem:[#allocation11 + $0x1424] ss:$40 sps:$4 sm:$0xff]   ;;  %v14993_v47 = vld [vmem:[#allocation11 + $0x1474] ss:$40 sps:$4 sm:$0xff]  }
 0x682   :  { %v10315_v36 = vadd.f32 %v10314_v62, %v10313_v51  ;;  %v10308_v30 = vadd.f32 %v10307_v4, %v10306_v53  ;;  %v14986_v53 = vld [vmem:[#allocation11 + $0x1420] ss:$40 sps:$4 sm:$0xff]   ;;  %v14998_v62 = vld [vmem:[#allocation11 + $0x14c4] ss:$40 sps:$4 sm:$0xff]  }
 0x683   :  { %v10302_v37 = vrot.slane %v10301_v20, 1  ;;  %v10322_v11 = vadd.f32 %v10321_v18, %v10320_v3  ;;  %v14991_v3 = vld [vmem:[#allocation11 + $0x1470] ss:$40 sps:$4 sm:$0xff]   ;;  %v14996_v4 = vld [vmem:[#allocation11 + $0x14c0] ss:$40 sps:$4 sm:$0xff]  }
 0x684   :  { %v10316_v19 = vrot.slane %v10315_v36, 1  ;;  %v10309_v48 = vrot.slane %v10308_v30, 1  ;;  %10084 = vmatpush1.bf16.msra.mxu1 %v14977_v22 }
 0x685   :  { %v10303_v8 = vadd.f32 %v10302_v37, %v10301_v20  ;;  %v10323_v7 = vrot.slane %v10322_v11, 1  ;;  %10085 = vmatprep.subr.bf16.mxu1 %v14982_v35  ;;  %v15003_v20 = vld [vmem:[#allocation11 + $0x1514] ss:$40 sps:$4 sm:$0xff]   ;;  %v15001_v37 = vld [vmem:[#allocation11 + $0x1510] ss:$40 sps:$4 sm:$0xff]  }
 0x686   :  { %v10317_v33 = vadd.f32 %v10316_v19, %v10315_v36  ;;  %v10310_v38 = vadd.f32 %v10309_v48, %v10308_v30  ;;  %v15006_v48 = vld [vmem:[#allocation11 + $0x1560] ss:$40 sps:$4 sm:$0xff]  }
 0x687   :  { %v10345_v43 = vmul.f32 0.0625, %v10303_v8  ;;  %v10324_v42 = vadd.f32 %v10323_v7, %v10322_v11  ;;  %v15013_v8 = vld [vmem:[#allocation11 + $0x15b4] ss:$40 sps:$4 sm:$0xff]   ;;  %v10421_v7 = vrot.slane %v10413_v32, %v15681_v54 }
 0x688   :  { %v10347_v31 = vmul.f32 0.0625, %v10317_v33  ;;  %v10346_v28 = vmul.f32 0.0625, %v10310_v38  ;;  %10086 = vmatpush1.bf16.msra.mxu1 %v14980_v60  ;;  %v10143_v33 = vld [vmem:[#allocation13] sm:$0xff] }
 0x689   :  { %v10355_v46 = vadd.f32 1e-05, %v10345_v43  ;;  %v10348_v27 = vmul.f32 0.0625, %v10324_v42  ;;  %10087 = vmatprep.subr.bf16.mxu1 %v14985_v21  ;;  %v15011_v38 = vld [vmem:[#allocation11 + $0x15b0] ss:$40 sps:$4 sm:$0xff]  }
 0x68a   :  { %v10357_v49 = vadd.f32 1e-05, %v10347_v31  ;;  %v10356_v41 = vadd.f32 1e-05, %v10346_v28  ;;  %v16106_v43 = vld [vmem:[#allocation14] sm:$0xff] }
 0x68b   :  { %15137 = vrsqrt.f32 %v10355_v46  ;;  %v10358_v51 = vadd.f32 1e-05, %v10348_v27  ;;  %v15018_v31 = vld [vmem:[#allocation11 + $0x1604] ss:$40 sps:$4 sm:$0xff]   ;;  %v15016_v46 = vld [vmem:[#allocation11 + $0x1600] ss:$40 sps:$4 sm:$0xff]   ;;  %v10530_v39 = vrot.slane %v16106_v43, %v15731_v56 }
 0x68c   :  { %15139 = vrsqrt.f32 %v10357_v49  ;;  %10088 = vmatpush1.bf16.msra.mxu1 %v14983_v26  ;;  %v16112_v26 = vrot.slane %v16106_v43, %v15753_v57  ;;  %v15023_v32 = vld [vmem:[#allocation11 + $0x1654] ss:$40 sps:$4 sm:$0xff]  }
 0x68d   :  { %15141 = vrsqrt.f32 %v10356_v41  ;;  %10100 = vmatprep.subr.bf16.mxu1 %v14988_v61  ;;  %v10526_v41 = vrot.slane %v16106_v43, %v15741_v63 }
 0x68e   :  { %15143 = vrsqrt.f32 %v10358_v51  ;;  %v10538_v51 = vrot.slane %v16106_v43, %v15744_v0 }
 0x68f   :  { %10090 = vmatmul.mubr.bf16.vlgmr.msra.gmra.mrb[16].mxu1 %v15887_v45  ;;  %v15008_v45 = vld [vmem:[#allocation11 + $0x1564] ss:$40 sps:$4 sm:$0xff]  }
 0x690   :  { %10101 = vmatpush1.bf16.msra.mxu1 %v14986_v53  ;;  %12799 = vmatprep.mubr.msk.bf16.mxu1 %vm4080_vm1, %v15897_v55 }
 0x691   :  { %10102 = vmatprep.subr.bf16.mxu1 %v14993_v47 }
 0x694   :  { %10103 = vmatpush1.bf16.msra.mxu1 %v14991_v3 }
 0x695   :  { %v15138_v22 = vpop.eup %15137  ;;  %10104 = vmatprep.subr.bf16.mxu1 %v14998_v62 }
 0x696   :  { %v15140_v18 = vpop.eup %15139 }
 0x697   :  { %v15142_v35 = vpop.eup %15141 }
 0x698   :  { %v15144_v36 = vpop.eup %15143  ;;  %v10383_v30 = vcombine.low %v15138_v22, %v15142_v35  ;;  %10105 = vmatpush1.bf16.msra.mxu1 %v14996_v4  ;;  %v15021_v4 = vld [vmem:[#allocation11 + $0x1650] ss:$40 sps:$4 sm:$0xff]  }
 0x699   :  { %v10384_v11 = vcombine.low %v15140_v18, %v15144_v36  ;;  %10106 = vmatprep.subr.bf16.mxu1 %v15003_v20 }
 0x69a   :  { %v10405_v19 = vrot.slane %v10383_v30, %v15681_v54 }
 0x69b   :  { %v10412_v55 = vrot.slane %v10384_v11, %v15681_v54  ;;  %v15026_v11 = vld [vmem:[#allocation11 + $0x16a0] ss:$40 sps:$4 sm:$0xff]  }
 0x69c   :  { %10107 = vmatpush1.bf16.msra.mxu1 %v15001_v37 }
 0x69d   :  { %v10414_v60 = vcombine.low %v10405_v19, %v10412_v55  ;;  %10108 = vmatprep.subr.bf16.mxu1 %v15008_v45  ;;  %v15029_v19 = vld [vmem:[#allocation16] ss:$40 sps:$4 sm:$0xff]  }
 0x69f   :  { %v10428_v21 = vrot.slane %v10414_v60, %v15681_v54 }
 0x6a0   :  { %10109 = vmatpush1.bf16.msra.mxu1 %v15006_v48 }
 0x6a1   :  { %v10429_v42 = vcombine.low %v10421_v7, %v10428_v21  ;;  %10110 = vmatprep.subr.bf16.mxu1 %v15013_v8  ;;  %v15036_v21 = vld [vmem:[#allocation16 + $0xc] ss:$40 sps:$4 sm:$0xff]  }
 0x6a3   :  { %v16108_v28 = vmul.f32 %v10429_v42, %v10143_v33  ;;  %v15039_v33 = vld [vmem:[#allocation11 + $0x16f4] ss:$40 sps:$4 sm:$0xff]   ;;  %v10542_v42 = vrot.slane %v16106_v43, %v15750_v2 }
 0x6a4   :  { %10111 = vmatpush1.bf16.msra.mxu1 %v15011_v38 }
 0x6a5   :  { %v10482_v40 = vrot.slane %v16108_v28, %v15753_v57  ;;  %10112 = vmatprep.subr.bf16.mxu1 %v15018_v31  ;;  %v10458_v27 = vrot.slane %v16108_v28, %v15731_v56  ;;  %v10454_v61 = vrot.slane %v16108_v28, %v15741_v63  ;;  %v10466_v49 = vrot.slane %v16108_v28, %v15744_v0 }
 0x6a6   :  { %v10474_v57 = vrot.slane %v16108_v28, %v15728_v50  ;;  %v10478_v31 = vrot.slane %v16108_v28, %v15756_v58 }
 0x6a7   :  { %v10508_v53 = vmul.f32 %v10482_v40, %v16080_v16  ;;  %v10518_v47 = vmul.f32 %v10482_v40, %v16082_v5  ;;  %v10502_v3 = vmul.f32 %v10458_v27, %v15959_v23  ;;  %v10512_v62 = vmul.f32 %v10458_v27, %v15962_v59  ;;  %v15028_v16 = vld [vmem:[#allocation11 + $0x16a4] ss:$40 sps:$4 sm:$0xff]   ;;  %v15033_v27 = vld [vmem:[%s16397_s9 + $0x80] sm:$0xff]  }
 0x6a8   :  { %10113 = vmatpush1.bf16.msra.mxu1 %v15016_v46  ;;  %v10501_v22 = vmul.f32 %v10454_v61, %v15947_v6  ;;  %v10511_v20 = vmul.f32 %v10454_v61, %v15950_v9  ;;  %v10504_v18 = vmul.f32 %v10466_v49, %v15965_v15  ;;  %v10514_v0 = vmul.f32 %v10466_v49, %v15968_v52  ;;  %v15031_v15 = vld [vmem:[#allocation16 + $0x4] ss:$40 sps:$4 sm:$0xff]  }
 0x6a9   :  { %v16139_v35 = vadd.f32 %v16112_v26, %v10518_v47  ;;  %10114 = vmatprep.subr.bf16.mxu1 %v15023_v32  ;;  %v10574_v5 = vadd.f32 %v10530_v39, %v10502_v3  ;;  %v10584_v36 = vadd.f32 %v10530_v39, %v10512_v62  ;;  %v10470_v23 = vrot.slane %v16108_v28, %v15750_v2  ;;  %v15044_v47 = vld [vmem:[#allocation11 + $0x1744] ss:$40 sps:$4 sm:$0xff]  }
 0x6aa   :  { %v10573_v59 = vadd.f32 %v10526_v41, %v10501_v22  ;;  %v10583_v30 = vadd.f32 %v10526_v41, %v10511_v20  ;;  %v10576_v37 = vadd.f32 %v10538_v51, %v10504_v18  ;;  %v10586_v6 = vadd.f32 %v10538_v51, %v10514_v0  ;;  %v15037_v41 = vld [vmem:[#allocation11 + $0x16f0] ss:$40 sps:$4 sm:$0xff]  }
 0x6ab   :  { %v10594_v9 = vmax.f32 %v10574_v5, 0.0  ;;  %v10604_v45 = vmax.f32 %v10584_v36, 0.0  ;;  %v10546_v52 = vrot.slane %v16106_v43, %v15728_v50  ;;  %v10506_v38 = vmul.f32 %v10474_v57, %v16071_v44 }
 0x6ac   :  { %10115 = vmatpush1.bf16.msra.mxu1 %v15021_v4  ;;  %v10593_v55 = vmax.f32 %v10573_v59, 0.0  ;;  %v10603_v48 = vmax.f32 %v10583_v30, 0.0  ;;  %v10596_v60 = vmax.f32 %v10576_v37, 0.0  ;;  %v10606_v8 = vmax.f32 %v10586_v6, 0.0  ;;  %v15046_v37 = vld [vmem:[%s16397_s9 + $0x90] sm:$0xff]   ;;  %v15047_v6 = vld [vmem:[%s16397_s9 + $0xd8] sm:$0xff]  }
 0x6ad   :  { %10116 = vmatprep.subr.bf16.mxu1 %v15028_v16  ;;  %v10614_v7 = vpack.c.bf16 %v10604_v45, %v10594_v9  ;;  %v10516_v39 = vmul.f32 %v10474_v57, %v16073_v34  ;;  %v10505_v40 = vmul.f32 %v10470_v23, %v16063_v24  ;;  %v10578_v61 = vadd.f32 %v10546_v52, %v10506_v38  ;;  %v15040_v34 = vld [vmem:[%s16397_s9 + $0xc8] sm:$0xff]   ;;  %v15048_v9 = vld [vmem:[%s16397_s9 + $0x98] sm:$0xff]   ;;  %v15049_v45 = vld [vmem:[%s16397_s9 + $0xe0] sm:$0xff]  }
 0x6ae   :  { %v10613_v46 = vpack.c.bf16 %v10603_v48, %v10593_v55  ;;  %v10616_v50 = vpack.c.bf16 %v10606_v8, %v10596_v60  ;;  %v10550_v44 = vrot.slane %v16106_v43, %v15756_v58  ;;  %v10610_v2 = vmax.f32 %v16139_v35, 0.0  ;;  %v15042_v16 = vld [vmem:[#allocation11 + $0x1740] ss:$40 sps:$4 sm:$0xff]  }
 0x6af   :  { %v10684_v32 = vmul.bf16 %v15031_v15, %v10614_v7  ;;  %v10588_v51 = vadd.f32 %v10546_v52, %v10516_v39  ;;  %v10515_v24 = vmul.f32 %v10470_v23, %v16065_v13  ;;  %v10598_v3 = vmax.f32 %v10578_v61, 0.0  ;;  %v15041_v13 = vld [vmem:[%s16397_s9 + $0x88] sm:$0xff]   ;;  %v15050_v52 = vld [vmem:[%s16397_s9 + $0xa0] sm:$0xff]   ;;  %v15053_v60 = vld [vmem:[%s16397_s9 + $0xf0] sm:$0xff]  }
 0x6b0   :  { %10117 = vmatpush1.bf16.msra.mxu1 %v15026_v11  ;;  %v10683_v49 = vmul.bf16 %v15029_v19, %v10613_v46  ;;  %v10686_v57 = vmul.bf16 %v15036_v21, %v10616_v50  ;;  %v10577_v62 = vadd.f32 %v10542_v42, %v10505_v40  ;;  %v10580_v58 = vadd.f32 %v16112_v26, %v10508_v53  ;;  %v15045_v26 = vld [vmem:[%s16397_s9 + $0xd0] sm:$0xff]   ;;  %v15056_v21 = vld [vmem:[%s16397_s9 + $0xb8] sm:$0xff]   ;;  %v15058_v46 = vld [vmem:[%s16397_s9 + $0x100] sm:$0xff]  }
 0x6b1   :  { %11335 = vmatprep.mubr.bf16.mxu0 %v10684_v32  ;;  %10118 = vmatprep.subr.bf16.mxu1 %v15039_v33  ;;  %v10608_v4 = vmax.f32 %v10588_v51, 0.0  ;;  %v10587_v22 = vadd.f32 %v10542_v42, %v10515_v24  ;;  %v10507_v20 = vmul.f32 %v10478_v31, %v16067_v29  ;;  %v10517_v18 = vmul.f32 %v10478_v31, %v16069_v25  ;;  %v15034_v33 = vld [vmem:[#allocation16 + $0x8] ss:$40 sps:$4 sm:$0xff]   ;;  %v15061_v31 = vld [vmem:[#allocation16 + $0x14] ss:$40 sps:$4 sm:$0xff]   ;;  %v15065_v61 = vld [vmem:[%s16397_s9 + $0x110] sm:$0xff]  }
 0x6b2   :  { %11336 = vmatmul.mubr.bf16.vlgmr.msra.gmra.mrb[24].mxu0 %v10683_v49  ;;  %v10597_v0 = vmax.f32 %v10577_v62, 0.0  ;;  %v10600_v35 = vmax.f32 %v10580_v58, 0.0  ;;  %v10462_v15 = vrot.slane %v16108_v28, %v15747_v1  ;;  %v10534_v48 = vrot.slane %v16106_v43, %v15747_v1  ;;  %v15052_v28 = vld [vmem:[%s16397_s9 + $0xa8] sm:$0xff]   ;;  %v15055_v1 = vld [vmem:[%s16397_s9 + $0xf8] sm:$0xff]   ;;  %v15057_v42 = vld [vmem:[%s16397_s9 + $0x140] sm:$0xff]  }
 0x6b3   :  { %12910 = vmatpush3.bf16.msra.mxu0 %v15033_v27  ;;  %11376 = vmatprep.mubr.bf16.mxu0 %v10686_v57  ;;  %v10618_v53 = vpack.c.bf16 %v10608_v4, %v10598_v3  ;;  %v10607_v5 = vmax.f32 %v10587_v22, 0.0  ;;  %v10579_v29 = vadd.f32 %v10550_v44, %v10507_v20  ;;  %v10589_v36 = vadd.f32 %v10550_v44, %v10517_v18  ;;  %v15062_v39 = vld [vmem:[%s16397_s9 + $0x148] sm:$0xff]   ;;  %v15064_v27 = vld [vmem:[%s16397_s9 + $0x150] sm:$0xff]   ;;  %v15066_v44 = vld [vmem:[%s16397_s9 + $0x158] sm:$0xff]  }
 0x6b4   :  { %12911 = vmatprep.subr.bf16.mxu0 %v15040_v34  ;;  %10119 = vmatpush1.bf16.msra.mxu1 %v15037_v41  ;;  %v16171_v25 = vpack.c.bf16 %v10610_v2, %v10600_v35  ;;  %v10503_v19 = vmul.f32 %v10462_v15, %v15953_v10  ;;  %v10513_v55 = vmul.f32 %v10462_v15, %v15956_v12  ;;  %v15054_v10 = vld [vmem:[%s16397_s9 + $0xb0] sm:$0xff]   ;;  %v15063_v32 = vld [vmem:[%s16397_s9 + $0x108] sm:$0xff]   ;;  %v15067_v2 = vld [vmem:[%s16397_s9 + $0x118] sm:$0xff]  }
 0x6b5   :  { %10120 = vmatprep.subr.bf16.mxu1 %v15044_v47  ;;  %v16173_v23 = vpack.c.bf16 %v10607_v5, %v10597_v0  ;;  %v10599_v59 = vmax.f32 %v10579_v29, 0.0  ;;  %v10609_v30 = vmax.f32 %v10589_v36, 0.0  ;;  %v10688_v40 = vmul.bf16 %v15061_v31, %v10618_v53  ;;  %v15068_v49 = vld [vmem:[%s16397_s9 + $0x160] sm:$0xff]   ;;  %v15070_v34 = vld [vmem:[%s16397_s9 + $0x168] sm:$0xff]   ;;  %v15072_v24 = vld [vmem:[%s16397_s9 + $0x170] sm:$0xff]  }
 0x6b6   :  { %v10575_v8 = vadd.f32 %v10534_v48, %v10503_v19  ;;  %v10585_v7 = vadd.f32 %v10534_v48, %v10513_v55  ;;  %v15069_v41 = vld [vmem:[%s16397_s9 + $0x120] sm:$0xff]   ;;  %v15071_v51 = vld [vmem:[%s16397_s9 + $0x128] sm:$0xff]   ;;  %v15073_v57 = vld [vmem:[%s16397_s9 + $0x130] sm:$0xff]  }
 0x6b7   :  { %12912 = vmatpush3.bf16.msra.mxu0 %v15041_v13  ;;  %v16181_v11 = vpack.c.bf16 %v10609_v30, %v10599_v59  ;;  %v15074_v47 = vld [vmem:[%s16397_s9 + $0x178] sm:$0xff]   ;;  %v15059_v62 = vld [vmem:[#allocation16 + $0x10] ss:$40 sps:$4 sm:$0xff]   ;;  %v15080_v4 = vld [vmem:[#allocation16 + $0x1c] ss:$40 sps:$4 sm:$0xff]  }
 0x6b8   :  { %12913 = vmatprep.subr.bf16.mxu0 %v15045_v26  ;;  %10121 = vmatpush1.bf16.msra.mxu1 %v15042_v16  ;;  %v10595_v12 = vmax.f32 %v10575_v8, 0.0  ;;  %v10605_v43 = vmax.f32 %v10585_v7, 0.0  ;;  %v15075_v3 = vld [vmem:[%s16397_s9 + $0x138] sm:$0xff]   ;;  %v15076_v58 = vld [vmem:[%s16397_s9 + $0x1c0] sm:$0xff]   ;;  %v10687_v20 = vmul.bf16 %v15059_v62, %v16173_v23  ;;  %v15081_v18 = vld [vmem:[%s16397_s9 + $0x1c8] sm:$0xff]   ;;  %v10690_v13 = vmul.bf16 %v15080_v4, %v16171_v25 }
 0x6b9   :  { %11467 = vmatprep.subr.bf16.mxu1 %v15433_v14  ;;  %v15077_v22 = vld [vmem:[%s16397_s9 + $0x180] sm:$0xff]   ;;  %v15082_v0 = vld [vmem:[%s16397_s9 + $0x188] sm:$0xff]   ;;  %v15083_v35 = vld [vmem:[%s16397_s9 + $0x1d0] sm:$0xff]  }
 0x6ba   :  { %v10615_v38 = vpack.c.bf16 %v10605_v43, %v10595_v12  ;;  %v15084_v16 = vld [vmem:[%s16397_s9 + $0x190] sm:$0xff]   ;;  %v15085_v26 = vld [vmem:[%s16397_s9 + $0x1d8] sm:$0xff]   ;;  %v15087_v5 = vld [vmem:[%s16397_s9 + $0x1e0] sm:$0xff]  }
 0x6bb   :  { %12914 = vmatpush3.bf16.msra.mxu0 %v15046_v37  ;;  %10133 = vmatmul.mubr.bf16.vlgmr.msra.gmra.mrb[16].mxu1 %v15904_v17  ;;  %v15051_v17 = vld [vmem:[%s16397_s9 + $0xe8] sm:$0xff]   ;;  %v15086_v53 = vld [vmem:[%s16397_s9 + $0x198] sm:$0xff]   ;;  %v15088_v29 = vld [vmem:[%s16397_s9 + $0x1a0] sm:$0xff]  }
 0x6bc   :  { %12915 = vmatprep.subr.bf16.mxu0 %v15047_v6  ;;  %v10685_v50 = vmul.bf16 %v15034_v33, %v10615_v38  ;;  %v15089_v36 = vld [vmem:[%s16397_s9 + $0x1e8] sm:$0xff]   ;;  %v15091_v23 = vld [vmem:[%s16397_s9 + $0x1f0] sm:$0xff]   ;;  %v15093_v30 = vld [vmem:[%s16397_s9 + $0x1f8] sm:$0xff]  }
 0x6bd   :  { %v15090_v25 = vld [vmem:[%s16397_s9 + $0x1a8] sm:$0xff]   ;;  %v15092_v59 = vld [vmem:[%s16397_s9 + $0x1b0] sm:$0xff]   ;;  %v15094_v37 = vld [vmem:[%s16397_s9 + $0x1b8] sm:$0xff]  }
 0x6be   :  { %v15078_v6 = vld [vmem:[#allocation16 + $0x18] ss:$40 sps:$4 sm:$0xff]   ;;  %v15102_v48 = vld [vmem:[%s16397_s9 + $0x238] sm:$0xff]   ;;  %v12810_v4 = vld [vmem:[#allocation17] ss:$0 sm:$0xff] }
 0x6bf   :  { %12916 = vmatpush3.bf16.msra.mxu0 %v15048_v9  ;;  %v10689_v9 = vmul.bf16 %v15078_v6, %v16181_v11  ;;  %v15096_v15 = vld [vmem:[%s16397_s9 + $0x208] sm:$0xff]   ;;  %v15098_v11 = vld [vmem:[%s16397_s9 + $0x218] sm:$0xff]   ;;  %v15101_v55 = vld [vmem:[%s16397_s9 + $0x230] sm:$0xff]  }
 0x6c0   :  { %12917 = vmatprep.subr.bf16.mxu0 %v15049_v45  ;;  %v15095_v45 = vld [vmem:[%s16397_s9 + $0x200] sm:$0xff]   ;;  %v15100_v19 = vld [vmem:[%s16397_s9 + $0x228] sm:$0xff]   ;;  %v15105_v8 = vld [vmem:[%s16397_s9 + $0x250] sm:$0xff]  }
 0x6c1   :  { %11468 = vmatpush1.bf16.msra.mxu1 %v15095_v45 }
 0x6c2   :  { %11469 = vmatprep.subr.bf16.mxu1 %v15433_v14 }
 0x6c3   :  { %12918 = vmatpush3.bf16.msra.mxu0 %v15050_v52  ;;  %v15097_v52 = vld [vmem:[%s16397_s9 + $0x210] sm:$0xff]  }
 0x6c4   :  { %12919 = vmatprep.subr.bf16.mxu0 %v15051_v17  ;;  %v15099_v17 = vld [vmem:[%s16397_s9 + $0x220] sm:$0xff]  }
 0x6c5   :  { %11470 = vmatpush1.bf16.msra.mxu1 %v15096_v15 }
 0x6c6   :  { %11471 = vmatprep.subr.bf16.mxu1 %v15433_v14 }
 0x6c7   :  { %12920 = vmatpush3.bf16.msra.mxu0 %v15052_v28  ;;  %v15103_v28 = vld [vmem:[%s16397_s9 + $0x240] sm:$0xff]  }
 0x6c8   :  { %12921 = vmatprep.subr.bf16.mxu0 %v15053_v60  ;;  %v15104_v60 = vld [vmem:[%s16397_s9 + $0x248] sm:$0xff]   ;;  %s15435_s9 = smov [#allocation19]  }
 0x6c9   :  { %11472 = vmatpush1.bf16.msra.mxu1 %v15097_v52  ;;  %s11516_s17 = sshll.u32 %s15435_s9, 4  ;;  %s11517_s17 = int_to_ptr.vmem [resolvable:$true] %s11516_s17 }
 0x6ca   :  { %11473 = vmatprep.subr.bf16.mxu1 %v15433_v14  ;;  %s15383_s3 = scalar_lea.vmem %s11517_s17, 256  ;;  %p15388_p11 = scmp.lt.s32.totalorder %s11517_s17, %s11517_s17 }
 0x6cb   :  { %12922 = vmatpush3.bf16.msra.mxu0 %v15054_v10  ;;  %p15384_p10 = scmp.ne.s32.totalorder %s11517_s17, %s15383_s3  ;;  %p15389_p12 = scmp.lt.s32.totalorder %s15383_s3, %s15383_s3 }
 0x6cc   :  { %12923 = vmatprep.subr.bf16.mxu0 %v15055_v1 }
 0x6cd   :  { %11474 = vmatpush1.bf16.msra.mxu1 %v15098_v11  ;;  %p15390_p13 = por %p15389_p12, %p15388_p11 }
 0x6ce   :  { %11475 = vmatprep.subr.bf16.mxu1 %v15433_v14 }
 0x6cf   :  { %12924 = vmatpush3.bf16.msra.mxu0 %v15056_v21  ;;  %p15391_p0 = pnand %p15390_p13, %p15384_p10 }
 0x6d0   :  { %12931 = vmatprep.subr.bf16.mxu0 %v15057_v42 }
 0x6d1   :  { %11476 = vmatpush1.bf16.msra.mxu1 %v15099_v17 }
 0x6d2   :  { %11377 = vmatmul.mubr.bf16.vlgmr.msra.gmra.mrb[28].mxu0 %v10685_v50  ;;  %11477 = vmatprep.subr.bf16.mxu1 %v15433_v14 }
 0x6d3   :  { %12932 = vmatpush3.bf16.msra.mxu0 %v15058_v46  ;;  %11417 = vmatprep.mubr.bf16.mxu0 %v10688_v40 }
 0x6d4   :  { %12933 = vmatprep.subr.bf16.mxu0 %v15062_v39 }
 0x6d5   :  { %11478 = vmatpush1.bf16.msra.mxu1 %v15100_v19 }
 0x6d6   :  { %11479 = vmatprep.subr.bf16.mxu1 %v15433_v14 }
 0x6d7   :  { %12934 = vmatpush3.bf16.msra.mxu0 %v15063_v32 }
 0x6d8   :  { %12935 = vmatprep.subr.bf16.mxu0 %v15064_v27 }
 0x6d9   :  { %11480 = vmatpush1.bf16.msra.mxu1 %v15101_v55 }
 0x6da   :  { %11481 = vmatprep.subr.bf16.mxu1 %v15433_v14 }
 0x6db   :  { %12936 = vmatpush3.bf16.msra.mxu0 %v15065_v61 }
 0x6dc   :  { %12937 = vmatprep.subr.bf16.mxu0 %v15066_v44 }
 0x6dd   :  { %11482 = vmatpush1.bf16.msra.mxu1 %v15102_v48 }
 0x6de   :  { %11483 = vmatprep.subr.bf16.mxu1 %v15433_v14 }
 0x6df   :  { %12938 = vmatpush3.bf16.msra.mxu0 %v15067_v2 }
 0x6e0   :  { %12939 = vmatprep.subr.bf16.mxu0 %v15068_v49 }
 0x6e1   :  { %11484 = vmatpush1.bf16.msra.mxu1 %v15103_v28 }
 0x6e2   :  { %11485 = vmatprep.subr.bf16.mxu1 %v15433_v14 }
 0x6e3   :  { %12940 = vmatpush3.bf16.msra.mxu0 %v15069_v41 }
 0x6e4   :  { %12941 = vmatprep.subr.bf16.mxu0 %v15070_v34 }
 0x6e5   :  { %11486 = vmatpush1.bf16.msra.mxu1 %v15104_v60 }
 0x6e6   :  { %11487 = vmatprep.subr.bf16.mxu1 %v15433_v14 }
 0x6e7   :  { %12942 = vmatpush3.bf16.msra.mxu0 %v15071_v51 }
 0x6e8   :  { %12943 = vmatprep.subr.bf16.mxu0 %v15072_v24 }
 0x6e9   :  { %11488 = vmatpush1.bf16.msra.mxu1 %v15105_v8 }
 0x6eb   :  { %12944 = vmatpush3.bf16.msra.mxu0 %v15073_v57 }
 0x6ec   :  { %12945 = vmatprep.subr.bf16.mxu0 %v15074_v47 }
 0x6ef   :  { %12946 = vmatpush3.bf16.msra.mxu0 %v15075_v3 }
 0x6f0   :  { %12953 = vmatprep.subr.bf16.mxu0 %v15076_v58 }
 0x6f2   :  { %11418 = vmatmul.mubr.bf16.vlgmr.msra.gmra.mrb[32].mxu0 %v10687_v20 }
 0x6f3   :  { %12954 = vmatpush3.bf16.msra.mxu0 %v15077_v22  ;;  %11458 = vmatprep.mubr.bf16.mxu0 %v10690_v13 }
 0x6f4   :  { %12955 = vmatprep.subr.bf16.mxu0 %v15081_v18 }
 0x6f7   :  { %12956 = vmatpush3.bf16.msra.mxu0 %v15082_v0 }
 0x6f8   :  { %12957 = vmatprep.subr.bf16.mxu0 %v15083_v35 }
 0x6fb   :  { %12958 = vmatpush3.bf16.msra.mxu0 %v15084_v16 }
 0x6fc   :  { %12959 = vmatprep.subr.bf16.mxu0 %v15085_v26 }
 0x6ff   :  { %12960 = vmatpush3.bf16.msra.mxu0 %v15086_v53 }
 0x700   :  { %12961 = vmatprep.subr.bf16.mxu0 %v15087_v5 }
 0x703   :  { %12962 = vmatpush3.bf16.msra.mxu0 %v15088_v29 }
 0x704   :  { %12963 = vmatprep.subr.bf16.mxu0 %v15089_v36 }
 0x707   :  { %12964 = vmatpush3.bf16.msra.mxu0 %v15090_v25 }
 0x708   :  { %12965 = vmatprep.subr.bf16.mxu0 %v15091_v23 }
 0x70b   :  { %12966 = vmatpush3.bf16.msra.mxu0 %v15092_v59 }
 0x70c   :  { %12967 = vmatprep.subr.bf16.mxu0 %v15093_v30 }
 0x70f   :  { %12968 = vmatpush3.bf16.msra.mxu0 %v15094_v37 }
 0x712   :  { %11459 = vmatmul.mubr.bf16.vlgmr.msra.gmra.mrb[36].mxu0 %v10689_v9 }
 0x785   :  { %v12903_v7 = vpop.f32.mrb[24].mxu0 }
 0x786   :  { %v12904_v10 = vpop.f32.mrb[25].mxu0 }
 0x787   :  { %v12905_v1 = vadd.f32 %v12904_v10, %v12903_v7  ;;  %v12906_v12 = vpop.f32.mrb[26].mxu0 }
 0x788   :  { %v12907_v43 = vpop.f32.mrb[27].mxu0 }
 0x789   :  { %v12908_v21 = vadd.f32 %v12907_v43, %v12906_v12  ;;  %v11338_v53 = vadd.f32 %v12905_v1, %v12810_v4 }
 0x78b   :  { %v11341_v6 = vadd.f32 %v12908_v21, %v12810_v4 }
 0x78e   :  { %v10134_v33 = vpop.f32.mrb[16].mxu1 }
 0x78f   :  { %v10136_v38 = vpop.f32.mrb[17].mxu1 }
 0x790   :  { %v10138_v42 = vpop.f32.mrb[18].mxu1  ;;  %v10210_v50 = vsel %vm4080_vm1, %v10136_v38, 0.0 }
 0x791   :  { %v10203_v31 = vadd.f32 %v10138_v42, %v10134_v33  ;;  %v10140_v46 = vpop.f32.mrb[19].mxu1 }
 0x792   :  { %v10211_v39 = vsel %vm4080_vm1, %v10140_v46, 0.0 }
 0x793   :  { %v10204_v40 = vrot.slane %v10203_v31, 4  ;;  %v10212_v32 = vadd.f32 %v10211_v39, %v10210_v50 }
 0x795   :  { %v10205_v27 = vadd.f32 %v10204_v40, %v10203_v31  ;;  %v10213_v14 = vrot.slane %v10212_v32, 4 }
 0x797   :  { %v10206_v61 = vrot.slane %v10205_v27, 2  ;;  %v10214_v44 = vadd.f32 %v10213_v14, %v10212_v32  ;;  %v10144_v32 = vld [vmem:[#allocation13 + $0x8] sm:$0x3] }
 0x799   :  { %v10207_v2 = vadd.f32 %v10206_v61, %v10205_v27  ;;  %v10215_v49 = vrot.slane %v10214_v44, 2 }
 0x79b   :  { %v10208_v41 = vrot.slane %v10207_v2, 1  ;;  %v10216_v34 = vadd.f32 %v10215_v49, %v10214_v44 }
 0x79d   :  { %v10209_v51 = vadd.f32 %v10208_v41, %v10207_v2  ;;  %v10217_v24 = vrot.slane %v10216_v34, 1  ;;  %v10146_v2 = vld [vmem:[#allocation14 + $0x8] sm:$0x3] }
 0x79f   :  { %v10227_v57 = vmul.f32 0.0625, %v10209_v51  ;;  %v10218_v47 = vadd.f32 %v10217_v24, %v10216_v34  ;;  %v10558_v24 = vrot.slane %v10146_v2, %v15741_v63 }
 0x7a1   :  { %v10237_v3 = vsub.f32 %v10134_v33, %v10227_v57  ;;  %v16362_v62 = vsub.f32 %v10138_v42, %v10227_v57  ;;  %v10228_v58 = vmul.f32 0.0625, %v10218_v47  ;;  %v10562_v57 = vrot.slane %v10146_v2, %v15731_v56 }
 0x7a3   :  { %v10257_v22 = vmul.f32 %v10237_v3, %v10237_v3  ;;  %v10267_v20 = vmul.f32 %v16362_v62, %v16362_v62  ;;  %v10238_v18 = vsub.f32 %v10136_v38, %v10228_v58  ;;  %v10248_v13 = vsub.f32 %v10140_v46, %v10228_v58 }
 0x7a5   :  { %v10325_v0 = vadd.f32 %v10267_v20, %v10257_v22  ;;  %v10258_v35 = vmul.f32 %v10238_v18, %v10238_v18  ;;  %v10268_v16 = vmul.f32 %v10248_v13, %v10248_v13  ;;  %v12925_v26 = vpop.f32.mrb[28].mxu0 }
 0x7a6   :  { %v12926_v5 = vpop.f32.mrb[29].mxu0 }
 0x7a7   :  { %v10326_v29 = vrot.slane %v10325_v0, 4  ;;  %v10332_v36 = vsel %vm4080_vm1, %v10258_v35, 0.0  ;;  %v10333_v25 = vsel %vm4080_vm1, %v10268_v16, 0.0  ;;  %v12927_v23 = vadd.f32 %v12926_v5, %v12925_v26  ;;  %v12928_v59 = vpop.f32.mrb[30].mxu0  ;;  %v15106_v16 = vld [vmem:[#allocation16 + $0x24] ss:$40 sps:$4 sm:$0xff]  }
 0x7a8   :  { %v10334_v30 = vadd.f32 %v10333_v25, %v10332_v36  ;;  %v12929_v37 = vpop.f32.mrb[31].mxu0  ;;  %v15108_v36 = vld [vmem:[#allocation16 + $0x20] ss:$40 sps:$4 sm:$0xff]  }
 0x7a9   :  { %v10327_v9 = vadd.f32 %v10326_v29, %v10325_v0  ;;  %v11379_v45 = vadd.f32 %v12927_v23, %v11338_v53  ;;  %v12930_v15 = vadd.f32 %v12929_v37, %v12928_v59 }
 0x7aa   :  { %v10335_v52 = vrot.slane %v10334_v30, 4 }
 0x7ab   :  { %v10328_v11 = vrot.slane %v10327_v9, 2  ;;  %v11382_v17 = vadd.f32 %v12930_v15, %v11341_v6 }
 0x7ac   :  { %v10336_v19 = vadd.f32 %v10335_v52, %v10334_v30 }
 0x7ad   :  { %v10329_v55 = vadd.f32 %v10328_v11, %v10327_v9 }
 0x7ae   :  { %v10337_v48 = vrot.slane %v10336_v19, 2 }
 0x7af   :  { %v10330_v28 = vrot.slane %v10329_v55, 1 }
 0x7b0   :  { %v10338_v60 = vadd.f32 %v10337_v48, %v10336_v19 }
 0x7b1   :  { %v10331_v8 = vadd.f32 %v10330_v28, %v10329_v55 }
 0x7b2   :  { %v10339_v7 = vrot.slane %v10338_v60, 1 }
 0x7b3   :  { %v10349_v10 = vmul.f32 0.0625, %v10331_v8 }
 0x7b4   :  { %v10340_v1 = vadd.f32 %v10339_v7, %v10338_v60 }
 0x7b5   :  { %v10359_v12 = vadd.f32 1e-05, %v10349_v10 }
 0x7b6   :  { %v10350_v43 = vmul.f32 0.0625, %v10340_v1 }
 0x7b7   :  { %15145 = vrsqrt.f32 %v10359_v12 }
 0x7b8   :  { %v10360_v33 = vadd.f32 1e-05, %v10350_v43 }
 0x7ba   :  { %15147 = vrsqrt.f32 %v10360_v33 }
 0x7c1   :  { %v15146_v21 = vpop.eup %15145 }
 0x7c4   :  { %v15148_v38 = vpop.eup %15147 }
 0x7c5   :  { %v10430_v42 = vcombine.low %v15146_v21, %v15148_v38  ;;  %v12947_v31 = vpop.f32.mrb[32].mxu0 }
 0x7c6   :  { %v12948_v46 = vpop.f32.mrb[33].mxu0 }
 0x7c7   :  { %v10437_v50 = vrot.slane %v10430_v42, %v15681_v54  ;;  %v12949_v39 = vadd.f32 %v12948_v46, %v12947_v31  ;;  %v12950_v40 = vpop.f32.mrb[34].mxu0 }
 0x7c8   :  { %v12951_v27 = vpop.f32.mrb[35].mxu0 }
 0x7c9   :  { %v10444_v14 = vrot.slane %v10437_v50, %v15681_v54  ;;  %v11420_v61 = vadd.f32 %v12949_v39, %v11379_v45  ;;  %v12952_v44 = vadd.f32 %v12951_v27, %v12950_v40 }
 0x7cb   :  { %v10448_v49 = vmul.f32 %v10444_v14, %v10144_v32  ;;  %v11423_v41 = vadd.f32 %v12952_v44, %v11382_v17 }
 0x7cd   :  { %v10486_v34 = vrot.slane %v10448_v49, %v15741_v63  ;;  %v10490_v51 = vrot.slane %v10448_v49, %v15731_v56 }
 0x7cf   :  { %v10509_v47 = vmul.f32 %v10486_v34, %v10237_v3  ;;  %v10510_v58 = vmul.f32 %v10490_v51, %v10238_v18  ;;  %v10519_v4 = vmul.f32 %v10486_v34, %v16362_v62  ;;  %v10520_v22 = vmul.f32 %v10490_v51, %v10248_v13 }
 0x7d1   :  { %v10581_v20 = vadd.f32 %v10558_v24, %v10509_v47  ;;  %v10582_v54 = vadd.f32 %v10562_v57, %v10510_v58  ;;  %v10591_v0 = vadd.f32 %v10558_v24, %v10519_v4  ;;  %v10592_v35 = vadd.f32 %v10562_v57, %v10520_v22 }
 0x7d3   :  { %v10602_v26 = vmax.f32 %v10582_v54, 0.0  ;;  %v10612_v53 = vmax.f32 %v10592_v35, 0.0  ;;  %v10601_v5 = vmax.f32 %v10581_v20, 0.0  ;;  %v10611_v29 = vmax.f32 %v10591_v0, 0.0 }
 0x7d5   :  { %v10622_v25 = vpack.c.bf16 %v10612_v53, %v10602_v26  ;;  %v10621_v23 = vpack.c.bf16 %v10611_v29, %v10601_v5 }
 0x7d7   :  { %v10692_v63 = vmul.bf16 %v15106_v16, %v10622_v25  ;;  %v10691_v59 = vmul.bf16 %v15108_v36, %v10621_v23 }
 0x7d9   :  { %12886 = vmatprep.mubr.msk.bf16.mxu1 %vm4080_vm1, %v10692_v63 }
 0x7da   :  { %11500 = vmatmul.mubr.bf16.vlgmr.msra.gmra.mrb[20].mxu1 %v10691_v59 }
 0x7e5   :  { %v12969_v56 = vpop.f32.mrb[36].mxu0 }
 0x7e6   :  { %v12970_v3 = vpop.f32.mrb[37].mxu0 }
 0x7e7   :  { %v12971_v62 = vadd.f32 %v12970_v3, %v12969_v56  ;;  %v12972_v18 = vpop.f32.mrb[38].mxu0 }
 0x7e8   :  { %v12973_v13 = vpop.f32.mrb[39].mxu0 }
 0x7e9   :  { %v12974_v30 = vadd.f32 %v12973_v13, %v12972_v18  ;;  %v11461_v37 = vadd.f32 %v12971_v62, %v11420_v61 }
 0x7eb   :  { %v11464_v6 = vadd.f32 %v12974_v30, %v11423_v41 }
 0x8ad   :  { %v11501_v9 = vpop.f32.mrb[20].mxu1 }
 0x8ae   :  { %v11502_v45 = vadd.f32 %v11501_v9, %v11461_v37  ;;  %v11503_v15 = vpop.f32.mrb[21].mxu1 }
 0x8af   :  { %v11504_v52 = vpop.f32.mrb[22].mxu1 }
 0x8b0   :  { %11509 = vst.msk [vmem:[#allocation19] sm:$0xff] %vm11508_vm2, %v11502_v45  ;;  %v11505_v11 = vadd.f32 %v11504_v52, %v11464_v6  ;;  %v11506_v17 = vpop.f32.mrb[23].mxu1 }
 0x8b2   :  { %11510 = vst.msk [vmem:[#allocation19 + $0x8] sm:$0xff] %vm11508_vm2, %v11505_v11 }
 0x8b3   :  { %15394 = shalt.err (!%p15391_p0)
}
 0x8b4   :  { %s15395_s21 = scalar_lea.hbm %s16399_s11, 256 }
 0x8b5   :  { %p15396_p1 = scmp.ne.s32.totalorder %s16399_s11, %s15395_s21  ;;  %p15399_p2 = scmp.lt.u32.totalorder %s15395_s21, %s16399_s11 }
 0x8b7   :  { %p15401_p3 = pnand %p15399_p2, %p15396_p1 }
 0x8b9   :  { %15404 = shalt.err (!%p15401_p3)
}
 0x8ba   :  { %s15436_s6 = smov 128   ;;  %s15437_s2 = smov 8  }
 0x8bb   :  { %11522 = dma.vmem_to_hbm [thread:$0]  %s11517_s17, 256, %s16399_s11, [#allocation4], %s15436_s6, %s15436_s6, %s15437_s2  }
 0x8bc   :  { %15417 = dma.done.wait [#allocation4], 256  }
 0x8bd   :  { %15418 = vsyncadd [#allocation4], 4294967040 }
 0x8be   :  { %11526 = vsyncpa [#allocation3], 1 }
 0x8bf   :  { %11527 = vsyncpa [#allocation6], 1 }
 0x8c0   :  { %11528 = vsyncpa [#allocation9], 1 }
 0x8c1   :  { %11529 = vsyncpa [#allocation12], 1 }
 0x8c2   :  { %11530 = vsyncpa [#allocation15], 1 }
 0x8c3   :  { %11531 = vsyncpa [#allocation18], 1 }
 0x8c4   :  { %11532 = vsyncpa [#allocation4], 1 }

</bundles_post_ra>
